<compile_context>
chip_gen: v7x
topology: tpu7x:2x2x1
jax: 0.10.0
libtpu: 0.0.40
codegen_flags: <defaults>
</compile_context>

<pallas_src>
import numpy as np
import jax
import jax.numpy as jnp
from jax.experimental import pallas as pl
from jax.experimental.pallas import tpu as pltpu

# Network configuration (simplified stand-in for the efficientnet-b3 U-Net).
IN_CH = 3
NUM_CLASS = 2
C0, C1, C2 = 8, 16, 32
H = W = 16          # input spatial size used in this script
BN_EPS = 1e-5


# ----------------------------------------------------------------------------
# Constant 0/1 operator matrices (built once on host, shipped as bf16 inputs).
# In the [C, H*W] layout every spatial rearrangement is a right-matmul:
#   * 3x3 tap shift with zero border : a @ S_t
#   * 2x2 maxpool compaction         : max(shifted copies) @ P
#   * nearest 2x upsample            : a @ U
# so the whole network reduces to MXU matmuls + elementwise add/max.
# ----------------------------------------------------------------------------

def _shift_mats(h, w):
    """[9, h*w, h*w]; (a @ S[t])[c, y*w+x] = a[c, (y+dy)*w + (x+dx)] (0 if OOB),
    where (dy, dx) = (t//3 - 1, t%3 - 1)."""
    m = h * w
    mats = np.zeros((9, m, m), np.float32)
    for t in range(9):
        dy, dx = t // 3 - 1, t % 3 - 1
        for y in range(h):
            for x in range(w):
                yy, xx = y + dy, x + dx
                if 0 <= yy < h and 0 <= xx < w:
                    mats[t, yy * w + xx, y * w + x] = 1.0
    return mats


def _pool_select_mat(h, w):
    """[h*w, (h//2)*(w//2)]: picks the top-left element of every 2x2 window."""
    p = np.zeros((h * w, (h // 2) * (w // 2)), np.float32)
    for y in range(0, h, 2):
        for x in range(0, w, 2):
            p[y * w + x, (y // 2) * (w // 2) + x // 2] = 1.0
    return p


def _upsample_mat(h, w):
    """[h*w, (2h)*(2w)]: nearest-neighbour 2x upsample (F.interpolate nearest)."""
    u = np.zeros((h * w, (2 * h) * (2 * w)), np.float32)
    for y2 in range(2 * h):
        for x2 in range(2 * w):
            u[(y2 // 2) * w + x2 // 2, y2 * (2 * w) + x2] = 1.0
    return u


# ----------------------------------------------------------------------------
# The single fused Pallas kernel: one grid step == one batch element, all
# activations stay in VMEM / vregs from input load to logits store.
# ----------------------------------------------------------------------------

def _unet_kernel(x_ref,
                 s16_ref, s8_ref, s4_ref, p0_ref, p1_ref, u1_ref, u0_ref,
                 w0_ref, b0_ref, w1_ref, b1_ref, wb_ref, bb_ref,
                 wd1a_ref, wd1b_ref, bd1_ref,
                 wd0a_ref, wd0b_ref, bd0_ref,
                 wh_ref, bh_ref,
                 out_ref):
    f32, bf16 = jnp.float32, jnp.bfloat16

    def shift(a, s_ref, t):
        # a: [C, M] f32 -> [C, M] f32 copy shifted by tap t (zeros at border).
        return jnp.dot(a.astype(bf16), s_ref[t], preferred_element_type=f32)

    def conv3x3(a, s_ref, w_ref, acc=None):
        # a: [Cin, M]; w_ref: [9, Cout, Cin] bf16 (BN scale folded into W).
        cout = w_ref.shape[1]
        if acc is None:
            acc = jnp.zeros((cout, a.shape[1]), f32)
        for t in range(9):
            tap = shift(a, s_ref, t).astype(bf16)      # values already bf16-exact
            acc = acc + jnp.dot(w_ref[t], tap, preferred_element_type=f32)
        return acc

    def bias_act(acc, b_ref, relu=True):
        y = acc + b_ref[...]                           # [Cout, 1] broadcast
        return jnp.maximum(y, 0.0) if relu else y

    def maxpool2x2(a, s_ref, p_ref):
        # taps 5,7,8 == shifts (0,+1), (+1,0), (+1,+1); keep the top-left of
        # every 2x2 window via the compaction matmul.
        m = jnp.maximum(jnp.maximum(a, shift(a, s_ref, 5)),
                        jnp.maximum(shift(a, s_ref, 7), shift(a, s_ref, 8)))
        return jnp.dot(m.astype(bf16), p_ref[...], preferred_element_type=f32)

    def upsample2x(a, u_ref):
        return jnp.dot(a.astype(bf16), u_ref[...], preferred_element_type=f32)

    x = x_ref[0]                                               # [3,  256]

    e0 = bias_act(conv3x3(x, s16_ref, w0_ref), b0_ref)         # [8,  256]
    e0p = maxpool2x2(e0, s16_ref, p0_ref)                      # [8,   64]
    e1 = bias_act(conv3x3(e0p, s8_ref, w1_ref), b1_ref)        # [16,  64]
    e1p = maxpool2x2(e1, s8_ref, p1_ref)                       # [16,  16]
    bo = bias_act(conv3x3(e1p, s4_ref, wb_ref), bb_ref)        # [32,  16]

    up1 = upsample2x(bo, u1_ref)                               # [32,  64]
    acc = conv3x3(up1, s8_ref, wd1a_ref)                       # skip-concat ==
    acc = conv3x3(e1, s8_ref, wd1b_ref, acc=acc)               #   weight split
    d1 = bias_act(acc, bd1_ref)                                # [16,  64]

    up0 = upsample2x(d1, u0_ref)                               # [16, 256]
    acc = conv3x3(up0, s16_ref, wd0a_ref)
    acc = conv3x3(e0, s16_ref, wd0b_ref, acc=acc)
    d0 = bias_act(acc, bd0_ref)                                # [8,  256]

    logits = bias_act(conv3x3(d0, s16_ref, wh_ref), bh_ref, relu=False)  # [2, 256]
    out_ref[0] = logits                                        # lane-dense store


def _const_spec(arr):
    zeros = (0,) * arr.ndim

    def idx(n):
        return zeros

    return pl.BlockSpec(arr.shape, idx)


def unet_pallas_forward(x_nchw, *consts):
    n, cin, h, w = x_nchw.shape
    m0 = h * w
    x3 = x_nchw.reshape(n, cin, m0)                  # NCHW -> [N, C, H*W] (free)
    out = pl.pallas_call(
        _unet_kernel,
        grid=(n,),
        in_specs=[pl.BlockSpec((1, cin, m0), lambda i: (i, 0, 0))]
                 + [_const_spec(c) for c in consts],
        out_specs=pl.BlockSpec((1, NUM_CLASS, m0), lambda i: (i, 0, 0)),
        out_shape=jax.ShapeDtypeStruct((n, NUM_CLASS, m0), jnp.float32),
        compiler_params=pltpu.CompilerParams(
            dimension_semantics=("parallel",)),      # 2-TC sharding on v7x
    )(x3, *consts)
    return out.reshape(n, NUM_CLASS, h, w)           # already NCHW


# ----------------------------------------------------------------------------
# Deterministic parameter init (kaiming-normal conv weights, fresh BN stats),
# BN folding, and packing into the kernel's constant operands.
# ----------------------------------------------------------------------------

def init_params(seed=12):
    keys = jax.random.split(jax.random.PRNGKey(seed), 6)

    def conv_bn(key, cin, cout):
        std = (2.0 / (cin * 9)) ** 0.5               # kaiming_normal_, fan_in, relu
        return {
            "w": std * jax.random.normal(key, (3, 3, cin, cout), jnp.float32),
            "gamma": jnp.ones((cout,), jnp.float32),
            "beta": jnp.zeros((cout,), jnp.float32),
            "mean": jnp.zeros((cout,), jnp.float32),
            "var": jnp.ones((cout,), jnp.float32),
        }

    def head(key, cin, cout):
        std = (2.0 / (cin * 9)) ** 0.5
        return {"w": std * jax.random.normal(key, (3, 3, cin, cout), jnp.float32),
                "b": jnp.zeros((cout,), jnp.float32)}

    return {
        "enc0": conv_bn(keys[0], IN_CH, C0),
        "enc1": conv_bn(keys[1], C0, C1),
        "bott": conv_bn(keys[2], C1, C2),
        "dec1": conv_bn(keys[3], C2 + C1, C1),
        "dec0": conv_bn(keys[4], C1 + C0, C0),
        "head": head(keys[5], C0, NUM_CLASS),
    }


def folded_params(params):
    def fold(layer):
        scale = layer["gamma"] / jnp.sqrt(layer["var"] + BN_EPS)
        return {"w": layer["w"] * scale[None, None, None, :],
                "b": layer["beta"] - layer["mean"] * scale}

    out = {k: fold(v) for k, v in params.items() if k != "head"}
    out["head"] = {"w": params["head"]["w"], "b": params["head"]["b"]}
    return out


def _pack_taps(w_hwio):
    """[3,3,Cin,Cout] (HWIO) -> [9, Cout, Cin] bf16, tap t = ky*3+kx."""
    kh, kw, cin, cout = w_hwio.shape
    return jnp.transpose(w_hwio, (0, 1, 3, 2)).reshape(kh * kw, cout, cin) \
              .astype(jnp.bfloat16)


def build_kernel_consts(folded):
    bf16 = jnp.bfloat16
    s16 = jnp.asarray(_shift_mats(H, W)).astype(bf16)
    s8 = jnp.asarray(_shift_mats(H // 2, W // 2)).astype(bf16)
    s4 = jnp.asarray(_shift_mats(H // 4, W // 4)).astype(bf16)
    p0 = jnp.asarray(_pool_select_mat(H, W)).astype(bf16)
    p1 = jnp.asarray(_pool_select_mat(H // 2, W // 2)).astype(bf16)
    u1 = jnp.asarray(_upsample_mat(H // 4, W // 4)).astype(bf16)
    u0 = jnp.asarray(_upsample_mat(H // 2, W // 2)).astype(bf16)

    def b_col(b):
        return b.reshape(-1, 1).astype(jnp.float32)

    wd1, wd0 = folded["dec1"]["w"], folded["dec0"]["w"]
    return (
        s16, s8, s4, p0, p1, u1, u0,
        _pack_taps(folded["enc0"]["w"]), b_col(folded["enc0"]["b"]),
        _pack_taps(folded["enc1"]["w"]), b_col(folded["enc1"]["b"]),
        _pack_taps(folded["bott"]["w"]), b_col(folded["bott"]["b"]),
        _pack_taps(wd1[:, :, :C2, :]), _pack_taps(wd1[:, :, C2:, :]),
        b_col(folded["dec1"]["b"]),
        _pack_taps(wd0[:, :, :C1, :]), _pack_taps(wd0[:, :, C1:, :]),
        b_col(folded["dec0"]["b"]),
        _pack_taps(folded["head"]["w"]), b_col(folded["head"]["b"]),
    )


# ----------------------------------------------------------------------------
# Pure-JAX reference (XLA convs) for a numerical cross-check.
# ----------------------------------------------------------------------------

def reference_forward(x_nchw, folded):
    def conv(x, w_hwio, b, relu=True):
        w = jnp.transpose(w_hwio, (3, 2, 0, 1))      # OIHW
        y = jax.lax.conv_general_dilated(
            x, w, window_strides=(1, 1), padding="SAME",
            dimension_numbers=("NCHW", "OIHW", "NCHW"))
        y = y + b[None, :, None, None]
        return jnp.maximum(y, 0.0) if relu else y

    def pool(x):
        return jax.lax.reduce_window(x, -jnp.inf, jax.lax.max,
                                     (1, 1, 2, 2), (1, 1, 2, 2), "VALID")

    def up(x):
        return jnp.repeat(jnp.repeat(x, 2, axis=2), 2, axis=3)

    e0 = conv(x_nchw, folded["enc0"]["w"], folded["enc0"]["b"])
    e1 = conv(pool(e0), folded["enc1"]["w"], folded["enc1"]["b"])
    bo = conv(pool(e1), folded["bott"]["w"], folded["bott"]["b"])
    d1 = conv(jnp.concatenate([up(bo), e1], axis=1),
              folded["dec1"]["w"], folded["dec1"]["b"])
    d0 = conv(jnp.concatenate([up(d1), e0], axis=1),
              folded["dec0"]["w"], folded["dec0"]["b"])
    return conv(d0, folded["head"]["w"], folded["head"]["b"], relu=False)


if __name__ == "__main__":
    params = init_params(seed=12)
    folded = folded_params(params)
    consts = build_kernel_consts(folded)

    x = jax.random.normal(jax.random.PRNGKey(0), (2, IN_CH, H, W), jnp.float32)

    fwd = jax.jit(unet_pallas_forward)
    out = jax.block_until_ready(fwd(x, *consts))

    assert out.shape == (2, NUM_CLASS, H, W), out.shape
    assert out.dtype == jnp.float32
    assert bool(jnp.all(jnp.isfinite(out)))

    ref = jax.block_until_ready(jax.jit(reference_forward)(x, folded))
    np.testing.assert_allclose(np.asarray(out), np.asarray(ref),
                               rtol=1e-1, atol=1e-1)

    print("KERNEL_OK")
</pallas_src>

<mosaic_0001>
module attributes {stable_mosaic.version = 11 : i64} {
  func.func @_unet_kernel(%arg0: i32, %arg1: memref<1x3x256xf32, #tpu.memory_space<vmem>>, %arg2: memref<9x256x256xbf16, #tpu.memory_space<vmem>>, %arg3: memref<9x64x64xbf16, #tpu.memory_space<vmem>>, %arg4: memref<9x16x16xbf16, #tpu.memory_space<vmem>>, %arg5: memref<256x64xbf16, #tpu.memory_space<vmem>>, %arg6: memref<64x16xbf16, #tpu.memory_space<vmem>>, %arg7: memref<16x64xbf16, #tpu.memory_space<vmem>>, %arg8: memref<64x256xbf16, #tpu.memory_space<vmem>>, %arg9: memref<9x8x3xbf16, #tpu.memory_space<vmem>>, %arg10: memref<8x1xf32, #tpu.memory_space<vmem>>, %arg11: memref<9x16x8xbf16, #tpu.memory_space<vmem>>, %arg12: memref<16x1xf32, #tpu.memory_space<vmem>>, %arg13: memref<9x32x16xbf16, #tpu.memory_space<vmem>>, %arg14: memref<32x1xf32, #tpu.memory_space<vmem>>, %arg15: memref<9x16x32xbf16, #tpu.memory_space<vmem>>, %arg16: memref<9x16x16xbf16, #tpu.memory_space<vmem>>, %arg17: memref<16x1xf32, #tpu.memory_space<vmem>>, %arg18: memref<9x8x16xbf16, #tpu.memory_space<vmem>>, %arg19: memref<9x8x8xbf16, #tpu.memory_space<vmem>>, %arg20: memref<8x1xf32, #tpu.memory_space<vmem>>, %arg21: memref<9x2x8xbf16, #tpu.memory_space<vmem>>, %arg22: memref<2x1xf32, #tpu.memory_space<vmem>>, %arg23: memref<1x2x256xf32, #tpu.memory_space<vmem>>) attributes {dimension_semantics = [#tpu.dimension_semantics<parallel>], iteration_bounds = array<i64: 2>, scalar_prefetch = 0 : i64, scratch_operands = 0 : i64, tpu.core_type = #tpu.core_type<tc>, window_params = [{transform_indices = @transform_0, window_bounds = array<i64: 1, 3, 256>}, {pipeline_mode = #tpu.pipeline_mode<synchronous>, transform_indices = @transform_1, window_bounds = array<i64: 9, 256, 256>}, {pipeline_mode = #tpu.pipeline_mode<synchronous>, transform_indices = @transform_2, window_bounds = array<i64: 9, 64, 64>}, {pipeline_mode = #tpu.pipeline_mode<synchronous>, transform_indices = @transform_3, window_bounds = array<i64: 9, 16, 16>}, {pipeline_mode = #tpu.pipeline_mode<synchronous>, transform_indices = @transform_4, window_bounds = array<i64: 256, 64>}, {pipeline_mode = #tpu.pipeline_mode<synchronous>, transform_indices = @transform_5, window_bounds = array<i64: 64, 16>}, {pipeline_mode = #tpu.pipeline_mode<synchronous>, transform_indices = @transform_6, window_bounds = array<i64: 16, 64>}, {pipeline_mode = #tpu.pipeline_mode<synchronous>, transform_indices = @transform_7, window_bounds = array<i64: 64, 256>}, {pipeline_mode = #tpu.pipeline_mode<synchronous>, transform_indices = @transform_8, window_bounds = array<i64: 9, 8, 3>}, {pipeline_mode = #tpu.pipeline_mode<synchronous>, transform_indices = @transform_9, window_bounds = array<i64: 8, 1>}, {pipeline_mode = #tpu.pipeline_mode<synchronous>, transform_indices = @transform_10, window_bounds = array<i64: 9, 16, 8>}, {pipeline_mode = #tpu.pipeline_mode<synchronous>, transform_indices = @transform_11, window_bounds = array<i64: 16, 1>}, {pipeline_mode = #tpu.pipeline_mode<synchronous>, transform_indices = @transform_12, window_bounds = array<i64: 9, 32, 16>}, {pipeline_mode = #tpu.pipeline_mode<synchronous>, transform_indices = @transform_13, window_bounds = array<i64: 32, 1>}, {pipeline_mode = #tpu.pipeline_mode<synchronous>, transform_indices = @transform_14, window_bounds = array<i64: 9, 16, 32>}, {pipeline_mode = #tpu.pipeline_mode<synchronous>, transform_indices = @transform_15, window_bounds = array<i64: 9, 16, 16>}, {pipeline_mode = #tpu.pipeline_mode<synchronous>, transform_indices = @transform_16, window_bounds = array<i64: 16, 1>}, {pipeline_mode = #tpu.pipeline_mode<synchronous>, transform_indices = @transform_17, window_bounds = array<i64: 9, 8, 16>}, {pipeline_mode = #tpu.pipeline_mode<synchronous>, transform_indices = @transform_18, window_bounds = array<i64: 9, 8, 8>}, {pipeline_mode = #tpu.pipeline_mode<synchronous>, transform_indices = @transform_19, window_bounds = array<i64: 8, 1>}, {pipeline_mode = #tpu.pipeline_mode<synchronous>, transform_indices = @transform_20, window_bounds = array<i64: 9, 2, 8>}, {pipeline_mode = #tpu.pipeline_mode<synchronous>, transform_indices = @transform_21, window_bounds = array<i64: 2, 1>}, {transform_indices = @transform_22, window_bounds = array<i64: 1, 2, 256>}]} {
    %c0 = arith.constant 0 : index
    %c0_0 = arith.constant 0 : index
    %c0_1 = arith.constant 0 : index
    %0 = vector.load %arg1[%c0, %c0_0, %c0_1] : memref<1x3x256xf32, #tpu.memory_space<vmem>>, vector<1x3x256xf32>
    %1 = vector.shape_cast %0 : vector<1x3x256xf32> to vector<3x256xf32>
    %cst = arith.constant 0.000000e+00 : f32
    %2 = vector.broadcast %cst : f32 to vector<8x256xf32>
    %3 = arith.truncf %1 : vector<3x256xf32> to vector<3x256xbf16>
    %c0_2 = arith.constant 0 : index
    %c0_3 = arith.constant 0 : index
    %c0_4 = arith.constant 0 : index
    %4 = vector.load %arg2[%c0_2, %c0_3, %c0_4] : memref<9x256x256xbf16, #tpu.memory_space<vmem>>, vector<1x256x256xbf16>
    %5 = vector.shape_cast %4 : vector<1x256x256xbf16> to vector<256x256xbf16>
    %cst_5 = arith.constant dense<0.000000e+00> : vector<3x256xf32>
    %6 = tpu.matmul %3, %5, %cst_5 {dimension_numbers = #tpu.dot_dimension_numbers<[1], [0], [0], [1], [0, 0, 1, 1], [], []>} : vector<3x256xbf16>, vector<256x256xbf16>, vector<3x256xf32> -> vector<3x256xf32>
    %7 = arith.truncf %6 : vector<3x256xf32> to vector<3x256xbf16>
    %c0_6 = arith.constant 0 : index
    %c0_7 = arith.constant 0 : index
    %c0_8 = arith.constant 0 : index
    %8 = vector.load %arg9[%c0_6, %c0_7, %c0_8] : memref<9x8x3xbf16, #tpu.memory_space<vmem>>, vector<1x8x3xbf16>
    %9 = vector.shape_cast %8 : vector<1x8x3xbf16> to vector<8x3xbf16>
    %cst_9 = arith.constant dense<0.000000e+00> : vector<8x256xf32>
    %10 = tpu.matmul %9, %7, %cst_9 {dimension_numbers = #tpu.dot_dimension_numbers<[1], [0], [0], [1], [0, 0, 1, 1], [], []>} : vector<8x3xbf16>, vector<3x256xbf16>, vector<8x256xf32> -> vector<8x256xf32>
    %11 = arith.addf %2, %10 : vector<8x256xf32>
    %12 = arith.truncf %1 : vector<3x256xf32> to vector<3x256xbf16>
    %c1 = arith.constant 1 : index
    %c0_10 = arith.constant 0 : index
    %c0_11 = arith.constant 0 : index
    %13 = vector.load %arg2[%c1, %c0_10, %c0_11] : memref<9x256x256xbf16, #tpu.memory_space<vmem>>, vector<1x256x256xbf16>
    %14 = vector.shape_cast %13 : vector<1x256x256xbf16> to vector<256x256xbf16>
    %cst_12 = arith.constant dense<0.000000e+00> : vector<3x256xf32>
    %15 = tpu.matmul %12, %14, %cst_12 {dimension_numbers = #tpu.dot_dimension_numbers<[1], [0], [0], [1], [0, 0, 1, 1], [], []>} : vector<3x256xbf16>, vector<256x256xbf16>, vector<3x256xf32> -> vector<3x256xf32>
    %16 = arith.truncf %15 : vector<3x256xf32> to vector<3x256xbf16>
    %c1_13 = arith.constant 1 : index
    %c0_14 = arith.constant 0 : index
    %c0_15 = arith.constant 0 : index
    %17 = vector.load %arg9[%c1_13, %c0_14, %c0_15] : memref<9x8x3xbf16, #tpu.memory_space<vmem>>, vector<1x8x3xbf16>
    %18 = vector.shape_cast %17 : vector<1x8x3xbf16> to vector<8x3xbf16>
    %cst_16 = arith.constant dense<0.000000e+00> : vector<8x256xf32>
    %19 = tpu.matmul %18, %16, %cst_16 {dimension_numbers = #tpu.dot_dimension_numbers<[1], [0], [0], [1], [0, 0, 1, 1], [], []>} : vector<8x3xbf16>, vector<3x256xbf16>, vector<8x256xf32> -> vector<8x256xf32>
    %20 = arith.addf %11, %19 : vector<8x256xf32>
    %21 = arith.truncf %1 : vector<3x256xf32> to vector<3x256xbf16>
    %c2 = arith.constant 2 : index
    %c0_17 = arith.constant 0 : index
    %c0_18 = arith.constant 0 : index
    %22 = vector.load %arg2[%c2, %c0_17, %c0_18] : memref<9x256x256xbf16, #tpu.memory_space<vmem>>, vector<1x256x256xbf16>
    %23 = vector.shape_cast %22 : vector<1x256x256xbf16> to vector<256x256xbf16>
    %cst_19 = arith.constant dense<0.000000e+00> : vector<3x256xf32>
    %24 = tpu.matmul %21, %23, %cst_19 {dimension_numbers = #tpu.dot_dimension_numbers<[1], [0], [0], [1], [0, 0, 1, 1], [], []>} : vector<3x256xbf16>, vector<256x256xbf16>, vector<3x256xf32> -> vector<3x256xf32>
    %25 = arith.truncf %24 : vector<3x256xf32> to vector<3x256xbf16>
    %c2_20 = arith.constant 2 : index
    %c0_21 = arith.constant 0 : index
    %c0_22 = arith.constant 0 : index
    %26 = vector.load %arg9[%c2_20, %c0_21, %c0_22] : memref<9x8x3xbf16, #tpu.memory_space<vmem>>, vector<1x8x3xbf16>
    %27 = vector.shape_cast %26 : vector<1x8x3xbf16> to vector<8x3xbf16>
    %cst_23 = arith.constant dense<0.000000e+00> : vector<8x256xf32>
    %28 = tpu.matmul %27, %25, %cst_23 {dimension_numbers = #tpu.dot_dimension_numbers<[1], [0], [0], [1], [0, 0, 1, 1], [], []>} : vector<8x3xbf16>, vector<3x256xbf16>, vector<8x256xf32> -> vector<8x256xf32>
    %29 = arith.addf %20, %28 : vector<8x256xf32>
    %30 = arith.truncf %1 : vector<3x256xf32> to vector<3x256xbf16>
    %c3 = arith.constant 3 : index
    %c0_24 = arith.constant 0 : index
    %c0_25 = arith.constant 0 : index
    %31 = vector.load %arg2[%c3, %c0_24, %c0_25] : memref<9x256x256xbf16, #tpu.memory_space<vmem>>, vector<1x256x256xbf16>
    %32 = vector.shape_cast %31 : vector<1x256x256xbf16> to vector<256x256xbf16>
    %cst_26 = arith.constant dense<0.000000e+00> : vector<3x256xf32>
    %33 = tpu.matmul %30, %32, %cst_26 {dimension_numbers = #tpu.dot_dimension_numbers<[1], [0], [0], [1], [0, 0, 1, 1], [], []>} : vector<3x256xbf16>, vector<256x256xbf16>, vector<3x256xf32> -> vector<3x256xf32>
    %34 = arith.truncf %33 : vector<3x256xf32> to vector<3x256xbf16>
    %c3_27 = arith.constant 3 : index
    %c0_28 = arith.constant 0 : index
    %c0_29 = arith.constant 0 : index
    %35 = vector.load %arg9[%c3_27, %c0_28, %c0_29] : memref<9x8x3xbf16, #tpu.memory_space<vmem>>, vector<1x8x3xbf16>
    %36 = vector.shape_cast %35 : vector<1x8x3xbf16> to vector<8x3xbf16>
    %cst_30 = arith.constant dense<0.000000e+00> : vector<8x256xf32>
    %37 = tpu.matmul %36, %34, %cst_30 {dimension_numbers = #tpu.dot_dimension_numbers<[1], [0], [0], [1], [0, 0, 1, 1], [], []>} : vector<8x3xbf16>, vector<3x256xbf16>, vector<8x256xf32> -> vector<8x256xf32>
    %38 = arith.addf %29, %37 : vector<8x256xf32>
    %39 = arith.truncf %1 : vector<3x256xf32> to vector<3x256xbf16>
    %c4 = arith.constant 4 : index
    %c0_31 = arith.constant 0 : index
    %c0_32 = arith.constant 0 : index
    %40 = vector.load %arg2[%c4, %c0_31, %c0_32] : memref<9x256x256xbf16, #tpu.memory_space<vmem>>, vector<1x256x256xbf16>
    %41 = vector.shape_cast %40 : vector<1x256x256xbf16> to vector<256x256xbf16>
    %cst_33 = arith.constant dense<0.000000e+00> : vector<3x256xf32>
    %42 = tpu.matmul %39, %41, %cst_33 {dimension_numbers = #tpu.dot_dimension_numbers<[1], [0], [0], [1], [0, 0, 1, 1], [], []>} : vector<3x256xbf16>, vector<256x256xbf16>, vector<3x256xf32> -> vector<3x256xf32>
    %43 = arith.truncf %42 : vector<3x256xf32> to vector<3x256xbf16>
    %c4_34 = arith.constant 4 : index
    %c0_35 = arith.constant 0 : index
    %c0_36 = arith.constant 0 : index
    %44 = vector.load %arg9[%c4_34, %c0_35, %c0_36] : memref<9x8x3xbf16, #tpu.memory_space<vmem>>, vector<1x8x3xbf16>
    %45 = vector.shape_cast %44 : vector<1x8x3xbf16> to vector<8x3xbf16>
    %cst_37 = arith.constant dense<0.000000e+00> : vector<8x256xf32>
    %46 = tpu.matmul %45, %43, %cst_37 {dimension_numbers = #tpu.dot_dimension_numbers<[1], [0], [0], [1], [0, 0, 1, 1], [], []>} : vector<8x3xbf16>, vector<3x256xbf16>, vector<8x256xf32> -> vector<8x256xf32>
    %47 = arith.addf %38, %46 : vector<8x256xf32>
    %48 = arith.truncf %1 : vector<3x256xf32> to vector<3x256xbf16>
    %c5 = arith.constant 5 : index
    %c0_38 = arith.constant 0 : index
    %c0_39 = arith.constant 0 : index
    %49 = vector.load %arg2[%c5, %c0_38, %c0_39] : memref<9x256x256xbf16, #tpu.memory_space<vmem>>, vector<1x256x256xbf16>
    %50 = vector.shape_cast %49 : vector<1x256x256xbf16> to vector<256x256xbf16>
    %cst_40 = arith.constant dense<0.000000e+00> : vector<3x256xf32>
    %51 = tpu.matmul %48, %50, %cst_40 {dimension_numbers = #tpu.dot_dimension_numbers<[1], [0], [0], [1], [0, 0, 1, 1], [], []>} : vector<3x256xbf16>, vector<256x256xbf16>, vector<3x256xf32> -> vector<3x256xf32>
    %52 = arith.truncf %51 : vector<3x256xf32> to vector<3x256xbf16>
    %c5_41 = arith.constant 5 : index
    %c0_42 = arith.constant 0 : index
    %c0_43 = arith.constant 0 : index
    %53 = vector.load %arg9[%c5_41, %c0_42, %c0_43] : memref<9x8x3xbf16, #tpu.memory_space<vmem>>, vector<1x8x3xbf16>
    %54 = vector.shape_cast %53 : vector<1x8x3xbf16> to vector<8x3xbf16>
    %cst_44 = arith.constant dense<0.000000e+00> : vector<8x256xf32>
    %55 = tpu.matmul %54, %52, %cst_44 {dimension_numbers = #tpu.dot_dimension_numbers<[1], [0], [0], [1], [0, 0, 1, 1], [], []>} : vector<8x3xbf16>, vector<3x256xbf16>, vector<8x256xf32> -> vector<8x256xf32>
    %56 = arith.addf %47, %55 : vector<8x256xf32>
    %57 = arith.truncf %1 : vector<3x256xf32> to vector<3x256xbf16>
    %c6 = arith.constant 6 : index
    %c0_45 = arith.constant 0 : index
    %c0_46 = arith.constant 0 : index
    %58 = vector.load %arg2[%c6, %c0_45, %c0_46] : memref<9x256x256xbf16, #tpu.memory_space<vmem>>, vector<1x256x256xbf16>
    %59 = vector.shape_cast %58 : vector<1x256x256xbf16> to vector<256x256xbf16>
    %cst_47 = arith.constant dense<0.000000e+00> : vector<3x256xf32>
    %60 = tpu.matmul %57, %59, %cst_47 {dimension_numbers = #tpu.dot_dimension_numbers<[1], [0], [0], [1], [0, 0, 1, 1], [], []>} : vector<3x256xbf16>, vector<256x256xbf16>, vector<3x256xf32> -> vector<3x256xf32>
    %61 = arith.truncf %60 : vector<3x256xf32> to vector<3x256xbf16>
    %c6_48 = arith.constant 6 : index
    %c0_49 = arith.constant 0 : index
    %c0_50 = arith.constant 0 : index
    %62 = vector.load %arg9[%c6_48, %c0_49, %c0_50] : memref<9x8x3xbf16, #tpu.memory_space<vmem>>, vector<1x8x3xbf16>
    %63 = vector.shape_cast %62 : vector<1x8x3xbf16> to vector<8x3xbf16>
    %cst_51 = arith.constant dense<0.000000e+00> : vector<8x256xf32>
    %64 = tpu.matmul %63, %61, %cst_51 {dimension_numbers = #tpu.dot_dimension_numbers<[1], [0], [0], [1], [0, 0, 1, 1], [], []>} : vector<8x3xbf16>, vector<3x256xbf16>, vector<8x256xf32> -> vector<8x256xf32>
    %65 = arith.addf %56, %64 : vector<8x256xf32>
    %66 = arith.truncf %1 : vector<3x256xf32> to vector<3x256xbf16>
    %c7 = arith.constant 7 : index
    %c0_52 = arith.constant 0 : index
    %c0_53 = arith.constant 0 : index
    %67 = vector.load %arg2[%c7, %c0_52, %c0_53] : memref<9x256x256xbf16, #tpu.memory_space<vmem>>, vector<1x256x256xbf16>
    %68 = vector.shape_cast %67 : vector<1x256x256xbf16> to vector<256x256xbf16>
    %cst_54 = arith.constant dense<0.000000e+00> : vector<3x256xf32>
    %69 = tpu.matmul %66, %68, %cst_54 {dimension_numbers = #tpu.dot_dimension_numbers<[1], [0], [0], [1], [0, 0, 1, 1], [], []>} : vector<3x256xbf16>, vector<256x256xbf16>, vector<3x256xf32> -> vector<3x256xf32>
    %70 = arith.truncf %69 : vector<3x256xf32> to vector<3x256xbf16>
    %c7_55 = arith.constant 7 : index
    %c0_56 = arith.constant 0 : index
    %c0_57 = arith.constant 0 : index
    %71 = vector.load %arg9[%c7_55, %c0_56, %c0_57] : memref<9x8x3xbf16, #tpu.memory_space<vmem>>, vector<1x8x3xbf16>
    %72 = vector.shape_cast %71 : vector<1x8x3xbf16> to vector<8x3xbf16>
    %cst_58 = arith.constant dense<0.000000e+00> : vector<8x256xf32>
    %73 = tpu.matmul %72, %70, %cst_58 {dimension_numbers = #tpu.dot_dimension_numbers<[1], [0], [0], [1], [0, 0, 1, 1], [], []>} : vector<8x3xbf16>, vector<3x256xbf16>, vector<8x256xf32> -> vector<8x256xf32>
    %74 = arith.addf %65, %73 : vector<8x256xf32>
    %75 = arith.truncf %1 : vector<3x256xf32> to vector<3x256xbf16>
    %c8 = arith.constant 8 : index
    %c0_59 = arith.constant 0 : index
    %c0_60 = arith.constant 0 : index
    %76 = vector.load %arg2[%c8, %c0_59, %c0_60] : memref<9x256x256xbf16, #tpu.memory_space<vmem>>, vector<1x256x256xbf16>
    %77 = vector.shape_cast %76 : vector<1x256x256xbf16> to vector<256x256xbf16>
    %cst_61 = arith.constant dense<0.000000e+00> : vector<3x256xf32>
    %78 = tpu.matmul %75, %77, %cst_61 {dimension_numbers = #tpu.dot_dimension_numbers<[1], [0], [0], [1], [0, 0, 1, 1], [], []>} : vector<3x256xbf16>, vector<256x256xbf16>, vector<3x256xf32> -> vector<3x256xf32>
    %79 = arith.truncf %78 : vector<3x256xf32> to vector<3x256xbf16>
    %c8_62 = arith.constant 8 : index
    %c0_63 = arith.constant 0 : index
    %c0_64 = arith.constant 0 : index
    %80 = vector.load %arg9[%c8_62, %c0_63, %c0_64] : memref<9x8x3xbf16, #tpu.memory_space<vmem>>, vector<1x8x3xbf16>
    %81 = vector.shape_cast %80 : vector<1x8x3xbf16> to vector<8x3xbf16>
    %cst_65 = arith.constant dense<0.000000e+00> : vector<8x256xf32>
    %82 = tpu.matmul %81, %79, %cst_65 {dimension_numbers = #tpu.dot_dimension_numbers<[1], [0], [0], [1], [0, 0, 1, 1], [], []>} : vector<8x3xbf16>, vector<3x256xbf16>, vector<8x256xf32> -> vector<8x256xf32>
    %83 = arith.addf %74, %82 : vector<8x256xf32>
    %c0_66 = arith.constant 0 : index
    %c0_67 = arith.constant 0 : index
    %84 = vector.load %arg10[%c0_66, %c0_67] : memref<8x1xf32, #tpu.memory_space<vmem>>, vector<8x1xf32>
    %85 = vector.broadcast %84 : vector<8x1xf32> to vector<8x256xf32>
    %86 = arith.addf %83, %85 : vector<8x256xf32>
    %cst_68 = arith.constant 0.000000e+00 : f32
    %87 = vector.broadcast %cst_68 : f32 to vector<8x256xf32>
    %88 = arith.maximumf %86, %87 : vector<8x256xf32>
    %89 = arith.truncf %88 : vector<8x256xf32> to vector<8x256xbf16>
    %c5_69 = arith.constant 5 : index
    %c0_70 = arith.constant 0 : index
    %c0_71 = arith.constant 0 : index
    %90 = vector.load %arg2[%c5_69, %c0_70, %c0_71] : memref<9x256x256xbf16, #tpu.memory_space<vmem>>, vector<1x256x256xbf16>
    %91 = vector.shape_cast %90 : vector<1x256x256xbf16> to vector<256x256xbf16>
    %cst_72 = arith.constant dense<0.000000e+00> : vector<8x256xf32>
    %92 = tpu.matmul %89, %91, %cst_72 {dimension_numbers = #tpu.dot_dimension_numbers<[1], [0], [0], [1], [0, 0, 1, 1], [], []>} : vector<8x256xbf16>, vector<256x256xbf16>, vector<8x256xf32> -> vector<8x256xf32>
    %93 = arith.maximumf %88, %92 : vector<8x256xf32>
    %94 = arith.truncf %88 : vector<8x256xf32> to vector<8x256xbf16>
    %c7_73 = arith.constant 7 : index
    %c0_74 = arith.constant 0 : index
    %c0_75 = arith.constant 0 : index
    %95 = vector.load %arg2[%c7_73, %c0_74, %c0_75] : memref<9x256x256xbf16, #tpu.memory_space<vmem>>, vector<1x256x256xbf16>
    %96 = vector.shape_cast %95 : vector<1x256x256xbf16> to vector<256x256xbf16>
    %cst_76 = arith.constant dense<0.000000e+00> : vector<8x256xf32>
    %97 = tpu.matmul %94, %96, %cst_76 {dimension_numbers = #tpu.dot_dimension_numbers<[1], [0], [0], [1], [0, 0, 1, 1], [], []>} : vector<8x256xbf16>, vector<256x256xbf16>, vector<8x256xf32> -> vector<8x256xf32>
    %98 = arith.truncf %88 : vector<8x256xf32> to vector<8x256xbf16>
    %c8_77 = arith.constant 8 : index
    %c0_78 = arith.constant 0 : index
    %c0_79 = arith.constant 0 : index
    %99 = vector.load %arg2[%c8_77, %c0_78, %c0_79] : memref<9x256x256xbf16, #tpu.memory_space<vmem>>, vector<1x256x256xbf16>
    %100 = vector.shape_cast %99 : vector<1x256x256xbf16> to vector<256x256xbf16>
    %cst_80 = arith.constant dense<0.000000e+00> : vector<8x256xf32>
    %101 = tpu.matmul %98, %100, %cst_80 {dimension_numbers = #tpu.dot_dimension_numbers<[1], [0], [0], [1], [0, 0, 1, 1], [], []>} : vector<8x256xbf16>, vector<256x256xbf16>, vector<8x256xf32> -> vector<8x256xf32>
    %102 = arith.maximumf %97, %101 : vector<8x256xf32>
    %103 = arith.maximumf %93, %102 : vector<8x256xf32>
    %104 = arith.truncf %103 : vector<8x256xf32> to vector<8x256xbf16>
    %c0_81 = arith.constant 0 : index
    %c0_82 = arith.constant 0 : index
    %105 = vector.load %arg5[%c0_81, %c0_82] : memref<256x64xbf16, #tpu.memory_space<vmem>>, vector<256x64xbf16>
    %cst_83 = arith.constant dense<0.000000e+00> : vector<8x64xf32>
    %106 = tpu.matmul %104, %105, %cst_83 {dimension_numbers = #tpu.dot_dimension_numbers<[1], [0], [0], [1], [0, 0, 1, 1], [], []>} : vector<8x256xbf16>, vector<256x64xbf16>, vector<8x64xf32> -> vector<8x64xf32>
    %cst_84 = arith.constant 0.000000e+00 : f32
    %107 = vector.broadcast %cst_84 : f32 to vector<16x64xf32>
    %108 = arith.truncf %106 : vector<8x64xf32> to vector<8x64xbf16>
    %c0_85 = arith.constant 0 : index
    %c0_86 = arith.constant 0 : index
    %c0_87 = arith.constant 0 : index
    %109 = vector.load %arg3[%c0_85, %c0_86, %c0_87] : memref<9x64x64xbf16, #tpu.memory_space<vmem>>, vector<1x64x64xbf16>
    %110 = vector.shape_cast %109 : vector<1x64x64xbf16> to vector<64x64xbf16>
    %cst_88 = arith.constant dense<0.000000e+00> : vector<8x64xf32>
    %111 = tpu.matmul %108, %110, %cst_88 {dimension_numbers = #tpu.dot_dimension_numbers<[1], [0], [0], [1], [0, 0, 1, 1], [], []>} : vector<8x64xbf16>, vector<64x64xbf16>, vector<8x64xf32> -> vector<8x64xf32>
    %112 = arith.truncf %111 : vector<8x64xf32> to vector<8x64xbf16>
    %c0_89 = arith.constant 0 : index
    %c0_90 = arith.constant 0 : index
    %c0_91 = arith.constant 0 : index
    %113 = vector.load %arg11[%c0_89, %c0_90, %c0_91] : memref<9x16x8xbf16, #tpu.memory_space<vmem>>, vector<1x16x8xbf16>
    %114 = vector.shape_cast %113 : vector<1x16x8xbf16> to vector<16x8xbf16>
    %cst_92 = arith.constant dense<0.000000e+00> : vector<16x64xf32>
    %115 = tpu.matmul %114, %112, %cst_92 {dimension_numbers = #tpu.dot_dimension_numbers<[1], [0], [0], [1], [0, 0, 1, 1], [], []>} : vector<16x8xbf16>, vector<8x64xbf16>, vector<16x64xf32> -> vector<16x64xf32>
    %116 = arith.addf %107, %115 : vector<16x64xf32>
    %117 = arith.truncf %106 : vector<8x64xf32> to vector<8x64xbf16>
    %c1_93 = arith.constant 1 : index
    %c0_94 = arith.constant 0 : index
    %c0_95 = arith.constant 0 : index
    %118 = vector.load %arg3[%c1_93, %c0_94, %c0_95] : memref<9x64x64xbf16, #tpu.memory_space<vmem>>, vector<1x64x64xbf16>
    %119 = vector.shape_cast %118 : vector<1x64x64xbf16> to vector<64x64xbf16>
    %cst_96 = arith.constant dense<0.000000e+00> : vector<8x64xf32>
    %120 = tpu.matmul %117, %119, %cst_96 {dimension_numbers = #tpu.dot_dimension_numbers<[1], [0], [0], [1], [0, 0, 1, 1], [], []>} : vector<8x64xbf16>, vector<64x64xbf16>, vector<8x64xf32> -> vector<8x64xf32>
    %121 = arith.truncf %120 : vector<8x64xf32> to vector<8x64xbf16>
    %c1_97 = arith.constant 1 : index
    %c0_98 = arith.constant 0 : index
    %c0_99 = arith.constant 0 : index
    %122 = vector.load %arg11[%c1_97, %c0_98, %c0_99] : memref<9x16x8xbf16, #tpu.memory_space<vmem>>, vector<1x16x8xbf16>
    %123 = vector.shape_cast %122 : vector<1x16x8xbf16> to vector<16x8xbf16>
    %cst_100 = arith.constant dense<0.000000e+00> : vector<16x64xf32>
    %124 = tpu.matmul %123, %121, %cst_100 {dimension_numbers = #tpu.dot_dimension_numbers<[1], [0], [0], [1], [0, 0, 1, 1], [], []>} : vector<16x8xbf16>, vector<8x64xbf16>, vector<16x64xf32> -> vector<16x64xf32>
    %125 = arith.addf %116, %124 : vector<16x64xf32>
    %126 = arith.truncf %106 : vector<8x64xf32> to vector<8x64xbf16>
    %c2_101 = arith.constant 2 : index
    %c0_102 = arith.constant 0 : index
    %c0_103 = arith.constant 0 : index
    %127 = vector.load %arg3[%c2_101, %c0_102, %c0_103] : memref<9x64x64xbf16, #tpu.memory_space<vmem>>, vector<1x64x64xbf16>
    %128 = vector.shape_cast %127 : vector<1x64x64xbf16> to vector<64x64xbf16>
    %cst_104 = arith.constant dense<0.000000e+00> : vector<8x64xf32>
    %129 = tpu.matmul %126, %128, %cst_104 {dimension_numbers = #tpu.dot_dimension_numbers<[1], [0], [0], [1], [0, 0, 1, 1], [], []>} : vector<8x64xbf16>, vector<64x64xbf16>, vector<8x64xf32> -> vector<8x64xf32>
    %130 = arith.truncf %129 : vector<8x64xf32> to vector<8x64xbf16>
    %c2_105 = arith.constant 2 : index
    %c0_106 = arith.constant 0 : index
    %c0_107 = arith.constant 0 : index
    %131 = vector.load %arg11[%c2_105, %c0_106, %c0_107] : memref<9x16x8xbf16, #tpu.memory_space<vmem>>, vector<1x16x8xbf16>
    %132 = vector.shape_cast %131 : vector<1x16x8xbf16> to vector<16x8xbf16>
    %cst_108 = arith.constant dense<0.000000e+00> : vector<16x64xf32>
    %133 = tpu.matmul %132, %130, %cst_108 {dimension_numbers = #tpu.dot_dimension_numbers<[1], [0], [0], [1], [0, 0, 1, 1], [], []>} : vector<16x8xbf16>, vector<8x64xbf16>, vector<16x64xf32> -> vector<16x64xf32>
    %134 = arith.addf %125, %133 : vector<16x64xf32>
    %135 = arith.truncf %106 : vector<8x64xf32> to vector<8x64xbf16>
    %c3_109 = arith.constant 3 : index
    %c0_110 = arith.constant 0 : index
    %c0_111 = arith.constant 0 : index
    %136 = vector.load %arg3[%c3_109, %c0_110, %c0_111] : memref<9x64x64xbf16, #tpu.memory_space<vmem>>, vector<1x64x64xbf16>
    %137 = vector.shape_cast %136 : vector<1x64x64xbf16> to vector<64x64xbf16>
    %cst_112 = arith.constant dense<0.000000e+00> : vector<8x64xf32>
    %138 = tpu.matmul %135, %137, %cst_112 {dimension_numbers = #tpu.dot_dimension_numbers<[1], [0], [0], [1], [0, 0, 1, 1], [], []>} : vector<8x64xbf16>, vector<64x64xbf16>, vector<8x64xf32> -> vector<8x64xf32>
    %139 = arith.truncf %138 : vector<8x64xf32> to vector<8x64xbf16>
    %c3_113 = arith.constant 3 : index
    %c0_114 = arith.constant 0 : index
    %c0_115 = arith.constant 0 : index
    %140 = vector.load %arg11[%c3_113, %c0_114, %c0_115] : memref<9x16x8xbf16, #tpu.memory_space<vmem>>, vector<1x16x8xbf16>
    %141 = vector.shape_cast %140 : vector<1x16x8xbf16> to vector<16x8xbf16>
    %cst_116 = arith.constant dense<0.000000e+00> : vector<16x64xf32>
    %142 = tpu.matmul %141, %139, %cst_116 {dimension_numbers = #tpu.dot_dimension_numbers<[1], [0], [0], [1], [0, 0, 1, 1], [], []>} : vector<16x8xbf16>, vector<8x64xbf16>, vector<16x64xf32> -> vector<16x64xf32>
    %143 = arith.addf %134, %142 : vector<16x64xf32>
    %144 = arith.truncf %106 : vector<8x64xf32> to vector<8x64xbf16>
    %c4_117 = arith.constant 4 : index
    %c0_118 = arith.constant 0 : index
    %c0_119 = arith.constant 0 : index
    %145 = vector.load %arg3[%c4_117, %c0_118, %c0_119] : memref<9x64x64xbf16, #tpu.memory_space<vmem>>, vector<1x64x64xbf16>
    %146 = vector.shape_cast %145 : vector<1x64x64xbf16> to vector<64x64xbf16>
    %cst_120 = arith.constant dense<0.000000e+00> : vector<8x64xf32>
    %147 = tpu.matmul %144, %146, %cst_120 {dimension_numbers = #tpu.dot_dimension_numbers<[1], [0], [0], [1], [0, 0, 1, 1], [], []>} : vector<8x64xbf16>, vector<64x64xbf16>, vector<8x64xf32> -> vector<8x64xf32>
    %148 = arith.truncf %147 : vector<8x64xf32> to vector<8x64xbf16>
    %c4_121 = arith.constant 4 : index
    %c0_122 = arith.constant 0 : index
    %c0_123 = arith.constant 0 : index
    %149 = vector.load %arg11[%c4_121, %c0_122, %c0_123] : memref<9x16x8xbf16, #tpu.memory_space<vmem>>, vector<1x16x8xbf16>
    %150 = vector.shape_cast %149 : vector<1x16x8xbf16> to vector<16x8xbf16>
    %cst_124 = arith.constant dense<0.000000e+00> : vector<16x64xf32>
    %151 = tpu.matmul %150, %148, %cst_124 {dimension_numbers = #tpu.dot_dimension_numbers<[1], [0], [0], [1], [0, 0, 1, 1], [], []>} : vector<16x8xbf16>, vector<8x64xbf16>, vector<16x64xf32> -> vector<16x64xf32>
    %152 = arith.addf %143, %151 : vector<16x64xf32>
    %153 = arith.truncf %106 : vector<8x64xf32> to vector<8x64xbf16>
    %c5_125 = arith.constant 5 : index
    %c0_126 = arith.constant 0 : index
    %c0_127 = arith.constant 0 : index
    %154 = vector.load %arg3[%c5_125, %c0_126, %c0_127] : memref<9x64x64xbf16, #tpu.memory_space<vmem>>, vector<1x64x64xbf16>
    %155 = vector.shape_cast %154 : vector<1x64x64xbf16> to vector<64x64xbf16>
    %cst_128 = arith.constant dense<0.000000e+00> : vector<8x64xf32>
    %156 = tpu.matmul %153, %155, %cst_128 {dimension_numbers = #tpu.dot_dimension_numbers<[1], [0], [0], [1], [0, 0, 1, 1], [], []>} : vector<8x64xbf16>, vector<64x64xbf16>, vector<8x64xf32> -> vector<8x64xf32>
    %157 = arith.truncf %156 : vector<8x64xf32> to vector<8x64xbf16>
    %c5_129 = arith.constant 5 : index
    %c0_130 = arith.constant 0 : index
    %c0_131 = arith.constant 0 : index
    %158 = vector.load %arg11[%c5_129, %c0_130, %c0_131] : memref<9x16x8xbf16, #tpu.memory_space<vmem>>, vector<1x16x8xbf16>
    %159 = vector.shape_cast %158 : vector<1x16x8xbf16> to vector<16x8xbf16>
    %cst_132 = arith.constant dense<0.000000e+00> : vector<16x64xf32>
    %160 = tpu.matmul %159, %157, %cst_132 {dimension_numbers = #tpu.dot_dimension_numbers<[1], [0], [0], [1], [0, 0, 1, 1], [], []>} : vector<16x8xbf16>, vector<8x64xbf16>, vector<16x64xf32> -> vector<16x64xf32>
    %161 = arith.addf %152, %160 : vector<16x64xf32>
    %162 = arith.truncf %106 : vector<8x64xf32> to vector<8x64xbf16>
    %c6_133 = arith.constant 6 : index
    %c0_134 = arith.constant 0 : index
    %c0_135 = arith.constant 0 : index
    %163 = vector.load %arg3[%c6_133, %c0_134, %c0_135] : memref<9x64x64xbf16, #tpu.memory_space<vmem>>, vector<1x64x64xbf16>
    %164 = vector.shape_cast %163 : vector<1x64x64xbf16> to vector<64x64xbf16>
    %cst_136 = arith.constant dense<0.000000e+00> : vector<8x64xf32>
    %165 = tpu.matmul %162, %164, %cst_136 {dimension_numbers = #tpu.dot_dimension_numbers<[1], [0], [0], [1], [0, 0, 1, 1], [], []>} : vector<8x64xbf16>, vector<64x64xbf16>, vector<8x64xf32> -> vector<8x64xf32>
    %166 = arith.truncf %165 : vector<8x64xf32> to vector<8x64xbf16>
    %c6_137 = arith.constant 6 : index
    %c0_138 = arith.constant 0 : index
    %c0_139 = arith.constant 0 : index
    %167 = vector.load %arg11[%c6_137, %c0_138, %c0_139] : memref<9x16x8xbf16, #tpu.memory_space<vmem>>, vector<1x16x8xbf16>
    %168 = vector.shape_cast %167 : vector<1x16x8xbf16> to vector<16x8xbf16>
    %cst_140 = arith.constant dense<0.000000e+00> : vector<16x64xf32>
    %169 = tpu.matmul %168, %166, %cst_140 {dimension_numbers = #tpu.dot_dimension_numbers<[1], [0], [0], [1], [0, 0, 1, 1], [], []>} : vector<16x8xbf16>, vector<8x64xbf16>, vector<16x64xf32> -> vector<16x64xf32>
    %170 = arith.addf %161, %169 : vector<16x64xf32>
    %171 = arith.truncf %106 : vector<8x64xf32> to vector<8x64xbf16>
    %c7_141 = arith.constant 7 : index
    %c0_142 = arith.constant 0 : index
    %c0_143 = arith.constant 0 : index
    %172 = vector.load %arg3[%c7_141, %c0_142, %c0_143] : memref<9x64x64xbf16, #tpu.memory_space<vmem>>, vector<1x64x64xbf16>
    %173 = vector.shape_cast %172 : vector<1x64x64xbf16> to vector<64x64xbf16>
    %cst_144 = arith.constant dense<0.000000e+00> : vector<8x64xf32>
    %174 = tpu.matmul %171, %173, %cst_144 {dimension_numbers = #tpu.dot_dimension_numbers<[1], [0], [0], [1], [0, 0, 1, 1], [], []>} : vector<8x64xbf16>, vector<64x64xbf16>, vector<8x64xf32> -> vector<8x64xf32>
    %175 = arith.truncf %174 : vector<8x64xf32> to vector<8x64xbf16>
    %c7_145 = arith.constant 7 : index
    %c0_146 = arith.constant 0 : index
    %c0_147 = arith.constant 0 : index
    %176 = vector.load %arg11[%c7_145, %c0_146, %c0_147] : memref<9x16x8xbf16, #tpu.memory_space<vmem>>, vector<1x16x8xbf16>
    %177 = vector.shape_cast %176 : vector<1x16x8xbf16> to vector<16x8xbf16>
    %cst_148 = arith.constant dense<0.000000e+00> : vector<16x64xf32>
    %178 = tpu.matmul %177, %175, %cst_148 {dimension_numbers = #tpu.dot_dimension_numbers<[1], [0], [0], [1], [0, 0, 1, 1], [], []>} : vector<16x8xbf16>, vector<8x64xbf16>, vector<16x64xf32> -> vector<16x64xf32>
    %179 = arith.addf %170, %178 : vector<16x64xf32>
    %180 = arith.truncf %106 : vector<8x64xf32> to vector<8x64xbf16>
    %c8_149 = arith.constant 8 : index
    %c0_150 = arith.constant 0 : index
    %c0_151 = arith.constant 0 : index
    %181 = vector.load %arg3[%c8_149, %c0_150, %c0_151] : memref<9x64x64xbf16, #tpu.memory_space<vmem>>, vector<1x64x64xbf16>
    %182 = vector.shape_cast %181 : vector<1x64x64xbf16> to vector<64x64xbf16>
    %cst_152 = arith.constant dense<0.000000e+00> : vector<8x64xf32>
    %183 = tpu.matmul %180, %182, %cst_152 {dimension_numbers = #tpu.dot_dimension_numbers<[1], [0], [0], [1], [0, 0, 1, 1], [], []>} : vector<8x64xbf16>, vector<64x64xbf16>, vector<8x64xf32> -> vector<8x64xf32>
    %184 = arith.truncf %183 : vector<8x64xf32> to vector<8x64xbf16>
    %c8_153 = arith.constant 8 : index
    %c0_154 = arith.constant 0 : index
    %c0_155 = arith.constant 0 : index
    %185 = vector.load %arg11[%c8_153, %c0_154, %c0_155] : memref<9x16x8xbf16, #tpu.memory_space<vmem>>, vector<1x16x8xbf16>
    %186 = vector.shape_cast %185 : vector<1x16x8xbf16> to vector<16x8xbf16>
    %cst_156 = arith.constant dense<0.000000e+00> : vector<16x64xf32>
    %187 = tpu.matmul %186, %184, %cst_156 {dimension_numbers = #tpu.dot_dimension_numbers<[1], [0], [0], [1], [0, 0, 1, 1], [], []>} : vector<16x8xbf16>, vector<8x64xbf16>, vector<16x64xf32> -> vector<16x64xf32>
    %188 = arith.addf %179, %187 : vector<16x64xf32>
    %c0_157 = arith.constant 0 : index
    %c0_158 = arith.constant 0 : index
    %189 = vector.load %arg12[%c0_157, %c0_158] : memref<16x1xf32, #tpu.memory_space<vmem>>, vector<16x1xf32>
    %190 = vector.broadcast %189 : vector<16x1xf32> to vector<16x64xf32>
    %191 = arith.addf %188, %190 : vector<16x64xf32>
    %cst_159 = arith.constant 0.000000e+00 : f32
    %192 = vector.broadcast %cst_159 : f32 to vector<16x64xf32>
    %193 = arith.maximumf %191, %192 : vector<16x64xf32>
    %194 = arith.truncf %193 : vector<16x64xf32> to vector<16x64xbf16>
    %c5_160 = arith.constant 5 : index
    %c0_161 = arith.constant 0 : index
    %c0_162 = arith.constant 0 : index
    %195 = vector.load %arg3[%c5_160, %c0_161, %c0_162] : memref<9x64x64xbf16, #tpu.memory_space<vmem>>, vector<1x64x64xbf16>
    %196 = vector.shape_cast %195 : vector<1x64x64xbf16> to vector<64x64xbf16>
    %cst_163 = arith.constant dense<0.000000e+00> : vector<16x64xf32>
    %197 = tpu.matmul %194, %196, %cst_163 {dimension_numbers = #tpu.dot_dimension_numbers<[1], [0], [0], [1], [0, 0, 1, 1], [], []>} : vector<16x64xbf16>, vector<64x64xbf16>, vector<16x64xf32> -> vector<16x64xf32>
    %198 = arith.maximumf %193, %197 : vector<16x64xf32>
    %199 = arith.truncf %193 : vector<16x64xf32> to vector<16x64xbf16>
    %c7_164 = arith.constant 7 : index
    %c0_165 = arith.constant 0 : index
    %c0_166 = arith.constant 0 : index
    %200 = vector.load %arg3[%c7_164, %c0_165, %c0_166] : memref<9x64x64xbf16, #tpu.memory_space<vmem>>, vector<1x64x64xbf16>
    %201 = vector.shape_cast %200 : vector<1x64x64xbf16> to vector<64x64xbf16>
    %cst_167 = arith.constant dense<0.000000e+00> : vector<16x64xf32>
    %202 = tpu.matmul %199, %201, %cst_167 {dimension_numbers = #tpu.dot_dimension_numbers<[1], [0], [0], [1], [0, 0, 1, 1], [], []>} : vector<16x64xbf16>, vector<64x64xbf16>, vector<16x64xf32> -> vector<16x64xf32>
    %203 = arith.truncf %193 : vector<16x64xf32> to vector<16x64xbf16>
    %c8_168 = arith.constant 8 : index
    %c0_169 = arith.constant 0 : index
    %c0_170 = arith.constant 0 : index
    %204 = vector.load %arg3[%c8_168, %c0_169, %c0_170] : memref<9x64x64xbf16, #tpu.memory_space<vmem>>, vector<1x64x64xbf16>
    %205 = vector.shape_cast %204 : vector<1x64x64xbf16> to vector<64x64xbf16>
    %cst_171 = arith.constant dense<0.000000e+00> : vector<16x64xf32>
    %206 = tpu.matmul %203, %205, %cst_171 {dimension_numbers = #tpu.dot_dimension_numbers<[1], [0], [0], [1], [0, 0, 1, 1], [], []>} : vector<16x64xbf16>, vector<64x64xbf16>, vector<16x64xf32> -> vector<16x64xf32>
    %207 = arith.maximumf %202, %206 : vector<16x64xf32>
    %208 = arith.maximumf %198, %207 : vector<16x64xf32>
    %209 = arith.truncf %208 : vector<16x64xf32> to vector<16x64xbf16>
    %c0_172 = arith.constant 0 : index
    %c0_173 = arith.constant 0 : index
    %210 = vector.load %arg6[%c0_172, %c0_173] : memref<64x16xbf16, #tpu.memory_space<vmem>>, vector<64x16xbf16>
    %cst_174 = arith.constant dense<0.000000e+00> : vector<16x16xf32>
    %211 = tpu.matmul %209, %210, %cst_174 {dimension_numbers = #tpu.dot_dimension_numbers<[1], [0], [0], [1], [0, 0, 1, 1], [], []>} : vector<16x64xbf16>, vector<64x16xbf16>, vector<16x16xf32> -> vector<16x16xf32>
    %cst_175 = arith.constant 0.000000e+00 : f32
    %212 = vector.broadcast %cst_175 : f32 to vector<32x16xf32>
    %213 = arith.truncf %211 : vector<16x16xf32> to vector<16x16xbf16>
    %c0_176 = arith.constant 0 : index
    %c0_177 = arith.constant 0 : index
    %c0_178 = arith.constant 0 : index
    %214 = vector.load %arg4[%c0_176, %c0_177, %c0_178] : memref<9x16x16xbf16, #tpu.memory_space<vmem>>, vector<1x16x16xbf16>
    %215 = vector.shape_cast %214 : vector<1x16x16xbf16> to vector<16x16xbf16>
    %cst_179 = arith.constant dense<0.000000e+00> : vector<16x16xf32>
    %216 = tpu.matmul %213, %215, %cst_179 {dimension_numbers = #tpu.dot_dimension_numbers<[1], [0], [0], [1], [0, 0, 1, 1], [], []>} : vector<16x16xbf16>, vector<16x16xbf16>, vector<16x16xf32> -> vector<16x16xf32>
    %217 = arith.truncf %216 : vector<16x16xf32> to vector<16x16xbf16>
    %c0_180 = arith.constant 0 : index
    %c0_181 = arith.constant 0 : index
    %c0_182 = arith.constant 0 : index
    %218 = vector.load %arg13[%c0_180, %c0_181, %c0_182] : memref<9x32x16xbf16, #tpu.memory_space<vmem>>, vector<1x32x16xbf16>
    %219 = vector.shape_cast %218 : vector<1x32x16xbf16> to vector<32x16xbf16>
    %cst_183 = arith.constant dense<0.000000e+00> : vector<32x16xf32>
    %220 = tpu.matmul %219, %217, %cst_183 {dimension_numbers = #tpu.dot_dimension_numbers<[1], [0], [0], [1], [0, 0, 1, 1], [], []>} : vector<32x16xbf16>, vector<16x16xbf16>, vector<32x16xf32> -> vector<32x16xf32>
    %221 = arith.addf %212, %220 : vector<32x16xf32>
    %222 = arith.truncf %211 : vector<16x16xf32> to vector<16x16xbf16>
    %c1_184 = arith.constant 1 : index
    %c0_185 = arith.constant 0 : index
    %c0_186 = arith.constant 0 : index
    %223 = vector.load %arg4[%c1_184, %c0_185, %c0_186] : memref<9x16x16xbf16, #tpu.memory_space<vmem>>, vector<1x16x16xbf16>
    %224 = vector.shape_cast %223 : vector<1x16x16xbf16> to vector<16x16xbf16>
    %cst_187 = arith.constant dense<0.000000e+00> : vector<16x16xf32>
    %225 = tpu.matmul %222, %224, %cst_187 {dimension_numbers = #tpu.dot_dimension_numbers<[1], [0], [0], [1], [0, 0, 1, 1], [], []>} : vector<16x16xbf16>, vector<16x16xbf16>, vector<16x16xf32> -> vector<16x16xf32>
    %226 = arith.truncf %225 : vector<16x16xf32> to vector<16x16xbf16>
    %c1_188 = arith.constant 1 : index
    %c0_189 = arith.constant 0 : index
    %c0_190 = arith.constant 0 : index
    %227 = vector.load %arg13[%c1_188, %c0_189, %c0_190] : memref<9x32x16xbf16, #tpu.memory_space<vmem>>, vector<1x32x16xbf16>
    %228 = vector.shape_cast %227 : vector<1x32x16xbf16> to vector<32x16xbf16>
    %cst_191 = arith.constant dense<0.000000e+00> : vector<32x16xf32>
    %229 = tpu.matmul %228, %226, %cst_191 {dimension_numbers = #tpu.dot_dimension_numbers<[1], [0], [0], [1], [0, 0, 1, 1], [], []>} : vector<32x16xbf16>, vector<16x16xbf16>, vector<32x16xf32> -> vector<32x16xf32>
    %230 = arith.addf %221, %229 : vector<32x16xf32>
    %231 = arith.truncf %211 : vector<16x16xf32> to vector<16x16xbf16>
    %c2_192 = arith.constant 2 : index
    %c0_193 = arith.constant 0 : index
    %c0_194 = arith.constant 0 : index
    %232 = vector.load %arg4[%c2_192, %c0_193, %c0_194] : memref<9x16x16xbf16, #tpu.memory_space<vmem>>, vector<1x16x16xbf16>
    %233 = vector.shape_cast %232 : vector<1x16x16xbf16> to vector<16x16xbf16>
    %cst_195 = arith.constant dense<0.000000e+00> : vector<16x16xf32>
    %234 = tpu.matmul %231, %233, %cst_195 {dimension_numbers = #tpu.dot_dimension_numbers<[1], [0], [0], [1], [0, 0, 1, 1], [], []>} : vector<16x16xbf16>, vector<16x16xbf16>, vector<16x16xf32> -> vector<16x16xf32>
    %235 = arith.truncf %234 : vector<16x16xf32> to vector<16x16xbf16>
    %c2_196 = arith.constant 2 : index
    %c0_197 = arith.constant 0 : index
    %c0_198 = arith.constant 0 : index
    %236 = vector.load %arg13[%c2_196, %c0_197, %c0_198] : memref<9x32x16xbf16, #tpu.memory_space<vmem>>, vector<1x32x16xbf16>
    %237 = vector.shape_cast %236 : vector<1x32x16xbf16> to vector<32x16xbf16>
    %cst_199 = arith.constant dense<0.000000e+00> : vector<32x16xf32>
    %238 = tpu.matmul %237, %235, %cst_199 {dimension_numbers = #tpu.dot_dimension_numbers<[1], [0], [0], [1], [0, 0, 1, 1], [], []>} : vector<32x16xbf16>, vector<16x16xbf16>, vector<32x16xf32> -> vector<32x16xf32>
    %239 = arith.addf %230, %238 : vector<32x16xf32>
    %240 = arith.truncf %211 : vector<16x16xf32> to vector<16x16xbf16>
    %c3_200 = arith.constant 3 : index
    %c0_201 = arith.constant 0 : index
    %c0_202 = arith.constant 0 : index
    %241 = vector.load %arg4[%c3_200, %c0_201, %c0_202] : memref<9x16x16xbf16, #tpu.memory_space<vmem>>, vector<1x16x16xbf16>
    %242 = vector.shape_cast %241 : vector<1x16x16xbf16> to vector<16x16xbf16>
    %cst_203 = arith.constant dense<0.000000e+00> : vector<16x16xf32>
    %243 = tpu.matmul %240, %242, %cst_203 {dimension_numbers = #tpu.dot_dimension_numbers<[1], [0], [0], [1], [0, 0, 1, 1], [], []>} : vector<16x16xbf16>, vector<16x16xbf16>, vector<16x16xf32> -> vector<16x16xf32>
    %244 = arith.truncf %243 : vector<16x16xf32> to vector<16x16xbf16>
    %c3_204 = arith.constant 3 : index
    %c0_205 = arith.constant 0 : index
    %c0_206 = arith.constant 0 : index
    %245 = vector.load %arg13[%c3_204, %c0_205, %c0_206] : memref<9x32x16xbf16, #tpu.memory_space<vmem>>, vector<1x32x16xbf16>
    %246 = vector.shape_cast %245 : vector<1x32x16xbf16> to vector<32x16xbf16>
    %cst_207 = arith.constant dense<0.000000e+00> : vector<32x16xf32>
    %247 = tpu.matmul %246, %244, %cst_207 {dimension_numbers = #tpu.dot_dimension_numbers<[1], [0], [0], [1], [0, 0, 1, 1], [], []>} : vector<32x16xbf16>, vector<16x16xbf16>, vector<32x16xf32> -> vector<32x16xf32>
    %248 = arith.addf %239, %247 : vector<32x16xf32>
    %249 = arith.truncf %211 : vector<16x16xf32> to vector<16x16xbf16>
    %c4_208 = arith.constant 4 : index
    %c0_209 = arith.constant 0 : index
    %c0_210 = arith.constant 0 : index
    %250 = vector.load %arg4[%c4_208, %c0_209, %c0_210] : memref<9x16x16xbf16, #tpu.memory_space<vmem>>, vector<1x16x16xbf16>
    %251 = vector.shape_cast %250 : vector<1x16x16xbf16> to vector<16x16xbf16>
    %cst_211 = arith.constant dense<0.000000e+00> : vector<16x16xf32>
    %252 = tpu.matmul %249, %251, %cst_211 {dimension_numbers = #tpu.dot_dimension_numbers<[1], [0], [0], [1], [0, 0, 1, 1], [], []>} : vector<16x16xbf16>, vector<16x16xbf16>, vector<16x16xf32> -> vector<16x16xf32>
    %253 = arith.truncf %252 : vector<16x16xf32> to vector<16x16xbf16>
    %c4_212 = arith.constant 4 : index
    %c0_213 = arith.constant 0 : index
    %c0_214 = arith.constant 0 : index
    %254 = vector.load %arg13[%c4_212, %c0_213, %c0_214] : memref<9x32x16xbf16, #tpu.memory_space<vmem>>, vector<1x32x16xbf16>
    %255 = vector.shape_cast %254 : vector<1x32x16xbf16> to vector<32x16xbf16>
    %cst_215 = arith.constant dense<0.000000e+00> : vector<32x16xf32>
    %256 = tpu.matmul %255, %253, %cst_215 {dimension_numbers = #tpu.dot_dimension_numbers<[1], [0], [0], [1], [0, 0, 1, 1], [], []>} : vector<32x16xbf16>, vector<16x16xbf16>, vector<32x16xf32> -> vector<32x16xf32>
    %257 = arith.addf %248, %256 : vector<32x16xf32>
    %258 = arith.truncf %211 : vector<16x16xf32> to vector<16x16xbf16>
    %c5_216 = arith.constant 5 : index
    %c0_217 = arith.constant 0 : index
    %c0_218 = arith.constant 0 : index
    %259 = vector.load %arg4[%c5_216, %c0_217, %c0_218] : memref<9x16x16xbf16, #tpu.memory_space<vmem>>, vector<1x16x16xbf16>
    %260 = vector.shape_cast %259 : vector<1x16x16xbf16> to vector<16x16xbf16>
    %cst_219 = arith.constant dense<0.000000e+00> : vector<16x16xf32>
    %261 = tpu.matmul %258, %260, %cst_219 {dimension_numbers = #tpu.dot_dimension_numbers<[1], [0], [0], [1], [0, 0, 1, 1], [], []>} : vector<16x16xbf16>, vector<16x16xbf16>, vector<16x16xf32> -> vector<16x16xf32>
    %262 = arith.truncf %261 : vector<16x16xf32> to vector<16x16xbf16>
    %c5_220 = arith.constant 5 : index
    %c0_221 = arith.constant 0 : index
    %c0_222 = arith.constant 0 : index
    %263 = vector.load %arg13[%c5_220, %c0_221, %c0_222] : memref<9x32x16xbf16, #tpu.memory_space<vmem>>, vector<1x32x16xbf16>
    %264 = vector.shape_cast %263 : vector<1x32x16xbf16> to vector<32x16xbf16>
    %cst_223 = arith.constant dense<0.000000e+00> : vector<32x16xf32>
    %265 = tpu.matmul %264, %262, %cst_223 {dimension_numbers = #tpu.dot_dimension_numbers<[1], [0], [0], [1], [0, 0, 1, 1], [], []>} : vector<32x16xbf16>, vector<16x16xbf16>, vector<32x16xf32> -> vector<32x16xf32>
    %266 = arith.addf %257, %265 : vector<32x16xf32>
    %267 = arith.truncf %211 : vector<16x16xf32> to vector<16x16xbf16>
    %c6_224 = arith.constant 6 : index
    %c0_225 = arith.constant 0 : index
    %c0_226 = arith.constant 0 : index
    %268 = vector.load %arg4[%c6_224, %c0_225, %c0_226] : memref<9x16x16xbf16, #tpu.memory_space<vmem>>, vector<1x16x16xbf16>
    %269 = vector.shape_cast %268 : vector<1x16x16xbf16> to vector<16x16xbf16>
    %cst_227 = arith.constant dense<0.000000e+00> : vector<16x16xf32>
    %270 = tpu.matmul %267, %269, %cst_227 {dimension_numbers = #tpu.dot_dimension_numbers<[1], [0], [0], [1], [0, 0, 1, 1], [], []>} : vector<16x16xbf16>, vector<16x16xbf16>, vector<16x16xf32> -> vector<16x16xf32>
    %271 = arith.truncf %270 : vector<16x16xf32> to vector<16x16xbf16>
    %c6_228 = arith.constant 6 : index
    %c0_229 = arith.constant 0 : index
    %c0_230 = arith.constant 0 : index
    %272 = vector.load %arg13[%c6_228, %c0_229, %c0_230] : memref<9x32x16xbf16, #tpu.memory_space<vmem>>, vector<1x32x16xbf16>
    %273 = vector.shape_cast %272 : vector<1x32x16xbf16> to vector<32x16xbf16>
    %cst_231 = arith.constant dense<0.000000e+00> : vector<32x16xf32>
    %274 = tpu.matmul %273, %271, %cst_231 {dimension_numbers = #tpu.dot_dimension_numbers<[1], [0], [0], [1], [0, 0, 1, 1], [], []>} : vector<32x16xbf16>, vector<16x16xbf16>, vector<32x16xf32> -> vector<32x16xf32>
    %275 = arith.addf %266, %274 : vector<32x16xf32>
    %276 = arith.truncf %211 : vector<16x16xf32> to vector<16x16xbf16>
    %c7_232 = arith.constant 7 : index
    %c0_233 = arith.constant 0 : index
    %c0_234 = arith.constant 0 : index
    %277 = vector.load %arg4[%c7_232, %c0_233, %c0_234] : memref<9x16x16xbf16, #tpu.memory_space<vmem>>, vector<1x16x16xbf16>
    %278 = vector.shape_cast %277 : vector<1x16x16xbf16> to vector<16x16xbf16>
    %cst_235 = arith.constant dense<0.000000e+00> : vector<16x16xf32>
    %279 = tpu.matmul %276, %278, %cst_235 {dimension_numbers = #tpu.dot_dimension_numbers<[1], [0], [0], [1], [0, 0, 1, 1], [], []>} : vector<16x16xbf16>, vector<16x16xbf16>, vector<16x16xf32> -> vector<16x16xf32>
    %280 = arith.truncf %279 : vector<16x16xf32> to vector<16x16xbf16>
    %c7_236 = arith.constant 7 : index
    %c0_237 = arith.constant 0 : index
    %c0_238 = arith.constant 0 : index
    %281 = vector.load %arg13[%c7_236, %c0_237, %c0_238] : memref<9x32x16xbf16, #tpu.memory_space<vmem>>, vector<1x32x16xbf16>
    %282 = vector.shape_cast %281 : vector<1x32x16xbf16> to vector<32x16xbf16>
    %cst_239 = arith.constant dense<0.000000e+00> : vector<32x16xf32>
    %283 = tpu.matmul %282, %280, %cst_239 {dimension_numbers = #tpu.dot_dimension_numbers<[1], [0], [0], [1], [0, 0, 1, 1], [], []>} : vector<32x16xbf16>, vector<16x16xbf16>, vector<32x16xf32> -> vector<32x16xf32>
    %284 = arith.addf %275, %283 : vector<32x16xf32>
    %285 = arith.truncf %211 : vector<16x16xf32> to vector<16x16xbf16>
    %c8_240 = arith.constant 8 : index
    %c0_241 = arith.constant 0 : index
    %c0_242 = arith.constant 0 : index
    %286 = vector.load %arg4[%c8_240, %c0_241, %c0_242] : memref<9x16x16xbf16, #tpu.memory_space<vmem>>, vector<1x16x16xbf16>
    %287 = vector.shape_cast %286 : vector<1x16x16xbf16> to vector<16x16xbf16>
    %cst_243 = arith.constant dense<0.000000e+00> : vector<16x16xf32>
    %288 = tpu.matmul %285, %287, %cst_243 {dimension_numbers = #tpu.dot_dimension_numbers<[1], [0], [0], [1], [0, 0, 1, 1], [], []>} : vector<16x16xbf16>, vector<16x16xbf16>, vector<16x16xf32> -> vector<16x16xf32>
    %289 = arith.truncf %288 : vector<16x16xf32> to vector<16x16xbf16>
    %c8_244 = arith.constant 8 : index
    %c0_245 = arith.constant 0 : index
    %c0_246 = arith.constant 0 : index
    %290 = vector.load %arg13[%c8_244, %c0_245, %c0_246] : memref<9x32x16xbf16, #tpu.memory_space<vmem>>, vector<1x32x16xbf16>
    %291 = vector.shape_cast %290 : vector<1x32x16xbf16> to vector<32x16xbf16>
    %cst_247 = arith.constant dense<0.000000e+00> : vector<32x16xf32>
    %292 = tpu.matmul %291, %289, %cst_247 {dimension_numbers = #tpu.dot_dimension_numbers<[1], [0], [0], [1], [0, 0, 1, 1], [], []>} : vector<32x16xbf16>, vector<16x16xbf16>, vector<32x16xf32> -> vector<32x16xf32>
    %293 = arith.addf %284, %292 : vector<32x16xf32>
    %c0_248 = arith.constant 0 : index
    %c0_249 = arith.constant 0 : index
    %294 = vector.load %arg14[%c0_248, %c0_249] : memref<32x1xf32, #tpu.memory_space<vmem>>, vector<32x1xf32>
    %295 = vector.broadcast %294 : vector<32x1xf32> to vector<32x16xf32>
    %296 = arith.addf %293, %295 : vector<32x16xf32>
    %cst_250 = arith.constant 0.000000e+00 : f32
    %297 = vector.broadcast %cst_250 : f32 to vector<32x16xf32>
    %298 = arith.maximumf %296, %297 : vector<32x16xf32>
    %299 = arith.truncf %298 : vector<32x16xf32> to vector<32x16xbf16>
    %c0_251 = arith.constant 0 : index
    %c0_252 = arith.constant 0 : index
    %300 = vector.load %arg7[%c0_251, %c0_252] : memref<16x64xbf16, #tpu.memory_space<vmem>>, vector<16x64xbf16>
    %cst_253 = arith.constant dense<0.000000e+00> : vector<32x64xf32>
    %301 = tpu.matmul %299, %300, %cst_253 {dimension_numbers = #tpu.dot_dimension_numbers<[1], [0], [0], [1], [0, 0, 1, 1], [], []>} : vector<32x16xbf16>, vector<16x64xbf16>, vector<32x64xf32> -> vector<32x64xf32>
    %cst_254 = arith.constant 0.000000e+00 : f32
    %302 = vector.broadcast %cst_254 : f32 to vector<16x64xf32>
    %303 = arith.truncf %301 : vector<32x64xf32> to vector<32x64xbf16>
    %c0_255 = arith.constant 0 : index
    %c0_256 = arith.constant 0 : index
    %c0_257 = arith.constant 0 : index
    %304 = vector.load %arg3[%c0_255, %c0_256, %c0_257] : memref<9x64x64xbf16, #tpu.memory_space<vmem>>, vector<1x64x64xbf16>
    %305 = vector.shape_cast %304 : vector<1x64x64xbf16> to vector<64x64xbf16>
    %cst_258 = arith.constant dense<0.000000e+00> : vector<32x64xf32>
    %306 = tpu.matmul %303, %305, %cst_258 {dimension_numbers = #tpu.dot_dimension_numbers<[1], [0], [0], [1], [0, 0, 1, 1], [], []>} : vector<32x64xbf16>, vector<64x64xbf16>, vector<32x64xf32> -> vector<32x64xf32>
    %307 = arith.truncf %306 : vector<32x64xf32> to vector<32x64xbf16>
    %c0_259 = arith.constant 0 : index
    %c0_260 = arith.constant 0 : index
    %c0_261 = arith.constant 0 : index
    %308 = vector.load %arg15[%c0_259, %c0_260, %c0_261] : memref<9x16x32xbf16, #tpu.memory_space<vmem>>, vector<1x16x32xbf16>
    %309 = vector.shape_cast %308 : vector<1x16x32xbf16> to vector<16x32xbf16>
    %cst_262 = arith.constant dense<0.000000e+00> : vector<16x64xf32>
    %310 = tpu.matmul %309, %307, %cst_262 {dimension_numbers = #tpu.dot_dimension_numbers<[1], [0], [0], [1], [0, 0, 1, 1], [], []>} : vector<16x32xbf16>, vector<32x64xbf16>, vector<16x64xf32> -> vector<16x64xf32>
    %311 = arith.addf %302, %310 : vector<16x64xf32>
    %312 = arith.truncf %301 : vector<32x64xf32> to vector<32x64xbf16>
    %c1_263 = arith.constant 1 : index
    %c0_264 = arith.constant 0 : index
    %c0_265 = arith.constant 0 : index
    %313 = vector.load %arg3[%c1_263, %c0_264, %c0_265] : memref<9x64x64xbf16, #tpu.memory_space<vmem>>, vector<1x64x64xbf16>
    %314 = vector.shape_cast %313 : vector<1x64x64xbf16> to vector<64x64xbf16>
    %cst_266 = arith.constant dense<0.000000e+00> : vector<32x64xf32>
    %315 = tpu.matmul %312, %314, %cst_266 {dimension_numbers = #tpu.dot_dimension_numbers<[1], [0], [0], [1], [0, 0, 1, 1], [], []>} : vector<32x64xbf16>, vector<64x64xbf16>, vector<32x64xf32> -> vector<32x64xf32>
    %316 = arith.truncf %315 : vector<32x64xf32> to vector<32x64xbf16>
    %c1_267 = arith.constant 1 : index
    %c0_268 = arith.constant 0 : index
    %c0_269 = arith.constant 0 : index
    %317 = vector.load %arg15[%c1_267, %c0_268, %c0_269] : memref<9x16x32xbf16, #tpu.memory_space<vmem>>, vector<1x16x32xbf16>
    %318 = vector.shape_cast %317 : vector<1x16x32xbf16> to vector<16x32xbf16>
    %cst_270 = arith.constant dense<0.000000e+00> : vector<16x64xf32>
    %319 = tpu.matmul %318, %316, %cst_270 {dimension_numbers = #tpu.dot_dimension_numbers<[1], [0], [0], [1], [0, 0, 1, 1], [], []>} : vector<16x32xbf16>, vector<32x64xbf16>, vector<16x64xf32> -> vector<16x64xf32>
    %320 = arith.addf %311, %319 : vector<16x64xf32>
    %321 = arith.truncf %301 : vector<32x64xf32> to vector<32x64xbf16>
    %c2_271 = arith.constant 2 : index
    %c0_272 = arith.constant 0 : index
    %c0_273 = arith.constant 0 : index
    %322 = vector.load %arg3[%c2_271, %c0_272, %c0_273] : memref<9x64x64xbf16, #tpu.memory_space<vmem>>, vector<1x64x64xbf16>
    %323 = vector.shape_cast %322 : vector<1x64x64xbf16> to vector<64x64xbf16>
    %cst_274 = arith.constant dense<0.000000e+00> : vector<32x64xf32>
    %324 = tpu.matmul %321, %323, %cst_274 {dimension_numbers = #tpu.dot_dimension_numbers<[1], [0], [0], [1], [0, 0, 1, 1], [], []>} : vector<32x64xbf16>, vector<64x64xbf16>, vector<32x64xf32> -> vector<32x64xf32>
    %325 = arith.truncf %324 : vector<32x64xf32> to vector<32x64xbf16>
    %c2_275 = arith.constant 2 : index
    %c0_276 = arith.constant 0 : index
    %c0_277 = arith.constant 0 : index
    %326 = vector.load %arg15[%c2_275, %c0_276, %c0_277] : memref<9x16x32xbf16, #tpu.memory_space<vmem>>, vector<1x16x32xbf16>
    %327 = vector.shape_cast %326 : vector<1x16x32xbf16> to vector<16x32xbf16>
    %cst_278 = arith.constant dense<0.000000e+00> : vector<16x64xf32>
    %328 = tpu.matmul %327, %325, %cst_278 {dimension_numbers = #tpu.dot_dimension_numbers<[1], [0], [0], [1], [0, 0, 1, 1], [], []>} : vector<16x32xbf16>, vector<32x64xbf16>, vector<16x64xf32> -> vector<16x64xf32>
    %329 = arith.addf %320, %328 : vector<16x64xf32>
    %330 = arith.truncf %301 : vector<32x64xf32> to vector<32x64xbf16>
    %c3_279 = arith.constant 3 : index
    %c0_280 = arith.constant 0 : index
    %c0_281 = arith.constant 0 : index
    %331 = vector.load %arg3[%c3_279, %c0_280, %c0_281] : memref<9x64x64xbf16, #tpu.memory_space<vmem>>, vector<1x64x64xbf16>
    %332 = vector.shape_cast %331 : vector<1x64x64xbf16> to vector<64x64xbf16>
    %cst_282 = arith.constant dense<0.000000e+00> : vector<32x64xf32>
    %333 = tpu.matmul %330, %332, %cst_282 {dimension_numbers = #tpu.dot_dimension_numbers<[1], [0], [0], [1], [0, 0, 1, 1], [], []>} : vector<32x64xbf16>, vector<64x64xbf16>, vector<32x64xf32> -> vector<32x64xf32>
    %334 = arith.truncf %333 : vector<32x64xf32> to vector<32x64xbf16>
    %c3_283 = arith.constant 3 : index
    %c0_284 = arith.constant 0 : index
    %c0_285 = arith.constant 0 : index
    %335 = vector.load %arg15[%c3_283, %c0_284, %c0_285] : memref<9x16x32xbf16, #tpu.memory_space<vmem>>, vector<1x16x32xbf16>
    %336 = vector.shape_cast %335 : vector<1x16x32xbf16> to vector<16x32xbf16>
    %cst_286 = arith.constant dense<0.000000e+00> : vector<16x64xf32>
    %337 = tpu.matmul %336, %334, %cst_286 {dimension_numbers = #tpu.dot_dimension_numbers<[1], [0], [0], [1], [0, 0, 1, 1], [], []>} : vector<16x32xbf16>, vector<32x64xbf16>, vector<16x64xf32> -> vector<16x64xf32>
    %338 = arith.addf %329, %337 : vector<16x64xf32>
    %339 = arith.truncf %301 : vector<32x64xf32> to vector<32x64xbf16>
    %c4_287 = arith.constant 4 : index
    %c0_288 = arith.constant 0 : index
    %c0_289 = arith.constant 0 : index
    %340 = vector.load %arg3[%c4_287, %c0_288, %c0_289] : memref<9x64x64xbf16, #tpu.memory_space<vmem>>, vector<1x64x64xbf16>
    %341 = vector.shape_cast %340 : vector<1x64x64xbf16> to vector<64x64xbf16>
    %cst_290 = arith.constant dense<0.000000e+00> : vector<32x64xf32>
    %342 = tpu.matmul %339, %341, %cst_290 {dimension_numbers = #tpu.dot_dimension_numbers<[1], [0], [0], [1], [0, 0, 1, 1], [], []>} : vector<32x64xbf16>, vector<64x64xbf16>, vector<32x64xf32> -> vector<32x64xf32>
    %343 = arith.truncf %342 : vector<32x64xf32> to vector<32x64xbf16>
    %c4_291 = arith.constant 4 : index
    %c0_292 = arith.constant 0 : index
    %c0_293 = arith.constant 0 : index
    %344 = vector.load %arg15[%c4_291, %c0_292, %c0_293] : memref<9x16x32xbf16, #tpu.memory_space<vmem>>, vector<1x16x32xbf16>
    %345 = vector.shape_cast %344 : vector<1x16x32xbf16> to vector<16x32xbf16>
    %cst_294 = arith.constant dense<0.000000e+00> : vector<16x64xf32>
    %346 = tpu.matmul %345, %343, %cst_294 {dimension_numbers = #tpu.dot_dimension_numbers<[1], [0], [0], [1], [0, 0, 1, 1], [], []>} : vector<16x32xbf16>, vector<32x64xbf16>, vector<16x64xf32> -> vector<16x64xf32>
    %347 = arith.addf %338, %346 : vector<16x64xf32>
    %348 = arith.truncf %301 : vector<32x64xf32> to vector<32x64xbf16>
    %c5_295 = arith.constant 5 : index
    %c0_296 = arith.constant 0 : index
    %c0_297 = arith.constant 0 : index
    %349 = vector.load %arg3[%c5_295, %c0_296, %c0_297] : memref<9x64x64xbf16, #tpu.memory_space<vmem>>, vector<1x64x64xbf16>
    %350 = vector.shape_cast %349 : vector<1x64x64xbf16> to vector<64x64xbf16>
    %cst_298 = arith.constant dense<0.000000e+00> : vector<32x64xf32>
    %351 = tpu.matmul %348, %350, %cst_298 {dimension_numbers = #tpu.dot_dimension_numbers<[1], [0], [0], [1], [0, 0, 1, 1], [], []>} : vector<32x64xbf16>, vector<64x64xbf16>, vector<32x64xf32> -> vector<32x64xf32>
    %352 = arith.truncf %351 : vector<32x64xf32> to vector<32x64xbf16>
    %c5_299 = arith.constant 5 : index
    %c0_300 = arith.constant 0 : index
    %c0_301 = arith.constant 0 : index
    %353 = vector.load %arg15[%c5_299, %c0_300, %c0_301] : memref<9x16x32xbf16, #tpu.memory_space<vmem>>, vector<1x16x32xbf16>
    %354 = vector.shape_cast %353 : vector<1x16x32xbf16> to vector<16x32xbf16>
    %cst_302 = arith.constant dense<0.000000e+00> : vector<16x64xf32>
    %355 = tpu.matmul %354, %352, %cst_302 {dimension_numbers = #tpu.dot_dimension_numbers<[1], [0], [0], [1], [0, 0, 1, 1], [], []>} : vector<16x32xbf16>, vector<32x64xbf16>, vector<16x64xf32> -> vector<16x64xf32>
    %356 = arith.addf %347, %355 : vector<16x64xf32>
    %357 = arith.truncf %301 : vector<32x64xf32> to vector<32x64xbf16>
    %c6_303 = arith.constant 6 : index
    %c0_304 = arith.constant 0 : index
    %c0_305 = arith.constant 0 : index
    %358 = vector.load %arg3[%c6_303, %c0_304, %c0_305] : memref<9x64x64xbf16, #tpu.memory_space<vmem>>, vector<1x64x64xbf16>
    %359 = vector.shape_cast %358 : vector<1x64x64xbf16> to vector<64x64xbf16>
    %cst_306 = arith.constant dense<0.000000e+00> : vector<32x64xf32>
    %360 = tpu.matmul %357, %359, %cst_306 {dimension_numbers = #tpu.dot_dimension_numbers<[1], [0], [0], [1], [0, 0, 1, 1], [], []>} : vector<32x64xbf16>, vector<64x64xbf16>, vector<32x64xf32> -> vector<32x64xf32>
    %361 = arith.truncf %360 : vector<32x64xf32> to vector<32x64xbf16>
    %c6_307 = arith.constant 6 : index
    %c0_308 = arith.constant 0 : index
    %c0_309 = arith.constant 0 : index
    %362 = vector.load %arg15[%c6_307, %c0_308, %c0_309] : memref<9x16x32xbf16, #tpu.memory_space<vmem>>, vector<1x16x32xbf16>
    %363 = vector.shape_cast %362 : vector<1x16x32xbf16> to vector<16x32xbf16>
    %cst_310 = arith.constant dense<0.000000e+00> : vector<16x64xf32>
    %364 = tpu.matmul %363, %361, %cst_310 {dimension_numbers = #tpu.dot_dimension_numbers<[1], [0], [0], [1], [0, 0, 1, 1], [], []>} : vector<16x32xbf16>, vector<32x64xbf16>, vector<16x64xf32> -> vector<16x64xf32>
    %365 = arith.addf %356, %364 : vector<16x64xf32>
    %366 = arith.truncf %301 : vector<32x64xf32> to vector<32x64xbf16>
    %c7_311 = arith.constant 7 : index
    %c0_312 = arith.constant 0 : index
    %c0_313 = arith.constant 0 : index
    %367 = vector.load %arg3[%c7_311, %c0_312, %c0_313] : memref<9x64x64xbf16, #tpu.memory_space<vmem>>, vector<1x64x64xbf16>
    %368 = vector.shape_cast %367 : vector<1x64x64xbf16> to vector<64x64xbf16>
    %cst_314 = arith.constant dense<0.000000e+00> : vector<32x64xf32>
    %369 = tpu.matmul %366, %368, %cst_314 {dimension_numbers = #tpu.dot_dimension_numbers<[1], [0], [0], [1], [0, 0, 1, 1], [], []>} : vector<32x64xbf16>, vector<64x64xbf16>, vector<32x64xf32> -> vector<32x64xf32>
    %370 = arith.truncf %369 : vector<32x64xf32> to vector<32x64xbf16>
    %c7_315 = arith.constant 7 : index
    %c0_316 = arith.constant 0 : index
    %c0_317 = arith.constant 0 : index
    %371 = vector.load %arg15[%c7_315, %c0_316, %c0_317] : memref<9x16x32xbf16, #tpu.memory_space<vmem>>, vector<1x16x32xbf16>
    %372 = vector.shape_cast %371 : vector<1x16x32xbf16> to vector<16x32xbf16>
    %cst_318 = arith.constant dense<0.000000e+00> : vector<16x64xf32>
    %373 = tpu.matmul %372, %370, %cst_318 {dimension_numbers = #tpu.dot_dimension_numbers<[1], [0], [0], [1], [0, 0, 1, 1], [], []>} : vector<16x32xbf16>, vector<32x64xbf16>, vector<16x64xf32> -> vector<16x64xf32>
    %374 = arith.addf %365, %373 : vector<16x64xf32>
    %375 = arith.truncf %301 : vector<32x64xf32> to vector<32x64xbf16>
    %c8_319 = arith.constant 8 : index
    %c0_320 = arith.constant 0 : index
    %c0_321 = arith.constant 0 : index
    %376 = vector.load %arg3[%c8_319, %c0_320, %c0_321] : memref<9x64x64xbf16, #tpu.memory_space<vmem>>, vector<1x64x64xbf16>
    %377 = vector.shape_cast %376 : vector<1x64x64xbf16> to vector<64x64xbf16>
    %cst_322 = arith.constant dense<0.000000e+00> : vector<32x64xf32>
    %378 = tpu.matmul %375, %377, %cst_322 {dimension_numbers = #tpu.dot_dimension_numbers<[1], [0], [0], [1], [0, 0, 1, 1], [], []>} : vector<32x64xbf16>, vector<64x64xbf16>, vector<32x64xf32> -> vector<32x64xf32>
    %379 = arith.truncf %378 : vector<32x64xf32> to vector<32x64xbf16>
    %c8_323 = arith.constant 8 : index
    %c0_324 = arith.constant 0 : index
    %c0_325 = arith.constant 0 : index
    %380 = vector.load %arg15[%c8_323, %c0_324, %c0_325] : memref<9x16x32xbf16, #tpu.memory_space<vmem>>, vector<1x16x32xbf16>
    %381 = vector.shape_cast %380 : vector<1x16x32xbf16> to vector<16x32xbf16>
    %cst_326 = arith.constant dense<0.000000e+00> : vector<16x64xf32>
    %382 = tpu.matmul %381, %379, %cst_326 {dimension_numbers = #tpu.dot_dimension_numbers<[1], [0], [0], [1], [0, 0, 1, 1], [], []>} : vector<16x32xbf16>, vector<32x64xbf16>, vector<16x64xf32> -> vector<16x64xf32>
    %383 = arith.addf %374, %382 : vector<16x64xf32>
    %384 = arith.truncf %193 : vector<16x64xf32> to vector<16x64xbf16>
    %c0_327 = arith.constant 0 : index
    %c0_328 = arith.constant 0 : index
    %c0_329 = arith.constant 0 : index
    %385 = vector.load %arg3[%c0_327, %c0_328, %c0_329] : memref<9x64x64xbf16, #tpu.memory_space<vmem>>, vector<1x64x64xbf16>
    %386 = vector.shape_cast %385 : vector<1x64x64xbf16> to vector<64x64xbf16>
    %cst_330 = arith.constant dense<0.000000e+00> : vector<16x64xf32>
    %387 = tpu.matmul %384, %386, %cst_330 {dimension_numbers = #tpu.dot_dimension_numbers<[1], [0], [0], [1], [0, 0, 1, 1], [], []>} : vector<16x64xbf16>, vector<64x64xbf16>, vector<16x64xf32> -> vector<16x64xf32>
    %388 = arith.truncf %387 : vector<16x64xf32> to vector<16x64xbf16>
    %c0_331 = arith.constant 0 : index
    %c0_332 = arith.constant 0 : index
    %c0_333 = arith.constant 0 : index
    %389 = vector.load %arg16[%c0_331, %c0_332, %c0_333] : memref<9x16x16xbf16, #tpu.memory_space<vmem>>, vector<1x16x16xbf16>
    %390 = vector.shape_cast %389 : vector<1x16x16xbf16> to vector<16x16xbf16>
    %cst_334 = arith.constant dense<0.000000e+00> : vector<16x64xf32>
    %391 = tpu.matmul %390, %388, %cst_334 {dimension_numbers = #tpu.dot_dimension_numbers<[1], [0], [0], [1], [0, 0, 1, 1], [], []>} : vector<16x16xbf16>, vector<16x64xbf16>, vector<16x64xf32> -> vector<16x64xf32>
    %392 = arith.addf %383, %391 : vector<16x64xf32>
    %393 = arith.truncf %193 : vector<16x64xf32> to vector<16x64xbf16>
    %c1_335 = arith.constant 1 : index
    %c0_336 = arith.constant 0 : index
    %c0_337 = arith.constant 0 : index
    %394 = vector.load %arg3[%c1_335, %c0_336, %c0_337] : memref<9x64x64xbf16, #tpu.memory_space<vmem>>, vector<1x64x64xbf16>
    %395 = vector.shape_cast %394 : vector<1x64x64xbf16> to vector<64x64xbf16>
    %cst_338 = arith.constant dense<0.000000e+00> : vector<16x64xf32>
    %396 = tpu.matmul %393, %395, %cst_338 {dimension_numbers = #tpu.dot_dimension_numbers<[1], [0], [0], [1], [0, 0, 1, 1], [], []>} : vector<16x64xbf16>, vector<64x64xbf16>, vector<16x64xf32> -> vector<16x64xf32>
    %397 = arith.truncf %396 : vector<16x64xf32> to vector<16x64xbf16>
    %c1_339 = arith.constant 1 : index
    %c0_340 = arith.constant 0 : index
    %c0_341 = arith.constant 0 : index
    %398 = vector.load %arg16[%c1_339, %c0_340, %c0_341] : memref<9x16x16xbf16, #tpu.memory_space<vmem>>, vector<1x16x16xbf16>
    %399 = vector.shape_cast %398 : vector<1x16x16xbf16> to vector<16x16xbf16>
    %cst_342 = arith.constant dense<0.000000e+00> : vector<16x64xf32>
    %400 = tpu.matmul %399, %397, %cst_342 {dimension_numbers = #tpu.dot_dimension_numbers<[1], [0], [0], [1], [0, 0, 1, 1], [], []>} : vector<16x16xbf16>, vector<16x64xbf16>, vector<16x64xf32> -> vector<16x64xf32>
    %401 = arith.addf %392, %400 : vector<16x64xf32>
    %402 = arith.truncf %193 : vector<16x64xf32> to vector<16x64xbf16>
    %c2_343 = arith.constant 2 : index
    %c0_344 = arith.constant 0 : index
    %c0_345 = arith.constant 0 : index
    %403 = vector.load %arg3[%c2_343, %c0_344, %c0_345] : memref<9x64x64xbf16, #tpu.memory_space<vmem>>, vector<1x64x64xbf16>
    %404 = vector.shape_cast %403 : vector<1x64x64xbf16> to vector<64x64xbf16>
    %cst_346 = arith.constant dense<0.000000e+00> : vector<16x64xf32>
    %405 = tpu.matmul %402, %404, %cst_346 {dimension_numbers = #tpu.dot_dimension_numbers<[1], [0], [0], [1], [0, 0, 1, 1], [], []>} : vector<16x64xbf16>, vector<64x64xbf16>, vector<16x64xf32> -> vector<16x64xf32>
    %406 = arith.truncf %405 : vector<16x64xf32> to vector<16x64xbf16>
    %c2_347 = arith.constant 2 : index
    %c0_348 = arith.constant 0 : index
    %c0_349 = arith.constant 0 : index
    %407 = vector.load %arg16[%c2_347, %c0_348, %c0_349] : memref<9x16x16xbf16, #tpu.memory_space<vmem>>, vector<1x16x16xbf16>
    %408 = vector.shape_cast %407 : vector<1x16x16xbf16> to vector<16x16xbf16>
    %cst_350 = arith.constant dense<0.000000e+00> : vector<16x64xf32>
    %409 = tpu.matmul %408, %406, %cst_350 {dimension_numbers = #tpu.dot_dimension_numbers<[1], [0], [0], [1], [0, 0, 1, 1], [], []>} : vector<16x16xbf16>, vector<16x64xbf16>, vector<16x64xf32> -> vector<16x64xf32>
    %410 = arith.addf %401, %409 : vector<16x64xf32>
    %411 = arith.truncf %193 : vector<16x64xf32> to vector<16x64xbf16>
    %c3_351 = arith.constant 3 : index
    %c0_352 = arith.constant 0 : index
    %c0_353 = arith.constant 0 : index
    %412 = vector.load %arg3[%c3_351, %c0_352, %c0_353] : memref<9x64x64xbf16, #tpu.memory_space<vmem>>, vector<1x64x64xbf16>
    %413 = vector.shape_cast %412 : vector<1x64x64xbf16> to vector<64x64xbf16>
    %cst_354 = arith.constant dense<0.000000e+00> : vector<16x64xf32>
    %414 = tpu.matmul %411, %413, %cst_354 {dimension_numbers = #tpu.dot_dimension_numbers<[1], [0], [0], [1], [0, 0, 1, 1], [], []>} : vector<16x64xbf16>, vector<64x64xbf16>, vector<16x64xf32> -> vector<16x64xf32>
    %415 = arith.truncf %414 : vector<16x64xf32> to vector<16x64xbf16>
    %c3_355 = arith.constant 3 : index
    %c0_356 = arith.constant 0 : index
    %c0_357 = arith.constant 0 : index
    %416 = vector.load %arg16[%c3_355, %c0_356, %c0_357] : memref<9x16x16xbf16, #tpu.memory_space<vmem>>, vector<1x16x16xbf16>
    %417 = vector.shape_cast %416 : vector<1x16x16xbf16> to vector<16x16xbf16>
    %cst_358 = arith.constant dense<0.000000e+00> : vector<16x64xf32>
    %418 = tpu.matmul %417, %415, %cst_358 {dimension_numbers = #tpu.dot_dimension_numbers<[1], [0], [0], [1], [0, 0, 1, 1], [], []>} : vector<16x16xbf16>, vector<16x64xbf16>, vector<16x64xf32> -> vector<16x64xf32>
    %419 = arith.addf %410, %418 : vector<16x64xf32>
    %420 = arith.truncf %193 : vector<16x64xf32> to vector<16x64xbf16>
    %c4_359 = arith.constant 4 : index
    %c0_360 = arith.constant 0 : index
    %c0_361 = arith.constant 0 : index
    %421 = vector.load %arg3[%c4_359, %c0_360, %c0_361] : memref<9x64x64xbf16, #tpu.memory_space<vmem>>, vector<1x64x64xbf16>
    %422 = vector.shape_cast %421 : vector<1x64x64xbf16> to vector<64x64xbf16>
    %cst_362 = arith.constant dense<0.000000e+00> : vector<16x64xf32>
    %423 = tpu.matmul %420, %422, %cst_362 {dimension_numbers = #tpu.dot_dimension_numbers<[1], [0], [0], [1], [0, 0, 1, 1], [], []>} : vector<16x64xbf16>, vector<64x64xbf16>, vector<16x64xf32> -> vector<16x64xf32>
    %424 = arith.truncf %423 : vector<16x64xf32> to vector<16x64xbf16>
    %c4_363 = arith.constant 4 : index
    %c0_364 = arith.constant 0 : index
    %c0_365 = arith.constant 0 : index
    %425 = vector.load %arg16[%c4_363, %c0_364, %c0_365] : memref<9x16x16xbf16, #tpu.memory_space<vmem>>, vector<1x16x16xbf16>
    %426 = vector.shape_cast %425 : vector<1x16x16xbf16> to vector<16x16xbf16>
    %cst_366 = arith.constant dense<0.000000e+00> : vector<16x64xf32>
    %427 = tpu.matmul %426, %424, %cst_366 {dimension_numbers = #tpu.dot_dimension_numbers<[1], [0], [0], [1], [0, 0, 1, 1], [], []>} : vector<16x16xbf16>, vector<16x64xbf16>, vector<16x64xf32> -> vector<16x64xf32>
    %428 = arith.addf %419, %427 : vector<16x64xf32>
    %429 = arith.truncf %193 : vector<16x64xf32> to vector<16x64xbf16>
    %c5_367 = arith.constant 5 : index
    %c0_368 = arith.constant 0 : index
    %c0_369 = arith.constant 0 : index
    %430 = vector.load %arg3[%c5_367, %c0_368, %c0_369] : memref<9x64x64xbf16, #tpu.memory_space<vmem>>, vector<1x64x64xbf16>
    %431 = vector.shape_cast %430 : vector<1x64x64xbf16> to vector<64x64xbf16>
    %cst_370 = arith.constant dense<0.000000e+00> : vector<16x64xf32>
    %432 = tpu.matmul %429, %431, %cst_370 {dimension_numbers = #tpu.dot_dimension_numbers<[1], [0], [0], [1], [0, 0, 1, 1], [], []>} : vector<16x64xbf16>, vector<64x64xbf16>, vector<16x64xf32> -> vector<16x64xf32>
    %433 = arith.truncf %432 : vector<16x64xf32> to vector<16x64xbf16>
    %c5_371 = arith.constant 5 : index
    %c0_372 = arith.constant 0 : index
    %c0_373 = arith.constant 0 : index
    %434 = vector.load %arg16[%c5_371, %c0_372, %c0_373] : memref<9x16x16xbf16, #tpu.memory_space<vmem>>, vector<1x16x16xbf16>
    %435 = vector.shape_cast %434 : vector<1x16x16xbf16> to vector<16x16xbf16>
    %cst_374 = arith.constant dense<0.000000e+00> : vector<16x64xf32>
    %436 = tpu.matmul %435, %433, %cst_374 {dimension_numbers = #tpu.dot_dimension_numbers<[1], [0], [0], [1], [0, 0, 1, 1], [], []>} : vector<16x16xbf16>, vector<16x64xbf16>, vector<16x64xf32> -> vector<16x64xf32>
    %437 = arith.addf %428, %436 : vector<16x64xf32>
    %438 = arith.truncf %193 : vector<16x64xf32> to vector<16x64xbf16>
    %c6_375 = arith.constant 6 : index
    %c0_376 = arith.constant 0 : index
    %c0_377 = arith.constant 0 : index
    %439 = vector.load %arg3[%c6_375, %c0_376, %c0_377] : memref<9x64x64xbf16, #tpu.memory_space<vmem>>, vector<1x64x64xbf16>
    %440 = vector.shape_cast %439 : vector<1x64x64xbf16> to vector<64x64xbf16>
    %cst_378 = arith.constant dense<0.000000e+00> : vector<16x64xf32>
    %441 = tpu.matmul %438, %440, %cst_378 {dimension_numbers = #tpu.dot_dimension_numbers<[1], [0], [0], [1], [0, 0, 1, 1], [], []>} : vector<16x64xbf16>, vector<64x64xbf16>, vector<16x64xf32> -> vector<16x64xf32>
    %442 = arith.truncf %441 : vector<16x64xf32> to vector<16x64xbf16>
    %c6_379 = arith.constant 6 : index
    %c0_380 = arith.constant 0 : index
    %c0_381 = arith.constant 0 : index
    %443 = vector.load %arg16[%c6_379, %c0_380, %c0_381] : memref<9x16x16xbf16, #tpu.memory_space<vmem>>, vector<1x16x16xbf16>
    %444 = vector.shape_cast %443 : vector<1x16x16xbf16> to vector<16x16xbf16>
    %cst_382 = arith.constant dense<0.000000e+00> : vector<16x64xf32>
    %445 = tpu.matmul %444, %442, %cst_382 {dimension_numbers = #tpu.dot_dimension_numbers<[1], [0], [0], [1], [0, 0, 1, 1], [], []>} : vector<16x16xbf16>, vector<16x64xbf16>, vector<16x64xf32> -> vector<16x64xf32>
    %446 = arith.addf %437, %445 : vector<16x64xf32>
    %447 = arith.truncf %193 : vector<16x64xf32> to vector<16x64xbf16>
    %c7_383 = arith.constant 7 : index
    %c0_384 = arith.constant 0 : index
    %c0_385 = arith.constant 0 : index
    %448 = vector.load %arg3[%c7_383, %c0_384, %c0_385] : memref<9x64x64xbf16, #tpu.memory_space<vmem>>, vector<1x64x64xbf16>
    %449 = vector.shape_cast %448 : vector<1x64x64xbf16> to vector<64x64xbf16>
    %cst_386 = arith.constant dense<0.000000e+00> : vector<16x64xf32>
    %450 = tpu.matmul %447, %449, %cst_386 {dimension_numbers = #tpu.dot_dimension_numbers<[1], [0], [0], [1], [0, 0, 1, 1], [], []>} : vector<16x64xbf16>, vector<64x64xbf16>, vector<16x64xf32> -> vector<16x64xf32>
    %451 = arith.truncf %450 : vector<16x64xf32> to vector<16x64xbf16>
    %c7_387 = arith.constant 7 : index
    %c0_388 = arith.constant 0 : index
    %c0_389 = arith.constant 0 : index
    %452 = vector.load %arg16[%c7_387, %c0_388, %c0_389] : memref<9x16x16xbf16, #tpu.memory_space<vmem>>, vector<1x16x16xbf16>
    %453 = vector.shape_cast %452 : vector<1x16x16xbf16> to vector<16x16xbf16>
    %cst_390 = arith.constant dense<0.000000e+00> : vector<16x64xf32>
    %454 = tpu.matmul %453, %451, %cst_390 {dimension_numbers = #tpu.dot_dimension_numbers<[1], [0], [0], [1], [0, 0, 1, 1], [], []>} : vector<16x16xbf16>, vector<16x64xbf16>, vector<16x64xf32> -> vector<16x64xf32>
    %455 = arith.addf %446, %454 : vector<16x64xf32>
    %456 = arith.truncf %193 : vector<16x64xf32> to vector<16x64xbf16>
    %c8_391 = arith.constant 8 : index
    %c0_392 = arith.constant 0 : index
    %c0_393 = arith.constant 0 : index
    %457 = vector.load %arg3[%c8_391, %c0_392, %c0_393] : memref<9x64x64xbf16, #tpu.memory_space<vmem>>, vector<1x64x64xbf16>
    %458 = vector.shape_cast %457 : vector<1x64x64xbf16> to vector<64x64xbf16>
    %cst_394 = arith.constant dense<0.000000e+00> : vector<16x64xf32>
    %459 = tpu.matmul %456, %458, %cst_394 {dimension_numbers = #tpu.dot_dimension_numbers<[1], [0], [0], [1], [0, 0, 1, 1], [], []>} : vector<16x64xbf16>, vector<64x64xbf16>, vector<16x64xf32> -> vector<16x64xf32>
    %460 = arith.truncf %459 : vector<16x64xf32> to vector<16x64xbf16>
    %c8_395 = arith.constant 8 : index
    %c0_396 = arith.constant 0 : index
    %c0_397 = arith.constant 0 : index
    %461 = vector.load %arg16[%c8_395, %c0_396, %c0_397] : memref<9x16x16xbf16, #tpu.memory_space<vmem>>, vector<1x16x16xbf16>
    %462 = vector.shape_cast %461 : vector<1x16x16xbf16> to vector<16x16xbf16>
    %cst_398 = arith.constant dense<0.000000e+00> : vector<16x64xf32>
    %463 = tpu.matmul %462, %460, %cst_398 {dimension_numbers = #tpu.dot_dimension_numbers<[1], [0], [0], [1], [0, 0, 1, 1], [], []>} : vector<16x16xbf16>, vector<16x64xbf16>, vector<16x64xf32> -> vector<16x64xf32>
    %464 = arith.addf %455, %463 : vector<16x64xf32>
    %c0_399 = arith.constant 0 : index
    %c0_400 = arith.constant 0 : index
    %465 = vector.load %arg17[%c0_399, %c0_400] : memref<16x1xf32, #tpu.memory_space<vmem>>, vector<16x1xf32>
    %466 = vector.broadcast %465 : vector<16x1xf32> to vector<16x64xf32>
    %467 = arith.addf %464, %466 : vector<16x64xf32>
    %cst_401 = arith.constant 0.000000e+00 : f32
    %468 = vector.broadcast %cst_401 : f32 to vector<16x64xf32>
    %469 = arith.maximumf %467, %468 : vector<16x64xf32>
    %470 = arith.truncf %469 : vector<16x64xf32> to vector<16x64xbf16>
    %c0_402 = arith.constant 0 : index
    %c0_403 = arith.constant 0 : index
    %471 = vector.load %arg8[%c0_402, %c0_403] : memref<64x256xbf16, #tpu.memory_space<vmem>>, vector<64x256xbf16>
    %cst_404 = arith.constant dense<0.000000e+00> : vector<16x256xf32>
    %472 = tpu.matmul %470, %471, %cst_404 {dimension_numbers = #tpu.dot_dimension_numbers<[1], [0], [0], [1], [0, 0, 1, 1], [], []>} : vector<16x64xbf16>, vector<64x256xbf16>, vector<16x256xf32> -> vector<16x256xf32>
    %cst_405 = arith.constant 0.000000e+00 : f32
    %473 = vector.broadcast %cst_405 : f32 to vector<8x256xf32>
    %474 = arith.truncf %472 : vector<16x256xf32> to vector<16x256xbf16>
    %c0_406 = arith.constant 0 : index
    %c0_407 = arith.constant 0 : index
    %c0_408 = arith.constant 0 : index
    %475 = vector.load %arg2[%c0_406, %c0_407, %c0_408] : memref<9x256x256xbf16, #tpu.memory_space<vmem>>, vector<1x256x256xbf16>
    %476 = vector.shape_cast %475 : vector<1x256x256xbf16> to vector<256x256xbf16>
    %cst_409 = arith.constant dense<0.000000e+00> : vector<16x256xf32>
    %477 = tpu.matmul %474, %476, %cst_409 {dimension_numbers = #tpu.dot_dimension_numbers<[1], [0], [0], [1], [0, 0, 1, 1], [], []>} : vector<16x256xbf16>, vector<256x256xbf16>, vector<16x256xf32> -> vector<16x256xf32>
    %478 = arith.truncf %477 : vector<16x256xf32> to vector<16x256xbf16>
    %c0_410 = arith.constant 0 : index
    %c0_411 = arith.constant 0 : index
    %c0_412 = arith.constant 0 : index
    %479 = vector.load %arg18[%c0_410, %c0_411, %c0_412] : memref<9x8x16xbf16, #tpu.memory_space<vmem>>, vector<1x8x16xbf16>
    %480 = vector.shape_cast %479 : vector<1x8x16xbf16> to vector<8x16xbf16>
    %cst_413 = arith.constant dense<0.000000e+00> : vector<8x256xf32>
    %481 = tpu.matmul %480, %478, %cst_413 {dimension_numbers = #tpu.dot_dimension_numbers<[1], [0], [0], [1], [0, 0, 1, 1], [], []>} : vector<8x16xbf16>, vector<16x256xbf16>, vector<8x256xf32> -> vector<8x256xf32>
    %482 = arith.addf %473, %481 : vector<8x256xf32>
    %483 = arith.truncf %472 : vector<16x256xf32> to vector<16x256xbf16>
    %c1_414 = arith.constant 1 : index
    %c0_415 = arith.constant 0 : index
    %c0_416 = arith.constant 0 : index
    %484 = vector.load %arg2[%c1_414, %c0_415, %c0_416] : memref<9x256x256xbf16, #tpu.memory_space<vmem>>, vector<1x256x256xbf16>
    %485 = vector.shape_cast %484 : vector<1x256x256xbf16> to vector<256x256xbf16>
    %cst_417 = arith.constant dense<0.000000e+00> : vector<16x256xf32>
    %486 = tpu.matmul %483, %485, %cst_417 {dimension_numbers = #tpu.dot_dimension_numbers<[1], [0], [0], [1], [0, 0, 1, 1], [], []>} : vector<16x256xbf16>, vector<256x256xbf16>, vector<16x256xf32> -> vector<16x256xf32>
    %487 = arith.truncf %486 : vector<16x256xf32> to vector<16x256xbf16>
    %c1_418 = arith.constant 1 : index
    %c0_419 = arith.constant 0 : index
    %c0_420 = arith.constant 0 : index
    %488 = vector.load %arg18[%c1_418, %c0_419, %c0_420] : memref<9x8x16xbf16, #tpu.memory_space<vmem>>, vector<1x8x16xbf16>
    %489 = vector.shape_cast %488 : vector<1x8x16xbf16> to vector<8x16xbf16>
    %cst_421 = arith.constant dense<0.000000e+00> : vector<8x256xf32>
    %490 = tpu.matmul %489, %487, %cst_421 {dimension_numbers = #tpu.dot_dimension_numbers<[1], [0], [0], [1], [0, 0, 1, 1], [], []>} : vector<8x16xbf16>, vector<16x256xbf16>, vector<8x256xf32> -> vector<8x256xf32>
    %491 = arith.addf %482, %490 : vector<8x256xf32>
    %492 = arith.truncf %472 : vector<16x256xf32> to vector<16x256xbf16>
    %c2_422 = arith.constant 2 : index
    %c0_423 = arith.constant 0 : index
    %c0_424 = arith.constant 0 : index
    %493 = vector.load %arg2[%c2_422, %c0_423, %c0_424] : memref<9x256x256xbf16, #tpu.memory_space<vmem>>, vector<1x256x256xbf16>
    %494 = vector.shape_cast %493 : vector<1x256x256xbf16> to vector<256x256xbf16>
    %cst_425 = arith.constant dense<0.000000e+00> : vector<16x256xf32>
    %495 = tpu.matmul %492, %494, %cst_425 {dimension_numbers = #tpu.dot_dimension_numbers<[1], [0], [0], [1], [0, 0, 1, 1], [], []>} : vector<16x256xbf16>, vector<256x256xbf16>, vector<16x256xf32> -> vector<16x256xf32>
    %496 = arith.truncf %495 : vector<16x256xf32> to vector<16x256xbf16>
    %c2_426 = arith.constant 2 : index
    %c0_427 = arith.constant 0 : index
    %c0_428 = arith.constant 0 : index
    %497 = vector.load %arg18[%c2_426, %c0_427, %c0_428] : memref<9x8x16xbf16, #tpu.memory_space<vmem>>, vector<1x8x16xbf16>
    %498 = vector.shape_cast %497 : vector<1x8x16xbf16> to vector<8x16xbf16>
    %cst_429 = arith.constant dense<0.000000e+00> : vector<8x256xf32>
    %499 = tpu.matmul %498, %496, %cst_429 {dimension_numbers = #tpu.dot_dimension_numbers<[1], [0], [0], [1], [0, 0, 1, 1], [], []>} : vector<8x16xbf16>, vector<16x256xbf16>, vector<8x256xf32> -> vector<8x256xf32>
    %500 = arith.addf %491, %499 : vector<8x256xf32>
    %501 = arith.truncf %472 : vector<16x256xf32> to vector<16x256xbf16>
    %c3_430 = arith.constant 3 : index
    %c0_431 = arith.constant 0 : index
    %c0_432 = arith.constant 0 : index
    %502 = vector.load %arg2[%c3_430, %c0_431, %c0_432] : memref<9x256x256xbf16, #tpu.memory_space<vmem>>, vector<1x256x256xbf16>
    %503 = vector.shape_cast %502 : vector<1x256x256xbf16> to vector<256x256xbf16>
    %cst_433 = arith.constant dense<0.000000e+00> : vector<16x256xf32>
    %504 = tpu.matmul %501, %503, %cst_433 {dimension_numbers = #tpu.dot_dimension_numbers<[1], [0], [0], [1], [0, 0, 1, 1], [], []>} : vector<16x256xbf16>, vector<256x256xbf16>, vector<16x256xf32> -> vector<16x256xf32>
    %505 = arith.truncf %504 : vector<16x256xf32> to vector<16x256xbf16>
    %c3_434 = arith.constant 3 : index
    %c0_435 = arith.constant 0 : index
    %c0_436 = arith.constant 0 : index
    %506 = vector.load %arg18[%c3_434, %c0_435, %c0_436] : memref<9x8x16xbf16, #tpu.memory_space<vmem>>, vector<1x8x16xbf16>
    %507 = vector.shape_cast %506 : vector<1x8x16xbf16> to vector<8x16xbf16>
    %cst_437 = arith.constant dense<0.000000e+00> : vector<8x256xf32>
    %508 = tpu.matmul %507, %505, %cst_437 {dimension_numbers = #tpu.dot_dimension_numbers<[1], [0], [0], [1], [0, 0, 1, 1], [], []>} : vector<8x16xbf16>, vector<16x256xbf16>, vector<8x256xf32> -> vector<8x256xf32>
    %509 = arith.addf %500, %508 : vector<8x256xf32>
    %510 = arith.truncf %472 : vector<16x256xf32> to vector<16x256xbf16>
    %c4_438 = arith.constant 4 : index
    %c0_439 = arith.constant 0 : index
    %c0_440 = arith.constant 0 : index
    %511 = vector.load %arg2[%c4_438, %c0_439, %c0_440] : memref<9x256x256xbf16, #tpu.memory_space<vmem>>, vector<1x256x256xbf16>
    %512 = vector.shape_cast %511 : vector<1x256x256xbf16> to vector<256x256xbf16>
    %cst_441 = arith.constant dense<0.000000e+00> : vector<16x256xf32>
    %513 = tpu.matmul %510, %512, %cst_441 {dimension_numbers = #tpu.dot_dimension_numbers<[1], [0], [0], [1], [0, 0, 1, 1], [], []>} : vector<16x256xbf16>, vector<256x256xbf16>, vector<16x256xf32> -> vector<16x256xf32>
    %514 = arith.truncf %513 : vector<16x256xf32> to vector<16x256xbf16>
    %c4_442 = arith.constant 4 : index
    %c0_443 = arith.constant 0 : index
    %c0_444 = arith.constant 0 : index
    %515 = vector.load %arg18[%c4_442, %c0_443, %c0_444] : memref<9x8x16xbf16, #tpu.memory_space<vmem>>, vector<1x8x16xbf16>
    %516 = vector.shape_cast %515 : vector<1x8x16xbf16> to vector<8x16xbf16>
    %cst_445 = arith.constant dense<0.000000e+00> : vector<8x256xf32>
    %517 = tpu.matmul %516, %514, %cst_445 {dimension_numbers = #tpu.dot_dimension_numbers<[1], [0], [0], [1], [0, 0, 1, 1], [], []>} : vector<8x16xbf16>, vector<16x256xbf16>, vector<8x256xf32> -> vector<8x256xf32>
    %518 = arith.addf %509, %517 : vector<8x256xf32>
    %519 = arith.truncf %472 : vector<16x256xf32> to vector<16x256xbf16>
    %c5_446 = arith.constant 5 : index
    %c0_447 = arith.constant 0 : index
    %c0_448 = arith.constant 0 : index
    %520 = vector.load %arg2[%c5_446, %c0_447, %c0_448] : memref<9x256x256xbf16, #tpu.memory_space<vmem>>, vector<1x256x256xbf16>
    %521 = vector.shape_cast %520 : vector<1x256x256xbf16> to vector<256x256xbf16>
    %cst_449 = arith.constant dense<0.000000e+00> : vector<16x256xf32>
    %522 = tpu.matmul %519, %521, %cst_449 {dimension_numbers = #tpu.dot_dimension_numbers<[1], [0], [0], [1], [0, 0, 1, 1], [], []>} : vector<16x256xbf16>, vector<256x256xbf16>, vector<16x256xf32> -> vector<16x256xf32>
    %523 = arith.truncf %522 : vector<16x256xf32> to vector<16x256xbf16>
    %c5_450 = arith.constant 5 : index
    %c0_451 = arith.constant 0 : index
    %c0_452 = arith.constant 0 : index
    %524 = vector.load %arg18[%c5_450, %c0_451, %c0_452] : memref<9x8x16xbf16, #tpu.memory_space<vmem>>, vector<1x8x16xbf16>
    %525 = vector.shape_cast %524 : vector<1x8x16xbf16> to vector<8x16xbf16>
    %cst_453 = arith.constant dense<0.000000e+00> : vector<8x256xf32>
    %526 = tpu.matmul %525, %523, %cst_453 {dimension_numbers = #tpu.dot_dimension_numbers<[1], [0], [0], [1], [0, 0, 1, 1], [], []>} : vector<8x16xbf16>, vector<16x256xbf16>, vector<8x256xf32> -> vector<8x256xf32>
    %527 = arith.addf %518, %526 : vector<8x256xf32>
    %528 = arith.truncf %472 : vector<16x256xf32> to vector<16x256xbf16>
    %c6_454 = arith.constant 6 : index
    %c0_455 = arith.constant 0 : index
    %c0_456 = arith.constant 0 : index
    %529 = vector.load %arg2[%c6_454, %c0_455, %c0_456] : memref<9x256x256xbf16, #tpu.memory_space<vmem>>, vector<1x256x256xbf16>
    %530 = vector.shape_cast %529 : vector<1x256x256xbf16> to vector<256x256xbf16>
    %cst_457 = arith.constant dense<0.000000e+00> : vector<16x256xf32>
    %531 = tpu.matmul %528, %530, %cst_457 {dimension_numbers = #tpu.dot_dimension_numbers<[1], [0], [0], [1], [0, 0, 1, 1], [], []>} : vector<16x256xbf16>, vector<256x256xbf16>, vector<16x256xf32> -> vector<16x256xf32>
    %532 = arith.truncf %531 : vector<16x256xf32> to vector<16x256xbf16>
    %c6_458 = arith.constant 6 : index
    %c0_459 = arith.constant 0 : index
    %c0_460 = arith.constant 0 : index
    %533 = vector.load %arg18[%c6_458, %c0_459, %c0_460] : memref<9x8x16xbf16, #tpu.memory_space<vmem>>, vector<1x8x16xbf16>
    %534 = vector.shape_cast %533 : vector<1x8x16xbf16> to vector<8x16xbf16>
    %cst_461 = arith.constant dense<0.000000e+00> : vector<8x256xf32>
    %535 = tpu.matmul %534, %532, %cst_461 {dimension_numbers = #tpu.dot_dimension_numbers<[1], [0], [0], [1], [0, 0, 1, 1], [], []>} : vector<8x16xbf16>, vector<16x256xbf16>, vector<8x256xf32> -> vector<8x256xf32>
    %536 = arith.addf %527, %535 : vector<8x256xf32>
    %537 = arith.truncf %472 : vector<16x256xf32> to vector<16x256xbf16>
    %c7_462 = arith.constant 7 : index
    %c0_463 = arith.constant 0 : index
    %c0_464 = arith.constant 0 : index
    %538 = vector.load %arg2[%c7_462, %c0_463, %c0_464] : memref<9x256x256xbf16, #tpu.memory_space<vmem>>, vector<1x256x256xbf16>
    %539 = vector.shape_cast %538 : vector<1x256x256xbf16> to vector<256x256xbf16>
    %cst_465 = arith.constant dense<0.000000e+00> : vector<16x256xf32>
    %540 = tpu.matmul %537, %539, %cst_465 {dimension_numbers = #tpu.dot_dimension_numbers<[1], [0], [0], [1], [0, 0, 1, 1], [], []>} : vector<16x256xbf16>, vector<256x256xbf16>, vector<16x256xf32> -> vector<16x256xf32>
    %541 = arith.truncf %540 : vector<16x256xf32> to vector<16x256xbf16>
    %c7_466 = arith.constant 7 : index
    %c0_467 = arith.constant 0 : index
    %c0_468 = arith.constant 0 : index
    %542 = vector.load %arg18[%c7_466, %c0_467, %c0_468] : memref<9x8x16xbf16, #tpu.memory_space<vmem>>, vector<1x8x16xbf16>
    %543 = vector.shape_cast %542 : vector<1x8x16xbf16> to vector<8x16xbf16>
    %cst_469 = arith.constant dense<0.000000e+00> : vector<8x256xf32>
    %544 = tpu.matmul %543, %541, %cst_469 {dimension_numbers = #tpu.dot_dimension_numbers<[1], [0], [0], [1], [0, 0, 1, 1], [], []>} : vector<8x16xbf16>, vector<16x256xbf16>, vector<8x256xf32> -> vector<8x256xf32>
    %545 = arith.addf %536, %544 : vector<8x256xf32>
    %546 = arith.truncf %472 : vector<16x256xf32> to vector<16x256xbf16>
    %c8_470 = arith.constant 8 : index
    %c0_471 = arith.constant 0 : index
    %c0_472 = arith.constant 0 : index
    %547 = vector.load %arg2[%c8_470, %c0_471, %c0_472] : memref<9x256x256xbf16, #tpu.memory_space<vmem>>, vector<1x256x256xbf16>
    %548 = vector.shape_cast %547 : vector<1x256x256xbf16> to vector<256x256xbf16>
    %cst_473 = arith.constant dense<0.000000e+00> : vector<16x256xf32>
    %549 = tpu.matmul %546, %548, %cst_473 {dimension_numbers = #tpu.dot_dimension_numbers<[1], [0], [0], [1], [0, 0, 1, 1], [], []>} : vector<16x256xbf16>, vector<256x256xbf16>, vector<16x256xf32> -> vector<16x256xf32>
    %550 = arith.truncf %549 : vector<16x256xf32> to vector<16x256xbf16>
    %c8_474 = arith.constant 8 : index
    %c0_475 = arith.constant 0 : index
    %c0_476 = arith.constant 0 : index
    %551 = vector.load %arg18[%c8_474, %c0_475, %c0_476] : memref<9x8x16xbf16, #tpu.memory_space<vmem>>, vector<1x8x16xbf16>
    %552 = vector.shape_cast %551 : vector<1x8x16xbf16> to vector<8x16xbf16>
    %cst_477 = arith.constant dense<0.000000e+00> : vector<8x256xf32>
    %553 = tpu.matmul %552, %550, %cst_477 {dimension_numbers = #tpu.dot_dimension_numbers<[1], [0], [0], [1], [0, 0, 1, 1], [], []>} : vector<8x16xbf16>, vector<16x256xbf16>, vector<8x256xf32> -> vector<8x256xf32>
    %554 = arith.addf %545, %553 : vector<8x256xf32>
    %555 = arith.truncf %88 : vector<8x256xf32> to vector<8x256xbf16>
    %c0_478 = arith.constant 0 : index
    %c0_479 = arith.constant 0 : index
    %c0_480 = arith.constant 0 : index
    %556 = vector.load %arg2[%c0_478, %c0_479, %c0_480] : memref<9x256x256xbf16, #tpu.memory_space<vmem>>, vector<1x256x256xbf16>
    %557 = vector.shape_cast %556 : vector<1x256x256xbf16> to vector<256x256xbf16>
    %cst_481 = arith.constant dense<0.000000e+00> : vector<8x256xf32>
    %558 = tpu.matmul %555, %557, %cst_481 {dimension_numbers = #tpu.dot_dimension_numbers<[1], [0], [0], [1], [0, 0, 1, 1], [], []>} : vector<8x256xbf16>, vector<256x256xbf16>, vector<8x256xf32> -> vector<8x256xf32>
    %559 = arith.truncf %558 : vector<8x256xf32> to vector<8x256xbf16>
    %c0_482 = arith.constant 0 : index
    %c0_483 = arith.constant 0 : index
    %c0_484 = arith.constant 0 : index
    %560 = vector.load %arg19[%c0_482, %c0_483, %c0_484] : memref<9x8x8xbf16, #tpu.memory_space<vmem>>, vector<1x8x8xbf16>
    %561 = vector.shape_cast %560 : vector<1x8x8xbf16> to vector<8x8xbf16>
    %cst_485 = arith.constant dense<0.000000e+00> : vector<8x256xf32>
    %562 = tpu.matmul %561, %559, %cst_485 {dimension_numbers = #tpu.dot_dimension_numbers<[1], [0], [0], [1], [0, 0, 1, 1], [], []>} : vector<8x8xbf16>, vector<8x256xbf16>, vector<8x256xf32> -> vector<8x256xf32>
    %563 = arith.addf %554, %562 : vector<8x256xf32>
    %564 = arith.truncf %88 : vector<8x256xf32> to vector<8x256xbf16>
    %c1_486 = arith.constant 1 : index
    %c0_487 = arith.constant 0 : index
    %c0_488 = arith.constant 0 : index
    %565 = vector.load %arg2[%c1_486, %c0_487, %c0_488] : memref<9x256x256xbf16, #tpu.memory_space<vmem>>, vector<1x256x256xbf16>
    %566 = vector.shape_cast %565 : vector<1x256x256xbf16> to vector<256x256xbf16>
    %cst_489 = arith.constant dense<0.000000e+00> : vector<8x256xf32>
    %567 = tpu.matmul %564, %566, %cst_489 {dimension_numbers = #tpu.dot_dimension_numbers<[1], [0], [0], [1], [0, 0, 1, 1], [], []>} : vector<8x256xbf16>, vector<256x256xbf16>, vector<8x256xf32> -> vector<8x256xf32>
    %568 = arith.truncf %567 : vector<8x256xf32> to vector<8x256xbf16>
    %c1_490 = arith.constant 1 : index
    %c0_491 = arith.constant 0 : index
    %c0_492 = arith.constant 0 : index
    %569 = vector.load %arg19[%c1_490, %c0_491, %c0_492] : memref<9x8x8xbf16, #tpu.memory_space<vmem>>, vector<1x8x8xbf16>
    %570 = vector.shape_cast %569 : vector<1x8x8xbf16> to vector<8x8xbf16>
    %cst_493 = arith.constant dense<0.000000e+00> : vector<8x256xf32>
    %571 = tpu.matmul %570, %568, %cst_493 {dimension_numbers = #tpu.dot_dimension_numbers<[1], [0], [0], [1], [0, 0, 1, 1], [], []>} : vector<8x8xbf16>, vector<8x256xbf16>, vector<8x256xf32> -> vector<8x256xf32>
    %572 = arith.addf %563, %571 : vector<8x256xf32>
    %573 = arith.truncf %88 : vector<8x256xf32> to vector<8x256xbf16>
    %c2_494 = arith.constant 2 : index
    %c0_495 = arith.constant 0 : index
    %c0_496 = arith.constant 0 : index
    %574 = vector.load %arg2[%c2_494, %c0_495, %c0_496] : memref<9x256x256xbf16, #tpu.memory_space<vmem>>, vector<1x256x256xbf16>
    %575 = vector.shape_cast %574 : vector<1x256x256xbf16> to vector<256x256xbf16>
    %cst_497 = arith.constant dense<0.000000e+00> : vector<8x256xf32>
    %576 = tpu.matmul %573, %575, %cst_497 {dimension_numbers = #tpu.dot_dimension_numbers<[1], [0], [0], [1], [0, 0, 1, 1], [], []>} : vector<8x256xbf16>, vector<256x256xbf16>, vector<8x256xf32> -> vector<8x256xf32>
    %577 = arith.truncf %576 : vector<8x256xf32> to vector<8x256xbf16>
    %c2_498 = arith.constant 2 : index
    %c0_499 = arith.constant 0 : index
    %c0_500 = arith.constant 0 : index
    %578 = vector.load %arg19[%c2_498, %c0_499, %c0_500] : memref<9x8x8xbf16, #tpu.memory_space<vmem>>, vector<1x8x8xbf16>
    %579 = vector.shape_cast %578 : vector<1x8x8xbf16> to vector<8x8xbf16>
    %cst_501 = arith.constant dense<0.000000e+00> : vector<8x256xf32>
    %580 = tpu.matmul %579, %577, %cst_501 {dimension_numbers = #tpu.dot_dimension_numbers<[1], [0], [0], [1], [0, 0, 1, 1], [], []>} : vector<8x8xbf16>, vector<8x256xbf16>, vector<8x256xf32> -> vector<8x256xf32>
    %581 = arith.addf %572, %580 : vector<8x256xf32>
    %582 = arith.truncf %88 : vector<8x256xf32> to vector<8x256xbf16>
    %c3_502 = arith.constant 3 : index
    %c0_503 = arith.constant 0 : index
    %c0_504 = arith.constant 0 : index
    %583 = vector.load %arg2[%c3_502, %c0_503, %c0_504] : memref<9x256x256xbf16, #tpu.memory_space<vmem>>, vector<1x256x256xbf16>
    %584 = vector.shape_cast %583 : vector<1x256x256xbf16> to vector<256x256xbf16>
    %cst_505 = arith.constant dense<0.000000e+00> : vector<8x256xf32>
    %585 = tpu.matmul %582, %584, %cst_505 {dimension_numbers = #tpu.dot_dimension_numbers<[1], [0], [0], [1], [0, 0, 1, 1], [], []>} : vector<8x256xbf16>, vector<256x256xbf16>, vector<8x256xf32> -> vector<8x256xf32>
    %586 = arith.truncf %585 : vector<8x256xf32> to vector<8x256xbf16>
    %c3_506 = arith.constant 3 : index
    %c0_507 = arith.constant 0 : index
    %c0_508 = arith.constant 0 : index
    %587 = vector.load %arg19[%c3_506, %c0_507, %c0_508] : memref<9x8x8xbf16, #tpu.memory_space<vmem>>, vector<1x8x8xbf16>
    %588 = vector.shape_cast %587 : vector<1x8x8xbf16> to vector<8x8xbf16>
    %cst_509 = arith.constant dense<0.000000e+00> : vector<8x256xf32>
    %589 = tpu.matmul %588, %586, %cst_509 {dimension_numbers = #tpu.dot_dimension_numbers<[1], [0], [0], [1], [0, 0, 1, 1], [], []>} : vector<8x8xbf16>, vector<8x256xbf16>, vector<8x256xf32> -> vector<8x256xf32>
    %590 = arith.addf %581, %589 : vector<8x256xf32>
    %591 = arith.truncf %88 : vector<8x256xf32> to vector<8x256xbf16>
    %c4_510 = arith.constant 4 : index
    %c0_511 = arith.constant 0 : index
    %c0_512 = arith.constant 0 : index
    %592 = vector.load %arg2[%c4_510, %c0_511, %c0_512] : memref<9x256x256xbf16, #tpu.memory_space<vmem>>, vector<1x256x256xbf16>
    %593 = vector.shape_cast %592 : vector<1x256x256xbf16> to vector<256x256xbf16>
    %cst_513 = arith.constant dense<0.000000e+00> : vector<8x256xf32>
    %594 = tpu.matmul %591, %593, %cst_513 {dimension_numbers = #tpu.dot_dimension_numbers<[1], [0], [0], [1], [0, 0, 1, 1], [], []>} : vector<8x256xbf16>, vector<256x256xbf16>, vector<8x256xf32> -> vector<8x256xf32>
    %595 = arith.truncf %594 : vector<8x256xf32> to vector<8x256xbf16>
    %c4_514 = arith.constant 4 : index
    %c0_515 = arith.constant 0 : index
    %c0_516 = arith.constant 0 : index
    %596 = vector.load %arg19[%c4_514, %c0_515, %c0_516] : memref<9x8x8xbf16, #tpu.memory_space<vmem>>, vector<1x8x8xbf16>
    %597 = vector.shape_cast %596 : vector<1x8x8xbf16> to vector<8x8xbf16>
    %cst_517 = arith.constant dense<0.000000e+00> : vector<8x256xf32>
    %598 = tpu.matmul %597, %595, %cst_517 {dimension_numbers = #tpu.dot_dimension_numbers<[1], [0], [0], [1], [0, 0, 1, 1], [], []>} : vector<8x8xbf16>, vector<8x256xbf16>, vector<8x256xf32> -> vector<8x256xf32>
    %599 = arith.addf %590, %598 : vector<8x256xf32>
    %600 = arith.truncf %88 : vector<8x256xf32> to vector<8x256xbf16>
    %c5_518 = arith.constant 5 : index
    %c0_519 = arith.constant 0 : index
    %c0_520 = arith.constant 0 : index
    %601 = vector.load %arg2[%c5_518, %c0_519, %c0_520] : memref<9x256x256xbf16, #tpu.memory_space<vmem>>, vector<1x256x256xbf16>
    %602 = vector.shape_cast %601 : vector<1x256x256xbf16> to vector<256x256xbf16>
    %cst_521 = arith.constant dense<0.000000e+00> : vector<8x256xf32>
    %603 = tpu.matmul %600, %602, %cst_521 {dimension_numbers = #tpu.dot_dimension_numbers<[1], [0], [0], [1], [0, 0, 1, 1], [], []>} : vector<8x256xbf16>, vector<256x256xbf16>, vector<8x256xf32> -> vector<8x256xf32>
    %604 = arith.truncf %603 : vector<8x256xf32> to vector<8x256xbf16>
    %c5_522 = arith.constant 5 : index
    %c0_523 = arith.constant 0 : index
    %c0_524 = arith.constant 0 : index
    %605 = vector.load %arg19[%c5_522, %c0_523, %c0_524] : memref<9x8x8xbf16, #tpu.memory_space<vmem>>, vector<1x8x8xbf16>
    %606 = vector.shape_cast %605 : vector<1x8x8xbf16> to vector<8x8xbf16>
    %cst_525 = arith.constant dense<0.000000e+00> : vector<8x256xf32>
    %607 = tpu.matmul %606, %604, %cst_525 {dimension_numbers = #tpu.dot_dimension_numbers<[1], [0], [0], [1], [0, 0, 1, 1], [], []>} : vector<8x8xbf16>, vector<8x256xbf16>, vector<8x256xf32> -> vector<8x256xf32>
    %608 = arith.addf %599, %607 : vector<8x256xf32>
    %609 = arith.truncf %88 : vector<8x256xf32> to vector<8x256xbf16>
    %c6_526 = arith.constant 6 : index
    %c0_527 = arith.constant 0 : index
    %c0_528 = arith.constant 0 : index
    %610 = vector.load %arg2[%c6_526, %c0_527, %c0_528] : memref<9x256x256xbf16, #tpu.memory_space<vmem>>, vector<1x256x256xbf16>
    %611 = vector.shape_cast %610 : vector<1x256x256xbf16> to vector<256x256xbf16>
    %cst_529 = arith.constant dense<0.000000e+00> : vector<8x256xf32>
    %612 = tpu.matmul %609, %611, %cst_529 {dimension_numbers = #tpu.dot_dimension_numbers<[1], [0], [0], [1], [0, 0, 1, 1], [], []>} : vector<8x256xbf16>, vector<256x256xbf16>, vector<8x256xf32> -> vector<8x256xf32>
    %613 = arith.truncf %612 : vector<8x256xf32> to vector<8x256xbf16>
    %c6_530 = arith.constant 6 : index
    %c0_531 = arith.constant 0 : index
    %c0_532 = arith.constant 0 : index
    %614 = vector.load %arg19[%c6_530, %c0_531, %c0_532] : memref<9x8x8xbf16, #tpu.memory_space<vmem>>, vector<1x8x8xbf16>
    %615 = vector.shape_cast %614 : vector<1x8x8xbf16> to vector<8x8xbf16>
    %cst_533 = arith.constant dense<0.000000e+00> : vector<8x256xf32>
    %616 = tpu.matmul %615, %613, %cst_533 {dimension_numbers = #tpu.dot_dimension_numbers<[1], [0], [0], [1], [0, 0, 1, 1], [], []>} : vector<8x8xbf16>, vector<8x256xbf16>, vector<8x256xf32> -> vector<8x256xf32>
    %617 = arith.addf %608, %616 : vector<8x256xf32>
    %618 = arith.truncf %88 : vector<8x256xf32> to vector<8x256xbf16>
    %c7_534 = arith.constant 7 : index
    %c0_535 = arith.constant 0 : index
    %c0_536 = arith.constant 0 : index
    %619 = vector.load %arg2[%c7_534, %c0_535, %c0_536] : memref<9x256x256xbf16, #tpu.memory_space<vmem>>, vector<1x256x256xbf16>
    %620 = vector.shape_cast %619 : vector<1x256x256xbf16> to vector<256x256xbf16>
    %cst_537 = arith.constant dense<0.000000e+00> : vector<8x256xf32>
    %621 = tpu.matmul %618, %620, %cst_537 {dimension_numbers = #tpu.dot_dimension_numbers<[1], [0], [0], [1], [0, 0, 1, 1], [], []>} : vector<8x256xbf16>, vector<256x256xbf16>, vector<8x256xf32> -> vector<8x256xf32>
    %622 = arith.truncf %621 : vector<8x256xf32> to vector<8x256xbf16>
    %c7_538 = arith.constant 7 : index
    %c0_539 = arith.constant 0 : index
    %c0_540 = arith.constant 0 : index
    %623 = vector.load %arg19[%c7_538, %c0_539, %c0_540] : memref<9x8x8xbf16, #tpu.memory_space<vmem>>, vector<1x8x8xbf16>
    %624 = vector.shape_cast %623 : vector<1x8x8xbf16> to vector<8x8xbf16>
    %cst_541 = arith.constant dense<0.000000e+00> : vector<8x256xf32>
    %625 = tpu.matmul %624, %622, %cst_541 {dimension_numbers = #tpu.dot_dimension_numbers<[1], [0], [0], [1], [0, 0, 1, 1], [], []>} : vector<8x8xbf16>, vector<8x256xbf16>, vector<8x256xf32> -> vector<8x256xf32>
    %626 = arith.addf %617, %625 : vector<8x256xf32>
    %627 = arith.truncf %88 : vector<8x256xf32> to vector<8x256xbf16>
    %c8_542 = arith.constant 8 : index
    %c0_543 = arith.constant 0 : index
    %c0_544 = arith.constant 0 : index
    %628 = vector.load %arg2[%c8_542, %c0_543, %c0_544] : memref<9x256x256xbf16, #tpu.memory_space<vmem>>, vector<1x256x256xbf16>
    %629 = vector.shape_cast %628 : vector<1x256x256xbf16> to vector<256x256xbf16>
    %cst_545 = arith.constant dense<0.000000e+00> : vector<8x256xf32>
    %630 = tpu.matmul %627, %629, %cst_545 {dimension_numbers = #tpu.dot_dimension_numbers<[1], [0], [0], [1], [0, 0, 1, 1], [], []>} : vector<8x256xbf16>, vector<256x256xbf16>, vector<8x256xf32> -> vector<8x256xf32>
    %631 = arith.truncf %630 : vector<8x256xf32> to vector<8x256xbf16>
    %c8_546 = arith.constant 8 : index
    %c0_547 = arith.constant 0 : index
    %c0_548 = arith.constant 0 : index
    %632 = vector.load %arg19[%c8_546, %c0_547, %c0_548] : memref<9x8x8xbf16, #tpu.memory_space<vmem>>, vector<1x8x8xbf16>
    %633 = vector.shape_cast %632 : vector<1x8x8xbf16> to vector<8x8xbf16>
    %cst_549 = arith.constant dense<0.000000e+00> : vector<8x256xf32>
    %634 = tpu.matmul %633, %631, %cst_549 {dimension_numbers = #tpu.dot_dimension_numbers<[1], [0], [0], [1], [0, 0, 1, 1], [], []>} : vector<8x8xbf16>, vector<8x256xbf16>, vector<8x256xf32> -> vector<8x256xf32>
    %635 = arith.addf %626, %634 : vector<8x256xf32>
    %c0_550 = arith.constant 0 : index
    %c0_551 = arith.constant 0 : index
    %636 = vector.load %arg20[%c0_550, %c0_551] : memref<8x1xf32, #tpu.memory_space<vmem>>, vector<8x1xf32>
    %637 = vector.broadcast %636 : vector<8x1xf32> to vector<8x256xf32>
    %638 = arith.addf %635, %637 : vector<8x256xf32>
    %cst_552 = arith.constant 0.000000e+00 : f32
    %639 = vector.broadcast %cst_552 : f32 to vector<8x256xf32>
    %640 = arith.maximumf %638, %639 : vector<8x256xf32>
    %cst_553 = arith.constant 0.000000e+00 : f32
    %641 = vector.broadcast %cst_553 : f32 to vector<2x256xf32>
    %642 = arith.truncf %640 : vector<8x256xf32> to vector<8x256xbf16>
    %c0_554 = arith.constant 0 : index
    %c0_555 = arith.constant 0 : index
    %c0_556 = arith.constant 0 : index
    %643 = vector.load %arg2[%c0_554, %c0_555, %c0_556] : memref<9x256x256xbf16, #tpu.memory_space<vmem>>, vector<1x256x256xbf16>
    %644 = vector.shape_cast %643 : vector<1x256x256xbf16> to vector<256x256xbf16>
    %cst_557 = arith.constant dense<0.000000e+00> : vector<8x256xf32>
    %645 = tpu.matmul %642, %644, %cst_557 {dimension_numbers = #tpu.dot_dimension_numbers<[1], [0], [0], [1], [0, 0, 1, 1], [], []>} : vector<8x256xbf16>, vector<256x256xbf16>, vector<8x256xf32> -> vector<8x256xf32>
    %646 = arith.truncf %645 : vector<8x256xf32> to vector<8x256xbf16>
    %c0_558 = arith.constant 0 : index
    %c0_559 = arith.constant 0 : index
    %c0_560 = arith.constant 0 : index
    %647 = vector.load %arg21[%c0_558, %c0_559, %c0_560] : memref<9x2x8xbf16, #tpu.memory_space<vmem>>, vector<1x2x8xbf16>
    %648 = vector.shape_cast %647 : vector<1x2x8xbf16> to vector<2x8xbf16>
    %cst_561 = arith.constant dense<0.000000e+00> : vector<2x256xf32>
    %649 = tpu.matmul %648, %646, %cst_561 {dimension_numbers = #tpu.dot_dimension_numbers<[1], [0], [0], [1], [0, 0, 1, 1], [], []>} : vector<2x8xbf16>, vector<8x256xbf16>, vector<2x256xf32> -> vector<2x256xf32>
    %650 = arith.addf %641, %649 : vector<2x256xf32>
    %651 = arith.truncf %640 : vector<8x256xf32> to vector<8x256xbf16>
    %c1_562 = arith.constant 1 : index
    %c0_563 = arith.constant 0 : index
    %c0_564 = arith.constant 0 : index
    %652 = vector.load %arg2[%c1_562, %c0_563, %c0_564] : memref<9x256x256xbf16, #tpu.memory_space<vmem>>, vector<1x256x256xbf16>
    %653 = vector.shape_cast %652 : vector<1x256x256xbf16> to vector<256x256xbf16>
    %cst_565 = arith.constant dense<0.000000e+00> : vector<8x256xf32>
    %654 = tpu.matmul %651, %653, %cst_565 {dimension_numbers = #tpu.dot_dimension_numbers<[1], [0], [0], [1], [0, 0, 1, 1], [], []>} : vector<8x256xbf16>, vector<256x256xbf16>, vector<8x256xf32> -> vector<8x256xf32>
    %655 = arith.truncf %654 : vector<8x256xf32> to vector<8x256xbf16>
    %c1_566 = arith.constant 1 : index
    %c0_567 = arith.constant 0 : index
    %c0_568 = arith.constant 0 : index
    %656 = vector.load %arg21[%c1_566, %c0_567, %c0_568] : memref<9x2x8xbf16, #tpu.memory_space<vmem>>, vector<1x2x8xbf16>
    %657 = vector.shape_cast %656 : vector<1x2x8xbf16> to vector<2x8xbf16>
    %cst_569 = arith.constant dense<0.000000e+00> : vector<2x256xf32>
    %658 = tpu.matmul %657, %655, %cst_569 {dimension_numbers = #tpu.dot_dimension_numbers<[1], [0], [0], [1], [0, 0, 1, 1], [], []>} : vector<2x8xbf16>, vector<8x256xbf16>, vector<2x256xf32> -> vector<2x256xf32>
    %659 = arith.addf %650, %658 : vector<2x256xf32>
    %660 = arith.truncf %640 : vector<8x256xf32> to vector<8x256xbf16>
    %c2_570 = arith.constant 2 : index
    %c0_571 = arith.constant 0 : index
    %c0_572 = arith.constant 0 : index
    %661 = vector.load %arg2[%c2_570, %c0_571, %c0_572] : memref<9x256x256xbf16, #tpu.memory_space<vmem>>, vector<1x256x256xbf16>
    %662 = vector.shape_cast %661 : vector<1x256x256xbf16> to vector<256x256xbf16>
    %cst_573 = arith.constant dense<0.000000e+00> : vector<8x256xf32>
    %663 = tpu.matmul %660, %662, %cst_573 {dimension_numbers = #tpu.dot_dimension_numbers<[1], [0], [0], [1], [0, 0, 1, 1], [], []>} : vector<8x256xbf16>, vector<256x256xbf16>, vector<8x256xf32> -> vector<8x256xf32>
    %664 = arith.truncf %663 : vector<8x256xf32> to vector<8x256xbf16>
    %c2_574 = arith.constant 2 : index
    %c0_575 = arith.constant 0 : index
    %c0_576 = arith.constant 0 : index
    %665 = vector.load %arg21[%c2_574, %c0_575, %c0_576] : memref<9x2x8xbf16, #tpu.memory_space<vmem>>, vector<1x2x8xbf16>
    %666 = vector.shape_cast %665 : vector<1x2x8xbf16> to vector<2x8xbf16>
    %cst_577 = arith.constant dense<0.000000e+00> : vector<2x256xf32>
    %667 = tpu.matmul %666, %664, %cst_577 {dimension_numbers = #tpu.dot_dimension_numbers<[1], [0], [0], [1], [0, 0, 1, 1], [], []>} : vector<2x8xbf16>, vector<8x256xbf16>, vector<2x256xf32> -> vector<2x256xf32>
    %668 = arith.addf %659, %667 : vector<2x256xf32>
    %669 = arith.truncf %640 : vector<8x256xf32> to vector<8x256xbf16>
    %c3_578 = arith.constant 3 : index
    %c0_579 = arith.constant 0 : index
    %c0_580 = arith.constant 0 : index
    %670 = vector.load %arg2[%c3_578, %c0_579, %c0_580] : memref<9x256x256xbf16, #tpu.memory_space<vmem>>, vector<1x256x256xbf16>
    %671 = vector.shape_cast %670 : vector<1x256x256xbf16> to vector<256x256xbf16>
    %cst_581 = arith.constant dense<0.000000e+00> : vector<8x256xf32>
    %672 = tpu.matmul %669, %671, %cst_581 {dimension_numbers = #tpu.dot_dimension_numbers<[1], [0], [0], [1], [0, 0, 1, 1], [], []>} : vector<8x256xbf16>, vector<256x256xbf16>, vector<8x256xf32> -> vector<8x256xf32>
    %673 = arith.truncf %672 : vector<8x256xf32> to vector<8x256xbf16>
    %c3_582 = arith.constant 3 : index
    %c0_583 = arith.constant 0 : index
    %c0_584 = arith.constant 0 : index
    %674 = vector.load %arg21[%c3_582, %c0_583, %c0_584] : memref<9x2x8xbf16, #tpu.memory_space<vmem>>, vector<1x2x8xbf16>
    %675 = vector.shape_cast %674 : vector<1x2x8xbf16> to vector<2x8xbf16>
    %cst_585 = arith.constant dense<0.000000e+00> : vector<2x256xf32>
    %676 = tpu.matmul %675, %673, %cst_585 {dimension_numbers = #tpu.dot_dimension_numbers<[1], [0], [0], [1], [0, 0, 1, 1], [], []>} : vector<2x8xbf16>, vector<8x256xbf16>, vector<2x256xf32> -> vector<2x256xf32>
    %677 = arith.addf %668, %676 : vector<2x256xf32>
    %678 = arith.truncf %640 : vector<8x256xf32> to vector<8x256xbf16>
    %c4_586 = arith.constant 4 : index
    %c0_587 = arith.constant 0 : index
    %c0_588 = arith.constant 0 : index
    %679 = vector.load %arg2[%c4_586, %c0_587, %c0_588] : memref<9x256x256xbf16, #tpu.memory_space<vmem>>, vector<1x256x256xbf16>
    %680 = vector.shape_cast %679 : vector<1x256x256xbf16> to vector<256x256xbf16>
    %cst_589 = arith.constant dense<0.000000e+00> : vector<8x256xf32>
    %681 = tpu.matmul %678, %680, %cst_589 {dimension_numbers = #tpu.dot_dimension_numbers<[1], [0], [0], [1], [0, 0, 1, 1], [], []>} : vector<8x256xbf16>, vector<256x256xbf16>, vector<8x256xf32> -> vector<8x256xf32>
    %682 = arith.truncf %681 : vector<8x256xf32> to vector<8x256xbf16>
    %c4_590 = arith.constant 4 : index
    %c0_591 = arith.constant 0 : index
    %c0_592 = arith.constant 0 : index
    %683 = vector.load %arg21[%c4_590, %c0_591, %c0_592] : memref<9x2x8xbf16, #tpu.memory_space<vmem>>, vector<1x2x8xbf16>
    %684 = vector.shape_cast %683 : vector<1x2x8xbf16> to vector<2x8xbf16>
    %cst_593 = arith.constant dense<0.000000e+00> : vector<2x256xf32>
    %685 = tpu.matmul %684, %682, %cst_593 {dimension_numbers = #tpu.dot_dimension_numbers<[1], [0], [0], [1], [0, 0, 1, 1], [], []>} : vector<2x8xbf16>, vector<8x256xbf16>, vector<2x256xf32> -> vector<2x256xf32>
    %686 = arith.addf %677, %685 : vector<2x256xf32>
    %687 = arith.truncf %640 : vector<8x256xf32> to vector<8x256xbf16>
    %c5_594 = arith.constant 5 : index
    %c0_595 = arith.constant 0 : index
    %c0_596 = arith.constant 0 : index
    %688 = vector.load %arg2[%c5_594, %c0_595, %c0_596] : memref<9x256x256xbf16, #tpu.memory_space<vmem>>, vector<1x256x256xbf16>
    %689 = vector.shape_cast %688 : vector<1x256x256xbf16> to vector<256x256xbf16>
    %cst_597 = arith.constant dense<0.000000e+00> : vector<8x256xf32>
    %690 = tpu.matmul %687, %689, %cst_597 {dimension_numbers = #tpu.dot_dimension_numbers<[1], [0], [0], [1], [0, 0, 1, 1], [], []>} : vector<8x256xbf16>, vector<256x256xbf16>, vector<8x256xf32> -> vector<8x256xf32>
    %691 = arith.truncf %690 : vector<8x256xf32> to vector<8x256xbf16>
    %c5_598 = arith.constant 5 : index
    %c0_599 = arith.constant 0 : index
    %c0_600 = arith.constant 0 : index
    %692 = vector.load %arg21[%c5_598, %c0_599, %c0_600] : memref<9x2x8xbf16, #tpu.memory_space<vmem>>, vector<1x2x8xbf16>
    %693 = vector.shape_cast %692 : vector<1x2x8xbf16> to vector<2x8xbf16>
    %cst_601 = arith.constant dense<0.000000e+00> : vector<2x256xf32>
    %694 = tpu.matmul %693, %691, %cst_601 {dimension_numbers = #tpu.dot_dimension_numbers<[1], [0], [0], [1], [0, 0, 1, 1], [], []>} : vector<2x8xbf16>, vector<8x256xbf16>, vector<2x256xf32> -> vector<2x256xf32>
    %695 = arith.addf %686, %694 : vector<2x256xf32>
    %696 = arith.truncf %640 : vector<8x256xf32> to vector<8x256xbf16>
    %c6_602 = arith.constant 6 : index
    %c0_603 = arith.constant 0 : index
    %c0_604 = arith.constant 0 : index
    %697 = vector.load %arg2[%c6_602, %c0_603, %c0_604] : memref<9x256x256xbf16, #tpu.memory_space<vmem>>, vector<1x256x256xbf16>
    %698 = vector.shape_cast %697 : vector<1x256x256xbf16> to vector<256x256xbf16>
    %cst_605 = arith.constant dense<0.000000e+00> : vector<8x256xf32>
    %699 = tpu.matmul %696, %698, %cst_605 {dimension_numbers = #tpu.dot_dimension_numbers<[1], [0], [0], [1], [0, 0, 1, 1], [], []>} : vector<8x256xbf16>, vector<256x256xbf16>, vector<8x256xf32> -> vector<8x256xf32>
    %700 = arith.truncf %699 : vector<8x256xf32> to vector<8x256xbf16>
    %c6_606 = arith.constant 6 : index
    %c0_607 = arith.constant 0 : index
    %c0_608 = arith.constant 0 : index
    %701 = vector.load %arg21[%c6_606, %c0_607, %c0_608] : memref<9x2x8xbf16, #tpu.memory_space<vmem>>, vector<1x2x8xbf16>
    %702 = vector.shape_cast %701 : vector<1x2x8xbf16> to vector<2x8xbf16>
    %cst_609 = arith.constant dense<0.000000e+00> : vector<2x256xf32>
    %703 = tpu.matmul %702, %700, %cst_609 {dimension_numbers = #tpu.dot_dimension_numbers<[1], [0], [0], [1], [0, 0, 1, 1], [], []>} : vector<2x8xbf16>, vector<8x256xbf16>, vector<2x256xf32> -> vector<2x256xf32>
    %704 = arith.addf %695, %703 : vector<2x256xf32>
    %705 = arith.truncf %640 : vector<8x256xf32> to vector<8x256xbf16>
    %c7_610 = arith.constant 7 : index
    %c0_611 = arith.constant 0 : index
    %c0_612 = arith.constant 0 : index
    %706 = vector.load %arg2[%c7_610, %c0_611, %c0_612] : memref<9x256x256xbf16, #tpu.memory_space<vmem>>, vector<1x256x256xbf16>
    %707 = vector.shape_cast %706 : vector<1x256x256xbf16> to vector<256x256xbf16>
    %cst_613 = arith.constant dense<0.000000e+00> : vector<8x256xf32>
    %708 = tpu.matmul %705, %707, %cst_613 {dimension_numbers = #tpu.dot_dimension_numbers<[1], [0], [0], [1], [0, 0, 1, 1], [], []>} : vector<8x256xbf16>, vector<256x256xbf16>, vector<8x256xf32> -> vector<8x256xf32>
    %709 = arith.truncf %708 : vector<8x256xf32> to vector<8x256xbf16>
    %c7_614 = arith.constant 7 : index
    %c0_615 = arith.constant 0 : index
    %c0_616 = arith.constant 0 : index
    %710 = vector.load %arg21[%c7_614, %c0_615, %c0_616] : memref<9x2x8xbf16, #tpu.memory_space<vmem>>, vector<1x2x8xbf16>
    %711 = vector.shape_cast %710 : vector<1x2x8xbf16> to vector<2x8xbf16>
    %cst_617 = arith.constant dense<0.000000e+00> : vector<2x256xf32>
    %712 = tpu.matmul %711, %709, %cst_617 {dimension_numbers = #tpu.dot_dimension_numbers<[1], [0], [0], [1], [0, 0, 1, 1], [], []>} : vector<2x8xbf16>, vector<8x256xbf16>, vector<2x256xf32> -> vector<2x256xf32>
    %713 = arith.addf %704, %712 : vector<2x256xf32>
    %714 = arith.truncf %640 : vector<8x256xf32> to vector<8x256xbf16>
    %c8_618 = arith.constant 8 : index
    %c0_619 = arith.constant 0 : index
    %c0_620 = arith.constant 0 : index
    %715 = vector.load %arg2[%c8_618, %c0_619, %c0_620] : memref<9x256x256xbf16, #tpu.memory_space<vmem>>, vector<1x256x256xbf16>
    %716 = vector.shape_cast %715 : vector<1x256x256xbf16> to vector<256x256xbf16>
    %cst_621 = arith.constant dense<0.000000e+00> : vector<8x256xf32>
    %717 = tpu.matmul %714, %716, %cst_621 {dimension_numbers = #tpu.dot_dimension_numbers<[1], [0], [0], [1], [0, 0, 1, 1], [], []>} : vector<8x256xbf16>, vector<256x256xbf16>, vector<8x256xf32> -> vector<8x256xf32>
    %718 = arith.truncf %717 : vector<8x256xf32> to vector<8x256xbf16>
    %c8_622 = arith.constant 8 : index
    %c0_623 = arith.constant 0 : index
    %c0_624 = arith.constant 0 : index
    %719 = vector.load %arg21[%c8_622, %c0_623, %c0_624] : memref<9x2x8xbf16, #tpu.memory_space<vmem>>, vector<1x2x8xbf16>
    %720 = vector.shape_cast %719 : vector<1x2x8xbf16> to vector<2x8xbf16>
    %cst_625 = arith.constant dense<0.000000e+00> : vector<2x256xf32>
    %721 = tpu.matmul %720, %718, %cst_625 {dimension_numbers = #tpu.dot_dimension_numbers<[1], [0], [0], [1], [0, 0, 1, 1], [], []>} : vector<2x8xbf16>, vector<8x256xbf16>, vector<2x256xf32> -> vector<2x256xf32>
    %722 = arith.addf %713, %721 : vector<2x256xf32>
    %c0_626 = arith.constant 0 : index
    %c0_627 = arith.constant 0 : index
    %723 = vector.load %arg22[%c0_626, %c0_627] : memref<2x1xf32, #tpu.memory_space<vmem>>, vector<2x1xf32>
    %724 = vector.broadcast %723 : vector<2x1xf32> to vector<2x256xf32>
    %725 = arith.addf %722, %724 : vector<2x256xf32>
    %c0_628 = arith.constant 0 : index
    %c0_629 = arith.constant 0 : index
    %c0_630 = arith.constant 0 : index
    %726 = vector.load %arg23[%c0_628, %c0_629, %c0_630] : memref<1x2x256xf32, #tpu.memory_space<vmem>>, vector<1x2x256xf32>
    %727 = vector.shape_cast %726 : vector<1x2x256xf32> to vector<2x256xf32>
    %728 = vector.shape_cast %725 : vector<2x256xf32> to vector<1x2x256xf32>
    tpu.vector_store %arg23[%c0_628, %c0_629, %c0_630], %728 {strides = array<i32>} : memref<1x2x256xf32, #tpu.memory_space<vmem>>, vector<1x2x256xf32>,
    return
  }
  func.func @transform_0(%arg0: i32) -> (i32, i32, i32) {
    %c0_i32 = arith.constant 0 : i32
    %c0_i32_0 = arith.constant 0 : i32
    %c0_i32_1 = arith.constant 0 : i32
    return %arg0, %c0_i32, %c0_i32_0 : i32, i32, i32
  }
  func.func @transform_1(%arg0: i32) -> (i32, i32, i32) {
    %c0_i32 = arith.constant 0 : i32
    %c0_i32_0 = arith.constant 0 : i32
    %c0_i32_1 = arith.constant 0 : i32
    %c0_i32_2 = arith.constant 0 : i32
    return %c0_i32, %c0_i32_0, %c0_i32_1 : i32, i32, i32
  }
  func.func @transform_2(%arg0: i32) -> (i32, i32, i32) {
    %c0_i32 = arith.constant 0 : i32
    %c0_i32_0 = arith.constant 0 : i32
    %c0_i32_1 = arith.constant 0 : i32
    %c0_i32_2 = arith.constant 0 : i32
    return %c0_i32, %c0_i32_0, %c0_i32_1 : i32, i32, i32
  }
  func.func @transform_3(%arg0: i32) -> (i32, i32, i32) {
    %c0_i32 = arith.constant 0 : i32
    %c0_i32_0 = arith.constant 0 : i32
    %c0_i32_1 = arith.constant 0 : i32
    %c0_i32_2 = arith.constant 0 : i32
    return %c0_i32, %c0_i32_0, %c0_i32_1 : i32, i32, i32
  }
  func.func @transform_4(%arg0: i32) -> (i32, i32) {
    %c0_i32 = arith.constant 0 : i32
    %c0_i32_0 = arith.constant 0 : i32
    %c0_i32_1 = arith.constant 0 : i32
    return %c0_i32, %c0_i32_0 : i32, i32
  }
  func.func @transform_5(%arg0: i32) -> (i32, i32) {
    %c0_i32 = arith.constant 0 : i32
    %c0_i32_0 = arith.constant 0 : i32
    %c0_i32_1 = arith.constant 0 : i32
    return %c0_i32, %c0_i32_0 : i32, i32
  }
  func.func @transform_6(%arg0: i32) -> (i32, i32) {
    %c0_i32 = arith.constant 0 : i32
    %c0_i32_0 = arith.constant 0 : i32
    %c0_i32_1 = arith.constant 0 : i32
    return %c0_i32, %c0_i32_0 : i32, i32
  }
  func.func @transform_7(%arg0: i32) -> (i32, i32) {
    %c0_i32 = arith.constant 0 : i32
    %c0_i32_0 = arith.constant 0 : i32
    %c0_i32_1 = arith.constant 0 : i32
    return %c0_i32, %c0_i32_0 : i32, i32
  }
  func.func @transform_8(%arg0: i32) -> (i32, i32, i32) {
    %c0_i32 = arith.constant 0 : i32
    %c0_i32_0 = arith.constant 0 : i32
    %c0_i32_1 = arith.constant 0 : i32
    %c0_i32_2 = arith.constant 0 : i32
    return %c0_i32, %c0_i32_0, %c0_i32_1 : i32, i32, i32
  }
  func.func @transform_9(%arg0: i32) -> (i32, i32) {
    %c0_i32 = arith.constant 0 : i32
    %c0_i32_0 = arith.constant 0 : i32
    %c0_i32_1 = arith.constant 0 : i32
    return %c0_i32, %c0_i32_0 : i32, i32
  }
  func.func @transform_10(%arg0: i32) -> (i32, i32, i32) {
    %c0_i32 = arith.constant 0 : i32
    %c0_i32_0 = arith.constant 0 : i32
    %c0_i32_1 = arith.constant 0 : i32
    %c0_i32_2 = arith.constant 0 : i32
    return %c0_i32, %c0_i32_0, %c0_i32_1 : i32, i32, i32
  }
  func.func @transform_11(%arg0: i32) -> (i32, i32) {
    %c0_i32 = arith.constant 0 : i32
    %c0_i32_0 = arith.constant 0 : i32
    %c0_i32_1 = arith.constant 0 : i32
    return %c0_i32, %c0_i32_0 : i32, i32
  }
  func.func @transform_12(%arg0: i32) -> (i32, i32, i32) {
    %c0_i32 = arith.constant 0 : i32
    %c0_i32_0 = arith.constant 0 : i32
    %c0_i32_1 = arith.constant 0 : i32
    %c0_i32_2 = arith.constant 0 : i32
    return %c0_i32, %c0_i32_0, %c0_i32_1 : i32, i32, i32
  }
  func.func @transform_13(%arg0: i32) -> (i32, i32) {
    %c0_i32 = arith.constant 0 : i32
    %c0_i32_0 = arith.constant 0 : i32
    %c0_i32_1 = arith.constant 0 : i32
    return %c0_i32, %c0_i32_0 : i32, i32
  }
  func.func @transform_14(%arg0: i32) -> (i32, i32, i32) {
    %c0_i32 = arith.constant 0 : i32
    %c0_i32_0 = arith.constant 0 : i32
    %c0_i32_1 = arith.constant 0 : i32
    %c0_i32_2 = arith.constant 0 : i32
    return %c0_i32, %c0_i32_0, %c0_i32_1 : i32, i32, i32
  }
  func.func @transform_15(%arg0: i32) -> (i32, i32, i32) {
    %c0_i32 = arith.constant 0 : i32
    %c0_i32_0 = arith.constant 0 : i32
    %c0_i32_1 = arith.constant 0 : i32
    %c0_i32_2 = arith.constant 0 : i32
    return %c0_i32, %c0_i32_0, %c0_i32_1 : i32, i32, i32
  }
  func.func @transform_16(%arg0: i32) -> (i32, i32) {
    %c0_i32 = arith.constant 0 : i32
    %c0_i32_0 = arith.constant 0 : i32
    %c0_i32_1 = arith.constant 0 : i32
    return %c0_i32, %c0_i32_0 : i32, i32
  }
  func.func @transform_17(%arg0: i32) -> (i32, i32, i32) {
    %c0_i32 = arith.constant 0 : i32
    %c0_i32_0 = arith.constant 0 : i32
    %c0_i32_1 = arith.constant 0 : i32
    %c0_i32_2 = arith.constant 0 : i32
    return %c0_i32, %c0_i32_0, %c0_i32_1 : i32, i32, i32
  }
  func.func @transform_18(%arg0: i32) -> (i32, i32, i32) {
    %c0_i32 = arith.constant 0 : i32
    %c0_i32_0 = arith.constant 0 : i32
    %c0_i32_1 = arith.constant 0 : i32
    %c0_i32_2 = arith.constant 0 : i32
    return %c0_i32, %c0_i32_0, %c0_i32_1 : i32, i32, i32
  }
  func.func @transform_19(%arg0: i32) -> (i32, i32) {
    %c0_i32 = arith.constant 0 : i32
    %c0_i32_0 = arith.constant 0 : i32
    %c0_i32_1 = arith.constant 0 : i32
    return %c0_i32, %c0_i32_0 : i32, i32
  }
  func.func @transform_20(%arg0: i32) -> (i32, i32, i32) {
    %c0_i32 = arith.constant 0 : i32
    %c0_i32_0 = arith.constant 0 : i32
    %c0_i32_1 = arith.constant 0 : i32
    %c0_i32_2 = arith.constant 0 : i32
    return %c0_i32, %c0_i32_0, %c0_i32_1 : i32, i32, i32
  }
  func.func @transform_21(%arg0: i32) -> (i32, i32) {
    %c0_i32 = arith.constant 0 : i32
    %c0_i32_0 = arith.constant 0 : i32
    %c0_i32_1 = arith.constant 0 : i32
    return %c0_i32, %c0_i32_0 : i32, i32
  }
  func.func @transform_22(%arg0: i32) -> (i32, i32, i32) {
    %c0_i32 = arith.constant 0 : i32
    %c0_i32_0 = arith.constant 0 : i32
    %c0_i32_1 = arith.constant 0 : i32
    return %arg0, %c0_i32, %c0_i32_0 : i32, i32, i32
  }
}

</mosaic_0001>

<bundles_post_ra>
// kernel: unet_pallas_forward.1
= control target key start
LH: loop header
LB: loop body
LE: loop exit
PB: predicated region body
PF: predicated region fallthrough
CT: control target
= control target key end

     0   :  { %s16632_s0 = inlined_call_operand.vmem [shape: f32[2,3,256], index: 0, kind: input, shape index: {}]   ;;  %s16633_s1 = inlined_call_operand.hbm [shape: bf16[9,256,256], index: 1, kind: input, shape index: {}]   ;;  %s16634_s2 = inlined_call_operand.hbm [shape: bf16[9,64,64], index: 2, kind: input, shape index: {}]   ;;  %s16635_s3 = inlined_call_operand.hbm [shape: bf16[9,16,16], index: 3, kind: input, shape index: {}]   ;;  %s16636_s4 = inlined_call_operand.vmem [shape: bf16[256,64], index: 4, kind: input, shape index: {}]   ;;  %s16637_s5 = inlined_call_operand.vmem [shape: bf16[64,16], index: 5, kind: input, shape index: {}]   ;;  %s16638_s6 = inlined_call_operand.hbm [shape: bf16[16,64], index: 6, kind: input, shape index: {}]   ;;  %s16639_s7 = inlined_call_operand.hbm [shape: bf16[64,256], index: 7, kind: input, shape index: {}]   ;;  %s16640_s8 = inlined_call_operand.vmem [shape: bf16[9,8,3], index: 8, kind: input, shape index: {}]   ;;  %s16641_s9 = inlined_call_operand.vmem [shape: f32[8,1], index: 9, kind: input, shape index: {}]   ;;  %s16642_s10 = inlined_call_operand.vmem [shape: bf16[9,16,8], index: 10, kind: input, shape index: {}]   ;;  %s16643_s11 = inlined_call_operand.vmem [shape: f32[16,1], index: 11, kind: input, shape index: {}]   ;;  %s16644_s12 = inlined_call_operand.vmem [shape: bf16[9,32,16], index: 12, kind: input, shape index: {}]   ;;  %s16645_s13 = inlined_call_operand.vmem [shape: f32[32,1], index: 13, kind: input, shape index: {}]   ;;  %s16646_s14 = inlined_call_operand.hbm [shape: bf16[9,16,32], index: 14, kind: input, shape index: {}]   ;;  %s16647_s15 = inlined_call_operand.hbm [shape: bf16[9,16,16], index: 15, kind: input, shape index: {}]   ;;  %s16648_s16 = inlined_call_operand.vmem [shape: f32[16,1], index: 16, kind: input, shape index: {}]   ;;  %s16649_s17 = inlined_call_operand.hbm [shape: bf16[9,8,16], index: 17, kind: input, shape index: {}]   ;;  %s16650_s18 = inlined_call_operand.vmem [shape: bf16[9,8,8], index: 18, kind: input, shape index: {}]   ;;  %s16651_s19 = inlined_call_operand.vmem [shape: f32[8,1], index: 19, kind: input, shape index: {}]   ;;  %s16652_s20 = inlined_call_operand.vmem [shape: bf16[9,2,8], index: 20, kind: input, shape index: {}]   ;;  %s16653_s21 = inlined_call_operand.vmem [shape: f32[2,1], index: 21, kind: input, shape index: {}]   ;;  %s16654_s22 = inlined_call_operand.vmem [shape: f32[2,2,256], index: 22, kind: output, shape index: {}]  }
   0x1   :  { %16865 = sst [smem:[#allocation173_spill]] %s16632_s0 }
   0x2   :  { %16866 = sst [smem:[#allocation174_spill]] %s16633_s1 }
   0x3   :  { %16867 = sst [smem:[#allocation175_spill]] %s16634_s2 }
   0x4   :  { %16868 = sst [smem:[#allocation176_spill]] %s16635_s3 }
   0x5   :  { %16869 = sst [smem:[#allocation177_spill]] %s16636_s4 }
   0x6   :  { %16870 = sst [smem:[#allocation178_spill]] %s16637_s5 }
   0x7   :  { %16871 = sst [smem:[#allocation179_spill]] %s16638_s6 }
   0x8   :  { %16872 = sst [smem:[#allocation180_spill]] %s16642_s10 }
   0x9   :  { %16873 = sst [smem:[#allocation181_spill]] %s16644_s12 }
   0xa   :  { %16874 = sst [smem:[#allocation182_spill]] %s16646_s14 }
   0xb   :  { %16875 = sst [smem:[#allocation183_spill]] %s16650_s18 }
   0xc   :  { %16876 = sst [smem:[#allocation184_spill]] %s16651_s19 }
   0xd   :  { %16877 = sst [smem:[#allocation185_spill]] %s16652_s20 }
   0xe   :  { %16878 = sst [smem:[#allocation186_spill]] %s16654_s22 }
   0xf   :  { %27 = vsyncpa [#allocation3], 0 }
  0x10   :  { %28 = vsyncpa [#allocation5], 0 }
  0x11   :  { %29 = vsyncpa [#allocation8], 0 }
  0x12   :  { %30 = vsyncpa [#allocation11], 0 }
  0x13   :  { %31 = vsyncpa [#allocation14], 0  ;;  %s14019_s3 = smov 0  }
  0x14 LB: > { %16879 = sst [smem:[#allocation20_spill]] %s13886_s3  ;;  %s13888_s28 = smov [#allocation4]   ;;  %s13886_s3 = sphi %s14019_s3, %s37_s3  }
  0x15   : > { %s560_s29 = sshll.u32 %s13888_s28, 4  ;;  %s14025_s30 = sadd.s32 4294967295, %s13886_s3   ;;  %s14030_s29 = int_to_ptr.vmem [resolvable:$true] %s560_s29 }
  0x16   : > { %p10770_p0 = scmp.ge.s32.totalorder %s13886_s3, 1  ;;  %p535_p1 = scmp.lt.s32.totalorder %s13886_s3, 3 }
  0x17   : > { %p16666_p2 = scmp.eq.s32.totalorder %s14025_s30, 0  ;;  %s13889_s0 = smov [#allocation7]  }
  0x18   : > { %p14032_p3 = pnand %p10770_p0, %p535_p1  ;;  %s592_s23 = sshll.u32 %s13889_s0, 4  ;;  %s14038_s23 = int_to_ptr.vmem [resolvable:$true] %s592_s23 }
  0x19   : > { %s13890_s5 = smov [#allocation10]   ;;  %s13891_s6 = smov [#allocation2]  }
  0x1a   : > { %s16880_s4 = scalar_select %p14032_p3, 1, 0 }
  0x1b   : > { %p12401_p4 = pneg %p14032_p3  ;;  %s636_s24 = sshll.u32 %s13890_s5, 4  ;;  %s14046_s24 = int_to_ptr.vmem [resolvable:$true] %s636_s24 }
  0x1c   : > { %s14048_s25 = sshll.u32 %s13891_s6, 4  ;;  %s16882_s27 = sld [smem:[#allocation175_spill]]  ;;  %s548_s25 = int_to_ptr.vmem [resolvable:$true] %s14048_s25 }
  0x1d   : > { %p14042_p5 = pnand %p16666_p2, %p12401_p4 }
  0x1f   : > { %p14058_p7 = pneg %p14042_p5 }
  0x22   : > { %s13636_s28 = scalar_lea.hbm %s16882_s27, 4608 }
  0x23   : > { %p13637_p6 = scmp.ne.s32.totalorder %s16882_s27, %s13636_s28  ;;  %p13643_p10 = scmp.lt.u32.totalorder %s13636_s28, %s16882_s27 }
  0x25   : > { %p13639_p8 = pnand %p14058_p7, %p13637_p6 }
  0x27   : > { %p13640_p9 = pneg %p13639_p8 }
  0x29   : > { %p13645_p11 = pnand %p13643_p10, %p13640_p9 }
  0x2b   : > { %13648 = shalt.err (!%p13645_p11)
}
  0x2c   : > { %s13649_s3 = scalar_lea.vmem %s14030_s29, 4608  ;;  %p13657_p1 = scmp.lt.s32.totalorder %s14030_s29, %s14030_s29 }
  0x2d   : > { %p13650_p12 = scmp.ne.s32.totalorder %s14030_s29, %s13649_s3  ;;  %p13658_p4 = scmp.lt.s32.totalorder %s13649_s3, %s13649_s3 }
  0x2f   : > { %p13652_p13 = pnand %p13650_p12, %p14058_p7  ;;  %p13659_p6 = por %p13658_p4, %p13657_p1 }
  0x31   : > { %p13653_p0 = pneg %p13652_p13 }
  0x33   : > { %p13660_p8 = pnand %p13659_p6, %p13653_p0 }
  0x35   : > { %13663 = shalt.err (!%p13660_p8)
}
  0x36   : > { %s16668_s26 = smov 64   ;;  %s16670_s2 = smov 4  }
  0x37   : > { %12407 = dma.hbm_to_vmem [thread:$0]  (!%p14042_p5), %s16882_s27, 4608, %s14030_s29, [#allocation5], %s16668_s26, %s16668_s26, %s16670_s2  }
  0x38   : > { %s16884_s20 = sld [smem:[#allocation179_spill]] }
  0x3e   : > { %s13664_s3 = scalar_lea.hbm %s16884_s20, 128 }
  0x3f   : > { %p13665_p9 = scmp.ne.s32.totalorder %s16884_s20, %s13664_s3  ;;  %p13671_p12 = scmp.lt.u32.totalorder %s13664_s3, %s16884_s20 }
  0x41   : > { %p13667_p10 = pnand %p13665_p9, %p14058_p7 }
  0x43   : > { %p13668_p11 = pneg %p13667_p10 }
  0x45   : > { %p13673_p13 = pnand %p13671_p12, %p13668_p11 }
  0x47   : > { %13676 = shalt.err (!%p13673_p13)
}
  0x48   : > { %s13677_s29 = scalar_lea.vmem %s14038_s23, 128  ;;  %p13685_p6 = scmp.lt.s32.totalorder %s14038_s23, %s14038_s23 }
  0x49   : > { %p13678_p0 = scmp.ne.s32.totalorder %s14038_s23, %s13677_s29  ;;  %p13686_p8 = scmp.lt.s32.totalorder %s13677_s29, %s13677_s29 }
  0x4b   : > { %p13680_p1 = pnand %p13678_p0, %p14058_p7  ;;  %p13687_p9 = por %p13686_p8, %p13685_p6 }
  0x4d   : > { %p13681_p4 = pneg %p13680_p1 }
  0x4f   : > { %p13688_p10 = pnand %p13687_p9, %p13681_p4 }
  0x51   : > { %13691 = shalt.err (!%p13688_p10)
}
  0x52   : > { %12413 = dma.hbm_to_vmem [thread:$0]  (!%p14042_p5), %s16884_s20, 128, %s14038_s23, [#allocation8], %s16668_s26, %s16668_s26, %s16670_s2  }
  0x53   : > { %s16885_s14 = sld [smem:[#allocation182_spill]] }
  0x59   : > { %s13692_s28 = scalar_lea.hbm %s16885_s14, 1152 }
  0x5a   : > { %p13693_p11 = scmp.ne.s32.totalorder %s16885_s14, %s13692_s28  ;;  %p13699_p0 = scmp.lt.u32.totalorder %s13692_s28, %s16885_s14 }
  0x5c   : > { %p13695_p12 = pnand %p13693_p11, %p14058_p7 }
  0x5e   : > { %p13696_p13 = pneg %p13695_p12 }
  0x60   : > { %p13701_p1 = pnand %p13699_p0, %p13696_p13 }
  0x62   : > { %13704 = shalt.err (!%p13701_p1)
}
  0x63   : > { %s13705_s23 = scalar_lea.vmem %s14046_s24, 1152  ;;  %p13713_p9 = scmp.lt.s32.totalorder %s14046_s24, %s14046_s24 }
  0x64   : > { %p13706_p4 = scmp.ne.s32.totalorder %s14046_s24, %s13705_s23  ;;  %p13714_p10 = scmp.lt.s32.totalorder %s13705_s23, %s13705_s23 }
  0x66   : > { %p13708_p6 = pnand %p13706_p4, %p14058_p7  ;;  %p13715_p11 = por %p13714_p10, %p13713_p9 }
  0x68   : > { %p13709_p8 = pneg %p13708_p6 }
  0x6a   : > { %p13716_p12 = pnand %p13715_p11, %p13709_p8 }
  0x6c   : > { %13719 = shalt.err (!%p13716_p12)
}
  0x6d   : > { %12419 = dma.hbm_to_vmem [thread:$0]  (!%p14042_p5), %s16885_s14, 1152, %s14046_s24, [#allocation11], %s16668_s26, %s16668_s26, %s16670_s2  }
  0x6e   : > { %s16886_s19 = sld [smem:[#allocation174_spill]] }
  0x74   : > { %s13720_s28 = scalar_lea.hbm %s16886_s19, 36864 }
  0x75   : > { %p13721_p13 = scmp.ne.s32.totalorder %s16886_s19, %s13720_s28  ;;  %p13727_p4 = scmp.lt.u32.totalorder %s13720_s28, %s16886_s19 }
  0x77   : > { %p13723_p0 = pnand %p13721_p13, %p14058_p7 }
  0x79   : > { %p13724_p1 = pneg %p13723_p0 }
  0x7b   : > { %p13729_p6 = pnand %p13727_p4, %p13724_p1 }
  0x7d   : > { %13732 = shalt.err (!%p13729_p6)
}
  0x7e   : > { %s13733_s23 = scalar_lea.vmem %s548_s25, 36864  ;;  %p13741_p11 = scmp.lt.s32.totalorder %s548_s25, %s548_s25 }
  0x7f   : > { %p13734_p8 = scmp.ne.s32.totalorder %s548_s25, %s13733_s23  ;;  %p13742_p12 = scmp.lt.s32.totalorder %s13733_s23, %s13733_s23 }
  0x81   : > { %p13736_p9 = pnand %p13734_p8, %p14058_p7  ;;  %p13743_p2 = por %p13742_p12, %p13741_p11 }
  0x83   : > { %p13737_p10 = pneg %p13736_p9 }
  0x85   : > { %p13744_p3 = pnand %p13743_p2, %p13737_p10 }
  0x87   : > { %13747 = shalt.err (!%p13744_p3)
}
  0x88   : > { %s13894_s24 = smov 128   ;;  %s13895_s29 = smov 8  }
  0x89   : > { %12404 = dma.hbm_to_vmem [thread:$0]  (!%p14042_p5), %s16886_s19, 36864, %s548_s25, [#allocation3], %s13894_s24, %s13894_s24, %s13895_s29  }
  0x8a   : > { %s13896_s18 = smov [#allocation6]   ;;  %s13897_s0 = smov [#allocation9]  }
  0x8b   : > { %s573_s28 = sshll.u32 %s13896_s18, 4  ;;  %s605_s5 = sshll.u32 %s13897_s0, 4  ;;  %s574_s28 = int_to_ptr.vmem [resolvable:$true] %s573_s28  ;;  %s606_s5 = int_to_ptr.vmem [resolvable:$true] %s605_s5 }
  0x8c   : > { %s16887_s23 = sld [smem:[#allocation176_spill]] }
  0x92   : > { %s13748_s26 = scalar_lea.hbm %s16887_s23, 1152 }
  0x93   : > { %p13749_p2 = scmp.ne.s32.totalorder %s16887_s23, %s13748_s26  ;;  %p13755_p0 = scmp.lt.u32.totalorder %s13748_s26, %s16887_s23 }
  0x95   : > { %p13751_p3 = pnand %p13749_p2, %p14058_p7 }
  0x97   : > { %p13752_p13 = pneg %p13751_p3 }
  0x99   : > { %p13757_p1 = pnand %p13755_p0, %p13752_p13 }
  0x9b   : > { %13760 = shalt.err (!%p13757_p1)
}
  0x9c   : > { %s13761_s25 = scalar_lea.vmem %s574_s28, 1152  ;;  %p13769_p9 = scmp.lt.s32.totalorder %s574_s28, %s574_s28 }
  0x9d   : > { %p13762_p4 = scmp.ne.s32.totalorder %s574_s28, %s13761_s25  ;;  %p13770_p10 = scmp.lt.s32.totalorder %s13761_s25, %s13761_s25 }
  0x9f   : > { %p13764_p6 = pnand %p13762_p4, %p14058_p7  ;;  %p13771_p11 = por %p13770_p10, %p13769_p9 }
  0xa1   : > { %p13765_p8 = pneg %p13764_p6 }
  0xa3   : > { %p13772_p12 = pnand %p13771_p11, %p13765_p8 }
  0xa5   : > { %13775 = shalt.err (!%p13772_p12)
}
  0xa6   : > { %s16888_s14 = smov 4   ;;  %s16889_s2 = smov 64  }
  0xa7   : > { %12410 = dma.hbm_to_vmem [thread:$0]  (!%p14042_p5), %s16887_s23, 1152, %s574_s28, [#allocation5], %s16889_s2, %s16889_s2, %s16888_s14  }
  0xa8   : > { %s13776_s12 = scalar_lea.hbm %s16639_s7, 1024 }
  0xa9   : > { %p13777_p2 = scmp.ne.s32.totalorder %s16639_s7, %s13776_s12  ;;  %p13783_p0 = scmp.lt.u32.totalorder %s13776_s12, %s16639_s7 }
  0xab   : > { %p13779_p3 = pnand %p13777_p2, %p14058_p7 }
  0xad   : > { %p13780_p13 = pneg %p13779_p3 }
  0xaf   : > { %p13785_p1 = pnand %p13783_p0, %p13780_p13 }
  0xb1   : > { %13788 = shalt.err (!%p13785_p1)
}
  0xb2   : > { %s13789_s25 = scalar_lea.vmem %s606_s5, 1024  ;;  %p13797_p9 = scmp.lt.s32.totalorder %s606_s5, %s606_s5 }
  0xb3   : > { %p13790_p4 = scmp.ne.s32.totalorder %s606_s5, %s13789_s25  ;;  %p13798_p10 = scmp.lt.s32.totalorder %s13789_s25, %s13789_s25 }
  0xb5   : > { %p13792_p6 = pnand %p13790_p4, %p14058_p7  ;;  %p13799_p11 = por %p13798_p10, %p13797_p9 }
  0xb7   : > { %p13793_p8 = pneg %p13792_p6 }
  0xb9   : > { %p13800_p12 = pnand %p13799_p11, %p13793_p8 }
  0xbb   : > { %13803 = shalt.err (!%p13800_p12)
}
  0xbc   : > { %12416 = dma.hbm_to_vmem [thread:$0]  (!%p14042_p5), %s16639_s7, 1024, %s606_s5, [#allocation8], %s13894_s24, %s13894_s24, %s13895_s29  }
  0xbd   : > { %s13898_s27 = smov [#allocation12]   ;;  %s13899_s10 = smov [#allocation13]  }
  0xbe   : > { %s649_s26 = sshll.u32 %s13898_s27, 4  ;;  %s665_s12 = sshll.u32 %s13899_s10, 4  ;;  %s650_s26 = int_to_ptr.vmem [resolvable:$true] %s649_s26  ;;  %s666_s12 = int_to_ptr.vmem [resolvable:$true] %s665_s12 }
  0xbf   : > { %s13804_s6 = scalar_lea.hbm %s16647_s15, 1152 }
  0xc0   : > { %p13805_p2 = scmp.ne.s32.totalorder %s16647_s15, %s13804_s6  ;;  %p13811_p0 = scmp.lt.u32.totalorder %s13804_s6, %s16647_s15 }
  0xc2   : > { %p13807_p3 = pnand %p13805_p2, %p14058_p7 }
  0xc4   : > { %p13808_p13 = pneg %p13807_p3 }
  0xc6   : > { %p13813_p1 = pnand %p13811_p0, %p13808_p13 }
  0xc8   : > { %13816 = shalt.err (!%p13813_p1)
}
  0xc9   : > { %s13817_s24 = scalar_lea.vmem %s650_s26, 1152  ;;  %p13825_p9 = scmp.lt.s32.totalorder %s650_s26, %s650_s26 }
  0xca   : > { %p13818_p4 = scmp.ne.s32.totalorder %s650_s26, %s13817_s24  ;;  %p13826_p10 = scmp.lt.s32.totalorder %s13817_s24, %s13817_s24 }
  0xcc   : > { %p13820_p6 = pnand %p13818_p4, %p14058_p7  ;;  %p13827_p11 = por %p13826_p10, %p13825_p9 }
  0xce   : > { %p13821_p8 = pneg %p13820_p6 }
  0xd0   : > { %p13828_p12 = pnand %p13827_p11, %p13821_p8 }
  0xd2   : > { %13831 = shalt.err (!%p13828_p12)
}
  0xd3   : > { %12422 = dma.hbm_to_vmem [thread:$0]  (!%p14042_p5), %s16647_s15, 1152, %s650_s26, [#allocation11], %s16889_s2, %s16889_s2, %s16888_s14  }
  0xd4   : > { %s13832_s27 = scalar_lea.hbm %s16649_s17, 576 }
  0xd5   : > { %p13833_p2 = scmp.ne.s32.totalorder %s16649_s17, %s13832_s27  ;;  %p13839_p0 = scmp.lt.u32.totalorder %s13832_s27, %s16649_s17 }
  0xd7   : > { %p13835_p3 = pnand %p13833_p2, %p14058_p7 }
  0xd9   : > { %p13836_p13 = pneg %p13835_p3 }
  0xdb   : > { %p13841_p1 = pnand %p13839_p0, %p13836_p13 }
  0xdd   : > { %13844 = shalt.err (!%p13841_p1)
}
  0xde   : > { %s13845_s3 = scalar_lea.vmem %s666_s12, 576  ;;  %p13853_p9 = scmp.lt.s32.totalorder %s666_s12, %s666_s12 }
  0xdf   : > { %p13846_p4 = scmp.ne.s32.totalorder %s666_s12, %s13845_s3  ;;  %p13854_p10 = scmp.lt.s32.totalorder %s13845_s3, %s13845_s3 }
  0xe1   : > { %p13848_p6 = pnand %p13846_p4, %p14058_p7  ;;  %p13855_p11 = por %p13854_p10, %p13853_p9 }
  0xe3   : > { %p13849_p8 = pneg %p13848_p6 }
  0xe5   : > { %p13856_p12 = pnand %p13855_p11, %p13849_p8 }
  0xe7   : > { %13859 = shalt.err (!%p13856_p12)
}
  0xe8   : > { %12425 = dma.hbm_to_vmem [thread:$0]  (!%p14042_p5), %s16649_s17, 576, %s666_s12, [#allocation14], %s16889_s2, %s16889_s2, %s16888_s14  }
  0xe9   : > { %p16890_p2 = scmp.ne.s32.totalorder %s16880_s4, 0 }
  0xeb   : > { %701 = sbr.rel (%p16890_p2) target bundleno = 16016 (0x3e90), region = 108 }
  0xf2   : > { %p16891_p7 = scmp.eq.s32.totalorder %s14025_s30, 0 }
  0xf4   : > { %13865 = dma.done.wait (%p16891_p7), [#allocation3], 36864   ;;  %p16892_p3 = pmov %p16891_p7 }
  0xf6   : > { %13867 = vsyncadd (%p16892_p3), [#allocation3], 4294930432  ;;  %p16893_p13 = pmov %p16892_p3 }
  0xf7   : > { %p16894_p0 = pmov %p16892_p3 }
  0xf8   : > { %13869 = dma.done.wait (%p16893_p13), [#allocation5], 5760  }
  0xf9   : > { %13871 = vsyncadd (%p16894_p0), [#allocation5], 4294961536  ;;  %p16895_p1 = pmov %p16894_p0 }
  0xfa   : > { %p16896_p5 = pmov %p16894_p0 }
  0xfb   : > { %13873 = dma.done.wait (%p16895_p1), [#allocation8], 1152  }
  0xfc   : > { %13875 = vsyncadd (%p16896_p5), [#allocation8], 4294966144  ;;  %p16897_p4 = pmov %p16894_p0 }
  0xfd   : > { %p16898_p6 = pmov %p16894_p0 }
  0xfe   : > { %13877 = dma.done.wait (%p16897_p4), [#allocation11], 2304  }
  0xff   : > { %13879 = vsyncadd (%p16898_p6), [#allocation11], 4294964992  ;;  %p16899_p8 = pmov %p16894_p0 }
 0x100   : > { %p16900_p9 = pmov %p16894_p0 }
 0x101   : > { %13881 = dma.done.wait (%p16899_p8), [#allocation14], 576  }
 0x102   : > { %13883 = vsyncadd (%p16900_p9), [#allocation14], 4294966720  ;;  %v12468_v0 = vld [vmem:[#allocation2 + $0x4] ss:$8 sps:$4 sm:$0xff]   ;;  %v12472_v2 = vld [vmem:[#allocation2] ss:$8 sps:$4 sm:$0xff]  }
 0x103   : > { %v12470_v1 = vld [vmem:[#allocation2 + $0x104] ss:$8 sps:$4 sm:$0xff]   ;;  %1000 = vmatprep.subr.bf16.mxu0 %v12468_v0  ;;  %v12473_v3 = vld [vmem:[#allocation2 + $0x100] ss:$8 sps:$4 sm:$0xff]   ;;  %v12474_v4 = vld [vmem:[#allocation2 + $0x14] ss:$8 sps:$4 sm:$0xff]  }
 0x104   : > { %1237 = vmatprep.subr.bf16.mxu1 %v12470_v1  ;;  %1001 = vmatpush1.bf16.msra.mxu0 %v12472_v2  ;;  %v12476_v5 = vld [vmem:[#allocation2 + $0x114] ss:$8 sps:$4 sm:$0xff]   ;;  %v12478_v6 = vld [vmem:[#allocation2 + $0x10] ss:$8 sps:$4 sm:$0xff]   ;;  %v12480_v8 = vld [vmem:[#allocation2 + $0x24] ss:$8 sps:$4 sm:$0xff]  }
 0x105   : > { %1238 = vmatpush1.bf16.msra.mxu1 %v12473_v3  ;;  %1002 = vmatprep.subr.bf16.mxu0 %v12474_v4  ;;  %v12479_v7 = vld [vmem:[#allocation2 + $0x110] ss:$8 sps:$4 sm:$0xff]   ;;  %v12482_v9 = vld [vmem:[#allocation2 + $0x124] ss:$8 sps:$4 sm:$0xff]   ;;  %v12484_v10 = vld [vmem:[#allocation2 + $0x20] ss:$8 sps:$4 sm:$0xff]  }
 0x106   : > { %1239 = vmatprep.subr.bf16.mxu1 %v12476_v5  ;;  %v12485_v11 = vld [vmem:[#allocation2 + $0x120] ss:$8 sps:$4 sm:$0xff]   ;;  %v12486_v12 = vld [vmem:[#allocation2 + $0x34] ss:$8 sps:$4 sm:$0xff]   ;;  %v12490_v14 = vld [vmem:[#allocation2 + $0x30] ss:$8 sps:$4 sm:$0xff]  }
 0x107   : > { %v12488_v13 = vld [vmem:[#allocation2 + $0x134] ss:$8 sps:$4 sm:$0xff]   ;;  %v12491_v15 = vld [vmem:[#allocation2 + $0x130] ss:$8 sps:$4 sm:$0xff]   ;;  %v12492_v16 = vld [vmem:[#allocation2 + $0x44] ss:$8 sps:$4 sm:$0xff]  }
 0x108   : > { %1003 = vmatpush1.bf16.msra.mxu0 %v12478_v6  ;;  %v12494_v17 = vld [vmem:[#allocation2 + $0x144] ss:$8 sps:$4 sm:$0xff]   ;;  %v12496_v18 = vld [vmem:[#allocation2 + $0x40] ss:$8 sps:$4 sm:$0xff]   ;;  %v12498_v20 = vld [vmem:[#allocation2 + $0x54] ss:$8 sps:$4 sm:$0xff]  }
 0x109   : > { %1240 = vmatpush1.bf16.msra.mxu1 %v12479_v7  ;;  %1004 = vmatprep.subr.bf16.mxu0 %v12480_v8  ;;  %v12497_v19 = vld [vmem:[#allocation2 + $0x140] ss:$8 sps:$4 sm:$0xff]   ;;  %v12500_v21 = vld [vmem:[#allocation2 + $0x154] ss:$8 sps:$4 sm:$0xff]   ;;  %v12502_v22 = vld [vmem:[#allocation2 + $0x50] ss:$8 sps:$4 sm:$0xff]  }
 0x10a   : > { %1241 = vmatprep.subr.bf16.mxu1 %v12482_v9  ;;  %v12503_v23 = vld [vmem:[#allocation2 + $0x150] ss:$8 sps:$4 sm:$0xff]   ;;  %v12504_v24 = vld [vmem:[#allocation2 + $0x64] ss:$8 sps:$4 sm:$0xff]   ;;  %v12508_v26 = vld [vmem:[#allocation2 + $0x60] ss:$8 sps:$4 sm:$0xff]  }
 0x10b   : > { %v12506_v25 = vld [vmem:[#allocation2 + $0x164] ss:$8 sps:$4 sm:$0xff]   ;;  %v12509_v27 = vld [vmem:[#allocation2 + $0x160] ss:$8 sps:$4 sm:$0xff]   ;;  %v12510_v28 = vld [vmem:[#allocation2 + $0x74] ss:$8 sps:$4 sm:$0xff]  }
 0x10c   : > { %1005 = vmatpush1.bf16.msra.mxu0 %v12484_v10  ;;  %v12512_v29 = vld [vmem:[#allocation2 + $0x174] ss:$8 sps:$4 sm:$0xff]   ;;  %v12514_v30 = vld [vmem:[#allocation2 + $0x70] ss:$8 sps:$4 sm:$0xff]   ;;  %v12516_v32 = vld [vmem:[#allocation2 + $0x84] ss:$8 sps:$4 sm:$0xff]  }
 0x10d   : > { %1242 = vmatpush1.bf16.msra.mxu1 %v12485_v11  ;;  %1006 = vmatprep.subr.bf16.mxu0 %v12486_v12  ;;  %v12515_v31 = vld [vmem:[#allocation2 + $0x170] ss:$8 sps:$4 sm:$0xff]   ;;  %p791_p10 = scmp.lt.s32.totalorder %s14025_s30, 1  ;;  %v12518_v33 = vld [vmem:[#allocation2 + $0x184] ss:$8 sps:$4 sm:$0xff]   ;;  %s16901_s14 = sld [smem:[#allocation173_spill]] }
 0x10e   : > { %1243 = vmatprep.subr.bf16.mxu1 %v12488_v13  ;;  %v12520_v34 = vld [vmem:[#allocation2 + $0x80] ss:$8 sps:$4 sm:$0xff]   ;;  %v12522_v36 = vld [vmem:[#allocation2 + $0x94] ss:$8 sps:$4 sm:$0xff]   ;;  %v12526_v38 = vld [vmem:[#allocation2 + $0x90] ss:$8 sps:$4 sm:$0xff]  }
 0x10f   : > { %v12521_v35 = vld [vmem:[#allocation2 + $0x180] ss:$8 sps:$4 sm:$0xff]   ;;  %s17291_s30 = smov (!%p791_p10, %s14025_s30), 1  ;;  %v12524_v37 = vld [vmem:[#allocation2 + $0x194] ss:$8 sps:$4 sm:$0xff]   ;;  %v16675_v4 = vmov 0  }
 0x110   : > { %1007 = vmatpush1.bf16.msra.mxu0 %v12490_v14  ;;  %v12527_v39 = vld [vmem:[#allocation2 + $0x190] ss:$8 sps:$4 sm:$0xff]   ;;  %v12528_v40 = vld [vmem:[#allocation2 + $0xa4] ss:$8 sps:$4 sm:$0xff]   ;;  %s11423_s22 = sshll.u32 %s17291_s30, 3  ;;  %12466 = vset.pattern.permute.xlu0 %v16675_v4  ;;  %vm1286_vm0 = vcmask 1040384  }
 0x111   : > { %1244 = vmatpush1.bf16.msra.mxu1 %v12491_v15  ;;  %1008 = vmatprep.subr.bf16.mxu0 %v12492_v16  ;;  %v12530_v41 = vld [vmem:[#allocation2 + $0x1a4] ss:$8 sps:$4 sm:$0xff]   ;;  %v12532_v42 = vld [vmem:[#allocation2 + $0xa0] ss:$8 sps:$4 sm:$0xff]   ;;  %v12534_v44 = vld [vmem:[#allocation2 + $0xb4] ss:$8 sps:$4 sm:$0xff]  }
 0x112   : > { %1245 = vmatprep.subr.bf16.mxu1 %v12494_v17  ;;  %v12533_v43 = vld [vmem:[#allocation2 + $0x1a0] ss:$8 sps:$4 sm:$0xff]   ;;  %v12536_v45 = vld [vmem:[#allocation2 + $0x1b4] ss:$8 sps:$4 sm:$0xff]   ;;  %v12538_v46 = vld [vmem:[#allocation2 + $0xb0] ss:$8 sps:$4 sm:$0xff]   ;;  %12467 = vset.pattern.permute.xlu1 %v16675_v4 }
 0x113   : > { %s795_s2 = scalar_lea.vmem %s16901_s14, %s11423_s22  ;;  %v12539_v47 = vld [vmem:[#allocation2 + $0x1b0] ss:$8 sps:$4 sm:$0xff]   ;;  %v12540_v49 = vld [vmem:[#allocation2 + $0xc4] ss:$8 sps:$4 sm:$0xff]   ;;  %v12544_v53 = vld [vmem:[#allocation2 + $0xc0] ss:$8 sps:$4 sm:$0xff]  }
 0x114   : > { %1009 = vmatpush1.bf16.msra.mxu0 %v12496_v18  ;;  %v802_v48 = vld [vmem:[%s795_s2] sm:$0x77]  ;;  %v12546_v55 = vld [vmem:[#allocation2 + $0xd4] ss:$8 sps:$4 sm:$0xff]   ;;  %v12550_v57 = vld [vmem:[#allocation2 + $0xd0] ss:$8 sps:$4 sm:$0xff]  }
 0x115   : > { %1246 = vmatpush1.bf16.msra.mxu1 %v12497_v19  ;;  %1010 = vmatprep.subr.bf16.mxu0 %v12498_v20  ;;  %v12542_v50 = vld [vmem:[#allocation2 + $0x1c4] ss:$8 sps:$4 sm:$0xff]   ;;  %v804_v51 = vcombine.high %v802_v48, %v802_v48  ;;  %v12545_v54 = vld [vmem:[#allocation2 + $0x1c0] ss:$8 sps:$4 sm:$0xff]   ;;  %v12548_v56 = vld [vmem:[#allocation2 + $0x1d4] ss:$8 sps:$4 sm:$0xff]   ;;  %v14274_v3 = vpack.c.bf16 %v802_v48, %v802_v48 }
 0x116   : > { %1247 = vmatprep.subr.bf16.mxu1 %v12500_v21  ;;  %v12551_v58 = vld [vmem:[#allocation2 + $0x1d0] ss:$8 sps:$4 sm:$0xff]   ;;  %v12552_v59 = vld [vmem:[#allocation2 + $0xe4] ss:$8 sps:$4 sm:$0xff]   ;;  %v12556_v61 = vld [vmem:[#allocation2 + $0xe0] ss:$8 sps:$4 sm:$0xff]  }
 0x117   : > { %v14270_v52 = vpack.c.bf16 %v804_v51, %v804_v51  ;;  %v12554_v60 = vld [vmem:[#allocation2 + $0x1e4] ss:$8 sps:$4 sm:$0xff]   ;;  %v12557_v62 = vld [vmem:[#allocation2 + $0x1e0] ss:$8 sps:$4 sm:$0xff]   ;;  %v12558_v63 = vld [vmem:[#allocation2 + $0xf4] ss:$8 sps:$4 sm:$0xff]  }
 0x118   : > { %1011 = vmatpush1.bf16.msra.mxu0 %v12502_v22  ;;  %v12560_v0 = vld [vmem:[#allocation2 + $0x1f4] ss:$8 sps:$4 sm:$0xff]   ;;  %v12562_v1 = vld [vmem:[#allocation2 + $0xf0] ss:$8 sps:$4 sm:$0xff]   ;;  %vm1287_vm1 = vcmask 1041408   ;;  %v13901_v5 = vmov 65535  }
 0x119   : > { %1248 = vmatpush1.bf16.msra.mxu1 %v12503_v23  ;;  %1012 = vmatprep.subr.bf16.mxu0 %v12504_v24  ;;  %v12563_v2 = vld [vmem:[#allocation2 + $0x1f0] ss:$8 sps:$4 sm:$0xff]   ;;  %v1288_v6 = vsel %vm1286_vm0, 4294967295, %v13901_v5  ;;  %v12565_v23 = vld [vmem:[#allocation2 + $0x204] ss:$8 sps:$4 sm:$0xff]   ;;  %vm1282_vm2 = vcmask 23552  }
 0x11a   : > { %1249 = vmatprep.subr.bf16.mxu1 %v12506_v25  ;;  %1032 = vmatprep.mubr.bf16.mxu0 %v14270_v52  ;;  %v14282_v10 = vsel %vm1287_vm1, %v1288_v6, 0  ;;  %v10857_v25 = vld [vmem:[%s16640_s8 + $0x4] sm:$0xf]  ;;  %v12598_v48 = vld [vmem:[#allocation2 + $0x2b4] ss:$8 sps:$4 sm:$0xff]   ;;  %s16975_s3 = sld [smem:[#allocation177_spill]] }
 0x11b   : > { %1269 = vmatprep.mubr.bf16.mxu1 %v14270_v52  ;;  %v12603_v51 = vld [vmem:[#allocation2 + $0x2c0] ss:$8 sps:$4 sm:$0xff]   ;;  %vm13903_vm3 = vmmov 0   ;;  %vm3761_vm4 = vcmask 523264   ;;  %vm3894_vm5 = vcmask 1043456   ;;  %s16983_s27 = sld [smem:[#allocation180_spill]] }
 0x11c   : > { %1013 = vmatpush1.bf16.msra.mxu0 %v12508_v26  ;;  %v1043_v26 = vld [vmem:[%s16640_s8] sm:$0xf]  ;;  %vm3890_vm6 = vcmask 64512   ;;  %s16984_s22 = sld [smem:[#allocation184_spill]]  ;;  %s16985_s12 = sld [smem:[#allocation178_spill]]  ;;  %vm5143_vm7 = vcmask 130048  }
 0x11d   : > { %1250 = vmatpush1.bf16.msra.mxu1 %v12509_v27  ;;  %1014 = vmatprep.subr.bf16.mxu0 %v12510_v28  ;;  %v12567_v27 = vld [vmem:[#allocation2 + $0x200] ss:$8 sps:$4 sm:$0xff]   ;;  %v12568_v28 = vld [vmem:[#allocation2 + $0x214] ss:$8 sps:$4 sm:$0xff]   ;;  %s16986_s0 = sld [smem:[#allocation181_spill]]  ;;  %vm6471_vm8 = vcmask 261120  }
 0x11e   : > { %1251 = vmatprep.subr.bf16.mxu1 %v12512_v29  ;;  %v12570_v29 = vld [vmem:[#allocation2 + $0x210] ss:$8 sps:$4 sm:$0xff]   ;;  %s17134_s4 = sld [smem:[#allocation183_spill]]  ;;  %s17287_s28 = sld [smem:[#allocation185_spill]] }
 0x11f   : > { %s11424_s29 = sshll.u32 %s17291_s30, 2  ;;  %s17288_s10 = sld [smem:[#allocation186_spill]] }
 0x120   : > { %1015 = vmatpush1.bf16.msra.mxu0 %v12514_v30  ;;  %v12571_v30 = vld [vmem:[#allocation2 + $0x224] ss:$8 sps:$4 sm:$0xff]   ;;  %s16976_s26 = smov %s16975_s3 }
 0x121   : > { %1252 = vmatpush1.bf16.msra.mxu1 %v12515_v31  ;;  %1016 = vmatprep.subr.bf16.mxu0 %v12516_v32  ;;  %v12573_v31 = vld [vmem:[#allocation2 + $0x220] ss:$8 sps:$4 sm:$0xff]   ;;  %v12574_v32 = vld [vmem:[#allocation2 + $0x234] ss:$8 sps:$4 sm:$0xff]  }
 0x122   : > { %1253 = vmatprep.subr.bf16.mxu1 %v12518_v33  ;;  %v12576_v33 = vld [vmem:[#allocation2 + $0x230] ss:$8 sps:$4 sm:$0xff]  }
 0x124   : > { %1017 = vmatpush1.bf16.msra.mxu0 %v12520_v34  ;;  %v12577_v34 = vld [vmem:[#allocation2 + $0x244] ss:$8 sps:$4 sm:$0xff]  }
 0x125   : > { %1254 = vmatpush1.bf16.msra.mxu1 %v12521_v35  ;;  %1018 = vmatprep.subr.bf16.mxu0 %v12522_v36  ;;  %v12579_v35 = vld [vmem:[#allocation2 + $0x240] ss:$8 sps:$4 sm:$0xff]   ;;  %v12580_v36 = vld [vmem:[#allocation2 + $0x254] ss:$8 sps:$4 sm:$0xff]   ;;  %s800_s18 = scalar_lea.vmem %s17288_s10, %s11424_s29 }
 0x126   : > { %1255 = vmatprep.subr.bf16.mxu1 %v12524_v37  ;;  %v12582_v37 = vld [vmem:[#allocation2 + $0x250] ss:$8 sps:$4 sm:$0xff]  }
 0x128   : > { %1019 = vmatpush1.bf16.msra.mxu0 %v12526_v38  ;;  %v12583_v38 = vld [vmem:[#allocation2 + $0x264] ss:$8 sps:$4 sm:$0xff]  }
 0x129   : > { %1256 = vmatpush1.bf16.msra.mxu1 %v12527_v39  ;;  %1020 = vmatprep.subr.bf16.mxu0 %v12528_v40  ;;  %v12585_v39 = vld [vmem:[#allocation2 + $0x260] ss:$8 sps:$4 sm:$0xff]   ;;  %v12586_v40 = vld [vmem:[#allocation2 + $0x274] ss:$8 sps:$4 sm:$0xff]  }
 0x12a   : > { %1257 = vmatprep.subr.bf16.mxu1 %v12530_v41  ;;  %v12588_v41 = vld [vmem:[#allocation2 + $0x270] ss:$8 sps:$4 sm:$0xff]  }
 0x12c   : > { %1021 = vmatpush1.bf16.msra.mxu0 %v12532_v42  ;;  %v12589_v42 = vld [vmem:[#allocation2 + $0x284] ss:$8 sps:$4 sm:$0xff]  }
 0x12d   : > { %1258 = vmatpush1.bf16.msra.mxu1 %v12533_v43  ;;  %1022 = vmatprep.subr.bf16.mxu0 %v12534_v44  ;;  %v12591_v43 = vld [vmem:[#allocation2 + $0x280] ss:$8 sps:$4 sm:$0xff]   ;;  %v12592_v44 = vld [vmem:[#allocation2 + $0x294] ss:$8 sps:$4 sm:$0xff]  }
 0x12e   : > { %1259 = vmatprep.subr.bf16.mxu1 %v12536_v45  ;;  %v12594_v45 = vld [vmem:[#allocation2 + $0x290] ss:$8 sps:$4 sm:$0xff]  }
 0x130   : > { %1023 = vmatpush1.bf16.msra.mxu0 %v12538_v46  ;;  %v12595_v46 = vld [vmem:[#allocation2 + $0x2a4] ss:$8 sps:$4 sm:$0xff]  }
 0x131   : > { %1260 = vmatpush1.bf16.msra.mxu1 %v12539_v47  ;;  %1024 = vmatprep.subr.bf16.mxu0 %v12540_v49  ;;  %v12597_v47 = vld [vmem:[#allocation2 + $0x2a0] ss:$8 sps:$4 sm:$0xff]   ;;  %v12600_v49 = vld [vmem:[#allocation2 + $0x2b0] ss:$8 sps:$4 sm:$0xff]  }
 0x132   : > { %1261 = vmatprep.subr.bf16.mxu1 %v12542_v50  ;;  %v12601_v50 = vld [vmem:[#allocation2 + $0x2c4] ss:$8 sps:$4 sm:$0xff]  }
 0x134   : > { %1025 = vmatpush1.bf16.msra.mxu0 %v12544_v53  ;;  %v12604_v53 = vld [vmem:[#allocation2 + $0x2d4] ss:$8 sps:$4 sm:$0xff]  }
 0x135   : > { %1262 = vmatpush1.bf16.msra.mxu1 %v12545_v54  ;;  %1026 = vmatprep.subr.bf16.mxu0 %v12546_v55  ;;  %v12606_v54 = vld [vmem:[#allocation2 + $0x2d0] ss:$8 sps:$4 sm:$0xff]   ;;  %v12607_v55 = vld [vmem:[#allocation2 + $0x2e4] ss:$8 sps:$4 sm:$0xff]  }
 0x136   : > { %1263 = vmatprep.subr.bf16.mxu1 %v12548_v56  ;;  %v12609_v56 = vld [vmem:[#allocation2 + $0x2e0] ss:$8 sps:$4 sm:$0xff]  }
 0x138   : > { %1027 = vmatpush1.bf16.msra.mxu0 %v12550_v57  ;;  %v12610_v57 = vld [vmem:[#allocation2 + $0x2f4] ss:$8 sps:$4 sm:$0xff]  }
 0x139   : > { %1264 = vmatpush1.bf16.msra.mxu1 %v12551_v58  ;;  %1028 = vmatprep.subr.bf16.mxu0 %v12552_v59  ;;  %v12612_v58 = vld [vmem:[#allocation2 + $0x2f0] ss:$8 sps:$4 sm:$0xff]  }
 0x13a   : > { %1265 = vmatprep.subr.bf16.mxu1 %v12554_v60 }
 0x13c   : > { %1029 = vmatpush1.bf16.msra.mxu0 %v12556_v61 }
 0x13d   : > { %1266 = vmatpush1.bf16.msra.mxu1 %v12557_v62  ;;  %1030 = vmatprep.subr.bf16.mxu0 %v12558_v63 }
 0x13e   : > { %1267 = vmatprep.subr.bf16.mxu1 %v12560_v0 }
 0x140   : > { %1031 = vmatpush1.bf16.msra.mxu0 %v12562_v1 }
 0x141   : > { %1268 = vmatpush1.bf16.msra.mxu1 %v12563_v2 }
 0x143   : > { %1033 = vmatmul.mubr.bf16.vlgmr.msra.gmra.mrb[0].mxu0 %v14274_v3 }
 0x144   : > { %1270 = vmatmul.mubr.bf16.vlgmr.msra.gmra.mrb[0].mxu1 %v14274_v3  ;;  %1328 = vmatprep.mubr.bf16.mxu0 %v16675_v4 }
 0x145   : > { %1378 = vmatprep.mubr.bf16.mxu1 %v16675_v4 }
 0x216   : > { %v1034_v7 = vpop.f32.mrb[0].mxu0 }
 0x217   : > { %v1271_v8 = vpop.f32.mrb[0].mxu1  ;;  %v1041_v9 = vpack.c.bf16 %v1034_v7, %v1034_v7  ;;  %v1036_v12 = vpop.f32.mrb[1].mxu0 }
 0x218   : > { %v1278_v11 = vpack.c.bf16 %v1271_v8, %v1271_v8  ;;  %v1273_v13 = vpop.f32.mrb[1].mxu1  ;;  %v1042_v14 = vpack.c.bf16 %v1036_v12, %v1036_v12  ;;  %v1038_v17 = vpop.f32.mrb[2].mxu0 }
 0x219   : > { %v1279_v15 = vpack.c.bf16 %v1273_v13, %v1273_v13  ;;  %v1275_v16 = vpop.f32.mrb[2].mxu1  ;;  %v1341_v18 = vand.u32 %v14282_v10, %v1041_v9  ;;  %v1039_v20 = vpop.f32.mrb[3].mxu0  ;;  %v10892_v17 = vld [vmem:[%s16640_s8 + $0x8] sm:$0xf] }
 0x21a   : > { %v1276_v19 = vpop.f32.mrb[3].mxu1  ;;  %v1344_v22 = vand.u32 %v14282_v10, %v1042_v14  ;;  %v1291_v24 = vand.u32 %v14282_v10, %v1278_v11  ;;  %v12618_v20 = vld [vmem:[#allocation2 + $0x310] ss:$8 sps:$4 sm:$0xff]  }
 0x21b   : > { %v1294_v21 = vand.u32 %v14282_v10, %v1279_v15  ;;  %v12613_v15 = vld [vmem:[#allocation2 + $0x304] ss:$8 sps:$4 sm:$0xff]   ;;  %v12616_v19 = vld [vmem:[#allocation2 + $0x314] ss:$8 sps:$4 sm:$0xff]  }
 0x21c   : > { %1346 = vmatprep.subr.bf16.mxu1 %v1344_v22  ;;  %v12621_v22 = vld [vmem:[#allocation2 + $0x320] ss:$8 sps:$4 sm:$0xff]  }
 0x21d   : > { %1296 = vmatprep.subr.bf16.mxu0 %v1294_v21  ;;  %1347 = vmatpush1.bf16.msra.mxu1 %v1341_v18  ;;  %v12615_v18 = vld [vmem:[#allocation2 + $0x300] ss:$8 sps:$4 sm:$0xff]   ;;  %v12619_v21 = vld [vmem:[#allocation2 + $0x324] ss:$8 sps:$4 sm:$0xff]  }
 0x21e   : > { %1297 = vmatpush1.bf16.msra.mxu0 %v1291_v24  ;;  %v12624_v24 = vld [vmem:[#allocation2 + $0x330] ss:$8 sps:$4 sm:$0xff]  }
 0x21f   : > { %1580 = vmatprep.subr.bf16.mxu0 %v12565_v23  ;;  %v12622_v23 = vld [vmem:[#allocation2 + $0x334] ss:$8 sps:$4 sm:$0xff]  }
 0x220   : > { %10859 = vmatmul.mubr.msk.bf16.vlgmr.msra.gmra.mrb[4].mxu1 %vm1282_vm2, %v1043_v26  ;;  %v12627_v26 = vld [vmem:[#allocation2 + $0x340] ss:$8 sps:$4 sm:$0xff]  }
 0x221   : > { %10858 = vmatmul.mubr.msk.bf16.vlgmr.msra.gmra.mrb[4].mxu0 %vm1282_vm2, %v10857_v25  ;;  %1666 = vmatprep.mubr.bf16.mxu1 %v16675_v4  ;;  %v12625_v25 = vld [vmem:[#allocation2 + $0x344] ss:$8 sps:$4 sm:$0xff]  }
 0x222   : > { %1581 = vmatpush1.bf16.msra.mxu0 %v12567_v27  ;;  %1612 = vmatprep.mubr.bf16.mxu0 %v14270_v52  ;;  %v12628_v27 = vld [vmem:[#allocation2 + $0x354] ss:$8 sps:$4 sm:$0xff]  }
 0x223   : > { %1582 = vmatprep.subr.bf16.mxu0 %v12568_v28  ;;  %v12630_v28 = vld [vmem:[#allocation2 + $0x350] ss:$8 sps:$4 sm:$0xff]  }
 0x226   : > { %1583 = vmatpush1.bf16.msra.mxu0 %v12570_v29  ;;  %v12631_v29 = vld [vmem:[#allocation2 + $0x364] ss:$8 sps:$4 sm:$0xff]  }
 0x227   : > { %1584 = vmatprep.subr.bf16.mxu0 %v12571_v30  ;;  %v12633_v30 = vld [vmem:[#allocation2 + $0x360] ss:$8 sps:$4 sm:$0xff]  }
 0x22a   : > { %1585 = vmatpush1.bf16.msra.mxu0 %v12573_v31  ;;  %v12634_v31 = vld [vmem:[#allocation2 + $0x374] ss:$8 sps:$4 sm:$0xff]  }
 0x22b   : > { %1586 = vmatprep.subr.bf16.mxu0 %v12574_v32  ;;  %v12636_v32 = vld [vmem:[#allocation2 + $0x370] ss:$8 sps:$4 sm:$0xff]  }
 0x22e   : > { %1587 = vmatpush1.bf16.msra.mxu0 %v12576_v33  ;;  %v12637_v33 = vld [vmem:[#allocation2 + $0x384] ss:$8 sps:$4 sm:$0xff]  }
 0x22f   : > { %1588 = vmatprep.subr.bf16.mxu0 %v12577_v34  ;;  %v12639_v34 = vld [vmem:[#allocation2 + $0x380] ss:$8 sps:$4 sm:$0xff]  }
 0x232   : > { %1589 = vmatpush1.bf16.msra.mxu0 %v12579_v35  ;;  %v12640_v35 = vld [vmem:[#allocation2 + $0x394] ss:$8 sps:$4 sm:$0xff]  }
 0x233   : > { %1590 = vmatprep.subr.bf16.mxu0 %v12580_v36  ;;  %v12642_v36 = vld [vmem:[#allocation2 + $0x390] ss:$8 sps:$4 sm:$0xff]  }
 0x236   : > { %1591 = vmatpush1.bf16.msra.mxu0 %v12582_v37  ;;  %v12643_v37 = vld [vmem:[#allocation2 + $0x3a4] ss:$8 sps:$4 sm:$0xff]  }
 0x237   : > { %1592 = vmatprep.subr.bf16.mxu0 %v12583_v38  ;;  %v12645_v38 = vld [vmem:[#allocation2 + $0x3a0] ss:$8 sps:$4 sm:$0xff]  }
 0x23a   : > { %1593 = vmatpush1.bf16.msra.mxu0 %v12585_v39  ;;  %v12646_v39 = vld [vmem:[#allocation2 + $0x3b4] ss:$8 sps:$4 sm:$0xff]  }
 0x23b   : > { %1594 = vmatprep.subr.bf16.mxu0 %v12586_v40  ;;  %v12648_v40 = vld [vmem:[#allocation2 + $0x3b0] ss:$8 sps:$4 sm:$0xff]  }
 0x23e   : > { %1595 = vmatpush1.bf16.msra.mxu0 %v12588_v41  ;;  %v12649_v41 = vld [vmem:[#allocation2 + $0x3c4] ss:$8 sps:$4 sm:$0xff]  }
 0x23f   : > { %1596 = vmatprep.subr.bf16.mxu0 %v12589_v42  ;;  %v12651_v42 = vld [vmem:[#allocation2 + $0x3c0] ss:$8 sps:$4 sm:$0xff]  }
 0x242   : > { %1597 = vmatpush1.bf16.msra.mxu0 %v12591_v43  ;;  %v12652_v43 = vld [vmem:[#allocation2 + $0x3d4] ss:$8 sps:$4 sm:$0xff]  }
 0x243   : > { %1598 = vmatprep.subr.bf16.mxu0 %v12592_v44  ;;  %v12654_v44 = vld [vmem:[#allocation2 + $0x3d0] ss:$8 sps:$4 sm:$0xff]  }
 0x246   : > { %1599 = vmatpush1.bf16.msra.mxu0 %v12594_v45  ;;  %v12655_v45 = vld [vmem:[#allocation2 + $0x3e4] ss:$8 sps:$4 sm:$0xff]  }
 0x247   : > { %1600 = vmatprep.subr.bf16.mxu0 %v12595_v46  ;;  %v12657_v46 = vld [vmem:[#allocation2 + $0x3e0] ss:$8 sps:$4 sm:$0xff]  }
 0x24a   : > { %1601 = vmatpush1.bf16.msra.mxu0 %v12597_v47  ;;  %v12658_v47 = vld [vmem:[#allocation2 + $0x3f4] ss:$8 sps:$4 sm:$0xff]  }
 0x24b   : > { %1602 = vmatprep.subr.bf16.mxu0 %v12598_v48  ;;  %v12660_v48 = vld [vmem:[#allocation2 + $0x3f0] ss:$8 sps:$4 sm:$0xff]  }
 0x24e   : > { %1603 = vmatpush1.bf16.msra.mxu0 %v12600_v49 }
 0x24f   : > { %1604 = vmatprep.subr.bf16.mxu0 %v12601_v50 }
 0x252   : > { %1605 = vmatpush1.bf16.msra.mxu0 %v12603_v51 }
 0x253   : > { %1606 = vmatprep.subr.bf16.mxu0 %v12604_v53 }
 0x256   : > { %1607 = vmatpush1.bf16.msra.mxu0 %v12606_v54 }
 0x257   : > { %1608 = vmatprep.subr.bf16.mxu0 %v12607_v55 }
 0x25a   : > { %1609 = vmatpush1.bf16.msra.mxu0 %v12609_v56 }
 0x25b   : > { %1610 = vmatprep.subr.bf16.mxu0 %v12610_v57 }
 0x25e   : > { %1611 = vmatpush1.bf16.msra.mxu0 %v12612_v58 }
 0x261   : > { %1613 = vmatmul.mubr.bf16.vlgmr.msra.gmra.mrb[8].mxu0 %v14274_v3 }
 0x262   : > { %1956 = vmatprep.mubr.bf16.mxu0 %v16675_v4 }
 0x2f3   : > { %v1380_v60 = vpop.f32.mrb[4].mxu1 }
 0x2f4   : > { %v1330_v59 = vpop.f32.mrb[4].mxu0  ;;  %v1382_v63 = vpop.f32.mrb[5].mxu1 }
 0x2f5   : > { %v14300_v61 = vadd.f32 %v1380_v60, %v1330_v59  ;;  %v1332_v62 = vpop.f32.mrb[5].mxu0  ;;  %v1384_v2 = vpop.f32.mrb[6].mxu1 }
 0x2f6   : > { %v14302_v0 = vadd.f32 %v1382_v63, %v1332_v62  ;;  %v1334_v1 = vpop.f32.mrb[6].mxu0  ;;  %v1385_v6 = vpop.f32.mrb[7].mxu1 }
 0x2f7   : > { %v1335_v5 = vpop.f32.mrb[7].mxu0  ;;  %v12661_v1 = vld [vmem:[#allocation2 + $0x404] ss:$8 sps:$4 sm:$0xff]   ;;  %v12666_v6 = vld [vmem:[#allocation2 + $0x410] ss:$8 sps:$4 sm:$0xff]  }
 0x2f8   : > { %v12664_v5 = vld [vmem:[#allocation2 + $0x414] ss:$8 sps:$4 sm:$0xff]  }
 0x334   : > { %v1614_v7 = vpop.f32.mrb[8].mxu0 }
 0x335   : > { %v1621_v8 = vpack.c.bf16 %v1614_v7, %v1614_v7  ;;  %v1616_v9 = vpop.f32.mrb[9].mxu0  ;;  %v12667_v7 = vld [vmem:[#allocation2 + $0x424] ss:$8 sps:$4 sm:$0xff]  }
 0x336   : > { %v1622_v11 = vpack.c.bf16 %v1616_v9, %v1616_v9  ;;  %v1618_v12 = vpop.f32.mrb[10].mxu0  ;;  %v12670_v9 = vld [vmem:[#allocation2 + $0x434] ss:$8 sps:$4 sm:$0xff]  }
 0x337   : > { %v1619_v13 = vpop.f32.mrb[11].mxu0  ;;  %v1629_v16 = vand.u32 %v1621_v8, %v14282_v10  ;;  %v12669_v8 = vld [vmem:[#allocation2 + $0x420] ss:$8 sps:$4 sm:$0xff]   ;;  %v12673_v12 = vld [vmem:[#allocation2 + $0x444] ss:$8 sps:$4 sm:$0xff]  }
 0x338   : > { %v1632_v14 = vand.u32 %v1622_v11, %v14282_v10  ;;  %v12672_v11 = vld [vmem:[#allocation2 + $0x430] ss:$8 sps:$4 sm:$0xff]   ;;  %v12675_v13 = vld [vmem:[#allocation2 + $0x440] ss:$8 sps:$4 sm:$0xff]  }
 0x33a   : > { %1634 = vmatprep.subr.bf16.mxu1 %v1632_v14  ;;  %v12676_v14 = vld [vmem:[#allocation2 + $0x454] ss:$8 sps:$4 sm:$0xff]  }
 0x33b   : > { %1635 = vmatpush1.bf16.msra.mxu1 %v1629_v16  ;;  %v12679_v16 = vld [vmem:[#allocation2 + $0x464] ss:$8 sps:$4 sm:$0xff]  }
 0x33c   : > { %1870 = vmatprep.subr.bf16.mxu1 %v12613_v15  ;;  %v12678_v15 = vld [vmem:[#allocation2 + $0x450] ss:$8 sps:$4 sm:$0xff]  }
 0x33e   : > { %10893 = vmatmul.mubr.msk.bf16.vlgmr.msra.gmra.mrb[8].mxu1 %vm1282_vm2, %v10892_v17  ;;  %v12681_v17 = vld [vmem:[#allocation2 + $0x460] ss:$8 sps:$4 sm:$0xff]  }
 0x33f   : > { %1871 = vmatpush1.bf16.msra.mxu1 %v12615_v18  ;;  %1902 = vmatprep.mubr.bf16.mxu1 %v14270_v52  ;;  %v12682_v18 = vld [vmem:[#allocation2 + $0x474] ss:$8 sps:$4 sm:$0xff]  }
 0x340   : > { %1872 = vmatprep.subr.bf16.mxu1 %v12616_v19  ;;  %v12684_v19 = vld [vmem:[#allocation2 + $0x470] ss:$8 sps:$4 sm:$0xff]  }
 0x343   : > { %1873 = vmatpush1.bf16.msra.mxu1 %v12618_v20  ;;  %v12685_v20 = vld [vmem:[#allocation2 + $0x484] ss:$8 sps:$4 sm:$0xff]  }
 0x344   : > { %1874 = vmatprep.subr.bf16.mxu1 %v12619_v21  ;;  %v12687_v21 = vld [vmem:[#allocation2 + $0x480] ss:$8 sps:$4 sm:$0xff]  }
 0x347   : > { %1875 = vmatpush1.bf16.msra.mxu1 %v12621_v22  ;;  %v12688_v22 = vld [vmem:[#allocation2 + $0x494] ss:$8 sps:$4 sm:$0xff]  }
 0x348   : > { %1876 = vmatprep.subr.bf16.mxu1 %v12622_v23  ;;  %v12690_v23 = vld [vmem:[#allocation2 + $0x490] ss:$8 sps:$4 sm:$0xff]  }
 0x34b   : > { %1877 = vmatpush1.bf16.msra.mxu1 %v12624_v24  ;;  %v12691_v24 = vld [vmem:[#allocation2 + $0x4a4] ss:$8 sps:$4 sm:$0xff]  }
 0x34c   : > { %1878 = vmatprep.subr.bf16.mxu1 %v12625_v25  ;;  %v12693_v25 = vld [vmem:[#allocation2 + $0x4a0] ss:$8 sps:$4 sm:$0xff]  }
 0x34f   : > { %1879 = vmatpush1.bf16.msra.mxu1 %v12627_v26  ;;  %v12694_v26 = vld [vmem:[#allocation2 + $0x4b4] ss:$8 sps:$4 sm:$0xff]  }
 0x350   : > { %1880 = vmatprep.subr.bf16.mxu1 %v12628_v27  ;;  %v12696_v27 = vld [vmem:[#allocation2 + $0x4b0] ss:$8 sps:$4 sm:$0xff]  }
 0x353   : > { %1881 = vmatpush1.bf16.msra.mxu1 %v12630_v28  ;;  %v12697_v28 = vld [vmem:[#allocation2 + $0x4c4] ss:$8 sps:$4 sm:$0xff]  }
 0x354   : > { %1882 = vmatprep.subr.bf16.mxu1 %v12631_v29  ;;  %v12699_v29 = vld [vmem:[#allocation2 + $0x4c0] ss:$8 sps:$4 sm:$0xff]  }
 0x357   : > { %1883 = vmatpush1.bf16.msra.mxu1 %v12633_v30  ;;  %v12700_v30 = vld [vmem:[#allocation2 + $0x4d4] ss:$8 sps:$4 sm:$0xff]  }
 0x358   : > { %1884 = vmatprep.subr.bf16.mxu1 %v12634_v31  ;;  %v12702_v31 = vld [vmem:[#allocation2 + $0x4d0] ss:$8 sps:$4 sm:$0xff]  }
 0x35b   : > { %1885 = vmatpush1.bf16.msra.mxu1 %v12636_v32  ;;  %v12703_v32 = vld [vmem:[#allocation2 + $0x4e4] ss:$8 sps:$4 sm:$0xff]  }
 0x35c   : > { %1886 = vmatprep.subr.bf16.mxu1 %v12637_v33  ;;  %v12705_v33 = vld [vmem:[#allocation2 + $0x4e0] ss:$8 sps:$4 sm:$0xff]  }
 0x35f   : > { %1887 = vmatpush1.bf16.msra.mxu1 %v12639_v34  ;;  %v12706_v34 = vld [vmem:[#allocation2 + $0x4f4] ss:$8 sps:$4 sm:$0xff]  }
 0x360   : > { %1888 = vmatprep.subr.bf16.mxu1 %v12640_v35  ;;  %v12708_v35 = vld [vmem:[#allocation2 + $0x4f0] ss:$8 sps:$4 sm:$0xff]  }
 0x363   : > { %1889 = vmatpush1.bf16.msra.mxu1 %v12642_v36 }
 0x364   : > { %1890 = vmatprep.subr.bf16.mxu1 %v12643_v37 }
 0x367   : > { %1891 = vmatpush1.bf16.msra.mxu1 %v12645_v38 }
 0x368   : > { %1892 = vmatprep.subr.bf16.mxu1 %v12646_v39 }
 0x36b   : > { %1893 = vmatpush1.bf16.msra.mxu1 %v12648_v40 }
 0x36c   : > { %1894 = vmatprep.subr.bf16.mxu1 %v12649_v41 }
 0x36f   : > { %1895 = vmatpush1.bf16.msra.mxu1 %v12651_v42 }
 0x370   : > { %1896 = vmatprep.subr.bf16.mxu1 %v12652_v43 }
 0x373   : > { %1897 = vmatpush1.bf16.msra.mxu1 %v12654_v44 }
 0x374   : > { %1898 = vmatprep.subr.bf16.mxu1 %v12655_v45 }
 0x377   : > { %1899 = vmatpush1.bf16.msra.mxu1 %v12657_v46 }
 0x378   : > { %1900 = vmatprep.subr.bf16.mxu1 %v12658_v47 }
 0x37b   : > { %1901 = vmatpush1.bf16.msra.mxu1 %v12660_v48 }
 0x37e   : > { %1903 = vmatmul.mubr.bf16.vlgmr.msra.gmra.mrb[12].mxu1 %v14274_v3 }
 0x37f   : > { %2246 = vmatprep.mubr.bf16.mxu1 %v16675_v4 }
 0x411   : > { %v1668_v49 = vpop.f32.mrb[8].mxu1 }
 0x412   : > { %v1670_v50 = vpop.f32.mrb[9].mxu1  ;;  %v14314_v51 = vadd.f32 %v1668_v49, %v14300_v61  ;;  %v10926_v61 = vld [vmem:[%s16640_s8 + $0xc] sm:$0xf] }
 0x413   : > { %v1672_v53 = vpop.f32.mrb[10].mxu1  ;;  %v14317_v54 = vadd.f32 %v1670_v50, %v14302_v0  ;;  %v12663_v0 = vld [vmem:[#allocation2 + $0x400] ss:$8 sps:$4 sm:$0xff]   ;;  %v14335_v49 = vld [vmem:[#allocation2 + $0x504] ss:$8 sps:$4 sm:$0xff]  }
 0x414   : > { %v1673_v55 = vpop.f32.mrb[11].mxu1  ;;  %v14341_v53 = vld [vmem:[#allocation2 + $0x500] ss:$8 sps:$4 sm:$0xff]  }
 0x415   : > { %v14348_v55 = vld [vmem:[#allocation2 + $0x510] ss:$8 sps:$4 sm:$0xff]  }
 0x451   : > { %v1904_v56 = vpop.f32.mrb[12].mxu1 }
 0x452   : > { %v1911_v57 = vpack.c.bf16 %v1904_v56, %v1904_v56  ;;  %v1906_v58 = vpop.f32.mrb[13].mxu1  ;;  %v14352_v56 = vld [vmem:[#allocation2 + $0x524] ss:$8 sps:$4 sm:$0xff]  }
 0x453   : > { %v1912_v59 = vpack.c.bf16 %v1906_v58, %v1906_v58  ;;  %v1908_v60 = vpop.f32.mrb[14].mxu1  ;;  %v14358_v58 = vld [vmem:[#allocation2 + $0x534] ss:$8 sps:$4 sm:$0xff]  }
 0x454   : > { %v1909_v62 = vpop.f32.mrb[15].mxu1  ;;  %v1919_v2 = vand.u32 %v1911_v57, %v14282_v10  ;;  %v14355_v57 = vld [vmem:[#allocation2 + $0x520] ss:$8 sps:$4 sm:$0xff]   ;;  %v14364_v60 = vld [vmem:[#allocation2 + $0x544] ss:$8 sps:$4 sm:$0xff]  }
 0x455   : > { %v1922_v63 = vand.u32 %v1912_v59, %v14282_v10  ;;  %v14361_v59 = vld [vmem:[#allocation2 + $0x530] ss:$8 sps:$4 sm:$0xff]   ;;  %v14367_v62 = vld [vmem:[#allocation2 + $0x540] ss:$8 sps:$4 sm:$0xff]  }
 0x457   : > { %1924 = vmatprep.subr.bf16.mxu0 %v1922_v63  ;;  %v14370_v63 = vld [vmem:[#allocation2 + $0x554] ss:$8 sps:$4 sm:$0xff]  }
 0x458   : > { %1925 = vmatpush1.bf16.msra.mxu0 %v1919_v2  ;;  %v14376_v2 = vld [vmem:[#allocation2 + $0x564] ss:$8 sps:$4 sm:$0xff]  }
 0x459   : > { %2160 = vmatprep.subr.bf16.mxu0 %v12661_v1  ;;  %v14373_v1 = vld [vmem:[#allocation2 + $0x550] ss:$8 sps:$4 sm:$0xff]   ;;  %16902 = vst [vmem:[#allocation21_spill] sm:$0xff] %v14376_v2 }
 0x45b   : > { %10927 = vmatmul.mubr.msk.bf16.vlgmr.msra.gmra.mrb[12].mxu0 %vm1282_vm2, %v10926_v61  ;;  %v14379_v61 = vld [vmem:[#allocation2 + $0x560] ss:$8 sps:$4 sm:$0xff]  }
 0x45c   : > { %2161 = vmatpush1.bf16.msra.mxu0 %v12663_v0  ;;  %2192 = vmatprep.mubr.bf16.mxu0 %v14270_v52  ;;  %16903 = vst [vmem:[#allocation22_spill] sm:$0xff] %v14379_v61  ;;  %v14382_v0 = vld [vmem:[#allocation2 + $0x574] ss:$8 sps:$4 sm:$0xff]  }
 0x45d   : > { %2162 = vmatprep.subr.bf16.mxu0 %v12664_v5  ;;  %16904 = vst [vmem:[#allocation23_spill] sm:$0xff] %v14382_v0  ;;  %v14385_v5 = vld [vmem:[#allocation2 + $0x570] ss:$8 sps:$4 sm:$0xff]  }
 0x45e   : > { %16905 = vst [vmem:[#allocation24_spill] sm:$0xff] %v14385_v5 }
 0x460   : > { %2163 = vmatpush1.bf16.msra.mxu0 %v12666_v6  ;;  %v14388_v6 = vld [vmem:[#allocation2 + $0x584] ss:$8 sps:$4 sm:$0xff]  }
 0x461   : > { %2164 = vmatprep.subr.bf16.mxu0 %v12667_v7  ;;  %16906 = vst [vmem:[#allocation25_spill] sm:$0xff] %v14388_v6  ;;  %v14391_v7 = vld [vmem:[#allocation2 + $0x580] ss:$8 sps:$4 sm:$0xff]  }
 0x462   : > { %16907 = vst [vmem:[#allocation26_spill] sm:$0xff] %v14391_v7 }
 0x464   : > { %2165 = vmatpush1.bf16.msra.mxu0 %v12669_v8  ;;  %v14394_v8 = vld [vmem:[#allocation2 + $0x594] ss:$8 sps:$4 sm:$0xff]  }
 0x465   : > { %2166 = vmatprep.subr.bf16.mxu0 %v12670_v9  ;;  %16908 = vst [vmem:[#allocation27_spill] sm:$0xff] %v14394_v8  ;;  %v14397_v9 = vld [vmem:[#allocation2 + $0x590] ss:$8 sps:$4 sm:$0xff]  }
 0x466   : > { %16909 = vst [vmem:[#allocation28_spill] sm:$0xff] %v14397_v9 }
 0x468   : > { %2167 = vmatpush1.bf16.msra.mxu0 %v12672_v11  ;;  %v14400_v11 = vld [vmem:[#allocation2 + $0x5a4] ss:$8 sps:$4 sm:$0xff]  }
 0x469   : > { %2168 = vmatprep.subr.bf16.mxu0 %v12673_v12  ;;  %16910 = vst [vmem:[#allocation29_spill] sm:$0xff] %v14400_v11  ;;  %v14403_v12 = vld [vmem:[#allocation2 + $0x5a0] ss:$8 sps:$4 sm:$0xff]  }
 0x46a   : > { %16911 = vst [vmem:[#allocation30_spill] sm:$0xff] %v14403_v12 }
 0x46c   : > { %2169 = vmatpush1.bf16.msra.mxu0 %v12675_v13  ;;  %v14406_v13 = vld [vmem:[#allocation2 + $0x5b4] ss:$8 sps:$4 sm:$0xff]  }
 0x46d   : > { %2170 = vmatprep.subr.bf16.mxu0 %v12676_v14  ;;  %16912 = vst [vmem:[#allocation31_spill] sm:$0xff] %v14406_v13  ;;  %v14409_v14 = vld [vmem:[#allocation2 + $0x5b0] ss:$8 sps:$4 sm:$0xff]  }
 0x46e   : > { %16913 = vst [vmem:[#allocation32_spill] sm:$0xff] %v14409_v14 }
 0x470   : > { %2171 = vmatpush1.bf16.msra.mxu0 %v12678_v15  ;;  %v14412_v15 = vld [vmem:[#allocation2 + $0x5c4] ss:$8 sps:$4 sm:$0xff]  }
 0x471   : > { %2172 = vmatprep.subr.bf16.mxu0 %v12679_v16  ;;  %16914 = vst [vmem:[#allocation33_spill] sm:$0xff] %v14412_v15  ;;  %v14415_v16 = vld [vmem:[#allocation2 + $0x5c0] ss:$8 sps:$4 sm:$0xff]  }
 0x472   : > { %16915 = vst [vmem:[#allocation34_spill] sm:$0xff] %v14415_v16 }
 0x474   : > { %2173 = vmatpush1.bf16.msra.mxu0 %v12681_v17  ;;  %v14418_v17 = vld [vmem:[#allocation2 + $0x5d4] ss:$8 sps:$4 sm:$0xff]  }
 0x475   : > { %2174 = vmatprep.subr.bf16.mxu0 %v12682_v18  ;;  %16916 = vst [vmem:[#allocation35_spill] sm:$0xff] %v14418_v17  ;;  %v14421_v18 = vld [vmem:[#allocation2 + $0x5d0] ss:$8 sps:$4 sm:$0xff]  }
 0x476   : > { %16917 = vst [vmem:[#allocation36_spill] sm:$0xff] %v14421_v18 }
 0x478   : > { %2175 = vmatpush1.bf16.msra.mxu0 %v12684_v19  ;;  %v14424_v19 = vld [vmem:[#allocation2 + $0x5e4] ss:$8 sps:$4 sm:$0xff]  }
 0x479   : > { %2176 = vmatprep.subr.bf16.mxu0 %v12685_v20  ;;  %16918 = vst [vmem:[#allocation37_spill] sm:$0xff] %v14424_v19  ;;  %v14427_v20 = vld [vmem:[#allocation2 + $0x5e0] ss:$8 sps:$4 sm:$0xff]  }
 0x47a   : > { %16919 = vst [vmem:[#allocation38_spill] sm:$0xff] %v14427_v20 }
 0x47c   : > { %2177 = vmatpush1.bf16.msra.mxu0 %v12687_v21  ;;  %v14430_v21 = vld [vmem:[#allocation2 + $0x5f4] ss:$8 sps:$4 sm:$0xff]  }
 0x47d   : > { %2178 = vmatprep.subr.bf16.mxu0 %v12688_v22  ;;  %16920 = vst [vmem:[#allocation39_spill] sm:$0xff] %v14430_v21  ;;  %v14433_v22 = vld [vmem:[#allocation2 + $0x5f0] ss:$8 sps:$4 sm:$0xff]  }
 0x47e   : > { %16921 = vst [vmem:[#allocation40_spill] sm:$0xff] %v14433_v22 }
 0x480   : > { %2179 = vmatpush1.bf16.msra.mxu0 %v12690_v23 }
 0x481   : > { %2180 = vmatprep.subr.bf16.mxu0 %v12691_v24 }
 0x484   : > { %2181 = vmatpush1.bf16.msra.mxu0 %v12693_v25 }
 0x485   : > { %2182 = vmatprep.subr.bf16.mxu0 %v12694_v26 }
 0x488   : > { %2183 = vmatpush1.bf16.msra.mxu0 %v12696_v27 }
 0x489   : > { %2184 = vmatprep.subr.bf16.mxu0 %v12697_v28 }
 0x48c   : > { %2185 = vmatpush1.bf16.msra.mxu0 %v12699_v29 }
 0x48d   : > { %2186 = vmatprep.subr.bf16.mxu0 %v12700_v30 }
 0x490   : > { %2187 = vmatpush1.bf16.msra.mxu0 %v12702_v31 }
 0x491   : > { %2188 = vmatprep.subr.bf16.mxu0 %v12703_v32 }
 0x494   : > { %2189 = vmatpush1.bf16.msra.mxu0 %v12705_v33 }
 0x495   : > { %2190 = vmatprep.subr.bf16.mxu0 %v12706_v34 }
 0x498   : > { %2191 = vmatpush1.bf16.msra.mxu0 %v12708_v35 }
 0x49b   : > { %2193 = vmatmul.mubr.bf16.vlgmr.msra.gmra.mrb[16].mxu0 %v14274_v3 }
 0x49c   : > { %2536 = vmatprep.mubr.bf16.mxu0 %v16675_v4 }
 0x52e   : > { %v1958_v36 = vpop.f32.mrb[12].mxu0 }
 0x52f   : > { %v14329_v37 = vadd.f32 %v1958_v36, %v14314_v51  ;;  %v1960_v38 = vpop.f32.mrb[13].mxu0  ;;  %v10960_v51 = vld [vmem:[%s16640_s8 + $0x10] sm:$0xf]  ;;  %v12757_v36 = vld [vmem:[#allocation2 + $0x604] ss:$8 sps:$4 sm:$0xff]  }
 0x530   : > { %v14332_v39 = vadd.f32 %v1960_v38, %v14317_v54  ;;  %v1962_v40 = vpop.f32.mrb[14].mxu0  ;;  %v14344_v54 = vld [vmem:[#allocation2 + $0x514] ss:$8 sps:$4 sm:$0xff]  }
 0x531   : > { %v1963_v41 = vpop.f32.mrb[15].mxu0  ;;  %v12760_v40 = vld [vmem:[#allocation2 + $0x614] ss:$8 sps:$4 sm:$0xff]  }
 0x532   : > { %v12762_v41 = vld [vmem:[#allocation2 + $0x610] ss:$8 sps:$4 sm:$0xff]  }
 0x56e   : > { %v2194_v42 = vpop.f32.mrb[16].mxu0 }
 0x56f   : > { %v2201_v43 = vpack.c.bf16 %v2194_v42, %v2194_v42  ;;  %v2196_v44 = vpop.f32.mrb[17].mxu0  ;;  %v12763_v42 = vld [vmem:[#allocation2 + $0x624] ss:$8 sps:$4 sm:$0xff]  }
 0x570   : > { %v2202_v45 = vpack.c.bf16 %v2196_v44, %v2196_v44  ;;  %v2198_v46 = vpop.f32.mrb[18].mxu0  ;;  %v12766_v44 = vld [vmem:[#allocation2 + $0x634] ss:$8 sps:$4 sm:$0xff]  }
 0x571   : > { %v2199_v47 = vpop.f32.mrb[19].mxu0  ;;  %v2209_v50 = vand.u32 %v2201_v43, %v14282_v10  ;;  %v12765_v43 = vld [vmem:[#allocation2 + $0x620] ss:$8 sps:$4 sm:$0xff]   ;;  %v12769_v46 = vld [vmem:[#allocation2 + $0x644] ss:$8 sps:$4 sm:$0xff]  }
 0x572   : > { %v2212_v48 = vand.u32 %v2202_v45, %v14282_v10  ;;  %v12768_v45 = vld [vmem:[#allocation2 + $0x630] ss:$8 sps:$4 sm:$0xff]   ;;  %v12771_v47 = vld [vmem:[#allocation2 + $0x640] ss:$8 sps:$4 sm:$0xff]  }
 0x574   : > { %2214 = vmatprep.subr.bf16.mxu1 %v2212_v48  ;;  %v12772_v48 = vld [vmem:[#allocation2 + $0x654] ss:$8 sps:$4 sm:$0xff]  }
 0x575   : > { %2215 = vmatpush1.bf16.msra.mxu1 %v2209_v50  ;;  %v12774_v50 = vld [vmem:[#allocation2 + $0x650] ss:$8 sps:$4 sm:$0xff]  }
 0x576   : > { %2450 = vmatprep.subr.bf16.mxu1 %v14335_v49 }
 0x578   : > { %10961 = vmatmul.mubr.msk.bf16.vlgmr.msra.gmra.mrb[16].mxu1 %vm1282_vm2, %v10960_v51  ;;  %v12775_v51 = vld [vmem:[#allocation2 + $0x664] ss:$8 sps:$4 sm:$0xff]  }
 0x579   : > { %2451 = vmatpush1.bf16.msra.mxu1 %v14341_v53  ;;  %2482 = vmatprep.mubr.bf16.mxu1 %v14270_v52 }
 0x57a   : > { %2452 = vmatprep.subr.bf16.mxu1 %v14344_v54 }
 0x57d   : > { %2453 = vmatpush1.bf16.msra.mxu1 %v14348_v55 }
 0x57e   : > { %2454 = vmatprep.subr.bf16.mxu1 %v14352_v56 }
 0x581   : > { %2455 = vmatpush1.bf16.msra.mxu1 %v14355_v57 }
 0x582   : > { %2456 = vmatprep.subr.bf16.mxu1 %v14358_v58 }
 0x585   : > { %2457 = vmatpush1.bf16.msra.mxu1 %v14361_v59 }
 0x586   : > { %2458 = vmatprep.subr.bf16.mxu1 %v14364_v60 }
 0x589   : > { %2459 = vmatpush1.bf16.msra.mxu1 %v14367_v62 }
 0x58a   : > { %2460 = vmatprep.subr.bf16.mxu1 %v14370_v63 }
 0x58d   : > { %2461 = vmatpush1.bf16.msra.mxu1 %v14373_v1 }
 0x58e   : > { %2462 = vmatprep.subr.bf16.mxu1 %v14376_v2  ;;  %v14572_v2 = vld [vmem:[#allocation2 + $0x804] ss:$8 sps:$4 sm:$0xff]  }
 0x591   : > { %2463 = vmatpush1.bf16.msra.mxu1 %v14379_v61 }
 0x592   : > { %2464 = vmatprep.subr.bf16.mxu1 %v14382_v0 }
 0x595   : > { %2465 = vmatpush1.bf16.msra.mxu1 %v14385_v5 }
 0x596   : > { %2466 = vmatprep.subr.bf16.mxu1 %v14388_v6 }
 0x599   : > { %2467 = vmatpush1.bf16.msra.mxu1 %v14391_v7 }
 0x59a   : > { %2468 = vmatprep.subr.bf16.mxu1 %v14394_v8 }
 0x59d   : > { %2469 = vmatpush1.bf16.msra.mxu1 %v14397_v9 }
 0x59e   : > { %2470 = vmatprep.subr.bf16.mxu1 %v14400_v11 }
 0x5a1   : > { %2471 = vmatpush1.bf16.msra.mxu1 %v14403_v12 }
 0x5a2   : > { %2472 = vmatprep.subr.bf16.mxu1 %v14406_v13 }
 0x5a5   : > { %2473 = vmatpush1.bf16.msra.mxu1 %v14409_v14 }
 0x5a6   : > { %2474 = vmatprep.subr.bf16.mxu1 %v14412_v15 }
 0x5a9   : > { %2475 = vmatpush1.bf16.msra.mxu1 %v14415_v16 }
 0x5aa   : > { %2476 = vmatprep.subr.bf16.mxu1 %v14418_v17  ;;  %v16922_v17 = vmov 0  }
 0x5ad   : > { %2477 = vmatpush1.bf16.msra.mxu1 %v14421_v18  ;;  %v14559_v18 = vld [vmem:[#allocation2 + $0x7f0] ss:$8 sps:$4 sm:$0xff]  }
 0x5ae   : > { %2478 = vmatprep.subr.bf16.mxu1 %v14424_v19  ;;  %v14556_v19 = vld [vmem:[#allocation2 + $0x7f4] ss:$8 sps:$4 sm:$0xff]  }
 0x5b1   : > { %2479 = vmatpush1.bf16.msra.mxu1 %v14427_v20  ;;  %v14553_v20 = vld [vmem:[#allocation2 + $0x7e0] ss:$8 sps:$4 sm:$0xff]  }
 0x5b2   : > { %2480 = vmatprep.subr.bf16.mxu1 %v14430_v21  ;;  %v14550_v21 = vld [vmem:[#allocation2 + $0x7e4] ss:$8 sps:$4 sm:$0xff]  }
 0x5b5   : > { %2481 = vmatpush1.bf16.msra.mxu1 %v14433_v22  ;;  %v14547_v22 = vld [vmem:[#allocation2 + $0x7d0] ss:$8 sps:$4 sm:$0xff]  }
 0x5b8   : > { %2483 = vmatmul.mubr.bf16.vlgmr.msra.gmra.mrb[20].mxu1 %v14274_v3 }
 0x5b9   : > { %2826 = vmatprep.mubr.bf16.mxu1 %v16675_v4 }
 0x64b   : > { %v2248_v23 = vpop.f32.mrb[16].mxu1 }
 0x64c   : > { %v2250_v24 = vpop.f32.mrb[17].mxu1  ;;  %v14440_v25 = vadd.f32 %v2248_v23, %v14329_v37  ;;  %v10994_v37 = vld [vmem:[%s16640_s8 + $0x14] sm:$0xf]  ;;  %v12777_v23 = vld [vmem:[#allocation2 + $0x660] ss:$8 sps:$4 sm:$0xff]  }
 0x64d   : > { %v2252_v26 = vpop.f32.mrb[18].mxu1  ;;  %v14443_v27 = vadd.f32 %v2250_v24, %v14332_v39  ;;  %v12759_v39 = vld [vmem:[#allocation2 + $0x600] ss:$8 sps:$4 sm:$0xff]   ;;  %v12778_v24 = vld [vmem:[#allocation2 + $0x674] ss:$8 sps:$4 sm:$0xff]  }
 0x64e   : > { %v2253_v28 = vpop.f32.mrb[19].mxu1  ;;  %v12780_v26 = vld [vmem:[#allocation2 + $0x670] ss:$8 sps:$4 sm:$0xff]  }
 0x64f   : > { %v12781_v28 = vld [vmem:[#allocation2 + $0x684] ss:$8 sps:$4 sm:$0xff]  }
 0x68b   : > { %v2484_v29 = vpop.f32.mrb[20].mxu1 }
 0x68c   : > { %v2491_v30 = vpack.c.bf16 %v2484_v29, %v2484_v29  ;;  %v2486_v31 = vpop.f32.mrb[21].mxu1  ;;  %v12783_v29 = vld [vmem:[#allocation2 + $0x680] ss:$8 sps:$4 sm:$0xff]  }
 0x68d   : > { %v2492_v32 = vpack.c.bf16 %v2486_v31, %v2486_v31  ;;  %v2488_v33 = vpop.f32.mrb[22].mxu1  ;;  %v12786_v31 = vld [vmem:[#allocation2 + $0x690] ss:$8 sps:$4 sm:$0xff]  }
 0x68e   : > { %v2489_v34 = vpop.f32.mrb[23].mxu1  ;;  %v2499_v38 = vand.u32 %v2491_v30, %v14282_v10  ;;  %v12784_v30 = vld [vmem:[#allocation2 + $0x694] ss:$8 sps:$4 sm:$0xff]   ;;  %v12789_v33 = vld [vmem:[#allocation2 + $0x6a0] ss:$8 sps:$4 sm:$0xff]  }
 0x68f   : > { %v2502_v35 = vand.u32 %v2492_v32, %v14282_v10  ;;  %v12787_v32 = vld [vmem:[#allocation2 + $0x6a4] ss:$8 sps:$4 sm:$0xff]   ;;  %v12790_v34 = vld [vmem:[#allocation2 + $0x6b4] ss:$8 sps:$4 sm:$0xff]  }
 0x691   : > { %2504 = vmatprep.subr.bf16.mxu0 %v2502_v35  ;;  %v12792_v35 = vld [vmem:[#allocation2 + $0x6b0] ss:$8 sps:$4 sm:$0xff]  }
 0x692   : > { %2505 = vmatpush1.bf16.msra.mxu0 %v2499_v38  ;;  %v12795_v38 = vld [vmem:[#allocation2 + $0x6c0] ss:$8 sps:$4 sm:$0xff]  }
 0x693   : > { %2740 = vmatprep.subr.bf16.mxu0 %v12757_v36  ;;  %v12793_v36 = vld [vmem:[#allocation2 + $0x6c4] ss:$8 sps:$4 sm:$0xff]  }
 0x695   : > { %10995 = vmatmul.mubr.msk.bf16.vlgmr.msra.gmra.mrb[20].mxu0 %vm1282_vm2, %v10994_v37  ;;  %v12796_v37 = vld [vmem:[#allocation2 + $0x6d4] ss:$8 sps:$4 sm:$0xff]  }
 0x696   : > { %2741 = vmatpush1.bf16.msra.mxu0 %v12759_v39  ;;  %2772 = vmatprep.mubr.bf16.mxu0 %v14270_v52  ;;  %v12798_v39 = vld [vmem:[#allocation2 + $0x6d0] ss:$8 sps:$4 sm:$0xff]  }
 0x697   : > { %2742 = vmatprep.subr.bf16.mxu0 %v12760_v40  ;;  %v12799_v40 = vld [vmem:[#allocation2 + $0x6e4] ss:$8 sps:$4 sm:$0xff]  }
 0x69a   : > { %2743 = vmatpush1.bf16.msra.mxu0 %v12762_v41  ;;  %v12801_v41 = vld [vmem:[#allocation2 + $0x6e0] ss:$8 sps:$4 sm:$0xff]  }
 0x69b   : > { %2744 = vmatprep.subr.bf16.mxu0 %v12763_v42  ;;  %v12802_v42 = vld [vmem:[#allocation2 + $0x6f4] ss:$8 sps:$4 sm:$0xff]  }
 0x69e   : > { %2745 = vmatpush1.bf16.msra.mxu0 %v12765_v43  ;;  %v12804_v43 = vld [vmem:[#allocation2 + $0x6f0] ss:$8 sps:$4 sm:$0xff]  }
 0x69f   : > { %2746 = vmatprep.subr.bf16.mxu0 %v12766_v44 }
 0x6a2   : > { %2747 = vmatpush1.bf16.msra.mxu0 %v12768_v45 }
 0x6a3   : > { %2748 = vmatprep.subr.bf16.mxu0 %v12769_v46 }
 0x6a6   : > { %2749 = vmatpush1.bf16.msra.mxu0 %v12771_v47 }
 0x6a7   : > { %2750 = vmatprep.subr.bf16.mxu0 %v12772_v48 }
 0x6aa   : > { %2751 = vmatpush1.bf16.msra.mxu0 %v12774_v50 }
 0x6ab   : > { %2752 = vmatprep.subr.bf16.mxu0 %v12775_v51 }
 0x6ae   : > { %2753 = vmatpush1.bf16.msra.mxu0 %v12777_v23 }
 0x6af   : > { %2754 = vmatprep.subr.bf16.mxu0 %v12778_v24 }
 0x6b2   : > { %2755 = vmatpush1.bf16.msra.mxu0 %v12780_v26 }
 0x6b3   : > { %2756 = vmatprep.subr.bf16.mxu0 %v12781_v28 }
 0x6b6   : > { %2757 = vmatpush1.bf16.msra.mxu0 %v12783_v29 }
 0x6b7   : > { %2758 = vmatprep.subr.bf16.mxu0 %v12784_v30 }
 0x6ba   : > { %2759 = vmatpush1.bf16.msra.mxu0 %v12786_v31  ;;  %v14461_v31 = vld [vmem:[#allocation2 + $0x704] ss:$8 sps:$4 sm:$0xff]  }
 0x6bb   : > { %2760 = vmatprep.subr.bf16.mxu0 %v12787_v32 }
 0x6be   : > { %2761 = vmatpush1.bf16.msra.mxu0 %v12789_v33  ;;  %v14470_v33 = vld [vmem:[#allocation2 + $0x714] ss:$8 sps:$4 sm:$0xff]  }
 0x6bf   : > { %2762 = vmatprep.subr.bf16.mxu0 %v12790_v34  ;;  %v14474_v34 = vld [vmem:[#allocation2 + $0x710] ss:$8 sps:$4 sm:$0xff]  }
 0x6c2   : > { %2763 = vmatpush1.bf16.msra.mxu0 %v12792_v35  ;;  %v14478_v35 = vld [vmem:[#allocation2 + $0x724] ss:$8 sps:$4 sm:$0xff]  }
 0x6c3   : > { %2764 = vmatprep.subr.bf16.mxu0 %v12793_v36  ;;  %v14481_v36 = vld [vmem:[#allocation2 + $0x720] ss:$8 sps:$4 sm:$0xff]  }
 0x6c6   : > { %2765 = vmatpush1.bf16.msra.mxu0 %v12795_v38  ;;  %v14484_v38 = vld [vmem:[#allocation2 + $0x734] ss:$8 sps:$4 sm:$0xff]  }
 0x6c7   : > { %2766 = vmatprep.subr.bf16.mxu0 %v12796_v37  ;;  %v14487_v37 = vld [vmem:[#allocation2 + $0x730] ss:$8 sps:$4 sm:$0xff]  }
 0x6ca   : > { %2767 = vmatpush1.bf16.msra.mxu0 %v12798_v39  ;;  %v14490_v39 = vld [vmem:[#allocation2 + $0x744] ss:$8 sps:$4 sm:$0xff]  }
 0x6cb   : > { %2768 = vmatprep.subr.bf16.mxu0 %v12799_v40  ;;  %v14493_v40 = vld [vmem:[#allocation2 + $0x740] ss:$8 sps:$4 sm:$0xff]  }
 0x6ce   : > { %2769 = vmatpush1.bf16.msra.mxu0 %v12801_v41  ;;  %v14496_v41 = vld [vmem:[#allocation2 + $0x754] ss:$8 sps:$4 sm:$0xff]  }
 0x6cf   : > { %2770 = vmatprep.subr.bf16.mxu0 %v12802_v42  ;;  %v14499_v42 = vld [vmem:[#allocation2 + $0x750] ss:$8 sps:$4 sm:$0xff]  }
 0x6d2   : > { %2771 = vmatpush1.bf16.msra.mxu0 %v12804_v43  ;;  %v14502_v43 = vld [vmem:[#allocation2 + $0x764] ss:$8 sps:$4 sm:$0xff]  }
 0x6d5   : > { %2773 = vmatmul.mubr.bf16.vlgmr.msra.gmra.mrb[24].mxu0 %v14274_v3 }
 0x6d6   : > { %3116 = vmatprep.mubr.bf16.mxu0 %v16675_v4  ;;  %v14544_v4 = vld [vmem:[#allocation2 + $0x7d4] ss:$8 sps:$4 sm:$0xff]  }
 0x768   : > { %v2538_v44 = vpop.f32.mrb[20].mxu0 }
 0x769   : > { %v14455_v45 = vadd.f32 %v2538_v44, %v14440_v25  ;;  %v2540_v46 = vpop.f32.mrb[21].mxu0  ;;  %v11028_v25 = vld [vmem:[%s16640_s8 + $0x18] sm:$0xf]  ;;  %v14505_v44 = vld [vmem:[#allocation2 + $0x760] ss:$8 sps:$4 sm:$0xff]  }
 0x76a   : > { %v14458_v47 = vadd.f32 %v2540_v46, %v14443_v27  ;;  %v2542_v48 = vpop.f32.mrb[22].mxu0  ;;  %v14467_v27 = vld [vmem:[#allocation2 + $0x700] ss:$8 sps:$4 sm:$0xff]   ;;  %v14508_v46 = vld [vmem:[#allocation2 + $0x774] ss:$8 sps:$4 sm:$0xff]  }
 0x76b   : > { %v2543_v50 = vpop.f32.mrb[23].mxu0  ;;  %v14511_v48 = vld [vmem:[#allocation2 + $0x770] ss:$8 sps:$4 sm:$0xff]  }
 0x76c   : > { %v14514_v50 = vld [vmem:[#allocation2 + $0x784] ss:$8 sps:$4 sm:$0xff]  }
 0x7a8   : > { %v2774_v51 = vpop.f32.mrb[24].mxu0 }
 0x7a9   : > { %v2781_v23 = vpack.c.bf16 %v2774_v51, %v2774_v51  ;;  %v2776_v24 = vpop.f32.mrb[25].mxu0  ;;  %v14517_v51 = vld [vmem:[#allocation2 + $0x780] ss:$8 sps:$4 sm:$0xff]  }
 0x7aa   : > { %v2782_v26 = vpack.c.bf16 %v2776_v24, %v2776_v24  ;;  %v2778_v28 = vpop.f32.mrb[26].mxu0  ;;  %v14523_v24 = vld [vmem:[#allocation2 + $0x790] ss:$8 sps:$4 sm:$0xff]  }
 0x7ab   : > { %v2779_v29 = vpop.f32.mrb[27].mxu0  ;;  %v2789_v32 = vand.u32 %v2781_v23, %v14282_v10  ;;  %v14520_v23 = vld [vmem:[#allocation2 + $0x794] ss:$8 sps:$4 sm:$0xff]   ;;  %v14529_v28 = vld [vmem:[#allocation2 + $0x7a0] ss:$8 sps:$4 sm:$0xff]  }
 0x7ac   : > { %v2792_v30 = vand.u32 %v2782_v26, %v14282_v10  ;;  %v14526_v26 = vld [vmem:[#allocation2 + $0x7a4] ss:$8 sps:$4 sm:$0xff]   ;;  %v14532_v29 = vld [vmem:[#allocation2 + $0x7b4] ss:$8 sps:$4 sm:$0xff]  }
 0x7ae   : > { %2794 = vmatprep.subr.bf16.mxu1 %v2792_v30  ;;  %v14535_v30 = vld [vmem:[#allocation2 + $0x7b0] ss:$8 sps:$4 sm:$0xff]  }
 0x7af   : > { %2795 = vmatpush1.bf16.msra.mxu1 %v2789_v32  ;;  %v14538_v32 = vld [vmem:[#allocation2 + $0x7c4] ss:$8 sps:$4 sm:$0xff]  }
 0x7b0   : > { %3030 = vmatprep.subr.bf16.mxu1 %v14461_v31 }
 0x7b2   : > { %11029 = vmatmul.mubr.msk.bf16.vlgmr.msra.gmra.mrb[24].mxu1 %vm1282_vm2, %v11028_v25  ;;  %v14541_v25 = vld [vmem:[#allocation2 + $0x7c0] ss:$8 sps:$4 sm:$0xff]  }
 0x7b3   : > { %3031 = vmatpush1.bf16.msra.mxu1 %v14467_v27  ;;  %3062 = vmatprep.mubr.bf16.mxu1 %v14270_v52 }
 0x7b4   : > { %3032 = vmatprep.subr.bf16.mxu1 %v14470_v33 }
 0x7b7   : > { %3033 = vmatpush1.bf16.msra.mxu1 %v14474_v34 }
 0x7b8   : > { %3034 = vmatprep.subr.bf16.mxu1 %v14478_v35 }
 0x7bb   : > { %3035 = vmatpush1.bf16.msra.mxu1 %v14481_v36 }
 0x7bc   : > { %3036 = vmatprep.subr.bf16.mxu1 %v14484_v38 }
 0x7bf   : > { %3037 = vmatpush1.bf16.msra.mxu1 %v14487_v37 }
 0x7c0   : > { %3038 = vmatprep.subr.bf16.mxu1 %v14490_v39 }
 0x7c3   : > { %3039 = vmatpush1.bf16.msra.mxu1 %v14493_v40 }
 0x7c4   : > { %3040 = vmatprep.subr.bf16.mxu1 %v14496_v41 }
 0x7c7   : > { %3041 = vmatpush1.bf16.msra.mxu1 %v14499_v42 }
 0x7c8   : > { %3042 = vmatprep.subr.bf16.mxu1 %v14502_v43 }
 0x7cb   : > { %3043 = vmatpush1.bf16.msra.mxu1 %v14505_v44 }
 0x7cc   : > { %3044 = vmatprep.subr.bf16.mxu1 %v14508_v46 }
 0x7cf   : > { %3045 = vmatpush1.bf16.msra.mxu1 %v14511_v48 }
 0x7d0   : > { %3046 = vmatprep.subr.bf16.mxu1 %v14514_v50 }
 0x7d3   : > { %3047 = vmatpush1.bf16.msra.mxu1 %v14517_v51 }
 0x7d4   : > { %3048 = vmatprep.subr.bf16.mxu1 %v14520_v23 }
 0x7d7   : > { %3049 = vmatpush1.bf16.msra.mxu1 %v14523_v24 }
 0x7d8   : > { %3050 = vmatprep.subr.bf16.mxu1 %v14526_v26 }
 0x7db   : > { %3051 = vmatpush1.bf16.msra.mxu1 %v14529_v28 }
 0x7dc   : > { %3052 = vmatprep.subr.bf16.mxu1 %v14532_v29 }
 0x7df   : > { %3053 = vmatpush1.bf16.msra.mxu1 %v14535_v30 }
 0x7e0   : > { %3054 = vmatprep.subr.bf16.mxu1 %v14538_v32 }
 0x7e3   : > { %3055 = vmatpush1.bf16.msra.mxu1 %v14541_v25 }
 0x7e4   : > { %3056 = vmatprep.subr.bf16.mxu1 %v14544_v4 }
 0x7e7   : > { %3057 = vmatpush1.bf16.msra.mxu1 %v14547_v22 }
 0x7e8   : > { %3058 = vmatprep.subr.bf16.mxu1 %v14550_v21 }
 0x7eb   : > { %3059 = vmatpush1.bf16.msra.mxu1 %v14553_v20 }
 0x7ec   : > { %3060 = vmatprep.subr.bf16.mxu1 %v14556_v19 }
 0x7ef   : > { %3061 = vmatpush1.bf16.msra.mxu1 %v14559_v18 }
 0x7f2   : > { %3063 = vmatmul.mubr.bf16.vlgmr.msra.gmra.mrb[28].mxu1 %v14274_v3 }
 0x7f3   : > { %3406 = vmatprep.mubr.bf16.mxu1 %v16922_v17 }
 0x885   : > { %v2828_v16 = vpop.f32.mrb[24].mxu1 }
 0x886   : > { %v2830_v15 = vpop.f32.mrb[25].mxu1  ;;  %v14566_v14 = vadd.f32 %v2828_v16, %v14455_v45  ;;  %v14610_v16 = vld [vmem:[#allocation2 + $0x850] ss:$8 sps:$4 sm:$0xff]   ;;  %v14616_v45 = vld [vmem:[#allocation2 + $0x860] ss:$8 sps:$4 sm:$0xff]  }
 0x887   : > { %v2832_v13 = vpop.f32.mrb[26].mxu1  ;;  %v14569_v12 = vadd.f32 %v2830_v15, %v14458_v47  ;;  %v14578_v15 = vld [vmem:[#allocation2 + $0x800] ss:$8 sps:$4 sm:$0xff]   ;;  %16925 = vst [vmem:[#allocation43_spill] sm:$0xff] %v14610_v16  ;;  %16927 = vst [vmem:[#allocation45_spill] sm:$0xff] %v14616_v45 }
 0x888   : > { %v2833_v11 = vpop.f32.mrb[27].mxu1  ;;  %v11062_v13 = vld [vmem:[%s16640_s8 + $0x1c] sm:$0xf] }
 0x889   : > { %v14607_v11 = vld [vmem:[#allocation2 + $0x854] ss:$8 sps:$4 sm:$0xff]  }
 0x88a   : > { %16924 = vst [vmem:[#allocation42_spill] sm:$0xff] %v14607_v11  ;;  %v14619_v47 = vld [vmem:[#allocation2 + $0x874] ss:$8 sps:$4 sm:$0xff]  }
 0x88b   : > { %16928 = vst [vmem:[#allocation46_spill] sm:$0xff] %v14619_v47 }
 0x8c5   : > { %v3064_v9 = vpop.f32.mrb[28].mxu1 }
 0x8c6   : > { %v3071_v8 = vpack.c.bf16 %v3064_v9, %v3064_v9  ;;  %v3066_v7 = vpop.f32.mrb[29].mxu1  ;;  %v14581_v9 = vld [vmem:[#allocation2 + $0x814] ss:$8 sps:$4 sm:$0xff]  }
 0x8c7   : > { %v3072_v6 = vpack.c.bf16 %v3066_v7, %v3066_v7  ;;  %v3068_v5 = vpop.f32.mrb[30].mxu1  ;;  %v14598_v7 = vld [vmem:[#allocation2 + $0x830] ss:$8 sps:$4 sm:$0xff]  }
 0x8c8   : > { %v3069_v0 = vpop.f32.mrb[31].mxu1  ;;  %v3079_v17 = vand.u32 %v3071_v8, %v14282_v10  ;;  %v14592_v5 = vld [vmem:[#allocation2 + $0x820] ss:$8 sps:$4 sm:$0xff]   ;;  %v14601_v8 = vld [vmem:[#allocation2 + $0x844] ss:$8 sps:$4 sm:$0xff]  }
 0x8c9   : > { %v3082_v61 = vand.u32 %v3072_v6, %v14282_v10  ;;  %v14585_v0 = vld [vmem:[#allocation2 + $0x810] ss:$8 sps:$4 sm:$0xff]   ;;  %v14595_v6 = vld [vmem:[#allocation2 + $0x834] ss:$8 sps:$4 sm:$0xff]  }
 0x8cb   : > { %3084 = vmatprep.subr.bf16.mxu0 %v3082_v61  ;;  %v14589_v61 = vld [vmem:[#allocation2 + $0x824] ss:$8 sps:$4 sm:$0xff]  }
 0x8cc   : > { %3085 = vmatpush1.bf16.msra.mxu0 %v3079_v17  ;;  %v14613_v17 = vld [vmem:[#allocation2 + $0x864] ss:$8 sps:$4 sm:$0xff]  }
 0x8cd   : > { %3320 = vmatprep.subr.bf16.mxu0 %v14572_v2  ;;  %16926 = vst [vmem:[#allocation44_spill] sm:$0xff] %v14613_v17 }
 0x8cf   : > { %11063 = vmatmul.mubr.msk.bf16.vlgmr.msra.gmra.mrb[28].mxu0 %vm1282_vm2, %v11062_v13  ;;  %v14622_v13 = vld [vmem:[#allocation2 + $0x870] ss:$8 sps:$4 sm:$0xff]  }
 0x8d0   : > { %3321 = vmatpush1.bf16.msra.mxu0 %v14578_v15  ;;  %3352 = vmatprep.mubr.bf16.mxu0 %v14270_v52  ;;  %v14604_v52 = vld [vmem:[#allocation2 + $0x840] ss:$8 sps:$4 sm:$0xff]   ;;  %16929 = vst [vmem:[#allocation47_spill] sm:$0xff] %v14622_v13 }
 0x8d1   : > { %3322 = vmatprep.subr.bf16.mxu0 %v14581_v9  ;;  %16923 = vst [vmem:[#allocation41_spill] sm:$0xff] %v14604_v52 }
 0x8d4   : > { %3323 = vmatpush1.bf16.msra.mxu0 %v14585_v0 }
 0x8d5   : > { %3324 = vmatprep.subr.bf16.mxu0 %v14589_v61 }
 0x8d8   : > { %3325 = vmatpush1.bf16.msra.mxu0 %v14592_v5 }
 0x8d9   : > { %3326 = vmatprep.subr.bf16.mxu0 %v14595_v6 }
 0x8dc   : > { %3327 = vmatpush1.bf16.msra.mxu0 %v14598_v7 }
 0x8dd   : > { %3328 = vmatprep.subr.bf16.mxu0 %v14601_v8 }
 0x8e0   : > { %3329 = vmatpush1.bf16.msra.mxu0 %v14604_v52  ;;  %v14625_v52 = vld [vmem:[#allocation2 + $0x884] ss:$8 sps:$4 sm:$0xff]  }
 0x8e1   : > { %3330 = vmatprep.subr.bf16.mxu0 %v14607_v11  ;;  %16930 = vst [vmem:[#allocation48_spill] sm:$0xff] %v14625_v52  ;;  %v14628_v11 = vld [vmem:[#allocation2 + $0x880] ss:$8 sps:$4 sm:$0xff]  }
 0x8e2   : > { %16931 = vst [vmem:[#allocation49_spill] sm:$0xff] %v14628_v11 }
 0x8e4   : > { %3331 = vmatpush1.bf16.msra.mxu0 %v14610_v16  ;;  %v14631_v16 = vld [vmem:[#allocation2 + $0x894] ss:$8 sps:$4 sm:$0xff]  }
 0x8e5   : > { %3332 = vmatprep.subr.bf16.mxu0 %v14613_v17  ;;  %16932 = vst [vmem:[#allocation50_spill] sm:$0xff] %v14631_v16  ;;  %v14634_v17 = vld [vmem:[#allocation2 + $0x890] ss:$8 sps:$4 sm:$0xff]  }
 0x8e6   : > { %16933 = vst [vmem:[#allocation51_spill] sm:$0xff] %v14634_v17 }
 0x8e8   : > { %3333 = vmatpush1.bf16.msra.mxu0 %v14616_v45  ;;  %v14637_v45 = vld [vmem:[#allocation2 + $0x8a4] ss:$8 sps:$4 sm:$0xff]  }
 0x8e9   : > { %3334 = vmatprep.subr.bf16.mxu0 %v14619_v47  ;;  %16934 = vst [vmem:[#allocation52_spill] sm:$0xff] %v14637_v45  ;;  %v14640_v47 = vld [vmem:[#allocation2 + $0x8a0] ss:$8 sps:$4 sm:$0xff]  }
 0x8ea   : > { %16935 = vst [vmem:[#allocation53_spill] sm:$0xff] %v14640_v47 }
 0x8ec   : > { %3335 = vmatpush1.bf16.msra.mxu0 %v14622_v13  ;;  %v14643_v13 = vld [vmem:[#allocation2 + $0x8b4] ss:$8 sps:$4 sm:$0xff]  }
 0x8ed   : > { %3336 = vmatprep.subr.bf16.mxu0 %v14625_v52  ;;  %16936 = vst [vmem:[#allocation54_spill] sm:$0xff] %v14643_v13  ;;  %v14646_v52 = vld [vmem:[#allocation2 + $0x8b0] ss:$8 sps:$4 sm:$0xff]  }
 0x8ee   : > { %16937 = vst [vmem:[#allocation55_spill] sm:$0xff] %v14646_v52 }
 0x8f0   : > { %3337 = vmatpush1.bf16.msra.mxu0 %v14628_v11  ;;  %v14649_v11 = vld [vmem:[#allocation2 + $0x8c4] ss:$8 sps:$4 sm:$0xff]  }
 0x8f1   : > { %3338 = vmatprep.subr.bf16.mxu0 %v14631_v16  ;;  %16938 = vst [vmem:[#allocation56_spill] sm:$0xff] %v14649_v11  ;;  %v14652_v16 = vld [vmem:[#allocation2 + $0x8c0] ss:$8 sps:$4 sm:$0xff]  }
 0x8f4   : > { %3339 = vmatpush1.bf16.msra.mxu0 %v14634_v17  ;;  %v14655_v17 = vld [vmem:[#allocation2 + $0x8d4] ss:$8 sps:$4 sm:$0xff]  }
 0x8f5   : > { %3340 = vmatprep.subr.bf16.mxu0 %v14637_v45  ;;  %v14658_v45 = vld [vmem:[#allocation2 + $0x8d0] ss:$8 sps:$4 sm:$0xff]  }
 0x8f8   : > { %3341 = vmatpush1.bf16.msra.mxu0 %v14640_v47  ;;  %v14661_v47 = vld [vmem:[#allocation2 + $0x8e4] ss:$8 sps:$4 sm:$0xff]  }
 0x8f9   : > { %3342 = vmatprep.subr.bf16.mxu0 %v14643_v13  ;;  %v14664_v13 = vld [vmem:[#allocation2 + $0x8e0] ss:$8 sps:$4 sm:$0xff]  }
 0x8fc   : > { %3343 = vmatpush1.bf16.msra.mxu0 %v14646_v52  ;;  %v14667_v52 = vld [vmem:[#allocation2 + $0x8f4] ss:$8 sps:$4 sm:$0xff]  }
 0x8fd   : > { %3344 = vmatprep.subr.bf16.mxu0 %v14649_v11  ;;  %v14670_v11 = vld [vmem:[#allocation2 + $0x8f0] ss:$8 sps:$4 sm:$0xff]  }
 0x900   : > { %3345 = vmatpush1.bf16.msra.mxu0 %v14652_v16 }
 0x901   : > { %3346 = vmatprep.subr.bf16.mxu0 %v14655_v17 }
 0x904   : > { %3347 = vmatpush1.bf16.msra.mxu0 %v14658_v45 }
 0x905   : > { %3348 = vmatprep.subr.bf16.mxu0 %v14661_v47 }
 0x908   : > { %3349 = vmatpush1.bf16.msra.mxu0 %v14664_v13 }
 0x909   : > { %3350 = vmatprep.subr.bf16.mxu0 %v14667_v52 }
 0x90c   : > { %3351 = vmatpush1.bf16.msra.mxu0 %v14670_v11 }
 0x90d   : > { %3472 = vmatprep.subr.bf16.mxu0 %v14461_v31  ;;  %v4908_v31 = vld [vmem:[%s16643_s11] sm:$0xff] }
 0x90f   : > { %3353 = vmatmul.mubr.bf16.vlgmr.msra.gmra.mrb[32].mxu0 %v14274_v3  ;;  %v3417_v3 = vld [vmem:[%s16641_s9] sm:$0xff] }
 0x910   : > { %3473 = vmatpush1.bf16.msra.mxu0 %v14467_v27  ;;  %3420 = vperm.xlu0 %12466, %v3417_v3  }
 0x911   : > { %3474 = vmatprep.subr.bf16.mxu0 %v14470_v33 }
 0x914   : > { %3475 = vmatpush1.bf16.msra.mxu0 %v14474_v34  ;;  %4912 = vperm.xlu0 %12466, %v4908_v31  }
 0x915   : > { %3476 = vmatprep.subr.bf16.mxu0 %v14478_v35 }
 0x918   : > { %3477 = vmatpush1.bf16.msra.mxu0 %v14481_v36 }
 0x919   : > { %3478 = vmatprep.subr.bf16.mxu0 %v14484_v38 }
 0x91c   : > { %3479 = vmatpush1.bf16.msra.mxu0 %v14487_v37 }
 0x91d   : > { %3480 = vmatprep.subr.bf16.mxu0 %v14490_v39 }
 0x920   : > { %3481 = vmatpush1.bf16.msra.mxu0 %v14493_v40 }
 0x921   : > { %3482 = vmatprep.subr.bf16.mxu0 %v14496_v41 }
 0x924   : > { %3483 = vmatpush1.bf16.msra.mxu0 %v14499_v42 }
 0x925   : > { %3484 = vmatprep.subr.bf16.mxu0 %v14502_v43 }
 0x928   : > { %3485 = vmatpush1.bf16.msra.mxu0 %v14505_v44  ;;  %v16953_v44 = vld [vmem:[#allocation35_spill] sm:$0xff] }
 0x929   : > { %3486 = vmatprep.subr.bf16.mxu0 %v14508_v46  ;;  %v16954_v46 = vld [vmem:[#allocation36_spill] sm:$0xff] }
 0x92c   : > { %3487 = vmatpush1.bf16.msra.mxu0 %v14511_v48  ;;  %v16955_v48 = vld [vmem:[#allocation37_spill] sm:$0xff] }
 0x92d   : > { %3488 = vmatprep.subr.bf16.mxu0 %v14514_v50  ;;  %v16956_v50 = vld [vmem:[#allocation38_spill] sm:$0xff] }
 0x930   : > { %3489 = vmatpush1.bf16.msra.mxu0 %v14517_v51  ;;  %v16957_v51 = vld [vmem:[#allocation39_spill] sm:$0xff] }
 0x931   : > { %3490 = vmatprep.subr.bf16.mxu0 %v14520_v23  ;;  %v16958_v23 = vld [vmem:[#allocation40_spill] sm:$0xff] }
 0x934   : > { %3491 = vmatpush1.bf16.msra.mxu0 %v14523_v24 }
 0x935   : > { %3492 = vmatprep.subr.bf16.mxu0 %v14526_v26 }
 0x938   : > { %3493 = vmatpush1.bf16.msra.mxu0 %v14529_v28 }
 0x939   : > { %3494 = vmatprep.subr.bf16.mxu0 %v14532_v29 }
 0x93c   : > { %3495 = vmatpush1.bf16.msra.mxu0 %v14535_v30 }
 0x93d   : > { %3496 = vmatprep.subr.bf16.mxu0 %v14538_v32 }
 0x940   : > { %3497 = vmatpush1.bf16.msra.mxu0 %v14541_v25 }
 0x941   : > { %3498 = vmatprep.subr.bf16.mxu0 %v14544_v4  ;;  %v6255_v4 = vld [vmem:[%s16645_s13 + $0x8] sm:$0xff] }
 0x942   : > { %6265 = vperm.xlu0 %12466, %v6255_v4  }
 0x944   : > { %3499 = vmatpush1.bf16.msra.mxu0 %v14547_v22 }
 0x945   : > { %3500 = vmatprep.subr.bf16.mxu0 %v14550_v21 }
 0x948   : > { %3501 = vmatpush1.bf16.msra.mxu0 %v14553_v20  ;;  %v10614_v20 = vld [vmem:[%s16653_s21] sm:$0x3] }
 0x949   : > { %3502 = vmatprep.subr.bf16.mxu0 %v14556_v19  ;;  %v6257_v19 = vld [vmem:[%s16645_s13 + $0x18] sm:$0xff] }
 0x94a   : > { %6275 = vperm.xlu0 %12466, %v6257_v19  }
 0x94c   : > { %3503 = vmatpush1.bf16.msra.mxu0 %v14559_v18  ;;  %v8041_v18 = vld [vmem:[%s16648_s16 + $0x8] sm:$0xff] }
 0x94e   : > { %8049 = vperm.xlu0 %12466, %v8041_v18  }
 0x952   : > { %10617 = vperm.xlu0 %12466, %v10614_v20   ;;  %v16959_v20 = vld [vmem:[#allocation41_spill] sm:$0xff] }
 0x98f   : > { %v3421_v29 = vpop.permute.xlu0 %3420 }
 0x9a2   : > { %v3118_v21 = vpop.f32.mrb[28].mxu0 }
 0x9a3   : > { %v3125_v22 = vadd.f32 %v3118_v21, %v14566_v14  ;;  %v3120_v27 = vpop.f32.mrb[29].mxu0  ;;  %v11096_v14 = vld [vmem:[%s16640_s8 + $0x20] sm:$0xf]  ;;  %v16960_v21 = vld [vmem:[#allocation42_spill] sm:$0xff] }
 0x9a4   : > { %v3126_v33 = vadd.f32 %v3120_v27, %v14569_v12  ;;  %v3122_v34 = vpop.f32.mrb[30].mxu0  ;;  %v16952_v12 = vld [vmem:[#allocation34_spill] sm:$0xff]  ;;  %v16970_v27 = vld [vmem:[#allocation52_spill] sm:$0xff] }
 0x9a5   : > { %v3123_v35 = vpop.f32.mrb[31].mxu0  ;;  %v16972_v34 = vld [vmem:[#allocation54_spill] sm:$0xff] }
 0x9a6   : > { %v16973_v35 = vld [vmem:[#allocation55_spill] sm:$0xff] }
 0x9e2   : > { %v3354_v36 = vpop.f32.mrb[32].mxu0 }
 0x9e3   : > { %v3361_v38 = vpack.c.bf16 %v3354_v36, %v3354_v36  ;;  %v3356_v37 = vpop.f32.mrb[33].mxu0  ;;  %v16974_v36 = vld [vmem:[#allocation56_spill] sm:$0xff] }
 0x9e4   : > { %v3362_v39 = vpack.c.bf16 %v3356_v37, %v3356_v37  ;;  %v3358_v40 = vpop.f32.mrb[34].mxu0  ;;  %v12909_v37 = vld [vmem:[%s16976_s26 + $0x60] sm:$0xff]  }
 0x9e5   : > { %v3359_v41 = vpop.f32.mrb[35].mxu0  ;;  %v3369_v43 = vand.u32 %v3361_v38, %v14282_v10  ;;  %v12901_v38 = vld [vmem:[%s16975_s3 + $0x40] sm:$0xff]   ;;  %v12911_v40 = vld [vmem:[%s16976_s26 + $0x68] sm:$0xff]  }
 0x9e6   : > { %v3372_v42 = vand.u32 %v3362_v39, %v14282_v10  ;;  %v16939_v10 = vld [vmem:[#allocation21_spill] sm:$0xff]  ;;  %11425 = vmatprep.subr.bf16.mxu0 %v12901_v38 }
 0x9e7   : > { %v12910_v39 = vld [vmem:[%s16976_s26 + $0x20] sm:$0xff]   ;;  %v12912_v41 = vld [vmem:[%s16976_s26 + $0x28] sm:$0xff]  }
 0x9e8   : > { %3374 = vmatprep.subr.bf16.mxu1 %v3372_v42  ;;  %v12913_v42 = vld [vmem:[%s16976_s26 + $0x70] sm:$0xff]  }
 0x9e9   : > { %3375 = vmatpush1.bf16.msra.mxu1 %v3369_v43  ;;  %v12914_v43 = vld [vmem:[%s16976_s26 + $0x30] sm:$0xff]  }
 0x9ea   : > { %3429 = vmatprep.subr.bf16.mxu1 %v14335_v49  ;;  %v16940_v49 = vld [vmem:[#allocation22_spill] sm:$0xff] }
 0x9ec   : > { %11097 = vmatmul.mubr.msk.bf16.vlgmr.msra.gmra.mrb[32].mxu1 %vm1282_vm2, %v11096_v14  ;;  %v12915_v14 = vld [vmem:[%s16976_s26 + $0x78] sm:$0xff]  }
 0x9ed   : > { %3430 = vmatpush1.bf16.msra.mxu1 %v14341_v53  ;;  %v16941_v53 = vld [vmem:[#allocation23_spill] sm:$0xff] }
 0x9ee   : > { %3431 = vmatprep.subr.bf16.mxu1 %v14344_v54  ;;  %v16942_v54 = vld [vmem:[#allocation24_spill] sm:$0xff] }
 0x9f1   : > { %3432 = vmatpush1.bf16.msra.mxu1 %v14348_v55  ;;  %v16943_v55 = vld [vmem:[#allocation25_spill] sm:$0xff] }
 0x9f2   : > { %3433 = vmatprep.subr.bf16.mxu1 %v14352_v56  ;;  %v16944_v56 = vld [vmem:[#allocation26_spill] sm:$0xff] }
 0x9f5   : > { %3434 = vmatpush1.bf16.msra.mxu1 %v14355_v57  ;;  %v16945_v57 = vld [vmem:[#allocation27_spill] sm:$0xff] }
 0x9f6   : > { %3435 = vmatprep.subr.bf16.mxu1 %v14358_v58  ;;  %v16946_v58 = vld [vmem:[#allocation28_spill] sm:$0xff] }
 0x9f9   : > { %3436 = vmatpush1.bf16.msra.mxu1 %v14361_v59  ;;  %v16947_v59 = vld [vmem:[#allocation29_spill] sm:$0xff] }
 0x9fa   : > { %3437 = vmatprep.subr.bf16.mxu1 %v14364_v60  ;;  %v16948_v60 = vld [vmem:[#allocation30_spill] sm:$0xff] }
 0x9fd   : > { %3438 = vmatpush1.bf16.msra.mxu1 %v14367_v62  ;;  %v16949_v62 = vld [vmem:[#allocation31_spill] sm:$0xff] }
 0x9fe   : > { %3439 = vmatprep.subr.bf16.mxu1 %v14370_v63  ;;  %v16950_v63 = vld [vmem:[#allocation32_spill] sm:$0xff] }
 0xa01   : > { %3440 = vmatpush1.bf16.msra.mxu1 %v14373_v1  ;;  %v16951_v1 = vld [vmem:[#allocation33_spill] sm:$0xff] }
 0xa02   : > { %3441 = vmatprep.subr.bf16.mxu1 %v16939_v10  ;;  %v12916_v10 = vld [vmem:[%s16976_s26 + $0x38] sm:$0xff]  }
 0xa05   : > { %3442 = vmatpush1.bf16.msra.mxu1 %v16940_v49  ;;  %v12917_v49 = vld [vmem:[#allocation4 + $0x20] sm:$0xff]  }
 0xa06   : > { %3443 = vmatprep.subr.bf16.mxu1 %v16941_v53  ;;  %v13902_v53 = vmov 0.0  }
 0xa09   : > { %3444 = vmatpush1.bf16.msra.mxu1 %v16942_v54  ;;  %v12919_v54 = vld [vmem:[#allocation4 + $0x28] sm:$0xff]  }
 0xa0a   : > { %3445 = vmatprep.subr.bf16.mxu1 %v16943_v55  ;;  %v12921_v55 = vld [vmem:[#allocation4 + $0x30] sm:$0xff]  }
 0xa0d   : > { %3446 = vmatpush1.bf16.msra.mxu1 %v16944_v56 }
 0xa0e   : > { %3447 = vmatprep.subr.bf16.mxu1 %v16945_v57 }
 0xa11   : > { %3448 = vmatpush1.bf16.msra.mxu1 %v16946_v58 }
 0xa12   : > { %3449 = vmatprep.subr.bf16.mxu1 %v16947_v59 }
 0xa15   : > { %3450 = vmatpush1.bf16.msra.mxu1 %v16948_v60 }
 0xa16   : > { %3451 = vmatprep.subr.bf16.mxu1 %v16949_v62 }
 0xa19   : > { %3452 = vmatpush1.bf16.msra.mxu1 %v16950_v63 }
 0xa1a   : > { %3453 = vmatprep.subr.bf16.mxu1 %v16951_v1 }
 0xa1d   : > { %3454 = vmatpush1.bf16.msra.mxu1 %v16952_v12 }
 0xa1e   : > { %3455 = vmatprep.subr.bf16.mxu1 %v16953_v44 }
 0xa21   : > { %3456 = vmatpush1.bf16.msra.mxu1 %v16954_v46 }
 0xa22   : > { %3457 = vmatprep.subr.bf16.mxu1 %v16955_v48 }
 0xa25   : > { %3458 = vmatpush1.bf16.msra.mxu1 %v16956_v50 }
 0xa26   : > { %3459 = vmatprep.subr.bf16.mxu1 %v16957_v51 }
 0xa29   : > { %3460 = vmatpush1.bf16.msra.mxu1 %v16958_v23 }
 0xa2a   : > { %3513 = vmatprep.subr.bf16.mxu1 %v14572_v2 }
 0xabf   : > { %v3408_v24 = vpop.f32.mrb[32].mxu1 }
 0xac0   : > { %v3415_v26 = vadd.f32 %v3408_v24, %v3125_v22  ;;  %v3410_v28 = vpop.f32.mrb[33].mxu1  ;;  %v16962_v22 = vld [vmem:[#allocation44_spill] sm:$0xff] }
 0xac1   : > { %v3416_v30 = vadd.f32 %v3410_v28, %v3126_v33  ;;  %v3412_v32 = vpop.f32.mrb[34].mxu1  ;;  %v16971_v33 = vld [vmem:[#allocation53_spill] sm:$0xff] }
 0xac2   : > { %v3423_v25 = vadd.f32 %v3421_v29, %v3415_v26  ;;  %v3413_v3 = vpop.f32.mrb[35].mxu1 }
 0xac3   : > { %v3424_v31 = vadd.f32 %v3421_v29, %v3416_v30  ;;  %v12918_v30 = vld [vmem:[#allocation4] sm:$0xff]   ;;  %v12922_v3 = vld [vmem:[#allocation4 + $0x10] sm:$0xff]  }
 0xac4   : > { %v14766_v4 = vmax.f32 %v3423_v25, 0.0  ;;  %v12920_v25 = vld [vmem:[#allocation4 + $0x8] sm:$0xff]  }
 0xac5   : > { %v14768_v19 = vmax.f32 %v3424_v31, 0.0  ;;  %v14891_v31 = vld [vmem:[#allocation4 + $0x38] sm:$0xff]  }
 0xac6   : > { %v14776_v2 = vpack.c.bf16 %v14766_v4, %v14766_v4 }
 0xac7   : > { %v14772_v18 = vpack.c.bf16 %v14768_v19, %v14768_v19 }
 0xac9   : > { %3461 = vmatprep.mubr.bf16.mxu1 %v14772_v18  ;;  %3504 = vmatprep.mubr.bf16.mxu0 %v14772_v18 }
 0xaca   : > { %3462 = vmatmul.mubr.bf16.vlgmr.msra.gmra.mrb[36].mxu1 %v14776_v2  ;;  %3505 = vmatmul.mubr.bf16.vlgmr.msra.gmra.mrb[36].mxu0 %v14776_v2 }
 0xacb   : > { %3514 = vmatpush1.bf16.msra.mxu1 %v14578_v15  ;;  %3545 = vmatprep.mubr.bf16.mxu1 %v14772_v18  ;;  %v16961_v15 = vld [vmem:[#allocation43_spill] sm:$0xff] }
 0xacc   : > { %3515 = vmatprep.subr.bf16.mxu1 %v14581_v9  ;;  %v16963_v9 = vld [vmem:[#allocation45_spill] sm:$0xff] }
 0xacf   : > { %3516 = vmatpush1.bf16.msra.mxu1 %v14585_v0  ;;  %v16964_v0 = vld [vmem:[#allocation46_spill] sm:$0xff] }
 0xad0   : > { %3517 = vmatprep.subr.bf16.mxu1 %v14589_v61  ;;  %v16965_v61 = vld [vmem:[#allocation47_spill] sm:$0xff] }
 0xad3   : > { %3518 = vmatpush1.bf16.msra.mxu1 %v14592_v5  ;;  %v16966_v5 = vld [vmem:[#allocation48_spill] sm:$0xff] }
 0xad4   : > { %3519 = vmatprep.subr.bf16.mxu1 %v14595_v6  ;;  %v16967_v6 = vld [vmem:[#allocation49_spill] sm:$0xff] }
 0xad7   : > { %3520 = vmatpush1.bf16.msra.mxu1 %v14598_v7  ;;  %v16968_v7 = vld [vmem:[#allocation50_spill] sm:$0xff] }
 0xad8   : > { %3521 = vmatprep.subr.bf16.mxu1 %v14601_v8  ;;  %v16969_v8 = vld [vmem:[#allocation51_spill] sm:$0xff] }
 0xadb   : > { %3522 = vmatpush1.bf16.msra.mxu1 %v16959_v20 }
 0xadc   : > { %3523 = vmatprep.subr.bf16.mxu1 %v16960_v21 }
 0xadf   : > { %3524 = vmatpush1.bf16.msra.mxu1 %v16961_v15 }
 0xae0   : > { %3525 = vmatprep.subr.bf16.mxu1 %v16962_v22 }
 0xae3   : > { %3526 = vmatpush1.bf16.msra.mxu1 %v16963_v9  ;;  %v12925_v9 = vld [vmem:[#allocation4 + $0x40] sm:$0xff]  }
 0xae4   : > { %3527 = vmatprep.subr.bf16.mxu1 %v16964_v0 }
 0xae7   : > { %3528 = vmatpush1.bf16.msra.mxu1 %v16965_v61  ;;  %v12926_v61 = vld [vmem:[#allocation4 + $0x48] sm:$0xff]  }
 0xae8   : > { %3529 = vmatprep.subr.bf16.mxu1 %v16966_v5  ;;  %v12927_v5 = vld [vmem:[#allocation4 + $0x50] sm:$0xff]  }
 0xaeb   : > { %3530 = vmatpush1.bf16.msra.mxu1 %v16967_v6  ;;  %v12928_v6 = vld [vmem:[#allocation4 + $0x58] sm:$0xff]  }
 0xaec   : > { %3531 = vmatprep.subr.bf16.mxu1 %v16968_v7 }
 0xaef   : > { %3532 = vmatpush1.bf16.msra.mxu1 %v16969_v8 }
 0xaf0   : > { %3533 = vmatprep.subr.bf16.mxu1 %v16970_v27 }
 0xaf3   : > { %3534 = vmatpush1.bf16.msra.mxu1 %v16971_v33 }
 0xaf4   : > { %3535 = vmatprep.subr.bf16.mxu1 %v16972_v34 }
 0xaf7   : > { %3536 = vmatpush1.bf16.msra.mxu1 %v16973_v35 }
 0xaf8   : > { %3537 = vmatprep.subr.bf16.mxu1 %v16974_v36 }
 0xafb   : > { %3538 = vmatpush1.bf16.msra.mxu1 %v14652_v16  ;;  %v12902_v16 = vld [vmem:[%s16976_s26] sm:$0xff]  }
 0xafc   : > { %3539 = vmatprep.subr.bf16.mxu1 %v14655_v17  ;;  %v12903_v17 = vld [vmem:[%s16976_s26 + $0x48] sm:$0xff]   ;;  %11426 = vmatpush3.bf16.msra.mxu0 %v12902_v16 }
 0xafd   : > { %11427 = vmatprep.subr.bf16.mxu0 %v12903_v17 }
 0xaff   : > { %3540 = vmatpush1.bf16.msra.mxu1 %v14658_v45  ;;  %v12906_v45 = vld [vmem:[%s16976_s26 + $0x10] sm:$0xff]  }
 0xb00   : > { %3541 = vmatprep.subr.bf16.mxu1 %v14661_v47  ;;  %v12907_v47 = vld [vmem:[%s16976_s26 + $0x58] sm:$0xff]  }
 0xb03   : > { %3542 = vmatpush1.bf16.msra.mxu1 %v14664_v13  ;;  %v12908_v13 = vld [vmem:[%s16976_s26 + $0x18] sm:$0xff]  }
 0xb04   : > { %3543 = vmatprep.subr.bf16.mxu1 %v14667_v52  ;;  %v12904_v52 = vld [vmem:[%s16976_s26 + $0x8] sm:$0xff]  }
 0xb05   : > { %11428 = vmatpush3.bf16.msra.mxu0 %v12904_v52 }
 0xb07   : > { %3544 = vmatpush1.bf16.msra.mxu1 %v14670_v11  ;;  %v12905_v11 = vld [vmem:[%s16976_s26 + $0x50] sm:$0xff]  }
 0xb08   : > { %11429 = vmatprep.subr.bf16.mxu0 %v12905_v11  ;;  %11719 = vmatprep.subr.bf16.mxu1 %v13902_v53  ;;  %v12929_v11 = vld [vmem:[%s16983_s27 + $0x8] sm:$0xff]  }
 0xb09   : > { %11430 = vmatpush3.bf16.msra.mxu0 %v12906_v45 }
 0xb0a   : > { %3546 = vmatmul.mubr.bf16.vlgmr.msra.gmra.mrb[40].mxu1 %v14776_v2  ;;  %11431 = vmatprep.subr.bf16.mxu0 %v12907_v47  ;;  %v12930_v47 = vld [vmem:[%s16983_s27] sm:$0xff]  }
 0xb0b   : > { %11720 = vmatpush3.bf16.msra.mxu1 %v12917_v49  ;;  %11727 = vmatprep.mubr.msk.bf16.mxu1 %vm13903_vm3, %v13902_v53  ;;  %v12934_v49 = vld [vmem:[#allocation4 + $0x70] sm:$0xff]  }
 0xb0c   : > { %11721 = vmatprep.subr.bf16.mxu1 %v13902_v53 }
 0xb0d   : > { %11432 = vmatpush3.bf16.msra.mxu0 %v12908_v13 }
 0xb0e   : > { %11433 = vmatprep.subr.bf16.mxu0 %v12909_v37 }
 0xb0f   : > { %11722 = vmatpush3.bf16.msra.mxu1 %v12919_v54  ;;  %v12935_v54 = vld [vmem:[#allocation4 + $0x78] sm:$0xff]  }
 0xb10   : > { %11723 = vmatprep.subr.bf16.mxu1 %v13902_v53 }
 0xb11   : > { %11434 = vmatpush3.bf16.msra.mxu0 %v12910_v39 }
 0xb12   : > { %11435 = vmatprep.subr.bf16.mxu0 %v12911_v40 }
 0xb13   : > { %11724 = vmatpush3.bf16.msra.mxu1 %v12921_v55 }
 0xb14   : > { %11725 = vmatprep.subr.bf16.mxu1 %v13902_v53 }
 0xb15   : > { %11436 = vmatpush3.bf16.msra.mxu0 %v12912_v41 }
 0xb16   : > { %11437 = vmatprep.subr.bf16.mxu0 %v12913_v42 }
 0xb17   : > { %11726 = vmatpush3.bf16.msra.mxu1 %v14891_v31 }
 0xb18   : > { %11743 = vmatprep.subr.bf16.mxu1 %v13902_v53 }
 0xb19   : > { %11438 = vmatpush3.bf16.msra.mxu0 %v12914_v43  ;;  %v12931_v43 = vld [vmem:[%s16983_s27 + $0x10] sm:$0xff]  }
 0xb1a   : > { %11439 = vmatprep.subr.bf16.mxu0 %v12915_v14  ;;  %v12932_v14 = vld [vmem:[#allocation4 + $0x60] sm:$0xff]  }
 0xb1d   : > { %11440 = vmatpush3.bf16.msra.mxu0 %v12916_v10  ;;  %v12933_v10 = vld [vmem:[#allocation4 + $0x68] sm:$0xff]  }
 0xb1e   : > { %11707 = vmatprep.subr.bf16.mxu0 %v13902_v53 }
 0xb9d   : > { %v14868_v56 = vpop.f32.mrb[36].mxu1  ;;  %v14870_v57 = vpop.f32.mrb[36].mxu0 }
 0xb9e   : > { %16977 = vst [vmem:[#allocation21_spill] sm:$0xff] %v14868_v56  ;;  %16978 = vst [vmem:[#allocation22_spill] sm:$0xff] %v14870_v57  ;;  %v14872_v58 = vpop.f32.mrb[37].mxu1  ;;  %v14874_v59 = vpop.f32.mrb[37].mxu0  ;;  %v3470_v44 = vmax.f32 %v14766_v4, %v14868_v56  ;;  %v12924_v4 = vld [vmem:[#allocation4 + $0x18] sm:$0xff]  }
 0xb9f   : > { %16979 = vst [vmem:[#allocation23_spill] sm:$0xff] %v14872_v58  ;;  %16980 = vst [vmem:[#allocation24_spill] sm:$0xff] %v14874_v59  ;;  %v3467_v60 = vpop.f32.mrb[38].mxu1  ;;  %v3510_v62 = vpop.f32.mrb[38].mxu0  ;;  %v3471_v50 = vmax.f32 %v14768_v19, %v14872_v58  ;;  %v15742_v56 = vld [vmem:[#allocation2 + $0x2c0] ss:$8 sps:$4 sm:$0xff]  }
 0xba0   : > { %v3468_v63 = vpop.f32.mrb[39].mxu1  ;;  %v3511_v1 = vpop.f32.mrb[39].mxu0  ;;  %17006 = vst [vmem:[#allocation45_spill] sm:$0xff] %v15742_v56  ;;  %v15745_v58 = vld [vmem:[#allocation2 + $0x2d4] ss:$8 sps:$4 sm:$0xff]  }
 0xba1   : > { %17007 = vst [vmem:[#allocation46_spill] sm:$0xff] %v15745_v58 }
 0xbdd   : > { %v14876_v12 = vpop.f32.mrb[40].mxu1 }
 0xbde   : > { %16981 = vst [vmem:[#allocation25_spill] sm:$0xff] %v14876_v12  ;;  %v3554_v46 = vmax.f32 %v14870_v57, %v14876_v12  ;;  %v14882_v48 = vpop.f32.mrb[41].mxu1  ;;  %v15730_v12 = vld [vmem:[#allocation2 + $0x2a0] ss:$8 sps:$4 sm:$0xff]   ;;  %v15739_v57 = vld [vmem:[#allocation2 + $0x2c4] ss:$8 sps:$4 sm:$0xff]  }
 0xbdf   : > { %16982 = vst [vmem:[#allocation26_spill] sm:$0xff] %v14882_v48  ;;  %v3555_v51 = vmax.f32 %v14874_v59, %v14882_v48  ;;  %v3551_v23 = vpop.f32.mrb[42].mxu1  ;;  %17002 = vst [vmem:[#allocation41_spill] sm:$0xff] %v15730_v12  ;;  %v15733_v48 = vld [vmem:[#allocation2 + $0x2b4] ss:$8 sps:$4 sm:$0xff]  }
 0xbe0   : > { %v3556_v24 = vmax.f32 %v3470_v44, %v3554_v46  ;;  %v3552_v26 = vpop.f32.mrb[43].mxu1  ;;  %17003 = vst [vmem:[#allocation42_spill] sm:$0xff] %v15733_v48  ;;  %v15736_v59 = vld [vmem:[#allocation2 + $0x2b0] ss:$8 sps:$4 sm:$0xff]   ;;  %17005 = vst [vmem:[#allocation44_spill] sm:$0xff] %v15739_v57 }
 0xbe1   : > { %v3557_v28 = vmax.f32 %v3471_v50, %v3555_v51  ;;  %17004 = vst [vmem:[#allocation43_spill] sm:$0xff] %v15736_v59 }
 0xbe2   : > { %v3558_v32 = vpack.c.bf16 %v3556_v24, %v3556_v24 }
 0xbe3   : > { %v3559_v29 = vpack.c.bf16 %v3557_v28, %v3557_v28 }
 0xbe5   : > { %3720 = vmatprep.mubr.bf16.mxu0 %v3559_v29 }
 0xbe6   : > { %3721 = vmatmul.mubr.bf16.vlgmr.msra.gmra.mrb[40].mxu0 %v3558_v32 }
 0xbe7   : > { %11708 = vmatpush3.bf16.msra.mxu0 %v12918_v30  ;;  %11715 = vmatprep.mubr.msk.bf16.mxu0 %vm13903_vm3, %v13902_v53 }
 0xbe8   : > { %11709 = vmatprep.subr.bf16.mxu0 %v13902_v53 }
 0xbeb   : > { %11710 = vmatpush3.bf16.msra.mxu0 %v12920_v25 }
 0xbec   : > { %11711 = vmatprep.subr.bf16.mxu0 %v13902_v53 }
 0xbef   : > { %11712 = vmatpush3.bf16.msra.mxu0 %v12922_v3 }
 0xbf0   : > { %11713 = vmatprep.subr.bf16.mxu0 %v13902_v53 }
 0xbf3   : > { %11714 = vmatpush3.bf16.msra.mxu0 %v12924_v4 }
 0xbf4   : > { %11731 = vmatprep.subr.bf16.mxu0 %v13902_v53 }
 0xcb9   : > { %v11441_v19 = vpop.f32.mrb[40].mxu0 }
 0xcba   : > { %v11442_v20 = vpop.f32.mrb[41].mxu0 }
 0xcbb   : > { %v11443_v21 = vadd.f32 %v11442_v20, %v11441_v19  ;;  %v11444_v15 = vpop.f32.mrb[42].mxu0 }
 0xcbc   : > { %v11445_v22 = vpop.f32.mrb[43].mxu0  ;;  %v12936_v15 = vld [vmem:[%s16983_s27 + $0x18] sm:$0xff]  }
 0xcbd   : > { %v14900_v0 = vpack.c.bf16 %v11443_v21, %v11443_v21  ;;  %v12937_v22 = vld [vmem:[#allocation4 + $0x80] sm:$0xff]  }
 0xcbf   : > { %11716 = vmatmul.mubr.msk.bf16.vlgmr.msra.gmra.mrb[44].mxu0 %vm3761_vm4, %v14900_v0  ;;  %11728 = vmatmul.mubr.msk.bf16.vlgmr.msra.gmra.mrb[44].mxu1 %vm3761_vm4, %v14900_v0 }
 0xcc0   : > { %11744 = vmatpush3.bf16.msra.mxu1 %v12925_v9  ;;  %11751 = vmatprep.mubr.msk.bf16.mxu1 %vm13903_vm3, %v13902_v53  ;;  %v12938_v9 = vld [vmem:[#allocation4 + $0x88] sm:$0xff]  }
 0xcc1   : > { %11745 = vmatprep.subr.bf16.mxu1 %v13902_v53  ;;  %11733 = vmatprep.mubr.msk.bf16.mxu0 %vm13903_vm3, %v13902_v53 }
 0xcc4   : > { %11746 = vmatpush3.bf16.msra.mxu1 %v12926_v61  ;;  %v12939_v61 = vld [vmem:[#allocation4 + $0x90] sm:$0xff]  }
 0xcc5   : > { %11747 = vmatprep.subr.bf16.mxu1 %v13902_v53 }
 0xcc8   : > { %11748 = vmatpush3.bf16.msra.mxu1 %v12927_v5  ;;  %v12940_v5 = vld [vmem:[#allocation4 + $0x98] sm:$0xff]  }
 0xcc9   : > { %11749 = vmatprep.subr.bf16.mxu1 %v13902_v53 }
 0xccc   : > { %11750 = vmatpush3.bf16.msra.mxu1 %v12928_v6 }
 0xccd   : > { %11773 = vmatprep.subr.bf16.mxu1 %v13902_v53 }
 0xccf   : > { %11752 = vmatmul.mubr.msk.bf16.vlgmr.msra.gmra.mrb[48].mxu1 %vm3761_vm4, %v14900_v0 }
 0xcd0   : > { %11775 = vmatprep.mubr.msk.bf16.mxu1 %vm13903_vm3, %v13902_v53 }
 0xd92   : > { %v3799_v7 = vpop.f32.mrb[44].mxu0  ;;  %v3875_v8 = vpop.f32.mrb[44].mxu1 }
 0xd93   : > { %v3881_v27 = vpack.c.bf16 %v3875_v8, %v3875_v8  ;;  %v11717_v33 = vpop.f32.mrb[45].mxu0  ;;  %v11729_v34 = vpop.f32.mrb[45].mxu1  ;;  %v3805_v38 = vpack.c.bf16 %v3799_v7, %v3799_v7 }
 0xd94   : > { %v3802_v35 = vpop.f32.mrb[46].mxu0  ;;  %v3878_v36 = vpop.f32.mrb[46].mxu1 }
 0xd95   : > { %v3896_v16 = vsel %vm3894_vm5, %v3881_v27, 0  ;;  %v11718_v17 = vpop.f32.mrb[47].mxu0  ;;  %v11730_v52 = vpop.f32.mrb[47].mxu1  ;;  %v3948_v45 = vsel %vm3894_vm5, %v3805_v38, 0 }
 0xd96   : > { %11732 = vmatpush3.bf16.msra.mxu0 %v3896_v16 }
 0xd97   : > { %11737 = vmatprep.subr.bf16.mxu0 %v13902_v53 }
 0xd99   : > { %11734 = vmatmul.mubr.msk.bf16.vlgmr.msra.gmra.mrb[48].mxu0 %vm3890_vm6, %v12929_v11  ;;  %v12941_v11 = vld [vmem:[%s16983_s27 + $0x20] sm:$0xff]  }
 0xd9a   : > { %11738 = vmatpush3.bf16.msra.mxu0 %v3948_v45  ;;  %11739 = vmatprep.mubr.msk.bf16.mxu0 %vm13903_vm3, %v13902_v53  ;;  %v14970_v45 = vld [vmem:[#allocation4 + $0xa0] sm:$0xff]  }
 0xd9b   : > { %11755 = vmatprep.subr.bf16.mxu0 %v13902_v53 }
 0xda1   : > { %11740 = vmatmul.mubr.msk.bf16.vlgmr.msra.gmra.mrb[52].mxu0 %vm3890_vm6, %v12930_v47  ;;  %v14975_v47 = vld [vmem:[#allocation4 + $0xa8] sm:$0xff]  }
 0xda2   : > { %v4058_v13 = vpop.f32.mrb[48].mxu1  ;;  %11757 = vmatprep.mubr.msk.bf16.mxu0 %vm13903_vm3, %v13902_v53 }
 0xda3   : > { %v4064_v37 = vpack.c.bf16 %v4058_v13, %v4058_v13  ;;  %v11753_v39 = vpop.f32.mrb[49].mxu1  ;;  %v14981_v13 = vld [vmem:[#allocation4 + $0xb0] sm:$0xff]  }
 0xda4   : > { %v4061_v40 = vpop.f32.mrb[50].mxu1 }
 0xda5   : > { %v4077_v41 = vsel %vm3894_vm5, %v4064_v37, 0  ;;  %v11754_v42 = vpop.f32.mrb[51].mxu1  ;;  %v14985_v37 = vld [vmem:[#allocation4 + $0xb8] sm:$0xff]  }
 0xda6   : > { %11756 = vmatpush3.bf16.msra.mxu0 %v4077_v41 }
 0xda7   : > { %11761 = vmatprep.subr.bf16.mxu0 %v13902_v53 }
 0xda9   : > { %11758 = vmatmul.mubr.msk.bf16.vlgmr.msra.gmra.mrb[56].mxu0 %vm3890_vm6, %v12931_v43 }
 0xdaa   : > { %11762 = vmatpush3.bf16.msra.mxu0 %v12932_v14  ;;  %11769 = vmatprep.mubr.msk.bf16.mxu0 %vm13903_vm3, %v13902_v53 }
 0xdab   : > { %11763 = vmatprep.subr.bf16.mxu0 %v13902_v53 }
 0xdae   : > { %11764 = vmatpush3.bf16.msra.mxu0 %v12933_v10 }
 0xdaf   : > { %11765 = vmatprep.subr.bf16.mxu0 %v13902_v53 }
 0xdb2   : > { %11766 = vmatpush3.bf16.msra.mxu0 %v12934_v49 }
 0xdb3   : > { %11767 = vmatprep.subr.bf16.mxu0 %v13902_v53 }
 0xdb6   : > { %11768 = vmatpush3.bf16.msra.mxu0 %v12935_v54 }
 0xdb7   : > { %11791 = vmatprep.subr.bf16.mxu0 %v13902_v53 }
 0xdb9   : > { %11770 = vmatmul.mubr.msk.bf16.vlgmr.msra.gmra.mrb[60].mxu0 %vm3761_vm4, %v14900_v0 }
 0xdba   : > { %11793 = vmatprep.mubr.msk.bf16.mxu0 %vm13903_vm3, %v13902_v53 }
 0xe6c   : > { %v3932_v55 = vpop.f32.mrb[48].mxu0 }
 0xe6d   : > { %v11735_v60 = vpop.f32.mrb[49].mxu0 }
 0xe6e   : > { %v3935_v62 = vpop.f32.mrb[50].mxu0 }
 0xe6f   : > { %v11736_v63 = vpop.f32.mrb[51].mxu0 }
 0xe70   : > { %v12946_v63 = vld [vmem:[%s16983_s27 + $0x28] sm:$0xff]  }
 0xe74   : > { %v3984_v1 = vpop.f32.mrb[52].mxu0 }
 0xe75   : > { %v3985_v44 = vadd.f32 %v3984_v1, %v3932_v55  ;;  %v11741_v46 = vpop.f32.mrb[53].mxu0  ;;  %v12947_v1 = vld [vmem:[#allocation4 + $0xc0] sm:$0xff]  }
 0xe76   : > { %v3987_v50 = vpop.f32.mrb[54].mxu0  ;;  %v12949_v46 = vld [vmem:[#allocation4 + $0xd0] sm:$0xff]  }
 0xe77   : > { %v3988_v51 = vadd.f32 %v3987_v50, %v3935_v62  ;;  %v11742_v23 = vpop.f32.mrb[55].mxu0  ;;  %v12950_v50 = vld [vmem:[#allocation4 + $0xd8] sm:$0xff]  }
 0xe7c   : > { %v4113_v24 = vpop.f32.mrb[56].mxu0 }
 0xe7d   : > { %v4120_v26 = vadd.f32 %v4113_v24, %v3985_v44  ;;  %v11759_v28 = vpop.f32.mrb[57].mxu0  ;;  %v12948_v44 = vld [vmem:[#allocation4 + $0xc8] sm:$0xff]  }
 0xe7e   : > { %v4116_v29 = vpop.f32.mrb[58].mxu0 }
 0xe7f   : > { %v4121_v30 = vadd.f32 %v4116_v29, %v3988_v51  ;;  %v11760_v32 = vpop.f32.mrb[59].mxu0 }
 0xe8c   : > { %v4189_v25 = vpop.f32.mrb[60].mxu0 }
 0xe8d   : > { %v4195_v3 = vpack.c.bf16 %v4189_v25, %v4189_v25  ;;  %v11771_v4 = vpop.f32.mrb[61].mxu0 }
 0xe8e   : > { %v4192_v19 = vpop.f32.mrb[62].mxu0 }
 0xe8f   : > { %v4208_v20 = vsel %vm3894_vm5, %v4195_v3, 0  ;;  %v11772_v21 = vpop.f32.mrb[63].mxu0 }
 0xe90   : > { %11774 = vmatpush3.bf16.msra.mxu1 %v4208_v20  ;;  %v12951_v20 = vld [vmem:[%s16983_s27 + $0x30] sm:$0xff]   ;;  %v12952_v21 = vld [vmem:[#allocation4 + $0xe0] sm:$0xff]  }
 0xe91   : > { %11779 = vmatprep.subr.bf16.mxu1 %v13902_v53 }
 0xe93   : > { %11776 = vmatmul.mubr.msk.bf16.vlgmr.msra.gmra.mrb[52].mxu1 %vm3890_vm6, %v12936_v15  ;;  %v12953_v15 = vld [vmem:[#allocation4 + $0xe8] sm:$0xff]  }
 0xe94   : > { %11780 = vmatpush3.bf16.msra.mxu1 %v12937_v22  ;;  %11787 = vmatprep.mubr.msk.bf16.mxu1 %vm13903_vm3, %v13902_v53  ;;  %v12954_v22 = vld [vmem:[#allocation4 + $0xf0] sm:$0xff]  }
 0xe95   : > { %11781 = vmatprep.subr.bf16.mxu1 %v13902_v53 }
 0xe98   : > { %11782 = vmatpush3.bf16.msra.mxu1 %v12938_v9  ;;  %v12955_v9 = vld [vmem:[#allocation4 + $0xf8] sm:$0xff]  }
 0xe99   : > { %11783 = vmatprep.subr.bf16.mxu1 %v13902_v53 }
 0xe9c   : > { %11784 = vmatpush3.bf16.msra.mxu1 %v12939_v61 }
 0xe9d   : > { %11785 = vmatprep.subr.bf16.mxu1 %v13902_v53 }
 0xea0   : > { %11786 = vmatpush3.bf16.msra.mxu1 %v12940_v5 }
 0xea1   : > { %11809 = vmatprep.subr.bf16.mxu1 %v13902_v53 }
 0xea3   : > { %11788 = vmatmul.mubr.msk.bf16.vlgmr.msra.gmra.mrb[56].mxu1 %vm3761_vm4, %v14900_v0 }
 0xea4   : > { %11811 = vmatprep.mubr.msk.bf16.mxu1 %vm13903_vm3, %v13902_v53 }
 0xf66   : > { %v4244_v6 = vpop.f32.mrb[52].mxu1 }
 0xf67   : > { %v4251_v7 = vadd.f32 %v4244_v6, %v4120_v26  ;;  %v11777_v8 = vpop.f32.mrb[53].mxu1 }
 0xf68   : > { %v4247_v27 = vpop.f32.mrb[54].mxu1 }
 0xf69   : > { %v4252_v33 = vadd.f32 %v4247_v27, %v4121_v30  ;;  %v11778_v34 = vpop.f32.mrb[55].mxu1 }
 0xf76   : > { %v4320_v35 = vpop.f32.mrb[56].mxu1 }
 0xf77   : > { %v4326_v36 = vpack.c.bf16 %v4320_v35, %v4320_v35  ;;  %v11789_v38 = vpop.f32.mrb[57].mxu1 }
 0xf78   : > { %v4323_v16 = vpop.f32.mrb[58].mxu1 }
 0xf79   : > { %v4339_v17 = vsel %vm3894_vm5, %v4326_v36, 0  ;;  %v11790_v52 = vpop.f32.mrb[59].mxu1 }
 0xf7a   : > { %11792 = vmatpush3.bf16.msra.mxu0 %v4339_v17  ;;  %v12956_v17 = vld [vmem:[%s16983_s27 + $0x38] sm:$0xff]   ;;  %v15030_v52 = vld [vmem:[#allocation4 + $0x100] sm:$0xff]  }
 0xf7b   : > { %11797 = vmatprep.subr.bf16.mxu0 %v13902_v53 }
 0xf7d   : > { %11794 = vmatmul.mubr.msk.bf16.vlgmr.msra.gmra.mrb[64].mxu0 %vm3890_vm6, %v12941_v11  ;;  %v15035_v11 = vld [vmem:[#allocation4 + $0x108] sm:$0xff]  }
 0xf7e   : > { %11798 = vmatpush3.bf16.msra.mxu0 %v14970_v45  ;;  %11805 = vmatprep.mubr.msk.bf16.mxu0 %vm13903_vm3, %v13902_v53 }
 0xf7f   : > { %11799 = vmatprep.subr.bf16.mxu0 %v13902_v53 }
 0xf82   : > { %11800 = vmatpush3.bf16.msra.mxu0 %v14975_v47 }
 0xf83   : > { %11801 = vmatprep.subr.bf16.mxu0 %v13902_v53 }
 0xf86   : > { %11802 = vmatpush3.bf16.msra.mxu0 %v14981_v13 }
 0xf87   : > { %11803 = vmatprep.subr.bf16.mxu0 %v13902_v53 }
 0xf8a   : > { %11804 = vmatpush3.bf16.msra.mxu0 %v14985_v37 }
 0xf8b   : > { %11827 = vmatprep.subr.bf16.mxu0 %v13902_v53 }
 0xf8d   : > { %11806 = vmatmul.mubr.msk.bf16.vlgmr.msra.gmra.mrb[68].mxu0 %vm3761_vm4, %v14900_v0 }
 0xf8e   : > { %11829 = vmatprep.mubr.msk.bf16.mxu0 %vm13903_vm3, %v13902_v53 }
0x1050   : > { %v4375_v39 = vpop.f32.mrb[64].mxu0 }
0x1051   : > { %v4382_v40 = vadd.f32 %v4375_v39, %v4251_v7  ;;  %v11795_v41 = vpop.f32.mrb[65].mxu0  ;;  %v15041_v39 = vld [vmem:[#allocation4 + $0x110] sm:$0xff]  }
0x1052   : > { %v4378_v42 = vpop.f32.mrb[66].mxu0  ;;  %v4909_v41 = vld [vmem:[%s16643_s11 + $0x8] sm:$0xff] }
0x1053   : > { %v4383_v43 = vadd.f32 %v4378_v42, %v4252_v33  ;;  %v11796_v14 = vpop.f32.mrb[67].mxu0  ;;  %4917 = vperm.xlu1 %12467, %v4909_v41   ;;  %v6256_v42 = vld [vmem:[%s16645_s13 + $0x10] sm:$0xff] }
0x1054   : > { %v9734_v14 = vld [vmem:[%s16984_s22] sm:$0xff] }
0x1060   : > { %v4451_v10 = vpop.f32.mrb[68].mxu0 }
0x1061   : > { %v4457_v49 = vpack.c.bf16 %v4451_v10, %v4451_v10  ;;  %v11807_v54 = vpop.f32.mrb[69].mxu0 }
0x1062   : > { %v4454_v55 = vpop.f32.mrb[70].mxu0 }
0x1063   : > { %v4470_v60 = vsel %vm3894_vm5, %v4457_v49, 0  ;;  %v11808_v62 = vpop.f32.mrb[71].mxu0 }
0x1064   : > { %11810 = vmatpush3.bf16.msra.mxu1 %v4470_v60 }
0x1065   : > { %11815 = vmatprep.subr.bf16.mxu1 %v13902_v53 }
0x1067   : > { %11812 = vmatmul.mubr.msk.bf16.vlgmr.msra.gmra.mrb[60].mxu1 %vm3890_vm6, %v12946_v63 }
0x1068   : > { %11816 = vmatpush3.bf16.msra.mxu1 %v12947_v1  ;;  %11823 = vmatprep.mubr.msk.bf16.mxu1 %vm13903_vm3, %v13902_v53 }
0x1069   : > { %11817 = vmatprep.subr.bf16.mxu1 %v13902_v53 }
0x106c   : > { %11818 = vmatpush3.bf16.msra.mxu1 %v12948_v44 }
0x106d   : > { %11819 = vmatprep.subr.bf16.mxu1 %v13902_v53 }
0x1070   : > { %11820 = vmatpush3.bf16.msra.mxu1 %v12949_v46 }
0x1071   : > { %11821 = vmatprep.subr.bf16.mxu1 %v13902_v53 }
0x1074   : > { %11822 = vmatpush3.bf16.msra.mxu1 %v12950_v50 }
0x1075   : > { %11845 = vmatprep.subr.bf16.mxu1 %v13902_v53 }
0x1077   : > { %11824 = vmatmul.mubr.msk.bf16.vlgmr.msra.gmra.mrb[64].mxu1 %vm3761_vm4, %v14900_v0 }
0x1078   : > { %11847 = vmatprep.mubr.msk.bf16.mxu1 %vm13903_vm3, %v13902_v53 }
0x113a   : > { %v4506_v51 = vpop.f32.mrb[60].mxu1 }
0x113b   : > { %v4513_v23 = vadd.f32 %v4506_v51, %v4382_v40  ;;  %v11813_v24 = vpop.f32.mrb[61].mxu1  ;;  %v15045_v40 = vld [vmem:[#allocation4 + $0x118] sm:$0xff]  }
0x113c   : > { %v4509_v26 = vpop.f32.mrb[62].mxu1 }
0x113d   : > { %v4514_v28 = vadd.f32 %v4509_v26, %v4383_v43  ;;  %v11814_v29 = vpop.f32.mrb[63].mxu1  ;;  %v8040_v43 = vld [vmem:[%s16648_s16] sm:$0xff] }
0x114a   : > { %v4582_v30 = vpop.f32.mrb[64].mxu1 }
0x114b   : > { %v4588_v32 = vpack.c.bf16 %v4582_v30, %v4582_v30  ;;  %v11825_v25 = vpop.f32.mrb[65].mxu1 }
0x114c   : > { %v4585_v3 = vpop.f32.mrb[66].mxu1 }
0x114d   : > { %v4601_v4 = vsel %vm3894_vm5, %v4588_v32, 0  ;;  %v11826_v19 = vpop.f32.mrb[67].mxu1  ;;  %v4918_v3 = vpop.permute.xlu1 %4917 }
0x114e   : > { %11828 = vmatpush3.bf16.msra.mxu0 %v4601_v4 }
0x114f   : > { %11833 = vmatprep.subr.bf16.mxu0 %v13902_v53 }
0x1151   : > { %11830 = vmatmul.mubr.msk.bf16.vlgmr.msra.gmra.mrb[72].mxu0 %vm3890_vm6, %v12951_v20 }
0x1152   : > { %11834 = vmatpush3.bf16.msra.mxu0 %v12952_v21  ;;  %11841 = vmatprep.mubr.msk.bf16.mxu0 %vm13903_vm3, %v13902_v53 }
0x1153   : > { %11835 = vmatprep.subr.bf16.mxu0 %v13902_v53 }
0x1156   : > { %11836 = vmatpush3.bf16.msra.mxu0 %v12953_v15 }
0x1157   : > { %11837 = vmatprep.subr.bf16.mxu0 %v13902_v53 }
0x115a   : > { %11838 = vmatpush3.bf16.msra.mxu0 %v12954_v22 }
0x115b   : > { %11839 = vmatprep.subr.bf16.mxu0 %v13902_v53 }
0x115e   : > { %11840 = vmatpush3.bf16.msra.mxu0 %v12955_v9 }
0x115f   : > { %11863 = vmatprep.subr.bf16.mxu0 %v13902_v53 }
0x1161   : > { %11842 = vmatmul.mubr.msk.bf16.vlgmr.msra.gmra.mrb[76].mxu0 %vm3761_vm4, %v14900_v0 }
0x1162   : > { %11865 = vmatprep.mubr.msk.bf16.mxu0 %vm13903_vm3, %v13902_v53 }
0x1224   : > { %v4637_v61 = vpop.f32.mrb[72].mxu0 }
0x1225   : > { %v4644_v5 = vadd.f32 %v4637_v61, %v4513_v23  ;;  %v11831_v6 = vpop.f32.mrb[73].mxu0  ;;  %v12961_v23 = vld [vmem:[%s16983_s27 + $0x40] sm:$0xff]  }
0x1226   : > { %v4640_v7 = vpop.f32.mrb[74].mxu0 }
0x1227   : > { %v4645_v8 = vadd.f32 %v4640_v7, %v4514_v28  ;;  %v11832_v27 = vpop.f32.mrb[75].mxu0  ;;  %v4913_v28 = vpop.permute.xlu0 %4912 }
0x1234   : > { %v4713_v33 = vpop.f32.mrb[76].mxu0 }
0x1235   : > { %v4719_v34 = vpack.c.bf16 %v4713_v33, %v4713_v33  ;;  %v11843_v35 = vpop.f32.mrb[77].mxu0 }
0x1236   : > { %v4716_v36 = vpop.f32.mrb[78].mxu0 }
0x1237   : > { %v4732_v38 = vsel %vm3894_vm5, %v4719_v34, 0  ;;  %v11844_v16 = vpop.f32.mrb[79].mxu0 }
0x1238   : > { %11846 = vmatpush3.bf16.msra.mxu1 %v4732_v38 }
0x1239   : > { %11851 = vmatprep.subr.bf16.mxu1 %v13902_v53 }
0x123b   : > { %11848 = vmatmul.mubr.msk.bf16.vlgmr.msra.gmra.mrb[68].mxu1 %vm3890_vm6, %v12956_v17 }
0x123c   : > { %11852 = vmatpush3.bf16.msra.mxu1 %v15030_v52  ;;  %11859 = vmatprep.mubr.msk.bf16.mxu1 %vm13903_vm3, %v13902_v53 }
0x123d   : > { %11853 = vmatprep.subr.bf16.mxu1 %v13902_v53 }
0x1240   : > { %11854 = vmatpush3.bf16.msra.mxu1 %v15035_v11 }
0x1241   : > { %11855 = vmatprep.subr.bf16.mxu1 %v13902_v53 }
0x1244   : > { %11856 = vmatpush3.bf16.msra.mxu1 %v15041_v39 }
0x1245   : > { %11857 = vmatprep.subr.bf16.mxu1 %v13902_v53 }
0x1248   : > { %11858 = vmatpush3.bf16.msra.mxu1 %v15045_v40 }
0x1249   : > { %11881 = vmatprep.subr.bf16.mxu1 %v13902_v53 }
0x124b   : > { %11860 = vmatmul.mubr.msk.bf16.vlgmr.msra.gmra.mrb[72].mxu1 %vm3761_vm4, %v14900_v0  ;;  %v6254_v0 = vld [vmem:[%s16645_s13] sm:$0xff] }
0x124c   : > { %11882 = vmatpush3.bf16.msra.mxu1 %v12952_v21  ;;  %11889 = vmatprep.mubr.msk.bf16.mxu1 %vm13903_vm3, %v13902_v53  ;;  %v12964_v21 = vld [vmem:[%s16985_s12 + $0x10] sm:$0xff]  }
0x124d   : > { %11883 = vmatprep.subr.bf16.mxu1 %v13902_v53  ;;  %6260 = vperm.xlu1 %12467, %v6254_v0  }
0x1250   : > { %11884 = vmatpush3.bf16.msra.mxu1 %v12953_v15  ;;  %v12965_v15 = vld [vmem:[%s16985_s12 + $0x18] sm:$0xff]  }
0x1251   : > { %11885 = vmatprep.subr.bf16.mxu1 %v13902_v53  ;;  %6270 = vperm.xlu1 %12467, %v6256_v42  }
0x1254   : > { %11886 = vmatpush3.bf16.msra.mxu1 %v12954_v22 }
0x1255   : > { %11887 = vmatprep.subr.bf16.mxu1 %v13902_v53  ;;  %8044 = vperm.xlu1 %12467, %v8040_v43   ;;  %v12966_v43 = vld [vmem:[#allocation6] sm:$0xff]  }
0x1258   : > { %11888 = vmatpush3.bf16.msra.mxu1 %v12955_v9 }
0x1259   : > { %11905 = vmatprep.subr.bf16.mxu1 %v13902_v53  ;;  %9737 = vperm.xlu1 %12467, %v9734_v14   ;;  %v12967_v14 = vld [vmem:[#allocation6 + $0x8] sm:$0xff]  }
0x130e   : > { %v4768_v10 = vpop.f32.mrb[68].mxu1 }
0x130f   : > { %v4775_v49 = vadd.f32 %v4768_v10, %v4644_v5  ;;  %v11849_v54 = vpop.f32.mrb[69].mxu1 }
0x1310   : > { %v4771_v55 = vpop.f32.mrb[70].mxu1 }
0x1311   : > { %v4776_v60 = vadd.f32 %v4771_v55, %v4645_v8  ;;  %v11850_v62 = vpop.f32.mrb[71].mxu1  ;;  %v12968_v55 = vld [vmem:[#allocation6 + $0x10] sm:$0xff]  }
0x131e   : > { %v4844_v63 = vpop.f32.mrb[72].mxu1 }
0x131f   : > { %v4850_v1 = vpack.c.bf16 %v4844_v63, %v4844_v63  ;;  %v11861_v44 = vpop.f32.mrb[73].mxu1  ;;  %v12969_v63 = vld [vmem:[#allocation6 + $0x18] sm:$0xff]  }
0x1320   : > { %v4847_v46 = vpop.f32.mrb[74].mxu1  ;;  %v12971_v44 = vld [vmem:[#allocation6 + $0x28] sm:$0xff]  }
0x1321   : > { %v4863_v50 = vsel %vm3894_vm5, %v4850_v1, 0  ;;  %v11862_v51 = vpop.f32.mrb[75].mxu1  ;;  %v12970_v1 = vld [vmem:[#allocation6 + $0x20] sm:$0xff]   ;;  %v12972_v46 = vld [vmem:[#allocation6 + $0x30] sm:$0xff]  }
0x1322   : > { %11864 = vmatpush3.bf16.msra.mxu0 %v4863_v50  ;;  %v12973_v50 = vld [vmem:[#allocation6 + $0x38] sm:$0xff]   ;;  %v12974_v51 = vld [vmem:[#allocation6 + $0x40] sm:$0xff]  }
0x1323   : > { %11869 = vmatprep.subr.bf16.mxu0 %v13902_v53 }
0x1325   : > { %11866 = vmatmul.mubr.msk.bf16.vlgmr.msra.gmra.mrb[80].mxu0 %vm3890_vm6, %v12961_v23  ;;  %v12975_v23 = vld [vmem:[%s16986_s0 + $0x10] sm:$0xff]  }
0x1326   : > { %11870 = vmatpush3.bf16.msra.mxu0 %v14970_v45  ;;  %11877 = vmatprep.mubr.msk.bf16.mxu0 %vm13903_vm3, %v13902_v53 }
0x1327   : > { %11871 = vmatprep.subr.bf16.mxu0 %v13902_v53 }
0x132a   : > { %11872 = vmatpush3.bf16.msra.mxu0 %v14975_v47 }
0x132b   : > { %11873 = vmatprep.subr.bf16.mxu0 %v13902_v53 }
0x132e   : > { %11874 = vmatpush3.bf16.msra.mxu0 %v14981_v13  ;;  %v12962_v13 = vld [vmem:[%s16985_s12] sm:$0xff]  }
0x132f   : > { %11875 = vmatprep.subr.bf16.mxu0 %v13902_v53 }
0x1332   : > { %11876 = vmatpush3.bf16.msra.mxu0 %v14985_v37  ;;  %v12963_v37 = vld [vmem:[%s16985_s12 + $0x8] sm:$0xff]  }
0x1333   : > { %11893 = vmatprep.subr.bf16.mxu0 %v13902_v53 }
0x13f8   : > { %v4899_v24 = vpop.f32.mrb[80].mxu0 }
0x13f9   : > { %v4906_v26 = vadd.f32 %v4899_v24, %v4775_v49  ;;  %v11867_v45 = vpop.f32.mrb[81].mxu0 }
0x13fa   : > { %v4902_v29 = vpop.f32.mrb[82].mxu0 }
0x13fb   : > { %v4920_v30 = vadd.f32 %v4913_v28, %v4906_v26  ;;  %v4907_v32 = vadd.f32 %v4902_v29, %v4776_v60  ;;  %v11868_v25 = vpop.f32.mrb[83].mxu0 }
0x13fd   : > { %v4921_v47 = vadd.f32 %v4918_v3, %v4907_v32  ;;  %v4922_v4 = vmax.f32 %v4920_v30, 0.0 }
0x13ff   : > { %v4923_v19 = vmax.f32 %v4921_v47, 0.0 }
0x1401   : > { %v15089_v20 = vpack.c.bf16 %v4923_v19, %v4922_v4 }
0x1403   : > { %11878 = vmatmul.mubr.msk.bf16.vlgmr.msra.gmra.mrb[84].mxu0 %vm3761_vm4, %v15089_v20  ;;  %11890 = vmatmul.mubr.msk.bf16.vlgmr.msra.gmra.mrb[76].mxu1 %vm3761_vm4, %v15089_v20 }
0x1404   : > { %11894 = vmatpush3.bf16.msra.mxu0 %v15030_v52  ;;  %11901 = vmatprep.mubr.msk.bf16.mxu0 %vm13903_vm3, %v13902_v53 }
0x1405   : > { %11895 = vmatprep.subr.bf16.mxu0 %v13902_v53  ;;  %11913 = vmatprep.mubr.msk.bf16.mxu1 %vm13903_vm3, %v13902_v53 }
0x1406   : > { %11906 = vmatpush3.bf16.msra.mxu1 %v12962_v13 }
0x1407   : > { %11907 = vmatprep.subr.bf16.mxu1 %v13902_v53 }
0x1408   : > { %11896 = vmatpush3.bf16.msra.mxu0 %v15035_v11 }
0x1409   : > { %11897 = vmatprep.subr.bf16.mxu0 %v13902_v53 }
0x140a   : > { %11908 = vmatpush3.bf16.msra.mxu1 %v12963_v37 }
0x140b   : > { %11909 = vmatprep.subr.bf16.mxu1 %v13902_v53 }
0x140c   : > { %11898 = vmatpush3.bf16.msra.mxu0 %v15041_v39 }
0x140d   : > { %11899 = vmatprep.subr.bf16.mxu0 %v13902_v53 }
0x140e   : > { %11910 = vmatpush3.bf16.msra.mxu1 %v12964_v21 }
0x140f   : > { %11911 = vmatprep.subr.bf16.mxu1 %v13902_v53 }
0x1410   : > { %11900 = vmatpush3.bf16.msra.mxu0 %v15045_v40 }
0x1411   : > { %11917 = vmatprep.subr.bf16.mxu0 %v13902_v53 }
0x1412   : > { %11912 = vmatpush3.bf16.msra.mxu1 %v12965_v15 }
0x1413   : > { %11902 = vmatmul.mubr.msk.bf16.vlgmr.msra.gmra.mrb[88].mxu0 %vm3761_vm4, %v15089_v20  ;;  %11923 = vmatprep.subr.bf16.mxu1 %v13902_v53 }
0x1414   : > { %11919 = vmatprep.mubr.msk.bf16.mxu0 %vm13903_vm3, %v13902_v53  ;;  %11918 = vmatpush3.bf16.msra.mxu0 %v12966_v43  ;;  %v12980_v43 = vld [vmem:[%s16986_s0 + $0x28] sm:$0xff]  }
0x14d6   : > { %v15127_v22 = vpop.f32.mrb[84].mxu0  ;;  %v15129_v9 = vpop.f32.mrb[76].mxu1 }
0x14d7   : > { %v11879_v61 = vpop.f32.mrb[85].mxu0  ;;  %v11891_v5 = vpop.f32.mrb[77].mxu1  ;;  %v4969_v36 = vmax.f32 %v4922_v4, %v15127_v22  ;;  %v12976_v4 = vld [vmem:[%s16986_s0 + $0x18] sm:$0xff]  }
0x14d8   : > { %v15131_v6 = vpop.f32.mrb[86].mxu0  ;;  %v15133_v7 = vpop.f32.mrb[78].mxu1 }
0x14d9   : > { %v7779_v8 = vpack.c.bf16 %v15131_v6, %v15127_v22  ;;  %v7930_v27 = vpack.c.bf16 %v15133_v7, %v15129_v9  ;;  %v11880_v33 = vpop.f32.mrb[87].mxu0  ;;  %v11892_v34 = vpop.f32.mrb[79].mxu1  ;;  %v4970_v52 = vmax.f32 %v4923_v19, %v15131_v6  ;;  %v12977_v19 = vld [vmem:[%s16986_s0] sm:$0xff]   ;;  %v13011_v22 = vld [vmem:[#allocation12 + $0x38] sm:$0xff]   ;;  %v16987_v6 = vmov 0  }
0x14da   : > { %v12978_v34 = vld [vmem:[%s16986_s0 + $0x8] sm:$0xff]  }
0x14e6   : > { %v15139_v35 = vpop.f32.mrb[88].mxu0 }
0x14e7   : > { %v5053_v38 = vmax.f32 %v15129_v9, %v15139_v35  ;;  %v11903_v16 = vpop.f32.mrb[89].mxu0 }
0x14e8   : > { %v15144_v17 = vpop.f32.mrb[90].mxu0 }
0x14e9   : > { %v5055_v11 = vmax.f32 %v4969_v36, %v5053_v38  ;;  %v5054_v39 = vmax.f32 %v15133_v7, %v15144_v17  ;;  %v7985_v40 = vpack.c.bf16 %v15144_v17, %v15139_v35  ;;  %v11904_v41 = vpop.f32.mrb[91].mxu0  ;;  %v12979_v38 = vld [vmem:[%s16986_s0 + $0x20] sm:$0xff]   ;;  %v13066_v35 = vld [vmem:[#allocation2 + $0x34] ss:$8 sps:$4 sm:$0xff]   ;;  %v13067_v17 = vld [vmem:[#allocation2 + $0x30] ss:$8 sps:$4 sm:$0xff]  }
0x14ea   : > { %v13020_v7 = vld [vmem:[#allocation9 + $0x24] ss:$8 sps:$4 sm:$0xff]  }
0x14eb   : > { %v5056_v0 = vmax.f32 %v4970_v52, %v5054_v39 }
0x14ed   : > { %v5057_v42 = vpack.c.bf16 %v5056_v0, %v5055_v11 }
0x14ef   : > { %11914 = vmatmul.mubr.msk.bf16.vlgmr.msra.gmra.mrb[80].mxu1 %vm3761_vm4, %v5057_v42 }
0x14f0   : > { %11925 = vmatprep.mubr.msk.bf16.mxu1 %vm13903_vm3, %v13902_v53  ;;  %11924 = vmatpush3.bf16.msra.mxu1 %v12967_v14  ;;  %v12981_v14 = vld [vmem:[%s16986_s0 + $0x30] sm:$0xff]  }
0x14f1   : > { %11941 = vmatprep.subr.bf16.mxu1 %v13902_v53 }
0x15c2   : > { %v5127_v10 = vpop.f32.mrb[80].mxu1 }
0x15c3   : > { %v11915_v49 = vpop.f32.mrb[81].mxu1 }
0x15c4   : > { %v5130_v54 = vpop.f32.mrb[82].mxu1 }
0x15c5   : > { %v5134_v60 = vpack.c.bf16 %v5130_v54, %v5127_v10  ;;  %v11916_v62 = vpop.f32.mrb[83].mxu1 }
0x15c7   : > { %11920 = vmatmul.mubr.msk.bf16.vlgmr.msra.gmra.mrb[92].mxu0 %vm5143_vm7, %v5134_v60  ;;  %11926 = vmatmul.mubr.msk.bf16.vlgmr.msra.gmra.mrb[84].mxu1 %vm5143_vm7, %v5134_v60 }
0x15c8   : > { %11942 = vmatpush3.bf16.msra.mxu1 %v12968_v55  ;;  %11943 = vmatprep.mubr.msk.bf16.mxu1 %vm13903_vm3, %v13902_v53 }
0x15c9   : > { %11953 = vmatprep.subr.bf16.mxu1 %v13902_v53  ;;  %11931 = vmatprep.mubr.msk.bf16.mxu0 %vm5143_vm7, %v12975_v23 }
0x15cf   : > { %11944 = vmatmul.mubr.msk.bf16.vlgmr.msra.gmra.mrb[88].mxu1 %vm5143_vm7, %v5134_v60 }
0x15d0   : > { %11954 = vmatpush3.bf16.msra.mxu1 %v12969_v63  ;;  %11955 = vmatprep.mubr.msk.bf16.mxu1 %vm13903_vm3, %v13902_v53 }
0x15d1   : > { %11965 = vmatprep.subr.bf16.mxu1 %v13902_v53 }
0x15d7   : > { %11956 = vmatmul.mubr.msk.bf16.vlgmr.msra.gmra.mrb[92].mxu1 %vm5143_vm7, %v5134_v60 }
0x15d8   : > { %11966 = vmatpush3.bf16.msra.mxu1 %v12970_v1  ;;  %11967 = vmatprep.mubr.msk.bf16.mxu1 %vm13903_vm3, %v13902_v53  ;;  %v12982_v1 = vld [vmem:[%s16986_s0 + $0x38] sm:$0xff]  }
0x15d9   : > { %11977 = vmatprep.subr.bf16.mxu1 %v13902_v53 }
0x15df   : > { %11968 = vmatmul.mubr.msk.bf16.vlgmr.msra.gmra.mrb[96].mxu1 %vm5143_vm7, %v5134_v60 }
0x15e0   : > { %11978 = vmatpush3.bf16.msra.mxu1 %v12971_v44  ;;  %11979 = vmatprep.mubr.msk.bf16.mxu1 %vm13903_vm3, %v13902_v53 }
0x15e1   : > { %11989 = vmatprep.subr.bf16.mxu1 %v13902_v53 }
0x15e7   : > { %11980 = vmatmul.mubr.msk.bf16.vlgmr.msra.gmra.mrb[100].mxu1 %vm5143_vm7, %v5134_v60 }
0x15e8   : > { %11990 = vmatpush3.bf16.msra.mxu1 %v12972_v46  ;;  %11991 = vmatprep.mubr.msk.bf16.mxu1 %vm13903_vm3, %v13902_v53  ;;  %v12983_v46 = vld [vmem:[%s16986_s0 + $0x40] sm:$0xff]  }
0x15e9   : > { %12001 = vmatprep.subr.bf16.mxu1 %v13902_v53 }
0x15ef   : > { %11992 = vmatmul.mubr.msk.bf16.vlgmr.msra.gmra.mrb[104].mxu1 %vm5143_vm7, %v5134_v60 }
0x15f0   : > { %12002 = vmatpush3.bf16.msra.mxu1 %v12973_v50  ;;  %12003 = vmatprep.mubr.msk.bf16.mxu1 %vm13903_vm3, %v13902_v53 }
0x15f1   : > { %12013 = vmatprep.subr.bf16.mxu1 %v13902_v53 }
0x15f7   : > { %12004 = vmatmul.mubr.msk.bf16.vlgmr.msra.gmra.mrb[108].mxu1 %vm5143_vm7, %v5134_v60 }
0x15f8   : > { %12014 = vmatpush3.bf16.msra.mxu1 %v12974_v51  ;;  %12015 = vmatprep.mubr.msk.bf16.mxu1 %vm13903_vm3, %v13902_v53 }
0x15ff   : > { %12016 = vmatmul.mubr.msk.bf16.vlgmr.msra.gmra.mrb[112].mxu1 %vm5143_vm7, %v5134_v60 }
0x169a   : > { %v5181_v24 = vpop.f32.mrb[92].mxu0  ;;  %v5236_v26 = vpop.f32.mrb[84].mxu1 }
0x169b   : > { %v11921_v45 = vpop.f32.mrb[93].mxu0  ;;  %v11927_v28 = vpop.f32.mrb[85].mxu1 }
0x169c   : > { %v5184_v29 = vpop.f32.mrb[94].mxu0  ;;  %v5239_v30 = vpop.f32.mrb[86].mxu1 }
0x169d   : > { %v5188_v32 = vpack.c.bf16 %v5184_v29, %v5181_v24  ;;  %v5243_v25 = vpack.c.bf16 %v5239_v30, %v5236_v26  ;;  %v11922_v3 = vpop.f32.mrb[95].mxu0  ;;  %v11928_v47 = vpop.f32.mrb[87].mxu1  ;;  %v12984_v29 = vld [vmem:[%s16986_s0 + $0x48] sm:$0xff]   ;;  %v12985_v30 = vld [vmem:[%s16986_s0 + $0x50] sm:$0xff]  }
0x169f   : > { %11929 = vmatprep.subr.bf16.mxu0 %v5243_v25 }
0x16a0   : > { %11930 = vmatpush3.bf16.msra.mxu0 %v5243_v25 }
0x16a1   : > { %11935 = vmatprep.subr.bf16.mxu0 %v5188_v32 }
0x16a2   : > { %v5422_v13 = vpop.f32.mrb[88].mxu1 }
0x16a3   : > { %11932 = vmatmul.mubr.msk.bf16.vlgmr.msra.gmra.mrb[96].mxu0 %vm5143_vm7, %v12976_v4  ;;  %v11945_v37 = vpop.f32.mrb[89].mxu1 }
0x16a4   : > { %11936 = vmatpush3.bf16.msra.mxu0 %v5188_v32  ;;  %v5425_v21 = vpop.f32.mrb[90].mxu1  ;;  %11937 = vmatprep.mubr.msk.bf16.mxu0 %vm5143_vm7, %v12977_v19  ;;  %v12986_v19 = vld [vmem:[%s16986_s0 + $0x58] sm:$0xff]   ;;  %v12988_v37 = vld [vmem:[%s16986_s0 + $0x68] sm:$0xff]  }
0x16a5   : > { %v5429_v15 = vpack.c.bf16 %v5425_v21, %v5422_v13  ;;  %v11946_v61 = vpop.f32.mrb[91].mxu1  ;;  %v12987_v13 = vld [vmem:[%s16986_s0 + $0x60] sm:$0xff]   ;;  %v12989_v21 = vld [vmem:[%s16986_s0 + $0x70] sm:$0xff]  }
0x16a6   : > { %v12991_v61 = vld [vmem:[%s16986_s0 + $0x80] sm:$0xff]  }
0x16a7   : > { %11947 = vmatprep.subr.bf16.mxu0 %v5429_v15 }
0x16aa   : > { %v5547_v5 = vpop.f32.mrb[92].mxu1 }
0x16ab   : > { %v11957_v33 = vpop.f32.mrb[93].mxu1 }
0x16ac   : > { %v5550_v36 = vpop.f32.mrb[94].mxu1  ;;  %v12992_v33 = vld [vmem:[%s16986_s0 + $0x88] sm:$0xff]  }
0x16ad   : > { %v5554_v16 = vpack.c.bf16 %v5550_v36, %v5547_v5  ;;  %v11958_v52 = vpop.f32.mrb[95].mxu1  ;;  %v15252_v5 = vld [vmem:[#allocation4 + $0x20] sm:$0xff]   ;;  %v15264_v36 = vld [vmem:[#allocation4 + $0x30] sm:$0xff]  }
0x16ae   : > { %v6261_v52 = vpop.permute.xlu1 %6260 }
0x16af   : > { %11938 = vmatmul.mubr.msk.bf16.vlgmr.msra.gmra.mrb[96].mxu0 %vm5143_vm7, %v12978_v34  ;;  %v15260_v34 = vld [vmem:[#allocation4 + $0x28] sm:$0xff]  }
0x16b0   : > { %11948 = vmatpush3.bf16.msra.mxu0 %v5429_v15  ;;  %11949 = vmatprep.mubr.msk.bf16.mxu0 %vm5143_vm7, %v12979_v38  ;;  %v12990_v15 = vld [vmem:[%s16986_s0 + $0x78] sm:$0xff]   ;;  %v12993_v38 = vld [vmem:[#allocation7] sm:$0xff]  }
0x16b1   : > { %11959 = vmatprep.subr.bf16.mxu0 %v5554_v16  ;;  %12025 = vmatprep.subr.bf16.mxu1 %v12993_v38 }
0x16b2   : > { %v5672_v11 = vpop.f32.mrb[96].mxu1  ;;  %12026 = vmatpush3.bf16.msra.mxu1 %v12993_v38  ;;  %v12995_v38 = vld [vmem:[#allocation10] sm:$0xff]  }
0x16b3   : > { %v11969_v39 = vpop.f32.mrb[97].mxu1 }
0x16b4   : > { %v5675_v41 = vpop.f32.mrb[98].mxu1  ;;  %v6271_v39 = vpop.permute.xlu1 %6270 }
0x16b5   : > { %v5679_v0 = vpack.c.bf16 %v5675_v41, %v5672_v11  ;;  %v11970_v42 = vpop.f32.mrb[99].mxu1  ;;  %v6266_v11 = vpop.permute.xlu0 %6265 }
0x16ba   : > { %v5797_v10 = vpop.f32.mrb[100].mxu1 }
0x16bb   : > { %11950 = vmatmul.mubr.msk.bf16.vlgmr.msra.gmra.mrb[96].mxu0 %vm5143_vm7, %v12980_v43  ;;  %v11981_v49 = vpop.f32.mrb[101].mxu1  ;;  %v6276_v43 = vpop.permute.xlu0 %6275 }
0x16bc   : > { %11960 = vmatpush3.bf16.msra.mxu0 %v5554_v16  ;;  %v5800_v54 = vpop.f32.mrb[102].mxu1  ;;  %11961 = vmatprep.mubr.msk.bf16.mxu0 %vm5143_vm7, %v12981_v14  ;;  %v15271_v16 = vld [vmem:[#allocation4] sm:$0xff]  }
0x16bd   : > { %11971 = vmatprep.subr.bf16.mxu0 %v5679_v0  ;;  %v5804_v55 = vpack.c.bf16 %v5800_v54, %v5797_v10  ;;  %v11982_v60 = vpop.f32.mrb[103].mxu1  ;;  %12031 = vmatprep.subr.bf16.mxu1 %v15271_v16 }
0x16c2   : > { %v5922_v62 = vpop.f32.mrb[104].mxu1 }
0x16c3   : > { %v11993_v63 = vpop.f32.mrb[105].mxu1 }
0x16c4   : > { %v5925_v44 = vpop.f32.mrb[106].mxu1 }
0x16c5   : > { %v5929_v50 = vpack.c.bf16 %v5925_v44, %v5922_v62  ;;  %v11994_v51 = vpop.f32.mrb[107].mxu1 }
0x16c6   : > { %v15285_v51 = vld [vmem:[#allocation4 + $0x18] sm:$0xff]  }
0x16c7   : > { %11962 = vmatmul.mubr.msk.bf16.vlgmr.msra.gmra.mrb[96].mxu0 %vm5143_vm7, %v12982_v1 }
0x16c8   : > { %11972 = vmatpush3.bf16.msra.mxu0 %v5679_v0  ;;  %11973 = vmatprep.mubr.msk.bf16.mxu0 %vm5143_vm7, %v12983_v46  ;;  %v15277_v46 = vld [vmem:[#allocation4 + $0x8] sm:$0xff]  }
0x16c9   : > { %11983 = vmatprep.subr.bf16.mxu0 %v5804_v55 }
0x16ca   : > { %v6047_v23 = vpop.f32.mrb[108].mxu1 }
0x16cb   : > { %v12005_v24 = vpop.f32.mrb[109].mxu1 }
0x16cc   : > { %v6050_v26 = vpop.f32.mrb[110].mxu1 }
0x16cd   : > { %v6054_v45 = vpack.c.bf16 %v6050_v26, %v6047_v23  ;;  %v12006_v28 = vpop.f32.mrb[111].mxu1 }
0x16d2   : > { %v6172_v32 = vpop.f32.mrb[112].mxu1 }
0x16d3   : > { %11974 = vmatmul.mubr.msk.bf16.vlgmr.msra.gmra.mrb[96].mxu0 %vm5143_vm7, %v12984_v29  ;;  %v12017_v25 = vpop.f32.mrb[113].mxu1 }
0x16d4   : > { %11984 = vmatpush3.bf16.msra.mxu0 %v5804_v55  ;;  %v6175_v3 = vpop.f32.mrb[114].mxu1  ;;  %11985 = vmatprep.mubr.msk.bf16.mxu0 %vm5143_vm7, %v12985_v30 }
0x16d5   : > { %11995 = vmatprep.subr.bf16.mxu0 %v5929_v50  ;;  %v6179_v47 = vpack.c.bf16 %v6175_v3, %v6172_v32  ;;  %v12018_v4 = vpop.f32.mrb[115].mxu1 }
0x16df   : > { %11986 = vmatmul.mubr.msk.bf16.vlgmr.msra.gmra.mrb[96].mxu0 %vm5143_vm7, %v12986_v19 }
0x16e0   : > { %11996 = vmatpush3.bf16.msra.mxu0 %v5929_v50  ;;  %11997 = vmatprep.mubr.msk.bf16.mxu0 %vm5143_vm7, %v12987_v13  ;;  %v15281_v50 = vld [vmem:[#allocation4 + $0x10] sm:$0xff]  }
0x16e1   : > { %12007 = vmatprep.subr.bf16.mxu0 %v6054_v45 }
0x16eb   : > { %11998 = vmatmul.mubr.msk.bf16.vlgmr.msra.gmra.mrb[96].mxu0 %vm5143_vm7, %v12988_v37 }
0x16ec   : > { %12008 = vmatpush3.bf16.msra.mxu0 %v6054_v45  ;;  %12009 = vmatprep.mubr.msk.bf16.mxu0 %vm5143_vm7, %v12989_v21 }
0x16ed   : > { %12019 = vmatprep.subr.bf16.mxu0 %v6179_v47 }
0x16f7   : > { %12010 = vmatmul.mubr.msk.bf16.vlgmr.msra.gmra.mrb[96].mxu0 %vm5143_vm7, %v12990_v15 }
0x16f8   : > { %12020 = vmatpush3.bf16.msra.mxu0 %v6179_v47  ;;  %12021 = vmatprep.mubr.msk.bf16.mxu0 %vm5143_vm7, %v12991_v61 }
0x16f9   : > { %12043 = vmatprep.subr.bf16.mxu0 %v15252_v5 }
0x1703   : > { %12022 = vmatmul.mubr.msk.bf16.vlgmr.msra.gmra.mrb[96].mxu0 %vm5143_vm7, %v12992_v33  ;;  %v12994_v33 = vld [vmem:[#allocation10 + $0x8] sm:$0xff]  }
0x1704   : > { %12044 = vmatpush3.bf16.msra.mxu0 %v15252_v5 }
0x1705   : > { %12045 = vmatprep.subr.bf16.mxu0 %v15260_v34 }
0x1708   : > { %12046 = vmatpush3.bf16.msra.mxu0 %v15260_v34 }
0x1709   : > { %12047 = vmatprep.subr.bf16.mxu0 %v15264_v36 }
0x170c   : > { %12048 = vmatpush3.bf16.msra.mxu0 %v15264_v36 }
0x170d   : > { %12049 = vmatprep.subr.bf16.mxu0 %v14891_v31 }
0x1710   : > { %12050 = vmatpush3.bf16.msra.mxu0 %v14891_v31 }
0x1711   : > { %12063 = vmatprep.subr.bf16.mxu0 %v13902_v53 }
0x17d6   : > { %v12023_v41 = vpop.f32.mrb[96].mxu0 }
0x17d7   : > { %v6280_v0 = vadd.f32 %v12023_v41, %v6271_v39  ;;  %v6235_v42 = vpop.f32.mrb[97].mxu0  ;;  %v15323_v39 = vld [vmem:[#allocation4 + $0x50] sm:$0xff]   ;;  %v15327_v41 = vld [vmem:[#allocation4 + $0x58] sm:$0xff]  }
0x17d8   : > { %v6278_v14 = vadd.f32 %v6261_v52, %v6235_v42  ;;  %v12024_v10 = vpop.f32.mrb[98].mxu0  ;;  %v15308_v52 = vld [vmem:[#allocation4 + $0x40] sm:$0xff]  }
0x17d9   : > { %v6281_v49 = vadd.f32 %v12024_v10, %v6276_v43  ;;  %v6238_v31 = vpop.f32.mrb[99].mxu0  ;;  %v6284_v55 = vmax.f32 %v6280_v0, 0.0 }
0x17da   : > { %v6279_v54 = vadd.f32 %v6266_v11, %v6238_v31  ;;  %v6282_v62 = vmax.f32 %v6278_v14, 0.0  ;;  %v15317_v11 = vld [vmem:[#allocation4 + $0x48] sm:$0xff]  }
0x17db   : > { %v6285_v60 = vmax.f32 %v6281_v49, 0.0 }
0x17dc   : > { %v6283_v63 = vmax.f32 %v6279_v54, 0.0 }
0x17dd   : > { %v6287_v1 = vpack.c.bf16 %v6285_v60, %v6284_v55 }
0x17de   : > { %v6286_v44 = vpack.c.bf16 %v6283_v63, %v6282_v62 }
0x17e0   : > { %12027 = vmatprep.mubr.msk.bf16.mxu1 %vm5143_vm7, %v6286_v44 }
0x17e1   : > { %12028 = vmatmul.mubr.msk.bf16.vlgmr.msra.gmra.mrb[116].mxu1 %vm5143_vm7, %v6287_v1 }
0x17e2   : > { %12032 = vmatpush3.bf16.msra.mxu1 %v15271_v16 }
0x17e3   : > { %12033 = vmatprep.subr.bf16.mxu1 %v15277_v46 }
0x17e6   : > { %12034 = vmatpush3.bf16.msra.mxu1 %v15277_v46 }
0x17e7   : > { %12035 = vmatprep.subr.bf16.mxu1 %v15281_v50 }
0x17ea   : > { %12036 = vmatpush3.bf16.msra.mxu1 %v15281_v50 }
0x17eb   : > { %12037 = vmatprep.subr.bf16.mxu1 %v15285_v51 }
0x17ee   : > { %12038 = vmatpush3.bf16.msra.mxu1 %v15285_v51 }
0x17ef   : > { %12055 = vmatprep.subr.bf16.mxu1 %v13902_v53 }
0x18b4   : > { %v12029_v23 = vpop.f32.mrb[116].mxu1 }
0x18b5   : > { %v6336_v24 = vpop.f32.mrb[117].mxu1 }
0x18b6   : > { %v12030_v26 = vpop.f32.mrb[118].mxu1 }
0x18b7   : > { %v15290_v45 = vpack.c.bf16 %v12030_v26, %v12029_v23  ;;  %v6339_v28 = vpop.f32.mrb[119].mxu1  ;;  %v12996_v26 = vld [vmem:[#allocation10 + $0x10] sm:$0xff]  }
0x18b8   : > { %v15292_v29 = vpack.c.bf16 %v6339_v28, %v6336_v24  ;;  %v15337_v28 = vld [vmem:[#allocation4 + $0x60] sm:$0xff]  }
0x18ba   : > { %12039 = vmatprep.mubr.msk.bf16.mxu1 %vm3761_vm4, %v15292_v29  ;;  %12051 = vmatprep.mubr.msk.bf16.mxu0 %vm3761_vm4, %v15292_v29 }
0x18bb   : > { %12040 = vmatmul.mubr.msk.bf16.vlgmr.msra.gmra.mrb[120].mxu1 %vm3761_vm4, %v15290_v45  ;;  %12052 = vmatmul.mubr.msk.bf16.vlgmr.msra.gmra.mrb[100].mxu0 %vm3761_vm4, %v15290_v45 }
0x18bc   : > { %12059 = vmatprep.mubr.msk.bf16.mxu1 %vm13903_vm3, %v13902_v53  ;;  %12067 = vmatprep.mubr.msk.bf16.mxu0 %vm13903_vm3, %v13902_v53 }
0x198e   : > { %v12041_v30 = vpop.f32.mrb[120].mxu1  ;;  %v12053_v32 = vpop.f32.mrb[100].mxu0 }
0x198f   : > { %v6393_v25 = vpop.f32.mrb[121].mxu1  ;;  %v6446_v3 = vpop.f32.mrb[101].mxu0 }
0x1990   : > { %v12042_v47 = vpop.f32.mrb[122].mxu1  ;;  %v12054_v4 = vpop.f32.mrb[102].mxu0 }
0x1991   : > { %v6409_v19 = vpack.c.bf16 %v12042_v47, %v12041_v30  ;;  %v6462_v13 = vpack.c.bf16 %v12054_v4, %v12053_v32  ;;  %v6396_v37 = vpop.f32.mrb[123].mxu1  ;;  %v6449_v21 = vpop.f32.mrb[103].mxu0  ;;  %v15344_v30 = vld [vmem:[#allocation4 + $0x68] sm:$0xff]   ;;  %v15348_v32 = vld [vmem:[#allocation4 + $0x70] sm:$0xff]  }
0x1992   : > { %v6408_v15 = vpack.c.bf16 %v6396_v37, %v6393_v25  ;;  %v6461_v61 = vpack.c.bf16 %v6449_v21, %v6446_v3  ;;  %v15352_v25 = vld [vmem:[#allocation4 + $0x78] sm:$0xff]  }
0x1994   : > { %12056 = vmatpush3.bf16.msra.mxu1 %v6461_v61  ;;  %12064 = vmatpush3.bf16.msra.mxu0 %v6408_v15 }
0x1995   : > { %12057 = vmatprep.subr.bf16.mxu1 %v13902_v53  ;;  %12065 = vmatprep.subr.bf16.mxu0 %v13902_v53 }
0x1998   : > { %12058 = vmatpush3.bf16.msra.mxu1 %v6462_v13  ;;  %12066 = vmatpush3.bf16.msra.mxu0 %v6409_v19 }
0x1999   : > { %12071 = vmatprep.subr.bf16.mxu1 %v15308_v52  ;;  %12083 = vmatprep.subr.bf16.mxu0 %v13902_v53 }
0x199b   : > { %12060 = vmatmul.mubr.msk.bf16.vlgmr.msra.gmra.mrb[124].mxu1 %vm6471_vm8, %v12994_v33  ;;  %12068 = vmatmul.mubr.msk.bf16.vlgmr.msra.gmra.mrb[104].mxu0 %vm6471_vm8, %v12995_v38 }
0x199c   : > { %12072 = vmatpush3.bf16.msra.mxu1 %v15308_v52  ;;  %12079 = vmatprep.mubr.msk.bf16.mxu1 %vm3761_vm4, %v15292_v29 }
0x199d   : > { %12073 = vmatprep.subr.bf16.mxu1 %v15317_v11  ;;  %12087 = vmatprep.mubr.msk.bf16.mxu0 %vm13903_vm3, %v13902_v53 }
0x19a0   : > { %12074 = vmatpush3.bf16.msra.mxu1 %v15317_v11 }
0x19a1   : > { %12075 = vmatprep.subr.bf16.mxu1 %v15323_v39 }
0x19a4   : > { %12076 = vmatpush3.bf16.msra.mxu1 %v15323_v39 }
0x19a5   : > { %12077 = vmatprep.subr.bf16.mxu1 %v15327_v41 }
0x19a8   : > { %12078 = vmatpush3.bf16.msra.mxu1 %v15327_v41 }
0x19a9   : > { %12103 = vmatprep.subr.bf16.mxu1 %v13902_v53 }
0x19ab   : > { %12080 = vmatmul.mubr.msk.bf16.vlgmr.msra.gmra.mrb[128].mxu1 %vm3761_vm4, %v15290_v45 }
0x19ac   : > { %12107 = vmatprep.mubr.msk.bf16.mxu1 %vm13903_vm3, %v13902_v53 }
0x1a6e   : > { %v6509_v0 = vpop.f32.mrb[124].mxu1  ;;  %v6558_v42 = vpop.f32.mrb[104].mxu0 }
0x1a6f   : > { %v6559_v43 = vadd.f32 %v6558_v42, %v6509_v0  ;;  %v12061_v14 = vpop.f32.mrb[125].mxu1  ;;  %v12069_v10 = vpop.f32.mrb[105].mxu0  ;;  %v12997_v42 = vld [vmem:[#allocation10 + $0x18] sm:$0xff]  }
0x1a70   : > { %v6512_v49 = vpop.f32.mrb[126].mxu1  ;;  %v6561_v31 = vpop.f32.mrb[106].mxu0  ;;  %v15362_v14 = vld [vmem:[#allocation4 + $0x80] sm:$0xff]   ;;  %v15373_v10 = vld [vmem:[#allocation4 + $0x90] sm:$0xff]  }
0x1a71   : > { %v6562_v54 = vadd.f32 %v6561_v31, %v6512_v49  ;;  %v12062_v55 = vpop.f32.mrb[127].mxu1  ;;  %v12070_v60 = vpop.f32.mrb[107].mxu0  ;;  %v15377_v49 = vld [vmem:[#allocation4 + $0x98] sm:$0xff]  }
0x1a7e   : > { %v12081_v62 = vpop.f32.mrb[128].mxu1 }
0x1a7f   : > { %v6599_v63 = vpop.f32.mrb[129].mxu1 }
0x1a80   : > { %v12082_v1 = vpop.f32.mrb[130].mxu1 }
0x1a81   : > { %v6615_v44 = vpack.c.bf16 %v12082_v1, %v12081_v62  ;;  %v6602_v23 = vpop.f32.mrb[131].mxu1 }
0x1a82   : > { %v6614_v24 = vpack.c.bf16 %v6602_v23, %v6599_v63 }
0x1a84   : > { %12084 = vmatpush3.bf16.msra.mxu0 %v6614_v24 }
0x1a85   : > { %12085 = vmatprep.subr.bf16.mxu0 %v13902_v53 }
0x1a88   : > { %12086 = vmatpush3.bf16.msra.mxu0 %v6615_v44 }
0x1a89   : > { %12091 = vmatprep.subr.bf16.mxu0 %v15337_v28 }
0x1a8b   : > { %12088 = vmatmul.mubr.msk.bf16.vlgmr.msra.gmra.mrb[108].mxu0 %vm6471_vm8, %v12996_v26 }
0x1a8c   : > { %12092 = vmatpush3.bf16.msra.mxu0 %v15337_v28  ;;  %12099 = vmatprep.mubr.msk.bf16.mxu0 %vm3761_vm4, %v15292_v29 }
0x1a8d   : > { %12093 = vmatprep.subr.bf16.mxu0 %v15344_v30 }
0x1a90   : > { %12094 = vmatpush3.bf16.msra.mxu0 %v15344_v30 }
0x1a91   : > { %12095 = vmatprep.subr.bf16.mxu0 %v15348_v32 }
0x1a94   : > { %12096 = vmatpush3.bf16.msra.mxu0 %v15348_v32 }
0x1a95   : > { %12097 = vmatprep.subr.bf16.mxu0 %v15352_v25 }
0x1a98   : > { %12098 = vmatpush3.bf16.msra.mxu0 %v15352_v25 }
0x1a99   : > { %12123 = vmatprep.subr.bf16.mxu0 %v13902_v53 }
0x1a9b   : > { %12100 = vmatmul.mubr.msk.bf16.vlgmr.msra.gmra.mrb[112].mxu0 %vm3761_vm4, %v15290_v45 }
0x1a9c   : > { %12127 = vmatprep.mubr.msk.bf16.mxu0 %vm13903_vm3, %v13902_v53 }
0x1b5e   : > { %v6661_v3 = vpop.f32.mrb[108].mxu0 }
0x1b5f   : > { %v6668_v47 = vadd.f32 %v6661_v3, %v6559_v43  ;;  %v12089_v4 = vpop.f32.mrb[109].mxu0  ;;  %v15369_v43 = vld [vmem:[#allocation4 + $0x88] sm:$0xff]  }
0x1b60   : > { %v6664_v19 = vpop.f32.mrb[110].mxu0  ;;  %v12998_v4 = vld [vmem:[#allocation10 + $0x20] sm:$0xff]  }
0x1b61   : > { %v6669_v13 = vadd.f32 %v6664_v19, %v6562_v54  ;;  %v12090_v37 = vpop.f32.mrb[111].mxu0  ;;  %v13043_v19 = vld [vmem:[#allocation4 + $0xa0] sm:$0xff]  }
0x1b62   : > { %v13046_v37 = vld [vmem:[#allocation4 + $0xb8] sm:$0xff]  }
0x1b6e   : > { %v12101_v21 = vpop.f32.mrb[112].mxu0 }
0x1b6f   : > { %v6704_v15 = vpop.f32.mrb[113].mxu0 }
0x1b70   : > { %v12102_v61 = vpop.f32.mrb[114].mxu0 }
0x1b71   : > { %v6720_v33 = vpack.c.bf16 %v12102_v61, %v12101_v21  ;;  %v6707_v38 = vpop.f32.mrb[115].mxu0 }
0x1b72   : > { %v6719_v0 = vpack.c.bf16 %v6707_v38, %v6704_v15 }
0x1b74   : > { %12104 = vmatpush3.bf16.msra.mxu1 %v6719_v0 }
0x1b75   : > { %12105 = vmatprep.subr.bf16.mxu1 %v13902_v53 }
0x1b78   : > { %12106 = vmatpush3.bf16.msra.mxu1 %v6720_v33 }
0x1b79   : > { %12111 = vmatprep.subr.bf16.mxu1 %v15362_v14 }
0x1b7b   : > { %12108 = vmatmul.mubr.msk.bf16.vlgmr.msra.gmra.mrb[132].mxu1 %vm6471_vm8, %v12997_v42 }
0x1b7c   : > { %12112 = vmatpush3.bf16.msra.mxu1 %v15362_v14  ;;  %12119 = vmatprep.mubr.msk.bf16.mxu1 %vm3761_vm4, %v15292_v29 }
0x1b7d   : > { %12113 = vmatprep.subr.bf16.mxu1 %v15369_v43 }
0x1b80   : > { %12114 = vmatpush3.bf16.msra.mxu1 %v15369_v43 }
0x1b81   : > { %12115 = vmatprep.subr.bf16.mxu1 %v15373_v10 }
0x1b84   : > { %12116 = vmatpush3.bf16.msra.mxu1 %v15373_v10 }
0x1b85   : > { %12117 = vmatprep.subr.bf16.mxu1 %v15377_v49 }
0x1b88   : > { %12118 = vmatpush3.bf16.msra.mxu1 %v15377_v49 }
0x1b89   : > { %12143 = vmatprep.subr.bf16.mxu1 %v13902_v53 }
0x1b8b   : > { %12120 = vmatmul.mubr.msk.bf16.vlgmr.msra.gmra.mrb[136].mxu1 %vm3761_vm4, %v15290_v45 }
0x1b8c   : > { %12147 = vmatprep.mubr.msk.bf16.mxu1 %vm13903_vm3, %v13902_v53 }
0x1c4e   : > { %v6766_v31 = vpop.f32.mrb[132].mxu1 }
0x1c4f   : > { %v6773_v54 = vadd.f32 %v6766_v31, %v6668_v47  ;;  %v12109_v55 = vpop.f32.mrb[133].mxu1  ;;  %v13044_v47 = vld [vmem:[#allocation4 + $0xa8] sm:$0xff]  }
0x1c50   : > { %v6769_v60 = vpop.f32.mrb[134].mxu1 }
0x1c51   : > { %v6774_v62 = vadd.f32 %v6769_v60, %v6669_v13  ;;  %v12110_v63 = vpop.f32.mrb[135].mxu1  ;;  %v13045_v13 = vld [vmem:[#allocation4 + $0xb0] sm:$0xff]  }
0x1c5e   : > { %v12121_v1 = vpop.f32.mrb[136].mxu1 }
0x1c5f   : > { %v6809_v44 = vpop.f32.mrb[137].mxu1 }
0x1c60   : > { %v12122_v23 = vpop.f32.mrb[138].mxu1 }
0x1c61   : > { %v6825_v24 = vpack.c.bf16 %v12122_v23, %v12121_v1  ;;  %v6812_v26 = vpop.f32.mrb[139].mxu1  ;;  %v15396_v23 = vld [vmem:[#allocation4 + $0xc0] sm:$0xff]  }
0x1c62   : > { %v6824_v3 = vpack.c.bf16 %v6812_v26, %v6809_v44  ;;  %v12999_v44 = vld [vmem:[#allocation10 + $0x28] sm:$0xff]  }
0x1c64   : > { %12124 = vmatpush3.bf16.msra.mxu0 %v6824_v3 }
0x1c65   : > { %12125 = vmatprep.subr.bf16.mxu0 %v13902_v53 }
0x1c68   : > { %12126 = vmatpush3.bf16.msra.mxu0 %v6825_v24  ;;  %v15411_v24 = vld [vmem:[#allocation4 + $0xd8] sm:$0xff]  }
0x1c69   : > { %12131 = vmatprep.subr.bf16.mxu0 %v13043_v19 }
0x1c6b   : > { %12128 = vmatmul.mubr.msk.bf16.vlgmr.msra.gmra.mrb[116].mxu0 %vm6471_vm8, %v12998_v4 }
0x1c6c   : > { %12132 = vmatpush3.bf16.msra.mxu0 %v13043_v19  ;;  %12139 = vmatprep.mubr.msk.bf16.mxu0 %vm3761_vm4, %v15292_v29 }
0x1c6d   : > { %12133 = vmatprep.subr.bf16.mxu0 %v13044_v47 }
0x1c70   : > { %12134 = vmatpush3.bf16.msra.mxu0 %v13044_v47 }
0x1c71   : > { %12135 = vmatprep.subr.bf16.mxu0 %v13045_v13 }
0x1c74   : > { %12136 = vmatpush3.bf16.msra.mxu0 %v13045_v13 }
0x1c75   : > { %12137 = vmatprep.subr.bf16.mxu0 %v13046_v37 }
0x1c78   : > { %12138 = vmatpush3.bf16.msra.mxu0 %v13046_v37 }
0x1c79   : > { %12163 = vmatprep.subr.bf16.mxu0 %v13902_v53 }
0x1c7b   : > { %12140 = vmatmul.mubr.msk.bf16.vlgmr.msra.gmra.mrb[120].mxu0 %vm3761_vm4, %v15290_v45 }
0x1c7c   : > { %12167 = vmatprep.mubr.msk.bf16.mxu0 %vm13903_vm3, %v13902_v53 }
0x1d3e   : > { %v6871_v21 = vpop.f32.mrb[116].mxu0 }
0x1d3f   : > { %v6878_v15 = vadd.f32 %v6871_v21, %v6773_v54  ;;  %v12129_v61 = vpop.f32.mrb[117].mxu0  ;;  %v15403_v54 = vld [vmem:[#allocation4 + $0xc8] sm:$0xff]  }
0x1d40   : > { %v6874_v33 = vpop.f32.mrb[118].mxu0 }
0x1d41   : > { %v6879_v38 = vadd.f32 %v6874_v33, %v6774_v62  ;;  %v12130_v0 = vpop.f32.mrb[119].mxu0  ;;  %v15407_v62 = vld [vmem:[#allocation4 + $0xd0] sm:$0xff]  }
0x1d4e   : > { %v12141_v42 = vpop.f32.mrb[120].mxu0 }
0x1d4f   : > { %v6914_v31 = vpop.f32.mrb[121].mxu0 }
0x1d50   : > { %v12142_v55 = vpop.f32.mrb[122].mxu0 }
0x1d51   : > { %v6930_v60 = vpack.c.bf16 %v12142_v55, %v12141_v42  ;;  %v6917_v63 = vpop.f32.mrb[123].mxu0  ;;  %v13051_v55 = vld [vmem:[#allocation4 + $0xe0] sm:$0xff]  }
0x1d52   : > { %v6929_v1 = vpack.c.bf16 %v6917_v63, %v6914_v31  ;;  %v13000_v31 = vld [vmem:[#allocation10 + $0x30] sm:$0xff]  }
0x1d54   : > { %12144 = vmatpush3.bf16.msra.mxu1 %v6929_v1 }
0x1d55   : > { %12145 = vmatprep.subr.bf16.mxu1 %v13902_v53 }
0x1d58   : > { %12146 = vmatpush3.bf16.msra.mxu1 %v6930_v60  ;;  %v13054_v60 = vld [vmem:[#allocation4 + $0xf8] sm:$0xff]  }
0x1d59   : > { %12151 = vmatprep.subr.bf16.mxu1 %v15396_v23 }
0x1d5b   : > { %12148 = vmatmul.mubr.msk.bf16.vlgmr.msra.gmra.mrb[140].mxu1 %vm6471_vm8, %v12999_v44 }
0x1d5c   : > { %12152 = vmatpush3.bf16.msra.mxu1 %v15396_v23  ;;  %12159 = vmatprep.mubr.msk.bf16.mxu1 %vm3761_vm4, %v15292_v29 }
0x1d5d   : > { %12153 = vmatprep.subr.bf16.mxu1 %v15403_v54 }
0x1d60   : > { %12154 = vmatpush3.bf16.msra.mxu1 %v15403_v54 }
0x1d61   : > { %12155 = vmatprep.subr.bf16.mxu1 %v15407_v62 }
0x1d64   : > { %12156 = vmatpush3.bf16.msra.mxu1 %v15407_v62 }
0x1d65   : > { %12157 = vmatprep.subr.bf16.mxu1 %v15411_v24 }
0x1d68   : > { %12158 = vmatpush3.bf16.msra.mxu1 %v15411_v24 }
0x1d69   : > { %12183 = vmatprep.subr.bf16.mxu1 %v13902_v53 }
0x1d6b   : > { %12160 = vmatmul.mubr.msk.bf16.vlgmr.msra.gmra.mrb[144].mxu1 %vm3761_vm4, %v15290_v45 }
0x1d6c   : > { %12187 = vmatprep.mubr.msk.bf16.mxu1 %vm13903_vm3, %v13902_v53 }
0x1e2e   : > { %v6976_v26 = vpop.f32.mrb[140].mxu1 }
0x1e2f   : > { %v6983_v3 = vadd.f32 %v6976_v26, %v6878_v15  ;;  %v12149_v4 = vpop.f32.mrb[141].mxu1  ;;  %v13052_v15 = vld [vmem:[#allocation4 + $0xe8] sm:$0xff]  }
0x1e30   : > { %v6979_v19 = vpop.f32.mrb[142].mxu1 }
0x1e31   : > { %v6984_v47 = vadd.f32 %v6979_v19, %v6879_v38  ;;  %v12150_v13 = vpop.f32.mrb[143].mxu1  ;;  %v13053_v38 = vld [vmem:[#allocation4 + $0xf0] sm:$0xff]  }
0x1e3e   : > { %v12161_v37 = vpop.f32.mrb[144].mxu1 }
0x1e3f   : > { %v7019_v21 = vpop.f32.mrb[145].mxu1 }
0x1e40   : > { %v12162_v61 = vpop.f32.mrb[146].mxu1 }
0x1e41   : > { %v7035_v33 = vpack.c.bf16 %v12162_v61, %v12161_v37  ;;  %v7022_v0 = vpop.f32.mrb[147].mxu1 }
0x1e42   : > { %v7034_v42 = vpack.c.bf16 %v7022_v0, %v7019_v21 }
0x1e44   : > { %12164 = vmatpush3.bf16.msra.mxu0 %v7034_v42  ;;  %v13001_v42 = vld [vmem:[#allocation10 + $0x38] sm:$0xff]  }
0x1e45   : > { %12165 = vmatprep.subr.bf16.mxu0 %v13902_v53 }
0x1e48   : > { %12166 = vmatpush3.bf16.msra.mxu0 %v7035_v33 }
0x1e49   : > { %12171 = vmatprep.subr.bf16.mxu0 %v13051_v55 }
0x1e4b   : > { %12168 = vmatmul.mubr.msk.bf16.vlgmr.msra.gmra.mrb[124].mxu0 %vm6471_vm8, %v13000_v31  ;;  %v13055_v31 = vld [vmem:[#allocation4 + $0x100] sm:$0xff]  }
0x1e4c   : > { %12172 = vmatpush3.bf16.msra.mxu0 %v13051_v55  ;;  %12179 = vmatprep.mubr.msk.bf16.mxu0 %vm3761_vm4, %v15292_v29  ;;  %v13058_v55 = vld [vmem:[#allocation4 + $0x118] sm:$0xff]  }
0x1e4d   : > { %12173 = vmatprep.subr.bf16.mxu0 %v13052_v15 }
0x1e50   : > { %12174 = vmatpush3.bf16.msra.mxu0 %v13052_v15 }
0x1e51   : > { %12175 = vmatprep.subr.bf16.mxu0 %v13053_v38 }
0x1e54   : > { %12176 = vmatpush3.bf16.msra.mxu0 %v13053_v38 }
0x1e55   : > { %12177 = vmatprep.subr.bf16.mxu0 %v13054_v60 }
0x1e58   : > { %12178 = vmatpush3.bf16.msra.mxu0 %v13054_v60 }
0x1e59   : > { %12203 = vmatprep.subr.bf16.mxu0 %v13902_v53 }
0x1e5b   : > { %12180 = vmatmul.mubr.msk.bf16.vlgmr.msra.gmra.mrb[128].mxu0 %vm3761_vm4, %v15290_v45 }
0x1e5c   : > { %12207 = vmatprep.mubr.msk.bf16.mxu0 %vm13903_vm3, %v13902_v53 }
0x1f1e   : > { %v7081_v63 = vpop.f32.mrb[124].mxu0 }
0x1f1f   : > { %v7088_v1 = vadd.f32 %v7081_v63, %v6983_v3  ;;  %v12169_v44 = vpop.f32.mrb[125].mxu0  ;;  %v13056_v3 = vld [vmem:[#allocation4 + $0x108] sm:$0xff]  }
0x1f20   : > { %v7084_v26 = vpop.f32.mrb[126].mxu0 }
0x1f21   : > { %v7089_v4 = vadd.f32 %v7084_v26, %v6984_v47  ;;  %v12170_v19 = vpop.f32.mrb[127].mxu0  ;;  %v13057_v47 = vld [vmem:[#allocation4 + $0x110] sm:$0xff]  }
0x1f2e   : > { %v12181_v13 = vpop.f32.mrb[128].mxu0 }
0x1f2f   : > { %v7124_v37 = vpop.f32.mrb[129].mxu0 }
0x1f30   : > { %v12182_v21 = vpop.f32.mrb[130].mxu0 }
0x1f31   : > { %v7140_v61 = vpack.c.bf16 %v12182_v21, %v12181_v13  ;;  %v7127_v33 = vpop.f32.mrb[131].mxu0 }
0x1f32   : > { %v7139_v0 = vpack.c.bf16 %v7127_v33, %v7124_v37  ;;  %v13002_v33 = vld [vmem:[#allocation10 + $0x40] sm:$0xff]  }
0x1f34   : > { %12184 = vmatpush3.bf16.msra.mxu1 %v7139_v0 }
0x1f35   : > { %12185 = vmatprep.subr.bf16.mxu1 %v13902_v53 }
0x1f38   : > { %12186 = vmatpush3.bf16.msra.mxu1 %v7140_v61 }
0x1f39   : > { %12191 = vmatprep.subr.bf16.mxu1 %v13055_v31 }
0x1f3b   : > { %12188 = vmatmul.mubr.msk.bf16.vlgmr.msra.gmra.mrb[148].mxu1 %vm6471_vm8, %v13001_v42 }
0x1f3c   : > { %12192 = vmatpush3.bf16.msra.mxu1 %v13055_v31  ;;  %12199 = vmatprep.mubr.msk.bf16.mxu1 %vm3761_vm4, %v15292_v29 }
0x1f3d   : > { %12193 = vmatprep.subr.bf16.mxu1 %v13056_v3 }
0x1f40   : > { %12194 = vmatpush3.bf16.msra.mxu1 %v13056_v3 }
0x1f41   : > { %12195 = vmatprep.subr.bf16.mxu1 %v13057_v47 }
0x1f44   : > { %12196 = vmatpush3.bf16.msra.mxu1 %v13057_v47 }
0x1f45   : > { %12197 = vmatprep.subr.bf16.mxu1 %v13058_v55 }
0x1f48   : > { %12198 = vmatpush3.bf16.msra.mxu1 %v13058_v55  ;;  %v13059_v55 = vld [vmem:[#allocation4 + $0x38] sm:$0xff]  }
0x1f49   : > { %12223 = vmatprep.subr.bf16.mxu1 %v13902_v53 }
0x1f4b   : > { %12200 = vmatmul.mubr.msk.bf16.vlgmr.msra.gmra.mrb[152].mxu1 %vm3761_vm4, %v15290_v45 }
0x1f4c   : > { %12225 = vmatprep.mubr.msk.bf16.mxu1 %vm13903_vm3, %v13902_v53 }
0x200e   : > { %v7186_v15 = vpop.f32.mrb[148].mxu1 }
0x200f   : > { %v7193_v38 = vadd.f32 %v7186_v15, %v7088_v1  ;;  %v12189_v29 = vpop.f32.mrb[149].mxu1 }
0x2010   : > { %v7189_v60 = vpop.f32.mrb[150].mxu1 }
0x2011   : > { %v7194_v63 = vadd.f32 %v7189_v60, %v7089_v4  ;;  %v12190_v44 = vpop.f32.mrb[151].mxu1 }
0x201e   : > { %v12201_v26 = vpop.f32.mrb[152].mxu1 }
0x201f   : > { %v7229_v19 = vpop.f32.mrb[153].mxu1 }
0x2020   : > { %v12202_v13 = vpop.f32.mrb[154].mxu1 }
0x2021   : > { %v7245_v37 = vpack.c.bf16 %v12202_v13, %v12201_v26  ;;  %v7232_v21 = vpop.f32.mrb[155].mxu1  ;;  %v13004_v13 = vld [vmem:[#allocation12 + $0x8] sm:$0xff]  }
0x2022   : > { %v7244_v61 = vpack.c.bf16 %v7232_v21, %v7229_v19 }
0x2024   : > { %12204 = vmatpush3.bf16.msra.mxu0 %v7244_v61 }
0x2025   : > { %12205 = vmatprep.subr.bf16.mxu0 %v13902_v53 }
0x2028   : > { %12206 = vmatpush3.bf16.msra.mxu0 %v7245_v37 }
0x2029   : > { %12211 = vmatprep.subr.bf16.mxu0 %v13902_v53 }
0x202b   : > { %12208 = vmatmul.mubr.msk.bf16.vlgmr.msra.gmra.mrb[132].mxu0 %vm6471_vm8, %v13002_v33 }
0x202c   : > { %12212 = vmatpush3.bf16.msra.mxu0 %v15271_v16  ;;  %12219 = vmatprep.mubr.msk.bf16.mxu0 %vm13903_vm3, %v13902_v53 }
0x202d   : > { %12213 = vmatprep.subr.bf16.mxu0 %v13902_v53 }
0x2030   : > { %12214 = vmatpush3.bf16.msra.mxu0 %v15277_v46 }
0x2031   : > { %12215 = vmatprep.subr.bf16.mxu0 %v13902_v53 }
0x2034   : > { %12216 = vmatpush3.bf16.msra.mxu0 %v15281_v50 }
0x2035   : > { %12217 = vmatprep.subr.bf16.mxu0 %v13902_v53 }
0x2038   : > { %12218 = vmatpush3.bf16.msra.mxu0 %v15285_v51  ;;  %v13003_v51 = vld [vmem:[#allocation12] sm:$0xff]  }
0x2039   : > { %12241 = vmatprep.subr.bf16.mxu0 %v13902_v53 }
0x203b   : > { %12220 = vmatmul.mubr.msk.bf16.vlgmr.msra.gmra.mrb[136].mxu0 %vm3761_vm4, %v15089_v20 }
0x203c   : > { %12243 = vmatprep.mubr.msk.bf16.mxu0 %vm13903_vm3, %v13902_v53 }
0x20fe   : > { %v7291_v16 = vpop.f32.mrb[132].mxu0 }
0x20ff   : > { %v7298_v45 = vadd.f32 %v7291_v16, %v7193_v38  ;;  %v12209_v1 = vpop.f32.mrb[133].mxu0 }
0x2100   : > { %v7294_v46 = vpop.f32.mrb[134].mxu0 }
0x2101   : > { %v7299_v4 = vadd.f32 %v7294_v46, %v7194_v63  ;;  %v12210_v0 = vpop.f32.mrb[135].mxu0 }
0x210e   : > { %v7334_v42 = vpop.f32.mrb[136].mxu0 }
0x210f   : > { %v12221_v50 = vpop.f32.mrb[137].mxu0 }
0x2110   : > { %v7337_v31 = vpop.f32.mrb[138].mxu0 }
0x2111   : > { %v7341_v3 = vpack.c.bf16 %v7337_v31, %v7334_v42  ;;  %v12222_v47 = vpop.f32.mrb[139].mxu0 }
0x2113   : > { %12224 = vmatpush3.bf16.msra.mxu1 %v7341_v3 }
0x2114   : > { %12229 = vmatprep.subr.bf16.mxu1 %v13902_v53 }
0x2116   : > { %12226 = vmatmul.mubr.msk.bf16.vlgmr.msra.gmra.mrb[156].mxu1 %vm5143_vm7, %v13003_v51  ;;  %v13006_v51 = vld [vmem:[#allocation12 + $0x18] sm:$0xff]  }
0x2117   : > { %12230 = vmatpush3.bf16.msra.mxu1 %v15252_v5  ;;  %12237 = vmatprep.mubr.msk.bf16.mxu1 %vm13903_vm3, %v13902_v53 }
0x2118   : > { %12231 = vmatprep.subr.bf16.mxu1 %v13902_v53 }
0x211b   : > { %12232 = vmatpush3.bf16.msra.mxu1 %v15260_v34 }
0x211c   : > { %12233 = vmatprep.subr.bf16.mxu1 %v13902_v53 }
0x211f   : > { %12234 = vmatpush3.bf16.msra.mxu1 %v15264_v36 }
0x2120   : > { %12235 = vmatprep.subr.bf16.mxu1 %v13902_v53 }
0x2123   : > { %12236 = vmatpush3.bf16.msra.mxu1 %v13059_v55  ;;  %v13071_v55 = vld [vmem:[#allocation2 + $0x50] ss:$8 sps:$4 sm:$0xff]  }
0x2124   : > { %12259 = vmatprep.subr.bf16.mxu1 %v13902_v53 }
0x2126   : > { %12238 = vmatmul.mubr.msk.bf16.vlgmr.msra.gmra.mrb[160].mxu1 %vm3761_vm4, %v15089_v20 }
0x2127   : > { %12261 = vmatprep.mubr.msk.bf16.mxu1 %vm13903_vm3, %v13902_v53 }
0x21e9   : > { %v7386_v5 = vpop.f32.mrb[156].mxu1 }
0x21ea   : > { %v7393_v15 = vadd.f32 %v7386_v5, %v7298_v45  ;;  %v12227_v38 = vpop.f32.mrb[157].mxu1  ;;  %v13072_v5 = vld [vmem:[#allocation2 + $0x64] ss:$8 sps:$4 sm:$0xff]  }
0x21eb   : > { %v7389_v34 = vpop.f32.mrb[158].mxu1  ;;  %v13074_v38 = vld [vmem:[#allocation2 + $0x74] ss:$8 sps:$4 sm:$0xff]  }
0x21ec   : > { %v7394_v29 = vadd.f32 %v7389_v34, %v7299_v4  ;;  %v12228_v60 = vpop.f32.mrb[159].mxu1  ;;  %v13075_v34 = vld [vmem:[#allocation2 + $0x70] ss:$8 sps:$4 sm:$0xff]  }
0x21ed   : > { %v13077_v60 = vld [vmem:[#allocation2 + $0x80] ss:$8 sps:$4 sm:$0xff]  }
0x21f9   : > { %v7429_v63 = vpop.f32.mrb[160].mxu1 }
0x21fa   : > { %v12239_v36 = vpop.f32.mrb[161].mxu1 }
0x21fb   : > { %v7432_v44 = vpop.f32.mrb[162].mxu1  ;;  %v13079_v36 = vld [vmem:[#allocation2 + $0x90] ss:$8 sps:$4 sm:$0xff]  }
0x21fc   : > { %v7436_v26 = vpack.c.bf16 %v7432_v44, %v7429_v63  ;;  %v12240_v19 = vpop.f32.mrb[163].mxu1  ;;  %v13078_v63 = vld [vmem:[#allocation2 + $0x94] ss:$8 sps:$4 sm:$0xff]   ;;  %v13080_v44 = vld [vmem:[#allocation2 + $0xa4] ss:$8 sps:$4 sm:$0xff]  }
0x21fd   : > { %v13082_v19 = vld [vmem:[#allocation2 + $0xb4] ss:$8 sps:$4 sm:$0xff]  }
0x21fe   : > { %12242 = vmatpush3.bf16.msra.mxu0 %v7436_v26  ;;  %v13081_v26 = vld [vmem:[#allocation2 + $0xa0] ss:$8 sps:$4 sm:$0xff]  }
0x21ff   : > { %12247 = vmatprep.subr.bf16.mxu0 %v13902_v53 }
0x2201   : > { %12244 = vmatmul.mubr.msk.bf16.vlgmr.msra.gmra.mrb[140].mxu0 %vm5143_vm7, %v13004_v13  ;;  %v13083_v13 = vld [vmem:[#allocation2 + $0xb0] ss:$8 sps:$4 sm:$0xff]  }
0x2202   : > { %12248 = vmatpush3.bf16.msra.mxu0 %v15308_v52  ;;  %12255 = vmatprep.mubr.msk.bf16.mxu0 %vm13903_vm3, %v13902_v53 }
0x2203   : > { %12249 = vmatprep.subr.bf16.mxu0 %v13902_v53 }
0x2206   : > { %12250 = vmatpush3.bf16.msra.mxu0 %v15317_v11 }
0x2207   : > { %12251 = vmatprep.subr.bf16.mxu0 %v13902_v53 }
0x220a   : > { %12252 = vmatpush3.bf16.msra.mxu0 %v15323_v39 }
0x220b   : > { %12253 = vmatprep.subr.bf16.mxu0 %v13902_v53 }
0x220e   : > { %12254 = vmatpush3.bf16.msra.mxu0 %v15327_v41  ;;  %v13005_v41 = vld [vmem:[#allocation12 + $0x10] sm:$0xff]  }
0x220f   : > { %12277 = vmatprep.subr.bf16.mxu0 %v13902_v53 }
0x2211   : > { %12256 = vmatmul.mubr.msk.bf16.vlgmr.msra.gmra.mrb[144].mxu0 %vm3761_vm4, %v15089_v20 }
0x2212   : > { %12279 = vmatprep.mubr.msk.bf16.mxu0 %vm13903_vm3, %v13902_v53 }
0x22d4   : > { %v7482_v52 = vpop.f32.mrb[140].mxu0 }
0x22d5   : > { %v7489_v37 = vadd.f32 %v7482_v52, %v7393_v15  ;;  %v12245_v21 = vpop.f32.mrb[141].mxu0  ;;  %v13073_v15 = vld [vmem:[#allocation2 + $0x60] ss:$8 sps:$4 sm:$0xff]   ;;  %v13084_v52 = vld [vmem:[#allocation2 + $0xc4] ss:$8 sps:$4 sm:$0xff]  }
0x22d6   : > { %v7485_v11 = vpop.f32.mrb[142].mxu0  ;;  %v13086_v21 = vld [vmem:[#allocation2 + $0xd4] ss:$8 sps:$4 sm:$0xff]  }
0x22d7   : > { %v7490_v61 = vadd.f32 %v7485_v11, %v7394_v29  ;;  %v12246_v33 = vpop.f32.mrb[143].mxu0  ;;  %v13076_v29 = vld [vmem:[#allocation2 + $0x84] ss:$8 sps:$4 sm:$0xff]   ;;  %v13087_v11 = vld [vmem:[#allocation2 + $0xd0] ss:$8 sps:$4 sm:$0xff]  }
0x22d8   : > { %v13089_v33 = vld [vmem:[#allocation2 + $0xe0] ss:$8 sps:$4 sm:$0xff]  }
0x22e4   : > { %v7525_v16 = vpop.f32.mrb[144].mxu0 }
0x22e5   : > { %v12257_v39 = vpop.f32.mrb[145].mxu0 }
0x22e6   : > { %v7528_v45 = vpop.f32.mrb[146].mxu0  ;;  %v13091_v39 = vld [vmem:[#allocation2 + $0xf0] ss:$8 sps:$4 sm:$0xff]  }
0x22e7   : > { %v7532_v1 = vpack.c.bf16 %v7528_v45, %v7525_v16  ;;  %v12258_v46 = vpop.f32.mrb[147].mxu0  ;;  %v13090_v16 = vld [vmem:[#allocation2 + $0xf4] ss:$8 sps:$4 sm:$0xff]  }
0x22e9   : > { %12260 = vmatpush3.bf16.msra.mxu1 %v7532_v1 }
0x22ea   : > { %12265 = vmatprep.subr.bf16.mxu1 %v13902_v53 }
0x22ec   : > { %12262 = vmatmul.mubr.msk.bf16.vlgmr.msra.gmra.mrb[164].mxu1 %vm5143_vm7, %v13005_v41 }
0x22ed   : > { %12266 = vmatpush3.bf16.msra.mxu1 %v15337_v28  ;;  %12273 = vmatprep.mubr.msk.bf16.mxu1 %vm13903_vm3, %v13902_v53 }
0x22ee   : > { %12267 = vmatprep.subr.bf16.mxu1 %v13902_v53 }
0x22f1   : > { %12268 = vmatpush3.bf16.msra.mxu1 %v15344_v30 }
0x22f2   : > { %12269 = vmatprep.subr.bf16.mxu1 %v13902_v53 }
0x22f5   : > { %12270 = vmatpush3.bf16.msra.mxu1 %v15348_v32 }
0x22f6   : > { %12271 = vmatprep.subr.bf16.mxu1 %v13902_v53 }
0x22f9   : > { %12272 = vmatpush3.bf16.msra.mxu1 %v15352_v25 }
0x22fa   : > { %12295 = vmatprep.subr.bf16.mxu1 %v13902_v53 }
0x22fc   : > { %12274 = vmatmul.mubr.msk.bf16.vlgmr.msra.gmra.mrb[168].mxu1 %vm3761_vm4, %v15089_v20 }
0x22fd   : > { %12297 = vmatprep.mubr.msk.bf16.mxu1 %vm13903_vm3, %v13902_v53 }
0x23bf   : > { %v7578_v28 = vpop.f32.mrb[164].mxu1 }
0x23c0   : > { %v15502_v4 = vadd.f32 %v7578_v28, %v7489_v37  ;;  %v12263_v30 = vpop.f32.mrb[165].mxu1  ;;  %v13085_v37 = vld [vmem:[#allocation2 + $0xc0] ss:$8 sps:$4 sm:$0xff]  }
0x23c1   : > { %v7581_v0 = vpop.f32.mrb[166].mxu1 }
0x23c2   : > { %v15504_v42 = vadd.f32 %v7581_v0, %v7490_v61  ;;  %v12264_v32 = vpop.f32.mrb[167].mxu1  ;;  %v13088_v61 = vld [vmem:[#allocation2 + $0xe4] ss:$8 sps:$4 sm:$0xff]  }
0x23cf   : > { %v7621_v50 = vpop.f32.mrb[168].mxu1 }
0x23d0   : > { %v12275_v31 = vpop.f32.mrb[169].mxu1 }
0x23d1   : > { %v7624_v3 = vpop.f32.mrb[170].mxu1 }
0x23d2   : > { %v7628_v25 = vpack.c.bf16 %v7624_v3, %v7621_v50  ;;  %v12276_v47 = vpop.f32.mrb[171].mxu1 }
0x23d4   : > { %12278 = vmatpush3.bf16.msra.mxu0 %v7628_v25  ;;  %v13007_v25 = vld [vmem:[#allocation12 + $0x20] sm:$0xff]  }
0x23d5   : > { %12283 = vmatprep.subr.bf16.mxu0 %v13902_v53 }
0x23d7   : > { %12280 = vmatmul.mubr.msk.bf16.vlgmr.msra.gmra.mrb[148].mxu0 %vm5143_vm7, %v13006_v51 }
0x23d8   : > { %12284 = vmatpush3.bf16.msra.mxu0 %v15362_v14  ;;  %12291 = vmatprep.mubr.msk.bf16.mxu0 %vm13903_vm3, %v13902_v53  ;;  %v13060_v14 = vld [vmem:[#allocation2 + $0x4] ss:$8 sps:$4 sm:$0xff]  }
0x23d9   : > { %12285 = vmatprep.subr.bf16.mxu0 %v13902_v53 }
0x23dc   : > { %12286 = vmatpush3.bf16.msra.mxu0 %v15369_v43  ;;  %v13010_v43 = vld [vmem:[#allocation12 + $0x40] sm:$0xff]  }
0x23dd   : > { %12287 = vmatprep.subr.bf16.mxu0 %v13902_v53 }
0x23e0   : > { %12288 = vmatpush3.bf16.msra.mxu0 %v15373_v10  ;;  %v13061_v10 = vld [vmem:[#allocation2] ss:$8 sps:$4 sm:$0xff]  }
0x23e1   : > { %12289 = vmatprep.subr.bf16.mxu0 %v13902_v53 }
0x23e4   : > { %12290 = vmatpush3.bf16.msra.mxu0 %v15377_v49  ;;  %v13062_v49 = vld [vmem:[#allocation2 + $0x14] ss:$8 sps:$4 sm:$0xff]  }
0x23e5   : > { %12307 = vmatprep.subr.bf16.mxu0 %v13902_v53 }
0x23e7   : > { %12292 = vmatmul.mubr.msk.bf16.vlgmr.msra.gmra.mrb[152].mxu0 %vm3761_vm4, %v15089_v20 }
0x23e8   : > { %12308 = vmatpush3.bf16.msra.mxu0 %v15396_v23  ;;  %12315 = vmatprep.mubr.msk.bf16.mxu0 %vm13903_vm3, %v13902_v53  ;;  %v13063_v23 = vld [vmem:[#allocation2 + $0x10] ss:$8 sps:$4 sm:$0xff]  }
0x23e9   : > { %12309 = vmatprep.subr.bf16.mxu0 %v13902_v53 }
0x23ec   : > { %12310 = vmatpush3.bf16.msra.mxu0 %v15403_v54  ;;  %v13064_v54 = vld [vmem:[#allocation2 + $0x24] ss:$8 sps:$4 sm:$0xff]  }
0x23ed   : > { %12311 = vmatprep.subr.bf16.mxu0 %v13902_v53 }
0x23f0   : > { %12312 = vmatpush3.bf16.msra.mxu0 %v15407_v62  ;;  %v13069_v62 = vld [vmem:[#allocation2 + $0x40] ss:$8 sps:$4 sm:$0xff]  }
0x23f1   : > { %12313 = vmatprep.subr.bf16.mxu0 %v13902_v53 }
0x23f4   : > { %12314 = vmatpush3.bf16.msra.mxu0 %v15411_v24  ;;  %v13070_v24 = vld [vmem:[#allocation2 + $0x54] ss:$8 sps:$4 sm:$0xff]  }
0x23f5   : > { %12331 = vmatprep.subr.bf16.mxu0 %v13902_v53 }
0x23f7   : > { %12316 = vmatmul.mubr.msk.bf16.vlgmr.msra.gmra.mrb[156].mxu0 %vm3761_vm4, %v15089_v20  ;;  %v13065_v20 = vld [vmem:[#allocation2 + $0x20] ss:$8 sps:$4 sm:$0xff]  }
0x23f8   : > { %12332 = vmatpush3.bf16.msra.mxu0 %v7985_v40  ;;  %12333 = vmatprep.mubr.msk.bf16.mxu0 %vm13903_vm3, %v13902_v53  ;;  %v13068_v40 = vld [vmem:[#allocation2 + $0x44] ss:$8 sps:$4 sm:$0xff]  }
0x23f9   : > { %8153 = vmatprep.subr.bf16.mxu0 %v13060_v14 }
0x23ff   : > { %12334 = vmatmul.mubr.msk.bf16.vlgmr.msra.gmra.mrb[160].mxu0 %vm5143_vm7, %v13010_v43 }
0x2400   : > { %8154 = vmatpush1.bf16.msra.mxu0 %v13061_v10  ;;  %v13009_v10 = vld [vmem:[#allocation12 + $0x30] sm:$0xff]  }
0x2401   : > { %8155 = vmatprep.subr.bf16.mxu0 %v13062_v49  ;;  %v13014_v49 = vld [vmem:[#allocation9 + $0x4] ss:$8 sps:$4 sm:$0xff]  }
0x2404   : > { %8156 = vmatpush1.bf16.msra.mxu0 %v13063_v23 }
0x2405   : > { %8157 = vmatprep.subr.bf16.mxu0 %v13064_v54 }
0x2408   : > { %8158 = vmatpush1.bf16.msra.mxu0 %v13065_v20  ;;  %v13017_v20 = vld [vmem:[#allocation9 + $0x14] ss:$8 sps:$4 sm:$0xff]  }
0x2409   : > { %8159 = vmatprep.subr.bf16.mxu0 %v13066_v35  ;;  %v13015_v35 = vld [vmem:[#allocation9 + $0x10] ss:$8 sps:$4 sm:$0xff]  }
0x240c   : > { %8160 = vmatpush1.bf16.msra.mxu0 %v13067_v17 }
0x240d   : > { %8161 = vmatprep.subr.bf16.mxu0 %v13068_v40  ;;  %v13021_v40 = vld [vmem:[#allocation9 + $0x30] ss:$8 sps:$4 sm:$0xff]  }
0x2410   : > { %8162 = vmatpush1.bf16.msra.mxu0 %v13069_v62  ;;  %v15560_v62 = vld [vmem:[#allocation2 + $0x104] ss:$8 sps:$4 sm:$0xff]  }
0x2411   : > { %8163 = vmatprep.subr.bf16.mxu0 %v13070_v24 }
0x2414   : > { %8164 = vmatpush1.bf16.msra.mxu0 %v13071_v55 }
0x2415   : > { %8165 = vmatprep.subr.bf16.mxu0 %v13072_v5 }
0x2418   : > { %8166 = vmatpush1.bf16.msra.mxu0 %v13073_v15 }
0x2419   : > { %8167 = vmatprep.subr.bf16.mxu0 %v13074_v38 }
0x241c   : > { %8168 = vmatpush1.bf16.msra.mxu0 %v13075_v34 }
0x241d   : > { %8169 = vmatprep.subr.bf16.mxu0 %v13076_v29 }
0x2420   : > { %8170 = vmatpush1.bf16.msra.mxu0 %v13077_v60 }
0x2421   : > { %8171 = vmatprep.subr.bf16.mxu0 %v13078_v63 }
0x2424   : > { %8172 = vmatpush1.bf16.msra.mxu0 %v13079_v36 }
0x2425   : > { %8173 = vmatprep.subr.bf16.mxu0 %v13080_v44 }
0x2428   : > { %8174 = vmatpush1.bf16.msra.mxu0 %v13081_v26 }
0x2429   : > { %8175 = vmatprep.subr.bf16.mxu0 %v13082_v19 }
0x242c   : > { %8176 = vmatpush1.bf16.msra.mxu0 %v13083_v13 }
0x242d   : > { %8177 = vmatprep.subr.bf16.mxu0 %v13084_v52 }
0x2430   : > { %8178 = vmatpush1.bf16.msra.mxu0 %v13085_v37 }
0x2431   : > { %8179 = vmatprep.subr.bf16.mxu0 %v13086_v21 }
0x2434   : > { %8180 = vmatpush1.bf16.msra.mxu0 %v13087_v11 }
0x2435   : > { %8181 = vmatprep.subr.bf16.mxu0 %v13088_v61 }
0x2438   : > { %8182 = vmatpush1.bf16.msra.mxu0 %v13089_v33 }
0x2439   : > { %8183 = vmatprep.subr.bf16.mxu0 %v13090_v16 }
0x243c   : > { %8184 = vmatpush1.bf16.msra.mxu0 %v13091_v39 }
0x24aa   : > { %v7674_v45 = vpop.f32.mrb[148].mxu0 }
0x24ab   : > { %v7681_v1 = vadd.f32 %v7674_v45, %v15502_v4  ;;  %v12281_v46 = vpop.f32.mrb[149].mxu0  ;;  %v13008_v4 = vld [vmem:[#allocation12 + $0x28] sm:$0xff]  }
0x24ac   : > { %v7677_v41 = vpop.f32.mrb[150].mxu0 }
0x24ad   : > { %v7682_v28 = vadd.f32 %v7677_v41, %v15504_v42  ;;  %v12282_v30 = vpop.f32.mrb[151].mxu0  ;;  %v8045_v41 = vpop.permute.xlu1 %8044 }
0x24ba   : > { %v7717_v0 = vpop.f32.mrb[152].mxu0 }
0x24bb   : > { %v12293_v32 = vpop.f32.mrb[153].mxu0 }
0x24bc   : > { %v7720_v50 = vpop.f32.mrb[154].mxu0 }
0x24bd   : > { %v7724_v31 = vpack.c.bf16 %v7720_v50, %v7717_v0  ;;  %v12294_v3 = vpop.f32.mrb[155].mxu0  ;;  %v8050_v0 = vpop.permute.xlu0 %8049 }
0x24bf   : > { %12296 = vmatpush3.bf16.msra.mxu1 %v7724_v31 }
0x24c0   : > { %12301 = vmatprep.subr.bf16.mxu1 %v13902_v53 }
0x24c2   : > { %12298 = vmatmul.mubr.msk.bf16.vlgmr.msra.gmra.mrb[172].mxu1 %vm5143_vm7, %v13007_v25  ;;  %v15564_v25 = vld [vmem:[#allocation2 + $0x100] ss:$8 sps:$4 sm:$0xff]  }
0x24c3   : > { %12302 = vmatpush3.bf16.msra.mxu1 %v7779_v8  ;;  %12303 = vmatprep.mubr.msk.bf16.mxu1 %vm13903_vm3, %v13902_v53  ;;  %v13012_v8 = vld [vmem:[#allocation9] ss:$8 sps:$4 sm:$0xff]  }
0x24c4   : > { %12319 = vmatprep.subr.bf16.mxu1 %v13902_v53 }
0x24ca   : > { %12304 = vmatmul.mubr.msk.bf16.vlgmr.msra.gmra.mrb[176].mxu1 %vm5143_vm7, %v13008_v4  ;;  %v7868_v42 = vpop.f32.mrb[156].mxu0  ;;  %v15567_v4 = vld [vmem:[#allocation2 + $0x114] ss:$8 sps:$4 sm:$0xff]  }
0x24cb   : > { %v12317_v47 = vpop.f32.mrb[157].mxu0  ;;  %12321 = vmatprep.mubr.msk.bf16.mxu1 %vm13903_vm3, %v13902_v53 }
0x24cc   : > { %v7871_v51 = vpop.f32.mrb[158].mxu0  ;;  %v15573_v47 = vld [vmem:[#allocation2 + $0x124] ss:$8 sps:$4 sm:$0xff]  }
0x24cd   : > { %v7875_v14 = vpack.c.bf16 %v7871_v51, %v7868_v42  ;;  %v12318_v43 = vpop.f32.mrb[159].mxu0  ;;  %v15570_v42 = vld [vmem:[#allocation2 + $0x110] ss:$8 sps:$4 sm:$0xff]   ;;  %v15576_v51 = vld [vmem:[#allocation2 + $0x120] ss:$8 sps:$4 sm:$0xff]  }
0x24ce   : > { %v15582_v43 = vld [vmem:[#allocation2 + $0x130] ss:$8 sps:$4 sm:$0xff]  }
0x24cf   : > { %12320 = vmatpush3.bf16.msra.mxu1 %v7875_v14  ;;  %v15579_v14 = vld [vmem:[#allocation2 + $0x134] ss:$8 sps:$4 sm:$0xff]  }
0x24d0   : > { %12325 = vmatprep.subr.bf16.mxu1 %v13902_v53 }
0x24d2   : > { %12322 = vmatmul.mubr.msk.bf16.vlgmr.msra.gmra.mrb[180].mxu1 %vm5143_vm7, %v13009_v10  ;;  %v8031_v23 = vpop.f32.mrb[160].mxu0  ;;  %v15585_v10 = vld [vmem:[#allocation2 + $0x144] ss:$8 sps:$4 sm:$0xff]  }
0x24d3   : > { %12326 = vmatpush3.bf16.msra.mxu1 %v7930_v27  ;;  %12327 = vmatprep.mubr.msk.bf16.mxu1 %vm13903_vm3, %v13902_v53  ;;  %v12335_v54 = vpop.f32.mrb[161].mxu0  ;;  %v13018_v27 = vld [vmem:[#allocation9 + $0x20] ss:$8 sps:$4 sm:$0xff]   ;;  %v13023_v53 = vld [vmem:[#allocation9 + $0x34] ss:$8 sps:$4 sm:$0xff]  }
0x24d4   : > { %8108 = vmatprep.subr.bf16.mxu1 %v13014_v49  ;;  %v8034_v17 = vpop.f32.mrb[162].mxu0  ;;  %v15594_v49 = vld [vmem:[#allocation2 + $0x150] ss:$8 sps:$4 sm:$0xff]   ;;  %v15600_v54 = vld [vmem:[#allocation2 + $0x160] ss:$8 sps:$4 sm:$0xff]  }
0x24d5   : > { %v12336_v9 = vpop.f32.mrb[163].mxu0 }
0x24d6   : > { %v15612_v9 = vld [vmem:[#allocation2 + $0x180] ss:$8 sps:$4 sm:$0xff]  }
0x24da   : > { %12328 = vmatmul.mubr.msk.bf16.vlgmr.msra.gmra.mrb[184].mxu1 %vm5143_vm7, %v13011_v22  ;;  %v15588_v22 = vld [vmem:[#allocation2 + $0x140] ss:$8 sps:$4 sm:$0xff]  }
0x24db   : > { %8140 = vmatprep.mubr.bf16.mxu1 %v16987_v6  ;;  %8109 = vmatpush1.bf16.msra.mxu1 %v13012_v8  ;;  %v15591_v8 = vld [vmem:[#allocation2 + $0x154] ss:$8 sps:$4 sm:$0xff]  }
0x24dc   : > { %8110 = vmatprep.subr.bf16.mxu1 %v13017_v20  ;;  %v15603_v20 = vld [vmem:[#allocation2 + $0x174] ss:$8 sps:$4 sm:$0xff]  }
0x24df   : > { %8111 = vmatpush1.bf16.msra.mxu1 %v13015_v35  ;;  %v15606_v35 = vld [vmem:[#allocation2 + $0x170] ss:$8 sps:$4 sm:$0xff]  }
0x24e0   : > { %8112 = vmatprep.subr.bf16.mxu1 %v13020_v7  ;;  %v15615_v7 = vld [vmem:[#allocation2 + $0x194] ss:$8 sps:$4 sm:$0xff]  }
0x24e3   : > { %8113 = vmatpush1.bf16.msra.mxu1 %v13018_v27  ;;  %v15618_v27 = vld [vmem:[#allocation2 + $0x190] ss:$8 sps:$4 sm:$0xff]  }
0x24e4   : > { %8114 = vmatprep.subr.bf16.mxu1 %v13023_v53  ;;  %v15621_v53 = vld [vmem:[#allocation2 + $0x1a4] ss:$8 sps:$4 sm:$0xff]  }
0x24e7   : > { %8115 = vmatpush1.bf16.msra.mxu1 %v13021_v40  ;;  %v15624_v40 = vld [vmem:[#allocation2 + $0x1a0] ss:$8 sps:$4 sm:$0xff]  }
0x24e8   : > { %8199 = vmatprep.subr.bf16.mxu1 %v15560_v62 }
0x2595   : > { %v7770_v24 = vpop.f32.mrb[172].mxu1 }
0x2596   : > { %v7777_v55 = vadd.f32 %v7770_v24, %v7681_v1  ;;  %v12299_v5 = vpop.f32.mrb[173].mxu1  ;;  %v15627_v24 = vld [vmem:[#allocation2 + $0x1b4] ss:$8 sps:$4 sm:$0xff]  }
0x2597   : > { %v7773_v15 = vpop.f32.mrb[174].mxu1  ;;  %v15633_v5 = vld [vmem:[#allocation2 + $0x1c4] ss:$8 sps:$4 sm:$0xff]  }
0x2598   : > { %v7778_v38 = vadd.f32 %v7773_v15, %v7682_v28  ;;  %v12300_v34 = vpop.f32.mrb[175].mxu1  ;;  %v15636_v15 = vld [vmem:[#allocation2 + $0x1c0] ss:$8 sps:$4 sm:$0xff]  }
0x2599   : > { %v15642_v34 = vld [vmem:[#allocation2 + $0x1d0] ss:$8 sps:$4 sm:$0xff]  }
0x259d   : > { %v7825_v29 = vpop.f32.mrb[176].mxu1 }
0x259e   : > { %v7832_v60 = vadd.f32 %v7825_v29, %v7777_v55  ;;  %v12305_v63 = vpop.f32.mrb[177].mxu1  ;;  %v15630_v55 = vld [vmem:[#allocation2 + $0x1b0] ss:$8 sps:$4 sm:$0xff]   ;;  %v15645_v29 = vld [vmem:[#allocation2 + $0x1e4] ss:$8 sps:$4 sm:$0xff]  }
0x259f   : > { %v7828_v36 = vpop.f32.mrb[178].mxu1  ;;  %v15651_v63 = vld [vmem:[#allocation2 + $0x1f4] ss:$8 sps:$4 sm:$0xff]  }
0x25a0   : > { %v7833_v44 = vadd.f32 %v7828_v36, %v7778_v38  ;;  %v12306_v26 = vpop.f32.mrb[179].mxu1  ;;  %v15639_v38 = vld [vmem:[#allocation2 + $0x1d4] ss:$8 sps:$4 sm:$0xff]   ;;  %v15654_v36 = vld [vmem:[#allocation2 + $0x1f0] ss:$8 sps:$4 sm:$0xff]  }
0x25a5   : > { %v7921_v19 = vpop.f32.mrb[180].mxu1 }
0x25a6   : > { %v7928_v13 = vadd.f32 %v7921_v19, %v7832_v60  ;;  %v12323_v52 = vpop.f32.mrb[181].mxu1  ;;  %v15648_v60 = vld [vmem:[#allocation2 + $0x1e0] ss:$8 sps:$4 sm:$0xff]  }
0x25a7   : > { %v7924_v37 = vpop.f32.mrb[182].mxu1 }
0x25a8   : > { %v7929_v21 = vadd.f32 %v7924_v37, %v7833_v44  ;;  %v12324_v11 = vpop.f32.mrb[183].mxu1  ;;  %v15657_v44 = vld [vmem:[#allocation2 + $0x204] ss:$8 sps:$4 sm:$0xff]  }
0x25a9   : > { %v15668_v11 = vld [vmem:[#allocation2 + $0x200] ss:$8 sps:$4 sm:$0xff]  }
0x25ad   : > { %v7976_v61 = vpop.f32.mrb[184].mxu1 }
0x25ae   : > { %v7983_v33 = vadd.f32 %v7976_v61, %v7928_v13  ;;  %v12329_v16 = vpop.f32.mrb[185].mxu1  ;;  %v15672_v61 = vld [vmem:[#allocation2 + $0x214] ss:$8 sps:$4 sm:$0xff]  }
0x25af   : > { %v7979_v39 = vpop.f32.mrb[186].mxu1  ;;  %v15679_v16 = vld [vmem:[#allocation2 + $0x224] ss:$8 sps:$4 sm:$0xff]  }
0x25b0   : > { %v8038_v45 = vadd.f32 %v8031_v23, %v7983_v33  ;;  %v7984_v1 = vadd.f32 %v7979_v39, %v7929_v21  ;;  %v12330_v46 = vpop.f32.mrb[187].mxu1  ;;  %v15597_v23 = vld [vmem:[#allocation2 + $0x164] ss:$8 sps:$4 sm:$0xff]   ;;  %v15676_v33 = vld [vmem:[#allocation2 + $0x210] ss:$8 sps:$4 sm:$0xff]  }
0x25b1   : > { %v15682_v39 = vld [vmem:[#allocation2 + $0x220] ss:$8 sps:$4 sm:$0xff]   ;;  %v15691_v46 = vld [vmem:[#allocation2 + $0x244] ss:$8 sps:$4 sm:$0xff]  }
0x25b2   : > { %v8052_v28 = vadd.f32 %v8045_v41, %v8038_v45  ;;  %v8039_v30 = vadd.f32 %v8034_v17, %v7984_v1  ;;  %v15609_v17 = vld [vmem:[#allocation2 + $0x184] ss:$8 sps:$4 sm:$0xff]   ;;  %v15685_v45 = vld [vmem:[#allocation2 + $0x234] ss:$8 sps:$4 sm:$0xff]   ;;  %v15688_v1 = vld [vmem:[#allocation2 + $0x230] ss:$8 sps:$4 sm:$0xff]  }
0x25b3   : > { %16988 = vst [vmem:[#allocation27_spill] sm:$0xff] %v15688_v1  ;;  %16989 = vst [vmem:[#allocation28_spill] sm:$0xff] %v15691_v46  ;;  %v15694_v41 = vld [vmem:[#allocation2 + $0x240] ss:$8 sps:$4 sm:$0xff]  }
0x25b4   : > { %v8053_v32 = vadd.f32 %v8050_v0, %v8039_v30  ;;  %v8054_v50 = vmax.f32 %v8052_v28, 0.0  ;;  %16990 = vst [vmem:[#allocation29_spill] sm:$0xff] %v15694_v41  ;;  %v15697_v28 = vld [vmem:[#allocation2 + $0x254] ss:$8 sps:$4 sm:$0xff]   ;;  %v15700_v30 = vld [vmem:[#allocation2 + $0x250] ss:$8 sps:$4 sm:$0xff]  }
0x25b5   : > { %16991 = vst [vmem:[#allocation30_spill] sm:$0xff] %v15697_v28  ;;  %16992 = vst [vmem:[#allocation31_spill] sm:$0xff] %v15700_v30  ;;  %v15703_v0 = vld [vmem:[#allocation2 + $0x264] ss:$8 sps:$4 sm:$0xff]  }
0x25b6   : > { %v8055_v31 = vmax.f32 %v8053_v32, 0.0  ;;  %16993 = vst [vmem:[#allocation32_spill] sm:$0xff] %v15703_v0  ;;  %v15706_v32 = vld [vmem:[#allocation2 + $0x260] ss:$8 sps:$4 sm:$0xff]  }
0x25b7   : > { %16994 = vst [vmem:[#allocation33_spill] sm:$0xff] %v15706_v32 }
0x25b8   : > { %v8056_v3 = vpack.c.bf16 %v8055_v31, %v8054_v50  ;;  %v15709_v50 = vld [vmem:[#allocation2 + $0x274] ss:$8 sps:$4 sm:$0xff]   ;;  %v15712_v31 = vld [vmem:[#allocation2 + $0x270] ss:$8 sps:$4 sm:$0xff]  }
0x25b9   : > { %16995 = vst [vmem:[#allocation34_spill] sm:$0xff] %v15709_v50  ;;  %16996 = vst [vmem:[#allocation35_spill] sm:$0xff] %v15712_v31 }
0x25ba   : > { %11358 = vmatmul.mubr.msk.bf16.vlgmr.msra.gmra.mrb[188].mxu1 %vm3761_vm4, %v8056_v3  ;;  %v15715_v3 = vld [vmem:[#allocation2 + $0x284] ss:$8 sps:$4 sm:$0xff]  }
0x25bb   : > { %8200 = vmatpush1.bf16.msra.mxu1 %v15564_v25  ;;  %16997 = vst [vmem:[#allocation36_spill] sm:$0xff] %v15715_v3 }
0x25bc   : > { %8201 = vmatprep.subr.bf16.mxu1 %v15567_v4 }
0x25bf   : > { %8202 = vmatpush1.bf16.msra.mxu1 %v15570_v42 }
0x25c0   : > { %8203 = vmatprep.subr.bf16.mxu1 %v15573_v47 }
0x25c3   : > { %8204 = vmatpush1.bf16.msra.mxu1 %v15576_v51 }
0x25c4   : > { %8205 = vmatprep.subr.bf16.mxu1 %v15579_v14 }
0x25c7   : > { %8206 = vmatpush1.bf16.msra.mxu1 %v15582_v43 }
0x25c8   : > { %8207 = vmatprep.subr.bf16.mxu1 %v15585_v10 }
0x25cb   : > { %8208 = vmatpush1.bf16.msra.mxu1 %v15588_v22 }
0x25cc   : > { %8209 = vmatprep.subr.bf16.mxu1 %v15591_v8 }
0x25cf   : > { %8210 = vmatpush1.bf16.msra.mxu1 %v15594_v49 }
0x25d0   : > { %8211 = vmatprep.subr.bf16.mxu1 %v15597_v23 }
0x25d3   : > { %8212 = vmatpush1.bf16.msra.mxu1 %v15600_v54 }
0x25d4   : > { %8213 = vmatprep.subr.bf16.mxu1 %v15603_v20 }
0x25d7   : > { %8214 = vmatpush1.bf16.msra.mxu1 %v15606_v35 }
0x25d8   : > { %8215 = vmatprep.subr.bf16.mxu1 %v15609_v17 }
0x25db   : > { %8216 = vmatpush1.bf16.msra.mxu1 %v15612_v9 }
0x25dc   : > { %8217 = vmatprep.subr.bf16.mxu1 %v15615_v7 }
0x25df   : > { %8218 = vmatpush1.bf16.msra.mxu1 %v15618_v27 }
0x25e0   : > { %8219 = vmatprep.subr.bf16.mxu1 %v15621_v53 }
0x25e3   : > { %8220 = vmatpush1.bf16.msra.mxu1 %v15624_v40 }
0x25e4   : > { %8221 = vmatprep.subr.bf16.mxu1 %v15627_v24 }
0x25e7   : > { %8222 = vmatpush1.bf16.msra.mxu1 %v15630_v55 }
0x25e8   : > { %8223 = vmatprep.subr.bf16.mxu1 %v15633_v5 }
0x25eb   : > { %8224 = vmatpush1.bf16.msra.mxu1 %v15636_v15 }
0x25ec   : > { %8225 = vmatprep.subr.bf16.mxu1 %v15639_v38 }
0x25ef   : > { %8226 = vmatpush1.bf16.msra.mxu1 %v15642_v34 }
0x25f0   : > { %8227 = vmatprep.subr.bf16.mxu1 %v15645_v29 }
0x25f3   : > { %8228 = vmatpush1.bf16.msra.mxu1 %v15648_v60 }
0x25f4   : > { %8229 = vmatprep.subr.bf16.mxu1 %v15651_v63 }
0x25f7   : > { %8230 = vmatpush1.bf16.msra.mxu1 %v15654_v36 }
0x25f8   : > { %8334 = vmatprep.subr.bf16.mxu1 %v15657_v44 }
0x268d   : > { %v8142_v26 = vpop.f32.mrb[188].mxu1 }
0x268e   : > { %v8144_v19 = vpop.f32.mrb[189].mxu1 }
0x268f   : > { %v8146_v13 = vpop.f32.mrb[190].mxu1 }
0x2690   : > { %v15660_v52 = vpack.c.bf16 %v8146_v13, %v8142_v26  ;;  %v8148_v37 = vpop.f32.mrb[191].mxu1  ;;  %v15718_v26 = vld [vmem:[#allocation2 + $0x280] ss:$8 sps:$4 sm:$0xff]   ;;  %v15724_v13 = vld [vmem:[#allocation2 + $0x290] ss:$8 sps:$4 sm:$0xff]  }
0x2691   : > { %v15662_v21 = vpack.c.bf16 %v8148_v37, %v8144_v19  ;;  %16998 = vst [vmem:[#allocation37_spill] sm:$0xff] %v15718_v26  ;;  %v15721_v19 = vld [vmem:[#allocation2 + $0x294] ss:$8 sps:$4 sm:$0xff]   ;;  %17000 = vst [vmem:[#allocation39_spill] sm:$0xff] %v15724_v13  ;;  %v15727_v37 = vld [vmem:[#allocation2 + $0x2a4] ss:$8 sps:$4 sm:$0xff]  }
0x2692   : > { %16999 = vst [vmem:[#allocation38_spill] sm:$0xff] %v15721_v19  ;;  %17001 = vst [vmem:[#allocation40_spill] sm:$0xff] %v15727_v37 }
0x2693   : > { %8185 = vmatprep.mubr.bf16.mxu0 %v15662_v21  ;;  %8231 = vmatprep.mubr.bf16.mxu1 %v15662_v21 }
0x2694   : > { %8186 = vmatmul.mubr.bf16.vlgmr.msra.gmra.mrb[164].mxu0 %v15660_v52  ;;  %8232 = vmatmul.mubr.bf16.vlgmr.msra.gmra.mrb[192].mxu1 %v15660_v52 }
0x2695   : > { %8335 = vmatpush1.bf16.msra.mxu1 %v15668_v11  ;;  %8366 = vmatprep.mubr.bf16.mxu1 %v15662_v21 }
0x2696   : > { %8336 = vmatprep.subr.bf16.mxu1 %v15672_v61  ;;  %8281 = vmatprep.mubr.bf16.mxu0 %v16987_v6 }
0x2699   : > { %8337 = vmatpush1.bf16.msra.mxu1 %v15676_v33 }
0x269a   : > { %8338 = vmatprep.subr.bf16.mxu1 %v15679_v16 }
0x269d   : > { %8339 = vmatpush1.bf16.msra.mxu1 %v15682_v39 }
0x269e   : > { %8340 = vmatprep.subr.bf16.mxu1 %v15685_v45 }
0x26a1   : > { %8341 = vmatpush1.bf16.msra.mxu1 %v15688_v1 }
0x26a2   : > { %8342 = vmatprep.subr.bf16.mxu1 %v15691_v46 }
0x26a5   : > { %8343 = vmatpush1.bf16.msra.mxu1 %v15694_v41 }
0x26a6   : > { %8344 = vmatprep.subr.bf16.mxu1 %v15697_v28 }
0x26a9   : > { %8345 = vmatpush1.bf16.msra.mxu1 %v15700_v30 }
0x26aa   : > { %8346 = vmatprep.subr.bf16.mxu1 %v15703_v0 }
0x26ad   : > { %8347 = vmatpush1.bf16.msra.mxu1 %v15706_v32  ;;  %v8245_v32 = vld [vmem:[#allocation13 + $0x4] sm:$0xf] }
0x26ae   : > { %8348 = vmatprep.subr.bf16.mxu1 %v15709_v50 }
0x26b1   : > { %8349 = vmatpush1.bf16.msra.mxu1 %v15712_v31 }
0x26b2   : > { %8350 = vmatprep.subr.bf16.mxu1 %v15715_v3 }
0x26b5   : > { %8351 = vmatpush1.bf16.msra.mxu1 %v15718_v26 }
0x26b6   : > { %8352 = vmatprep.subr.bf16.mxu1 %v15721_v19 }
0x26b9   : > { %8353 = vmatpush1.bf16.msra.mxu1 %v15724_v13 }
0x26ba   : > { %8354 = vmatprep.subr.bf16.mxu1 %v15727_v37 }
0x26bd   : > { %8355 = vmatpush1.bf16.msra.mxu1 %v15730_v12  ;;  %v15748_v12 = vld [vmem:[#allocation2 + $0x2d0] ss:$8 sps:$4 sm:$0xff]  }
0x26be   : > { %8356 = vmatprep.subr.bf16.mxu1 %v15733_v48  ;;  %17008 = vst [vmem:[#allocation47_spill] sm:$0xff] %v15748_v12  ;;  %v15751_v48 = vld [vmem:[#allocation2 + $0x2e4] ss:$8 sps:$4 sm:$0xff]  }
0x26bf   : > { %17009 = vst [vmem:[#allocation48_spill] sm:$0xff] %v15751_v48 }
0x26c1   : > { %8357 = vmatpush1.bf16.msra.mxu1 %v15736_v59  ;;  %v15754_v59 = vld [vmem:[#allocation2 + $0x2e0] ss:$8 sps:$4 sm:$0xff]  }
0x26c2   : > { %8358 = vmatprep.subr.bf16.mxu1 %v15739_v57  ;;  %17010 = vst [vmem:[#allocation49_spill] sm:$0xff] %v15754_v59  ;;  %v15757_v57 = vld [vmem:[#allocation2 + $0x2f4] ss:$8 sps:$4 sm:$0xff]  }
0x26c3   : > { %17011 = vst [vmem:[#allocation50_spill] sm:$0xff] %v15757_v57 }
0x26c5   : > { %8359 = vmatpush1.bf16.msra.mxu1 %v15742_v56  ;;  %v15760_v56 = vld [vmem:[#allocation2 + $0x2f0] ss:$8 sps:$4 sm:$0xff]  }
0x26c6   : > { %8360 = vmatprep.subr.bf16.mxu1 %v15745_v58  ;;  %17012 = vst [vmem:[#allocation51_spill] sm:$0xff] %v15760_v56 }
0x26c9   : > { %8361 = vmatpush1.bf16.msra.mxu1 %v15748_v12 }
0x26ca   : > { %8362 = vmatprep.subr.bf16.mxu1 %v15751_v48 }
0x26cd   : > { %8363 = vmatpush1.bf16.msra.mxu1 %v15754_v59 }
0x26ce   : > { %8364 = vmatprep.subr.bf16.mxu1 %v15757_v57 }
0x26d1   : > { %8365 = vmatpush1.bf16.msra.mxu1 %v15760_v56  ;;  %v8198_v56 = vld [vmem:[#allocation13] sm:$0xf] }
0x26d4   : > { %8367 = vmatmul.mubr.bf16.vlgmr.msra.gmra.mrb[196].mxu1 %v15660_v52 }
0x26d5   : > { %8509 = vmatprep.mubr.bf16.mxu1 %v16987_v6 }
0x2767   : > { %v8187_v12 = vpop.f32.mrb[164].mxu0  ;;  %v8233_v58 = vpop.f32.mrb[192].mxu1 }
0x2768   : > { %v8189_v37 = vpop.f32.mrb[165].mxu0  ;;  %v8235_v48 = vpop.f32.mrb[193].mxu1 }
0x2769   : > { %v8191_v13 = vpop.f32.mrb[166].mxu0  ;;  %v8237_v19 = vpop.f32.mrb[194].mxu1 }
0x276a   : > { %v8196_v26 = vpack.c.bf16 %v8191_v13, %v8187_v12  ;;  %v8242_v59 = vpack.c.bf16 %v8237_v19, %v8233_v58  ;;  %v8193_v3 = vpop.f32.mrb[167].mxu0  ;;  %v8239_v31 = vpop.f32.mrb[195].mxu1 }
0x276b   : > { %v8197_v50 = vpack.c.bf16 %v8193_v3, %v8189_v37  ;;  %v8243_v57 = vpack.c.bf16 %v8239_v31, %v8235_v48  ;;  %v15783_v31 = vld [vmem:[#allocation2 + $0x324] ss:$8 sps:$4 sm:$0xff]   ;;  %v15789_v37 = vld [vmem:[#allocation2 + $0x334] ss:$8 sps:$4 sm:$0xff]  }
0x276c   : > { %17017 = vst [vmem:[#allocation56_spill] sm:$0xff] %v15783_v31  ;;  %17019 = vst [vmem:[#allocation58_spill] sm:$0xff] %v15789_v37 }
0x276d   : > { %8249 = vmatprep.subr.bf16.mxu0 %v8243_v57  ;;  %v8380_v57 = vld [vmem:[#allocation13 + $0x8] sm:$0xf] }
0x276e   : > { %8250 = vmatpush1.bf16.msra.mxu0 %v8242_v59  ;;  %v15769_v59 = vld [vmem:[#allocation2 + $0x304] ss:$8 sps:$4 sm:$0xff]  }
0x276f   : > { %8293 = vmatprep.subr.bf16.mxu0 %v8197_v50  ;;  %17013 = vst [vmem:[#allocation52_spill] sm:$0xff] %v15769_v59  ;;  %v15780_v50 = vld [vmem:[#allocation2 + $0x310] ss:$8 sps:$4 sm:$0xff]  }
0x2770   : > { %17016 = vst [vmem:[#allocation55_spill] sm:$0xff] %v15780_v50 }
0x2771   : > { %11359 = vmatmul.mubr.msk.bf16.vlgmr.msra.gmra.mrb[168].mxu0 %vm5143_vm7, %v8245_v32  ;;  %v15773_v32 = vld [vmem:[#allocation2 + $0x300] ss:$8 sps:$4 sm:$0xff]  }
0x2772   : > { %8294 = vmatpush1.bf16.msra.mxu0 %v8196_v26  ;;  %8325 = vmatprep.mubr.bf16.mxu0 %v16987_v6  ;;  %17014 = vst [vmem:[#allocation53_spill] sm:$0xff] %v15773_v32  ;;  %v15786_v26 = vld [vmem:[#allocation2 + $0x320] ss:$8 sps:$4 sm:$0xff]  }
0x2773   : > { %17018 = vst [vmem:[#allocation57_spill] sm:$0xff] %v15786_v26 }
0x2779   : > { %11360 = vmatmul.mubr.msk.bf16.vlgmr.msra.gmra.mrb[172].mxu0 %vm5143_vm7, %v8198_v56  ;;  %v15777_v56 = vld [vmem:[#allocation2 + $0x314] ss:$8 sps:$4 sm:$0xff]  }
0x277a   : > { %8416 = vmatprep.mubr.bf16.mxu0 %v16987_v6  ;;  %17015 = vst [vmem:[#allocation54_spill] sm:$0xff] %v15777_v56 }
0x27a7   : > { %v8368_v12 = vpop.f32.mrb[196].mxu1 }
0x27a8   : > { %v8370_v58 = vpop.f32.mrb[197].mxu1 }
0x27a9   : > { %v8372_v19 = vpop.f32.mrb[198].mxu1 }
0x27aa   : > { %v8377_v13 = vpack.c.bf16 %v8372_v19, %v8368_v12  ;;  %v8374_v3 = vpop.f32.mrb[199].mxu1  ;;  %v15792_v12 = vld [vmem:[#allocation2 + $0x330] ss:$8 sps:$4 sm:$0xff]   ;;  %v15798_v19 = vld [vmem:[#allocation2 + $0x340] ss:$8 sps:$4 sm:$0xff]  }
0x27ab   : > { %v8378_v48 = vpack.c.bf16 %v8374_v3, %v8370_v58  ;;  %17020 = vst [vmem:[#allocation59_spill] sm:$0xff] %v15792_v12  ;;  %v15795_v58 = vld [vmem:[#allocation2 + $0x344] ss:$8 sps:$4 sm:$0xff]   ;;  %17022 = vst [vmem:[#allocation61_spill] sm:$0xff] %v15798_v19  ;;  %v15804_v3 = vld [vmem:[#allocation2 + $0x350] ss:$8 sps:$4 sm:$0xff]  }
0x27ac   : > { %17021 = vst [vmem:[#allocation60_spill] sm:$0xff] %v15795_v58  ;;  %17024 = vst [vmem:[#allocation63_spill] sm:$0xff] %v15804_v3 }
0x27ad   : > { %8384 = vmatprep.subr.bf16.mxu0 %v8378_v48  ;;  %v15807_v48 = vld [vmem:[#allocation2 + $0x364] ss:$8 sps:$4 sm:$0xff]  }
0x27ae   : > { %8385 = vmatpush1.bf16.msra.mxu0 %v8377_v13  ;;  %v15801_v13 = vld [vmem:[#allocation2 + $0x354] ss:$8 sps:$4 sm:$0xff]   ;;  %17025 = vst [vmem:[#allocation64_spill] sm:$0xff] %v15807_v48 }
0x27af   : > { %8427 = vmatprep.subr.bf16.mxu0 %v15769_v59  ;;  %17023 = vst [vmem:[#allocation62_spill] sm:$0xff] %v15801_v13 }
0x27b1   : > { %11361 = vmatmul.mubr.msk.bf16.vlgmr.msra.gmra.mrb[176].mxu0 %vm5143_vm7, %v8380_v57  ;;  %v15810_v57 = vld [vmem:[#allocation2 + $0x360] ss:$8 sps:$4 sm:$0xff]  }
0x27b2   : > { %8428 = vmatpush1.bf16.msra.mxu0 %v15773_v32  ;;  %8459 = vmatprep.mubr.bf16.mxu0 %v15662_v21  ;;  %17026 = vst [vmem:[#allocation65_spill] sm:$0xff] %v15810_v57 }
0x27b3   : > { %8429 = vmatprep.subr.bf16.mxu0 %v15777_v56 }
0x27b6   : > { %8430 = vmatpush1.bf16.msra.mxu0 %v15780_v50 }
0x27b7   : > { %8431 = vmatprep.subr.bf16.mxu0 %v15783_v31 }
0x27ba   : > { %8432 = vmatpush1.bf16.msra.mxu0 %v15786_v26 }
0x27bb   : > { %8433 = vmatprep.subr.bf16.mxu0 %v15789_v37 }
0x27be   : > { %8434 = vmatpush1.bf16.msra.mxu0 %v15792_v12 }
0x27bf   : > { %8435 = vmatprep.subr.bf16.mxu0 %v15795_v58  ;;  %v15813_v58 = vld [vmem:[#allocation2 + $0x374] ss:$8 sps:$4 sm:$0xff]  }
0x27c0   : > { %17027 = vst [vmem:[#allocation66_spill] sm:$0xff] %v15813_v58 }
0x27c2   : > { %8436 = vmatpush1.bf16.msra.mxu0 %v15798_v19  ;;  %v15816_v19 = vld [vmem:[#allocation2 + $0x370] ss:$8 sps:$4 sm:$0xff]  }
0x27c3   : > { %8437 = vmatprep.subr.bf16.mxu0 %v15801_v13  ;;  %17028 = vst [vmem:[#allocation67_spill] sm:$0xff] %v15816_v19  ;;  %v15819_v13 = vld [vmem:[#allocation2 + $0x384] ss:$8 sps:$4 sm:$0xff]  }
0x27c4   : > { %17029 = vst [vmem:[#allocation68_spill] sm:$0xff] %v15819_v13 }
0x27c6   : > { %8438 = vmatpush1.bf16.msra.mxu0 %v15804_v3  ;;  %v15822_v3 = vld [vmem:[#allocation2 + $0x380] ss:$8 sps:$4 sm:$0xff]  }
0x27c7   : > { %8439 = vmatprep.subr.bf16.mxu0 %v15807_v48  ;;  %17030 = vst [vmem:[#allocation69_spill] sm:$0xff] %v15822_v3  ;;  %v15825_v48 = vld [vmem:[#allocation2 + $0x394] ss:$8 sps:$4 sm:$0xff]  }
0x27c8   : > { %17031 = vst [vmem:[#allocation70_spill] sm:$0xff] %v15825_v48 }
0x27ca   : > { %8440 = vmatpush1.bf16.msra.mxu0 %v15810_v57  ;;  %v15828_v57 = vld [vmem:[#allocation2 + $0x390] ss:$8 sps:$4 sm:$0xff]  }
0x27cb   : > { %8441 = vmatprep.subr.bf16.mxu0 %v15813_v58  ;;  %17032 = vst [vmem:[#allocation71_spill] sm:$0xff] %v15828_v57  ;;  %v15831_v58 = vld [vmem:[#allocation2 + $0x3a4] ss:$8 sps:$4 sm:$0xff]  }
0x27cc   : > { %17033 = vst [vmem:[#allocation72_spill] sm:$0xff] %v15831_v58 }
0x27ce   : > { %8442 = vmatpush1.bf16.msra.mxu0 %v15816_v19  ;;  %v15834_v19 = vld [vmem:[#allocation2 + $0x3a0] ss:$8 sps:$4 sm:$0xff]  }
0x27cf   : > { %8443 = vmatprep.subr.bf16.mxu0 %v15819_v13  ;;  %17034 = vst [vmem:[#allocation73_spill] sm:$0xff] %v15834_v19  ;;  %v15837_v13 = vld [vmem:[#allocation2 + $0x3b4] ss:$8 sps:$4 sm:$0xff]  }
0x27d0   : > { %17035 = vst [vmem:[#allocation74_spill] sm:$0xff] %v15837_v13 }
0x27d2   : > { %8444 = vmatpush1.bf16.msra.mxu0 %v15822_v3  ;;  %v15840_v3 = vld [vmem:[#allocation2 + $0x3b0] ss:$8 sps:$4 sm:$0xff]  }
0x27d3   : > { %8445 = vmatprep.subr.bf16.mxu0 %v15825_v48  ;;  %17036 = vst [vmem:[#allocation75_spill] sm:$0xff] %v15840_v3  ;;  %v15843_v48 = vld [vmem:[#allocation2 + $0x3c4] ss:$8 sps:$4 sm:$0xff]  }
0x27d4   : > { %17037 = vst [vmem:[#allocation76_spill] sm:$0xff] %v15843_v48 }
0x27d6   : > { %8446 = vmatpush1.bf16.msra.mxu0 %v15828_v57  ;;  %v15846_v57 = vld [vmem:[#allocation2 + $0x3c0] ss:$8 sps:$4 sm:$0xff]  }
0x27d7   : > { %8447 = vmatprep.subr.bf16.mxu0 %v15831_v58  ;;  %17038 = vst [vmem:[#allocation77_spill] sm:$0xff] %v15846_v57  ;;  %v15849_v58 = vld [vmem:[#allocation2 + $0x3d4] ss:$8 sps:$4 sm:$0xff]  }
0x27d8   : > { %17039 = vst [vmem:[#allocation78_spill] sm:$0xff] %v15849_v58 }
0x27da   : > { %8448 = vmatpush1.bf16.msra.mxu0 %v15834_v19  ;;  %v15852_v19 = vld [vmem:[#allocation2 + $0x3d0] ss:$8 sps:$4 sm:$0xff]  }
0x27db   : > { %8449 = vmatprep.subr.bf16.mxu0 %v15837_v13  ;;  %17040 = vst [vmem:[#allocation79_spill] sm:$0xff] %v15852_v19  ;;  %v15855_v13 = vld [vmem:[#allocation2 + $0x3e4] ss:$8 sps:$4 sm:$0xff]  }
0x27dc   : > { %17041 = vst [vmem:[#allocation80_spill] sm:$0xff] %v15855_v13 }
0x27de   : > { %8450 = vmatpush1.bf16.msra.mxu0 %v15840_v3  ;;  %v15858_v3 = vld [vmem:[#allocation2 + $0x3e0] ss:$8 sps:$4 sm:$0xff]  }
0x27df   : > { %8451 = vmatprep.subr.bf16.mxu0 %v15843_v48  ;;  %17042 = vst [vmem:[#allocation81_spill] sm:$0xff] %v15858_v3  ;;  %v15861_v48 = vld [vmem:[#allocation2 + $0x3f4] ss:$8 sps:$4 sm:$0xff]  }
0x27e0   : > { %17043 = vst [vmem:[#allocation82_spill] sm:$0xff] %v15861_v48 }
0x27e2   : > { %8452 = vmatpush1.bf16.msra.mxu0 %v15846_v57  ;;  %v15864_v57 = vld [vmem:[#allocation2 + $0x3f0] ss:$8 sps:$4 sm:$0xff]  }
0x27e3   : > { %8453 = vmatprep.subr.bf16.mxu0 %v15849_v58  ;;  %17044 = vst [vmem:[#allocation83_spill] sm:$0xff] %v15864_v57 }
0x27e6   : > { %8454 = vmatpush1.bf16.msra.mxu0 %v15852_v19 }
0x27e7   : > { %8455 = vmatprep.subr.bf16.mxu0 %v15855_v13 }
0x27ea   : > { %8456 = vmatpush1.bf16.msra.mxu0 %v15858_v3 }
0x27eb   : > { %8457 = vmatprep.subr.bf16.mxu0 %v15861_v48 }
0x27ee   : > { %8458 = vmatpush1.bf16.msra.mxu0 %v15864_v57 }
0x27f1   : > { %8460 = vmatmul.mubr.bf16.vlgmr.msra.gmra.mrb[180].mxu0 %v15660_v52 }
0x27f2   : > { %8602 = vmatprep.mubr.bf16.mxu0 %v16987_v6 }
0x2844   : > { %v8283_v19 = vpop.f32.mrb[168].mxu0 }
0x2845   : > { %v8285_v58 = vpop.f32.mrb[169].mxu0 }
0x2846   : > { %v8287_v12 = vpop.f32.mrb[170].mxu0 }
0x2847   : > { %v8288_v13 = vpop.f32.mrb[171].mxu0 }
0x284c   : > { %v8327_v37 = vpop.f32.mrb[172].mxu0 }
0x284d   : > { %v8328_v26 = vadd.f32 %v8327_v37, %v8283_v19  ;;  %v8329_v31 = vpop.f32.mrb[173].mxu0  ;;  %v8473_v37 = vld [vmem:[#allocation13 + $0xc] sm:$0xf] }
0x284e   : > { %v8330_v3 = vadd.f32 %v8329_v31, %v8285_v58  ;;  %v8331_v50 = vpop.f32.mrb[174].mxu0  ;;  %v15873_v31 = vld [vmem:[#allocation2 + $0x404] ss:$8 sps:$4 sm:$0xff]   ;;  %v15908_v58 = vld [vmem:[#allocation2 + $0x450] ss:$8 sps:$4 sm:$0xff]  }
0x284f   : > { %v8332_v56 = vpop.f32.mrb[175].mxu0  ;;  %v15902_v50 = vld [vmem:[#allocation2 + $0x440] ss:$8 sps:$4 sm:$0xff]   ;;  %17052 = vst [vmem:[#allocation91_spill] sm:$0xff] %v15908_v58  ;;  %v15911_v19 = vld [vmem:[#allocation2 + $0x464] ss:$8 sps:$4 sm:$0xff]  }
0x2850   : > { %v15899_v56 = vld [vmem:[#allocation2 + $0x444] ss:$8 sps:$4 sm:$0xff]   ;;  %17050 = vst [vmem:[#allocation89_spill] sm:$0xff] %v15902_v50  ;;  %17053 = vst [vmem:[#allocation92_spill] sm:$0xff] %v15911_v19 }
0x2851   : > { %17049 = vst [vmem:[#allocation88_spill] sm:$0xff] %v15899_v56 }
0x2884   : > { %v8418_v32 = vpop.f32.mrb[176].mxu0 }
0x2885   : > { %v15869_v48 = vadd.f32 %v8418_v32, %v8328_v26  ;;  %v8420_v59 = vpop.f32.mrb[177].mxu0  ;;  %v15877_v32 = vld [vmem:[#allocation2 + $0x400] ss:$8 sps:$4 sm:$0xff]   ;;  %v15905_v26 = vld [vmem:[#allocation2 + $0x454] ss:$8 sps:$4 sm:$0xff]  }
0x2886   : > { %v15871_v0 = vadd.f32 %v8420_v59, %v8330_v3  ;;  %v8422_v57 = vpop.f32.mrb[178].mxu0  ;;  %v15896_v59 = vld [vmem:[#allocation2 + $0x430] ss:$8 sps:$4 sm:$0xff]   ;;  %17051 = vst [vmem:[#allocation90_spill] sm:$0xff] %v15905_v26  ;;  %v15914_v3 = vld [vmem:[#allocation2 + $0x460] ss:$8 sps:$4 sm:$0xff]  }
0x2887   : > { %v8423_v30 = vpop.f32.mrb[179].mxu0  ;;  %17048 = vst [vmem:[#allocation87_spill] sm:$0xff] %v15896_v59  ;;  %17054 = vst [vmem:[#allocation93_spill] sm:$0xff] %v15914_v3  ;;  %v15917_v57 = vld [vmem:[#allocation2 + $0x474] ss:$8 sps:$4 sm:$0xff]  }
0x2888   : > { %v15881_v30 = vld [vmem:[#allocation2 + $0x414] ss:$8 sps:$4 sm:$0xff]   ;;  %17055 = vst [vmem:[#allocation94_spill] sm:$0xff] %v15917_v57 }
0x28c4   : > { %v8461_v28 = vpop.f32.mrb[180].mxu0 }
0x28c5   : > { %v8463_v41 = vpop.f32.mrb[181].mxu0 }
0x28c6   : > { %v8465_v46 = vpop.f32.mrb[182].mxu0 }
0x28c7   : > { %v8470_v1 = vpack.c.bf16 %v8465_v46, %v8461_v28  ;;  %v8467_v12 = vpop.f32.mrb[183].mxu0  ;;  %v15884_v46 = vld [vmem:[#allocation2 + $0x410] ss:$8 sps:$4 sm:$0xff]   ;;  %v15893_v28 = vld [vmem:[#allocation2 + $0x434] ss:$8 sps:$4 sm:$0xff]  }
0x28c8   : > { %v8471_v13 = vpack.c.bf16 %v8467_v12, %v8463_v41  ;;  %v15890_v41 = vld [vmem:[#allocation2 + $0x420] ss:$8 sps:$4 sm:$0xff]   ;;  %17047 = vst [vmem:[#allocation86_spill] sm:$0xff] %v15893_v28  ;;  %v15920_v12 = vld [vmem:[#allocation2 + $0x470] ss:$8 sps:$4 sm:$0xff]  }
0x28c9   : > { %17046 = vst [vmem:[#allocation85_spill] sm:$0xff] %v15890_v41  ;;  %17056 = vst [vmem:[#allocation95_spill] sm:$0xff] %v15920_v12 }
0x28ca   : > { %8477 = vmatprep.subr.bf16.mxu1 %v8471_v13  ;;  %v15923_v13 = vld [vmem:[#allocation2 + $0x484] ss:$8 sps:$4 sm:$0xff]  }
0x28cb   : > { %8478 = vmatpush1.bf16.msra.mxu1 %v8470_v1  ;;  %v15887_v1 = vld [vmem:[#allocation2 + $0x424] ss:$8 sps:$4 sm:$0xff]   ;;  %17057 = vst [vmem:[#allocation96_spill] sm:$0xff] %v15923_v13 }
0x28cc   : > { %8520 = vmatprep.subr.bf16.mxu1 %v15873_v31  ;;  %17045 = vst [vmem:[#allocation84_spill] sm:$0xff] %v15887_v1 }
0x28ce   : > { %11362 = vmatmul.mubr.msk.bf16.vlgmr.msra.gmra.mrb[200].mxu1 %vm5143_vm7, %v8473_v37  ;;  %v15926_v37 = vld [vmem:[#allocation2 + $0x480] ss:$8 sps:$4 sm:$0xff]  }
0x28cf   : > { %8521 = vmatpush1.bf16.msra.mxu1 %v15877_v32  ;;  %8552 = vmatprep.mubr.bf16.mxu1 %v15662_v21  ;;  %17058 = vst [vmem:[#allocation97_spill] sm:$0xff] %v15926_v37 }
0x28d0   : > { %8522 = vmatprep.subr.bf16.mxu1 %v15881_v30 }
0x28d3   : > { %8523 = vmatpush1.bf16.msra.mxu1 %v15884_v46 }
0x28d4   : > { %8524 = vmatprep.subr.bf16.mxu1 %v15887_v1  ;;  %v13220_v1 = vld [vmem:[#allocation2 + $0x504] ss:$8 sps:$4 sm:$0xff]  }
0x28d7   : > { %8525 = vmatpush1.bf16.msra.mxu1 %v15890_v41  ;;  %v8566_v41 = vld [vmem:[#allocation13 + $0x10] sm:$0xf] }
0x28d8   : > { %8526 = vmatprep.subr.bf16.mxu1 %v15893_v28 }
0x28db   : > { %8527 = vmatpush1.bf16.msra.mxu1 %v15896_v59 }
0x28dc   : > { %8528 = vmatprep.subr.bf16.mxu1 %v15899_v56 }
0x28df   : > { %8529 = vmatpush1.bf16.msra.mxu1 %v15902_v50 }
0x28e0   : > { %8530 = vmatprep.subr.bf16.mxu1 %v15905_v26 }
0x28e3   : > { %8531 = vmatpush1.bf16.msra.mxu1 %v15908_v58 }
0x28e4   : > { %8532 = vmatprep.subr.bf16.mxu1 %v15911_v19  ;;  %v15929_v19 = vld [vmem:[#allocation2 + $0x494] ss:$8 sps:$4 sm:$0xff]  }
0x28e5   : > { %17059 = vst [vmem:[#allocation98_spill] sm:$0xff] %v15929_v19 }
0x28e7   : > { %8533 = vmatpush1.bf16.msra.mxu1 %v15914_v3  ;;  %v15932_v3 = vld [vmem:[#allocation2 + $0x490] ss:$8 sps:$4 sm:$0xff]  }
0x28e8   : > { %8534 = vmatprep.subr.bf16.mxu1 %v15917_v57  ;;  %17060 = vst [vmem:[#allocation99_spill] sm:$0xff] %v15932_v3  ;;  %v15935_v57 = vld [vmem:[#allocation2 + $0x4a4] ss:$8 sps:$4 sm:$0xff]  }
0x28e9   : > { %17061 = vst [vmem:[#allocation100_spill] sm:$0xff] %v15935_v57 }
0x28eb   : > { %8535 = vmatpush1.bf16.msra.mxu1 %v15920_v12  ;;  %v15938_v12 = vld [vmem:[#allocation2 + $0x4a0] ss:$8 sps:$4 sm:$0xff]  }
0x28ec   : > { %8536 = vmatprep.subr.bf16.mxu1 %v15923_v13  ;;  %17062 = vst [vmem:[#allocation101_spill] sm:$0xff] %v15938_v12  ;;  %v15941_v13 = vld [vmem:[#allocation2 + $0x4b4] ss:$8 sps:$4 sm:$0xff]  }
0x28ed   : > { %17063 = vst [vmem:[#allocation102_spill] sm:$0xff] %v15941_v13 }
0x28ef   : > { %8537 = vmatpush1.bf16.msra.mxu1 %v15926_v37  ;;  %v15944_v37 = vld [vmem:[#allocation2 + $0x4b0] ss:$8 sps:$4 sm:$0xff]  }
0x28f0   : > { %8538 = vmatprep.subr.bf16.mxu1 %v15929_v19  ;;  %17064 = vst [vmem:[#allocation103_spill] sm:$0xff] %v15944_v37  ;;  %v15947_v19 = vld [vmem:[#allocation2 + $0x4c4] ss:$8 sps:$4 sm:$0xff]  }
0x28f1   : > { %17065 = vst [vmem:[#allocation104_spill] sm:$0xff] %v15947_v19 }
0x28f3   : > { %8539 = vmatpush1.bf16.msra.mxu1 %v15932_v3  ;;  %v15950_v3 = vld [vmem:[#allocation2 + $0x4c0] ss:$8 sps:$4 sm:$0xff]  }
0x28f4   : > { %8540 = vmatprep.subr.bf16.mxu1 %v15935_v57  ;;  %17066 = vst [vmem:[#allocation105_spill] sm:$0xff] %v15950_v3  ;;  %v15953_v57 = vld [vmem:[#allocation2 + $0x4d4] ss:$8 sps:$4 sm:$0xff]  }
0x28f5   : > { %17067 = vst [vmem:[#allocation106_spill] sm:$0xff] %v15953_v57 }
0x28f7   : > { %8541 = vmatpush1.bf16.msra.mxu1 %v15938_v12  ;;  %v15956_v12 = vld [vmem:[#allocation2 + $0x4d0] ss:$8 sps:$4 sm:$0xff]  }
0x28f8   : > { %8542 = vmatprep.subr.bf16.mxu1 %v15941_v13  ;;  %17068 = vst [vmem:[#allocation107_spill] sm:$0xff] %v15956_v12  ;;  %v15959_v13 = vld [vmem:[#allocation2 + $0x4e4] ss:$8 sps:$4 sm:$0xff]  }
0x28f9   : > { %17069 = vst [vmem:[#allocation108_spill] sm:$0xff] %v15959_v13 }
0x28fb   : > { %8543 = vmatpush1.bf16.msra.mxu1 %v15944_v37  ;;  %v15962_v37 = vld [vmem:[#allocation2 + $0x4e0] ss:$8 sps:$4 sm:$0xff]  }
0x28fc   : > { %8544 = vmatprep.subr.bf16.mxu1 %v15947_v19  ;;  %17070 = vst [vmem:[#allocation109_spill] sm:$0xff] %v15962_v37  ;;  %v15965_v19 = vld [vmem:[#allocation2 + $0x4f4] ss:$8 sps:$4 sm:$0xff]  }
0x28fd   : > { %17071 = vst [vmem:[#allocation110_spill] sm:$0xff] %v15965_v19 }
0x28ff   : > { %8545 = vmatpush1.bf16.msra.mxu1 %v15950_v3  ;;  %v15968_v3 = vld [vmem:[#allocation2 + $0x4f0] ss:$8 sps:$4 sm:$0xff]  }
0x2900   : > { %8546 = vmatprep.subr.bf16.mxu1 %v15953_v57  ;;  %17072 = vst [vmem:[#allocation111_spill] sm:$0xff] %v15968_v3 }
0x2903   : > { %8547 = vmatpush1.bf16.msra.mxu1 %v15956_v12 }
0x2904   : > { %8548 = vmatprep.subr.bf16.mxu1 %v15959_v13 }
0x2907   : > { %8549 = vmatpush1.bf16.msra.mxu1 %v15962_v37 }
0x2908   : > { %8550 = vmatprep.subr.bf16.mxu1 %v15965_v19 }
0x290b   : > { %8551 = vmatpush1.bf16.msra.mxu1 %v15968_v3 }
0x290e   : > { %8553 = vmatmul.mubr.bf16.vlgmr.msra.gmra.mrb[204].mxu1 %v15660_v52 }
0x290f   : > { %8695 = vmatprep.mubr.bf16.mxu1 %v16987_v6 }
0x29a1   : > { %v8511_v12 = vpop.f32.mrb[200].mxu1 }
0x29a2   : > { %v15974_v57 = vadd.f32 %v8511_v12, %v15869_v48  ;;  %v8513_v13 = vpop.f32.mrb[201].mxu1  ;;  %v13221_v48 = vld [vmem:[#allocation2 + $0x500] ss:$8 sps:$4 sm:$0xff]   ;;  %v13224_v12 = vld [vmem:[#allocation2 + $0x524] ss:$8 sps:$4 sm:$0xff]  }
0x29a3   : > { %v15977_v58 = vadd.f32 %v8513_v13, %v15871_v0  ;;  %v8515_v37 = vpop.f32.mrb[202].mxu1  ;;  %v13222_v0 = vld [vmem:[#allocation2 + $0x514] ss:$8 sps:$4 sm:$0xff]   ;;  %v13233_v13 = vld [vmem:[#allocation2 + $0x560] ss:$8 sps:$4 sm:$0xff]  }
0x29a4   : > { %v8516_v26 = vpop.f32.mrb[203].mxu1  ;;  %v13234_v37 = vld [vmem:[#allocation2 + $0x574] ss:$8 sps:$4 sm:$0xff]  }
0x29a5   : > { %v13223_v26 = vld [vmem:[#allocation2 + $0x510] ss:$8 sps:$4 sm:$0xff]  }
0x29e1   : > { %v8554_v50 = vpop.f32.mrb[204].mxu1 }
0x29e2   : > { %v8556_v19 = vpop.f32.mrb[205].mxu1 }
0x29e3   : > { %v8558_v56 = vpop.f32.mrb[206].mxu1 }
0x29e4   : > { %v8563_v59 = vpack.c.bf16 %v8558_v56, %v8554_v50  ;;  %v8560_v28 = vpop.f32.mrb[207].mxu1  ;;  %v13225_v56 = vld [vmem:[#allocation2 + $0x520] ss:$8 sps:$4 sm:$0xff]   ;;  %v13228_v50 = vld [vmem:[#allocation2 + $0x544] ss:$8 sps:$4 sm:$0xff]  }
0x29e5   : > { %v8564_v3 = vpack.c.bf16 %v8560_v28, %v8556_v19  ;;  %v13226_v28 = vld [vmem:[#allocation2 + $0x534] ss:$8 sps:$4 sm:$0xff]   ;;  %v13231_v19 = vld [vmem:[#allocation2 + $0x550] ss:$8 sps:$4 sm:$0xff]  }
0x29e7   : > { %8570 = vmatprep.subr.bf16.mxu0 %v8564_v3  ;;  %v13232_v3 = vld [vmem:[#allocation2 + $0x564] ss:$8 sps:$4 sm:$0xff]  }
0x29e8   : > { %8571 = vmatpush1.bf16.msra.mxu0 %v8563_v59  ;;  %v13227_v59 = vld [vmem:[#allocation2 + $0x530] ss:$8 sps:$4 sm:$0xff]  }
0x29e9   : > { %8613 = vmatprep.subr.bf16.mxu0 %v13220_v1  ;;  %v13229_v1 = vld [vmem:[#allocation2 + $0x540] ss:$8 sps:$4 sm:$0xff]  }
0x29eb   : > { %11363 = vmatmul.mubr.msk.bf16.vlgmr.msra.gmra.mrb[184].mxu0 %vm5143_vm7, %v8566_v41  ;;  %v13230_v41 = vld [vmem:[#allocation2 + $0x554] ss:$8 sps:$4 sm:$0xff]  }
0x29ec   : > { %8614 = vmatpush1.bf16.msra.mxu0 %v13221_v48  ;;  %8645 = vmatprep.mubr.bf16.mxu0 %v15662_v21  ;;  %v13235_v48 = vld [vmem:[#allocation2 + $0x570] ss:$8 sps:$4 sm:$0xff]  }
0x29ed   : > { %8615 = vmatprep.subr.bf16.mxu0 %v13222_v0  ;;  %v13236_v0 = vld [vmem:[#allocation2 + $0x584] ss:$8 sps:$4 sm:$0xff]  }
0x29f0   : > { %8616 = vmatpush1.bf16.msra.mxu0 %v13223_v26  ;;  %v13237_v26 = vld [vmem:[#allocation2 + $0x580] ss:$8 sps:$4 sm:$0xff]  }
0x29f1   : > { %8617 = vmatprep.subr.bf16.mxu0 %v13224_v12  ;;  %v13238_v12 = vld [vmem:[#allocation2 + $0x594] ss:$8 sps:$4 sm:$0xff]  }
0x29f4   : > { %8618 = vmatpush1.bf16.msra.mxu0 %v13225_v56  ;;  %v13239_v56 = vld [vmem:[#allocation2 + $0x590] ss:$8 sps:$4 sm:$0xff]  }
0x29f5   : > { %8619 = vmatprep.subr.bf16.mxu0 %v13226_v28  ;;  %v13240_v28 = vld [vmem:[#allocation2 + $0x5a4] ss:$8 sps:$4 sm:$0xff]  }
0x29f8   : > { %8620 = vmatpush1.bf16.msra.mxu0 %v13227_v59  ;;  %v13241_v59 = vld [vmem:[#allocation2 + $0x5a0] ss:$8 sps:$4 sm:$0xff]  }
0x29f9   : > { %8621 = vmatprep.subr.bf16.mxu0 %v13228_v50  ;;  %v13242_v50 = vld [vmem:[#allocation2 + $0x5b4] ss:$8 sps:$4 sm:$0xff]  }
0x29fc   : > { %8622 = vmatpush1.bf16.msra.mxu0 %v13229_v1  ;;  %v13243_v1 = vld [vmem:[#allocation2 + $0x5b0] ss:$8 sps:$4 sm:$0xff]  }
0x29fd   : > { %8623 = vmatprep.subr.bf16.mxu0 %v13230_v41  ;;  %v13244_v41 = vld [vmem:[#allocation2 + $0x5c4] ss:$8 sps:$4 sm:$0xff]  }
0x2a00   : > { %8624 = vmatpush1.bf16.msra.mxu0 %v13231_v19  ;;  %v13245_v19 = vld [vmem:[#allocation2 + $0x5c0] ss:$8 sps:$4 sm:$0xff]  }
0x2a01   : > { %8625 = vmatprep.subr.bf16.mxu0 %v13232_v3  ;;  %v13246_v3 = vld [vmem:[#allocation2 + $0x5d4] ss:$8 sps:$4 sm:$0xff]  }
0x2a04   : > { %8626 = vmatpush1.bf16.msra.mxu0 %v13233_v13  ;;  %v13247_v13 = vld [vmem:[#allocation2 + $0x5d0] ss:$8 sps:$4 sm:$0xff]  }
0x2a05   : > { %8627 = vmatprep.subr.bf16.mxu0 %v13234_v37  ;;  %v13248_v37 = vld [vmem:[#allocation2 + $0x5e4] ss:$8 sps:$4 sm:$0xff]  }
0x2a08   : > { %8628 = vmatpush1.bf16.msra.mxu0 %v13235_v48  ;;  %v13249_v48 = vld [vmem:[#allocation2 + $0x5e0] ss:$8 sps:$4 sm:$0xff]  }
0x2a09   : > { %8629 = vmatprep.subr.bf16.mxu0 %v13236_v0  ;;  %v13250_v0 = vld [vmem:[#allocation2 + $0x5f4] ss:$8 sps:$4 sm:$0xff]  }
0x2a0c   : > { %8630 = vmatpush1.bf16.msra.mxu0 %v13237_v26  ;;  %v13251_v26 = vld [vmem:[#allocation2 + $0x5f0] ss:$8 sps:$4 sm:$0xff]  }
0x2a0d   : > { %8631 = vmatprep.subr.bf16.mxu0 %v13238_v12 }
0x2a10   : > { %8632 = vmatpush1.bf16.msra.mxu0 %v13239_v56 }
0x2a11   : > { %8633 = vmatprep.subr.bf16.mxu0 %v13240_v28 }
0x2a14   : > { %8634 = vmatpush1.bf16.msra.mxu0 %v13241_v59 }
0x2a15   : > { %8635 = vmatprep.subr.bf16.mxu0 %v13242_v50 }
0x2a18   : > { %8636 = vmatpush1.bf16.msra.mxu0 %v13243_v1 }
0x2a19   : > { %8637 = vmatprep.subr.bf16.mxu0 %v13244_v41 }
0x2a1c   : > { %8638 = vmatpush1.bf16.msra.mxu0 %v13245_v19 }
0x2a1d   : > { %8639 = vmatprep.subr.bf16.mxu0 %v13246_v3 }
0x2a20   : > { %8640 = vmatpush1.bf16.msra.mxu0 %v13247_v13 }
0x2a21   : > { %8641 = vmatprep.subr.bf16.mxu0 %v13248_v37 }
0x2a24   : > { %8642 = vmatpush1.bf16.msra.mxu0 %v13249_v48 }
0x2a25   : > { %8643 = vmatprep.subr.bf16.mxu0 %v13250_v0  ;;  %v8659_v0 = vld [vmem:[#allocation13 + $0x14] sm:$0xf] }
0x2a28   : > { %8644 = vmatpush1.bf16.msra.mxu0 %v13251_v26  ;;  %v15989_v26 = vld [vmem:[#allocation2 + $0x604] ss:$8 sps:$4 sm:$0xff]  }
0x2a29   : > { %17073 = vst [vmem:[#allocation112_spill] sm:$0xff] %v15989_v26 }
0x2a2b   : > { %8646 = vmatmul.mubr.bf16.vlgmr.msra.gmra.mrb[188].mxu0 %v15660_v52 }
0x2a2c   : > { %8788 = vmatprep.mubr.bf16.mxu0 %v16987_v6 }
0x2abe   : > { %v8604_v12 = vpop.f32.mrb[184].mxu0 }
0x2abf   : > { %v15984_v56 = vadd.f32 %v8604_v12, %v15974_v57  ;;  %v8606_v28 = vpop.f32.mrb[185].mxu0  ;;  %v15993_v57 = vld [vmem:[#allocation2 + $0x600] ss:$8 sps:$4 sm:$0xff]   ;;  %v16000_v12 = vld [vmem:[#allocation2 + $0x610] ss:$8 sps:$4 sm:$0xff]  }
0x2ac0   : > { %v15987_v59 = vadd.f32 %v8606_v28, %v15977_v58  ;;  %v8608_v50 = vpop.f32.mrb[186].mxu0  ;;  %17074 = vst [vmem:[#allocation113_spill] sm:$0xff] %v15993_v57  ;;  %v15997_v58 = vld [vmem:[#allocation2 + $0x614] ss:$8 sps:$4 sm:$0xff]   ;;  %17076 = vst [vmem:[#allocation115_spill] sm:$0xff] %v16000_v12 }
0x2ac1   : > { %v8609_v1 = vpop.f32.mrb[187].mxu0  ;;  %17075 = vst [vmem:[#allocation114_spill] sm:$0xff] %v15997_v58  ;;  %v16003_v28 = vld [vmem:[#allocation2 + $0x624] ss:$8 sps:$4 sm:$0xff]   ;;  %v16006_v50 = vld [vmem:[#allocation2 + $0x620] ss:$8 sps:$4 sm:$0xff]  }
0x2ac2   : > { %17077 = vst [vmem:[#allocation116_spill] sm:$0xff] %v16003_v28  ;;  %17078 = vst [vmem:[#allocation117_spill] sm:$0xff] %v16006_v50  ;;  %v16009_v1 = vld [vmem:[#allocation2 + $0x634] ss:$8 sps:$4 sm:$0xff]  }
0x2ac3   : > { %17079 = vst [vmem:[#allocation118_spill] sm:$0xff] %v16009_v1 }
0x2afe   : > { %v8647_v41 = vpop.f32.mrb[188].mxu0 }
0x2aff   : > { %v8649_v19 = vpop.f32.mrb[189].mxu0 }
0x2b00   : > { %v8651_v3 = vpop.f32.mrb[190].mxu0 }
0x2b01   : > { %v8656_v13 = vpack.c.bf16 %v8651_v3, %v8647_v41  ;;  %v8653_v37 = vpop.f32.mrb[191].mxu0  ;;  %v16012_v41 = vld [vmem:[#allocation2 + $0x630] ss:$8 sps:$4 sm:$0xff]   ;;  %v16018_v3 = vld [vmem:[#allocation2 + $0x640] ss:$8 sps:$4 sm:$0xff]  }
0x2b02   : > { %v8657_v48 = vpack.c.bf16 %v8653_v37, %v8649_v19  ;;  %17080 = vst [vmem:[#allocation119_spill] sm:$0xff] %v16012_v41  ;;  %v16015_v19 = vld [vmem:[#allocation2 + $0x644] ss:$8 sps:$4 sm:$0xff]   ;;  %17082 = vst [vmem:[#allocation121_spill] sm:$0xff] %v16018_v3  ;;  %v16024_v37 = vld [vmem:[#allocation2 + $0x650] ss:$8 sps:$4 sm:$0xff]  }
0x2b03   : > { %17081 = vst [vmem:[#allocation120_spill] sm:$0xff] %v16015_v19  ;;  %17084 = vst [vmem:[#allocation123_spill] sm:$0xff] %v16024_v37 }
0x2b04   : > { %8663 = vmatprep.subr.bf16.mxu1 %v8657_v48  ;;  %v16027_v48 = vld [vmem:[#allocation2 + $0x664] ss:$8 sps:$4 sm:$0xff]  }
0x2b05   : > { %8664 = vmatpush1.bf16.msra.mxu1 %v8656_v13  ;;  %v16021_v13 = vld [vmem:[#allocation2 + $0x654] ss:$8 sps:$4 sm:$0xff]   ;;  %17085 = vst [vmem:[#allocation124_spill] sm:$0xff] %v16027_v48 }
0x2b06   : > { %8706 = vmatprep.subr.bf16.mxu1 %v15989_v26  ;;  %17083 = vst [vmem:[#allocation122_spill] sm:$0xff] %v16021_v13  ;;  %v13284_v26 = vld [vmem:[#allocation2 + $0x704] ss:$8 sps:$4 sm:$0xff]  }
0x2b08   : > { %11364 = vmatmul.mubr.msk.bf16.vlgmr.msra.gmra.mrb[208].mxu1 %vm5143_vm7, %v8659_v0  ;;  %v16030_v0 = vld [vmem:[#allocation2 + $0x660] ss:$8 sps:$4 sm:$0xff]  }
0x2b09   : > { %8707 = vmatpush1.bf16.msra.mxu1 %v15993_v57  ;;  %8738 = vmatprep.mubr.bf16.mxu1 %v15662_v21  ;;  %17086 = vst [vmem:[#allocation125_spill] sm:$0xff] %v16030_v0  ;;  %v8752_v57 = vld [vmem:[#allocation13 + $0x18] sm:$0xf] }
0x2b0a   : > { %8708 = vmatprep.subr.bf16.mxu1 %v15997_v58 }
0x2b0d   : > { %8709 = vmatpush1.bf16.msra.mxu1 %v16000_v12 }
0x2b0e   : > { %8710 = vmatprep.subr.bf16.mxu1 %v16003_v28 }
0x2b11   : > { %8711 = vmatpush1.bf16.msra.mxu1 %v16006_v50 }
0x2b12   : > { %8712 = vmatprep.subr.bf16.mxu1 %v16009_v1 }
0x2b15   : > { %8713 = vmatpush1.bf16.msra.mxu1 %v16012_v41 }
0x2b16   : > { %8714 = vmatprep.subr.bf16.mxu1 %v16015_v19  ;;  %v16033_v19 = vld [vmem:[#allocation2 + $0x674] ss:$8 sps:$4 sm:$0xff]  }
0x2b17   : > { %17087 = vst [vmem:[#allocation126_spill] sm:$0xff] %v16033_v19 }
0x2b19   : > { %8715 = vmatpush1.bf16.msra.mxu1 %v16018_v3  ;;  %v16036_v3 = vld [vmem:[#allocation2 + $0x670] ss:$8 sps:$4 sm:$0xff]  }
0x2b1a   : > { %8716 = vmatprep.subr.bf16.mxu1 %v16021_v13  ;;  %17088 = vst [vmem:[#allocation127_spill] sm:$0xff] %v16036_v3  ;;  %v16039_v13 = vld [vmem:[#allocation2 + $0x684] ss:$8 sps:$4 sm:$0xff]  }
0x2b1b   : > { %17089 = vst [vmem:[#allocation128_spill] sm:$0xff] %v16039_v13 }
0x2b1d   : > { %8717 = vmatpush1.bf16.msra.mxu1 %v16024_v37  ;;  %v16042_v37 = vld [vmem:[#allocation2 + $0x680] ss:$8 sps:$4 sm:$0xff]  }
0x2b1e   : > { %8718 = vmatprep.subr.bf16.mxu1 %v16027_v48  ;;  %17090 = vst [vmem:[#allocation129_spill] sm:$0xff] %v16042_v37  ;;  %v16045_v48 = vld [vmem:[#allocation2 + $0x694] ss:$8 sps:$4 sm:$0xff]  }
0x2b1f   : > { %17091 = vst [vmem:[#allocation130_spill] sm:$0xff] %v16045_v48 }
0x2b21   : > { %8719 = vmatpush1.bf16.msra.mxu1 %v16030_v0  ;;  %v16048_v0 = vld [vmem:[#allocation2 + $0x690] ss:$8 sps:$4 sm:$0xff]  }
0x2b22   : > { %8720 = vmatprep.subr.bf16.mxu1 %v16033_v19  ;;  %17092 = vst [vmem:[#allocation131_spill] sm:$0xff] %v16048_v0  ;;  %v16051_v19 = vld [vmem:[#allocation2 + $0x6a4] ss:$8 sps:$4 sm:$0xff]  }
0x2b23   : > { %17093 = vst [vmem:[#allocation132_spill] sm:$0xff] %v16051_v19 }
0x2b25   : > { %8721 = vmatpush1.bf16.msra.mxu1 %v16036_v3  ;;  %v16054_v3 = vld [vmem:[#allocation2 + $0x6a0] ss:$8 sps:$4 sm:$0xff]  }
0x2b26   : > { %8722 = vmatprep.subr.bf16.mxu1 %v16039_v13  ;;  %17094 = vst [vmem:[#allocation133_spill] sm:$0xff] %v16054_v3  ;;  %v16057_v13 = vld [vmem:[#allocation2 + $0x6b4] ss:$8 sps:$4 sm:$0xff]  }
0x2b27   : > { %17095 = vst [vmem:[#allocation134_spill] sm:$0xff] %v16057_v13 }
0x2b29   : > { %8723 = vmatpush1.bf16.msra.mxu1 %v16042_v37  ;;  %v16060_v37 = vld [vmem:[#allocation2 + $0x6b0] ss:$8 sps:$4 sm:$0xff]  }
0x2b2a   : > { %8724 = vmatprep.subr.bf16.mxu1 %v16045_v48  ;;  %17096 = vst [vmem:[#allocation135_spill] sm:$0xff] %v16060_v37  ;;  %v16063_v48 = vld [vmem:[#allocation2 + $0x6c4] ss:$8 sps:$4 sm:$0xff]  }
0x2b2b   : > { %17097 = vst [vmem:[#allocation136_spill] sm:$0xff] %v16063_v48 }
0x2b2d   : > { %8725 = vmatpush1.bf16.msra.mxu1 %v16048_v0  ;;  %v16066_v0 = vld [vmem:[#allocation2 + $0x6c0] ss:$8 sps:$4 sm:$0xff]  }
0x2b2e   : > { %8726 = vmatprep.subr.bf16.mxu1 %v16051_v19  ;;  %17098 = vst [vmem:[#allocation137_spill] sm:$0xff] %v16066_v0  ;;  %v16069_v19 = vld [vmem:[#allocation2 + $0x6d4] ss:$8 sps:$4 sm:$0xff]  }
0x2b2f   : > { %17099 = vst [vmem:[#allocation138_spill] sm:$0xff] %v16069_v19 }
0x2b31   : > { %8727 = vmatpush1.bf16.msra.mxu1 %v16054_v3  ;;  %v16072_v3 = vld [vmem:[#allocation2 + $0x6d0] ss:$8 sps:$4 sm:$0xff]  }
0x2b32   : > { %8728 = vmatprep.subr.bf16.mxu1 %v16057_v13  ;;  %17100 = vst [vmem:[#allocation139_spill] sm:$0xff] %v16072_v3  ;;  %v16075_v13 = vld [vmem:[#allocation2 + $0x6e4] ss:$8 sps:$4 sm:$0xff]  }
0x2b33   : > { %17101 = vst [vmem:[#allocation140_spill] sm:$0xff] %v16075_v13 }
0x2b35   : > { %8729 = vmatpush1.bf16.msra.mxu1 %v16060_v37  ;;  %v16078_v37 = vld [vmem:[#allocation2 + $0x6e0] ss:$8 sps:$4 sm:$0xff]  }
0x2b36   : > { %8730 = vmatprep.subr.bf16.mxu1 %v16063_v48  ;;  %17102 = vst [vmem:[#allocation141_spill] sm:$0xff] %v16078_v37  ;;  %v16081_v48 = vld [vmem:[#allocation2 + $0x6f4] ss:$8 sps:$4 sm:$0xff]  }
0x2b37   : > { %17103 = vst [vmem:[#allocation142_spill] sm:$0xff] %v16081_v48 }
0x2b39   : > { %8731 = vmatpush1.bf16.msra.mxu1 %v16066_v0  ;;  %v16084_v0 = vld [vmem:[#allocation2 + $0x6f0] ss:$8 sps:$4 sm:$0xff]  }
0x2b3a   : > { %8732 = vmatprep.subr.bf16.mxu1 %v16069_v19  ;;  %17104 = vst [vmem:[#allocation143_spill] sm:$0xff] %v16084_v0 }
0x2b3d   : > { %8733 = vmatpush1.bf16.msra.mxu1 %v16072_v3 }
0x2b3e   : > { %8734 = vmatprep.subr.bf16.mxu1 %v16075_v13 }
0x2b41   : > { %8735 = vmatpush1.bf16.msra.mxu1 %v16078_v37 }
0x2b42   : > { %8736 = vmatprep.subr.bf16.mxu1 %v16081_v48 }
0x2b45   : > { %8737 = vmatpush1.bf16.msra.mxu1 %v16084_v0 }
0x2b48   : > { %8739 = vmatmul.mubr.bf16.vlgmr.msra.gmra.mrb[212].mxu1 %v15660_v52 }
0x2b49   : > { %8881 = vmatprep.mubr.bf16.mxu1 %v16987_v6 }
0x2bdb   : > { %v8697_v3 = vpop.f32.mrb[208].mxu1 }
0x2bdc   : > { %v16090_v19 = vadd.f32 %v8697_v3, %v15984_v56  ;;  %v8699_v13 = vpop.f32.mrb[209].mxu1  ;;  %v13285_v56 = vld [vmem:[#allocation2 + $0x700] ss:$8 sps:$4 sm:$0xff]   ;;  %v13288_v3 = vld [vmem:[#allocation2 + $0x724] ss:$8 sps:$4 sm:$0xff]  }
0x2bdd   : > { %v16093_v41 = vadd.f32 %v8699_v13, %v15987_v59  ;;  %v8701_v37 = vpop.f32.mrb[210].mxu1  ;;  %v13286_v59 = vld [vmem:[#allocation2 + $0x714] ss:$8 sps:$4 sm:$0xff]   ;;  %v13295_v13 = vld [vmem:[#allocation2 + $0x750] ss:$8 sps:$4 sm:$0xff]  }
0x2bde   : > { %v8702_v1 = vpop.f32.mrb[211].mxu1  ;;  %v13296_v37 = vld [vmem:[#allocation2 + $0x764] ss:$8 sps:$4 sm:$0xff]  }
0x2bdf   : > { %v13287_v1 = vld [vmem:[#allocation2 + $0x710] ss:$8 sps:$4 sm:$0xff]  }
0x2c1b   : > { %v8740_v50 = vpop.f32.mrb[212].mxu1 }
0x2c1c   : > { %v8742_v48 = vpop.f32.mrb[213].mxu1 }
0x2c1d   : > { %v8744_v28 = vpop.f32.mrb[214].mxu1 }
0x2c1e   : > { %v8749_v12 = vpack.c.bf16 %v8744_v28, %v8740_v50  ;;  %v8746_v58 = vpop.f32.mrb[215].mxu1  ;;  %v13289_v28 = vld [vmem:[#allocation2 + $0x720] ss:$8 sps:$4 sm:$0xff]   ;;  %v13292_v50 = vld [vmem:[#allocation2 + $0x744] ss:$8 sps:$4 sm:$0xff]  }
0x2c1f   : > { %v8750_v0 = vpack.c.bf16 %v8746_v58, %v8742_v48  ;;  %v13290_v58 = vld [vmem:[#allocation2 + $0x734] ss:$8 sps:$4 sm:$0xff]   ;;  %v13297_v48 = vld [vmem:[#allocation2 + $0x760] ss:$8 sps:$4 sm:$0xff]  }
0x2c21   : > { %8756 = vmatprep.subr.bf16.mxu0 %v8750_v0  ;;  %v13298_v0 = vld [vmem:[#allocation2 + $0x774] ss:$8 sps:$4 sm:$0xff]  }
0x2c22   : > { %8757 = vmatpush1.bf16.msra.mxu0 %v8749_v12  ;;  %v13291_v12 = vld [vmem:[#allocation2 + $0x730] ss:$8 sps:$4 sm:$0xff]  }
0x2c23   : > { %8799 = vmatprep.subr.bf16.mxu0 %v13284_v26  ;;  %v13293_v26 = vld [vmem:[#allocation2 + $0x740] ss:$8 sps:$4 sm:$0xff]  }
0x2c25   : > { %11365 = vmatmul.mubr.msk.bf16.vlgmr.msra.gmra.mrb[192].mxu0 %vm5143_vm7, %v8752_v57  ;;  %v13294_v57 = vld [vmem:[#allocation2 + $0x754] ss:$8 sps:$4 sm:$0xff]  }
0x2c26   : > { %8800 = vmatpush1.bf16.msra.mxu0 %v13285_v56  ;;  %8831 = vmatprep.mubr.bf16.mxu0 %v15662_v21  ;;  %v13299_v56 = vld [vmem:[#allocation2 + $0x770] ss:$8 sps:$4 sm:$0xff]  }
0x2c27   : > { %8801 = vmatprep.subr.bf16.mxu0 %v13286_v59  ;;  %v13300_v59 = vld [vmem:[#allocation2 + $0x784] ss:$8 sps:$4 sm:$0xff]  }
0x2c2a   : > { %8802 = vmatpush1.bf16.msra.mxu0 %v13287_v1  ;;  %v13301_v1 = vld [vmem:[#allocation2 + $0x780] ss:$8 sps:$4 sm:$0xff]  }
0x2c2b   : > { %8803 = vmatprep.subr.bf16.mxu0 %v13288_v3  ;;  %v13302_v3 = vld [vmem:[#allocation2 + $0x794] ss:$8 sps:$4 sm:$0xff]  }
0x2c2e   : > { %8804 = vmatpush1.bf16.msra.mxu0 %v13289_v28  ;;  %v13303_v28 = vld [vmem:[#allocation2 + $0x790] ss:$8 sps:$4 sm:$0xff]  }
0x2c2f   : > { %8805 = vmatprep.subr.bf16.mxu0 %v13290_v58  ;;  %v13304_v58 = vld [vmem:[#allocation2 + $0x7a4] ss:$8 sps:$4 sm:$0xff]  }
0x2c32   : > { %8806 = vmatpush1.bf16.msra.mxu0 %v13291_v12  ;;  %v13305_v12 = vld [vmem:[#allocation2 + $0x7a0] ss:$8 sps:$4 sm:$0xff]  }
0x2c33   : > { %8807 = vmatprep.subr.bf16.mxu0 %v13292_v50  ;;  %v13306_v50 = vld [vmem:[#allocation2 + $0x7b4] ss:$8 sps:$4 sm:$0xff]  }
0x2c36   : > { %8808 = vmatpush1.bf16.msra.mxu0 %v13293_v26  ;;  %v13307_v26 = vld [vmem:[#allocation2 + $0x7b0] ss:$8 sps:$4 sm:$0xff]  }
0x2c37   : > { %8809 = vmatprep.subr.bf16.mxu0 %v13294_v57  ;;  %v13308_v57 = vld [vmem:[#allocation2 + $0x7c4] ss:$8 sps:$4 sm:$0xff]  }
0x2c3a   : > { %8810 = vmatpush1.bf16.msra.mxu0 %v13295_v13  ;;  %v13309_v13 = vld [vmem:[#allocation2 + $0x7c0] ss:$8 sps:$4 sm:$0xff]  }
0x2c3b   : > { %8811 = vmatprep.subr.bf16.mxu0 %v13296_v37  ;;  %v13310_v37 = vld [vmem:[#allocation2 + $0x7d4] ss:$8 sps:$4 sm:$0xff]  }
0x2c3e   : > { %8812 = vmatpush1.bf16.msra.mxu0 %v13297_v48  ;;  %v13311_v48 = vld [vmem:[#allocation2 + $0x7d0] ss:$8 sps:$4 sm:$0xff]  }
0x2c3f   : > { %8813 = vmatprep.subr.bf16.mxu0 %v13298_v0  ;;  %v13312_v0 = vld [vmem:[#allocation2 + $0x7e4] ss:$8 sps:$4 sm:$0xff]  }
0x2c42   : > { %8814 = vmatpush1.bf16.msra.mxu0 %v13299_v56  ;;  %v13313_v56 = vld [vmem:[#allocation2 + $0x7e0] ss:$8 sps:$4 sm:$0xff]  }
0x2c43   : > { %8815 = vmatprep.subr.bf16.mxu0 %v13300_v59  ;;  %v13314_v59 = vld [vmem:[#allocation2 + $0x7f4] ss:$8 sps:$4 sm:$0xff]  }
0x2c46   : > { %8816 = vmatpush1.bf16.msra.mxu0 %v13301_v1  ;;  %v13315_v1 = vld [vmem:[#allocation2 + $0x7f0] ss:$8 sps:$4 sm:$0xff]  }
0x2c47   : > { %8817 = vmatprep.subr.bf16.mxu0 %v13302_v3 }
0x2c4a   : > { %8818 = vmatpush1.bf16.msra.mxu0 %v13303_v28 }
0x2c4b   : > { %8819 = vmatprep.subr.bf16.mxu0 %v13304_v58 }
0x2c4e   : > { %8820 = vmatpush1.bf16.msra.mxu0 %v13305_v12 }
0x2c4f   : > { %8821 = vmatprep.subr.bf16.mxu0 %v13306_v50 }
0x2c52   : > { %8822 = vmatpush1.bf16.msra.mxu0 %v13307_v26 }
0x2c53   : > { %8823 = vmatprep.subr.bf16.mxu0 %v13308_v57 }
0x2c56   : > { %8824 = vmatpush1.bf16.msra.mxu0 %v13309_v13 }
0x2c57   : > { %8825 = vmatprep.subr.bf16.mxu0 %v13310_v37 }
0x2c5a   : > { %8826 = vmatpush1.bf16.msra.mxu0 %v13311_v48 }
0x2c5b   : > { %8827 = vmatprep.subr.bf16.mxu0 %v13312_v0 }
0x2c5e   : > { %8828 = vmatpush1.bf16.msra.mxu0 %v13313_v56 }
0x2c5f   : > { %8829 = vmatprep.subr.bf16.mxu0 %v13314_v59  ;;  %v8845_v59 = vld [vmem:[#allocation13 + $0x1c] sm:$0xf] }
0x2c62   : > { %8830 = vmatpush1.bf16.msra.mxu0 %v13315_v1  ;;  %v13316_v1 = vld [vmem:[#allocation2 + $0x804] ss:$8 sps:$4 sm:$0xff]  }
0x2c65   : > { %8832 = vmatmul.mubr.bf16.vlgmr.msra.gmra.mrb[196].mxu0 %v15660_v52 }
0x2c66   : > { %8974 = vmatprep.mubr.bf16.mxu0 %v16987_v6 }
0x2cf8   : > { %v8790_v3 = vpop.f32.mrb[192].mxu0 }
0x2cf9   : > { %v16100_v28 = vadd.f32 %v8790_v3, %v16090_v19  ;;  %v8792_v58 = vpop.f32.mrb[193].mxu0  ;;  %v13317_v19 = vld [vmem:[#allocation2 + $0x800] ss:$8 sps:$4 sm:$0xff]   ;;  %v13319_v3 = vld [vmem:[#allocation2 + $0x810] ss:$8 sps:$4 sm:$0xff]  }
0x2cfa   : > { %v16103_v12 = vadd.f32 %v8792_v58, %v16093_v41  ;;  %v8794_v50 = vpop.f32.mrb[194].mxu0  ;;  %v13318_v41 = vld [vmem:[#allocation2 + $0x814] ss:$8 sps:$4 sm:$0xff]   ;;  %v13320_v58 = vld [vmem:[#allocation2 + $0x824] ss:$8 sps:$4 sm:$0xff]  }
0x2cfb   : > { %v8795_v26 = vpop.f32.mrb[195].mxu0  ;;  %v13321_v50 = vld [vmem:[#allocation2 + $0x820] ss:$8 sps:$4 sm:$0xff]  }
0x2cfc   : > { %v13322_v26 = vld [vmem:[#allocation2 + $0x834] ss:$8 sps:$4 sm:$0xff]  }
0x2d38   : > { %v8833_v57 = vpop.f32.mrb[196].mxu0 }
0x2d39   : > { %v8835_v13 = vpop.f32.mrb[197].mxu0 }
0x2d3a   : > { %v8837_v37 = vpop.f32.mrb[198].mxu0 }
0x2d3b   : > { %v8842_v48 = vpack.c.bf16 %v8837_v37, %v8833_v57  ;;  %v8839_v0 = vpop.f32.mrb[199].mxu0  ;;  %v13323_v57 = vld [vmem:[#allocation2 + $0x830] ss:$8 sps:$4 sm:$0xff]   ;;  %v13325_v37 = vld [vmem:[#allocation2 + $0x840] ss:$8 sps:$4 sm:$0xff]  }
0x2d3c   : > { %v8843_v56 = vpack.c.bf16 %v8839_v0, %v8835_v13  ;;  %v13324_v13 = vld [vmem:[#allocation2 + $0x844] ss:$8 sps:$4 sm:$0xff]   ;;  %v13327_v0 = vld [vmem:[#allocation2 + $0x850] ss:$8 sps:$4 sm:$0xff]  }
0x2d3e   : > { %8849 = vmatprep.subr.bf16.mxu1 %v8843_v56  ;;  %v13329_v56 = vld [vmem:[#allocation2 + $0x860] ss:$8 sps:$4 sm:$0xff]  }
0x2d3f   : > { %8850 = vmatpush1.bf16.msra.mxu1 %v8842_v48  ;;  %v13326_v48 = vld [vmem:[#allocation2 + $0x854] ss:$8 sps:$4 sm:$0xff]  }
0x2d40   : > { %8892 = vmatprep.subr.bf16.mxu1 %v13316_v1  ;;  %v13331_v1 = vld [vmem:[#allocation2 + $0x870] ss:$8 sps:$4 sm:$0xff]  }
0x2d42   : > { %11366 = vmatmul.mubr.msk.bf16.vlgmr.msra.gmra.mrb[216].mxu1 %vm5143_vm7, %v8845_v59  ;;  %v13330_v59 = vld [vmem:[#allocation2 + $0x874] ss:$8 sps:$4 sm:$0xff]  }
0x2d43   : > { %8893 = vmatpush1.bf16.msra.mxu1 %v13317_v19  ;;  %8924 = vmatprep.mubr.bf16.mxu1 %v15662_v21  ;;  %v13328_v21 = vld [vmem:[#allocation2 + $0x864] ss:$8 sps:$4 sm:$0xff]  }
0x2d44   : > { %8894 = vmatprep.subr.bf16.mxu1 %v13318_v41  ;;  %v13332_v19 = vld [vmem:[#allocation2 + $0x884] ss:$8 sps:$4 sm:$0xff]   ;;  %v13333_v41 = vld [vmem:[#allocation2 + $0x880] ss:$8 sps:$4 sm:$0xff]  }
0x2d47   : > { %8895 = vmatpush1.bf16.msra.mxu1 %v13319_v3  ;;  %v13334_v3 = vld [vmem:[#allocation2 + $0x894] ss:$8 sps:$4 sm:$0xff]  }
0x2d48   : > { %8896 = vmatprep.subr.bf16.mxu1 %v13320_v58  ;;  %v13335_v58 = vld [vmem:[#allocation2 + $0x890] ss:$8 sps:$4 sm:$0xff]  }
0x2d4b   : > { %8897 = vmatpush1.bf16.msra.mxu1 %v13321_v50  ;;  %v13336_v50 = vld [vmem:[#allocation2 + $0x8a4] ss:$8 sps:$4 sm:$0xff]  }
0x2d4c   : > { %8898 = vmatprep.subr.bf16.mxu1 %v13322_v26  ;;  %v13337_v26 = vld [vmem:[#allocation2 + $0x8a0] ss:$8 sps:$4 sm:$0xff]  }
0x2d4f   : > { %8899 = vmatpush1.bf16.msra.mxu1 %v13323_v57  ;;  %v13338_v57 = vld [vmem:[#allocation2 + $0x8b4] ss:$8 sps:$4 sm:$0xff]  }
0x2d50   : > { %8900 = vmatprep.subr.bf16.mxu1 %v13324_v13  ;;  %v13339_v13 = vld [vmem:[#allocation2 + $0x8b0] ss:$8 sps:$4 sm:$0xff]  }
0x2d53   : > { %8901 = vmatpush1.bf16.msra.mxu1 %v13325_v37  ;;  %v13340_v37 = vld [vmem:[#allocation2 + $0x8c4] ss:$8 sps:$4 sm:$0xff]  }
0x2d54   : > { %8902 = vmatprep.subr.bf16.mxu1 %v13326_v48  ;;  %v13341_v48 = vld [vmem:[#allocation2 + $0x8c0] ss:$8 sps:$4 sm:$0xff]  }
0x2d57   : > { %8903 = vmatpush1.bf16.msra.mxu1 %v13327_v0  ;;  %v13342_v0 = vld [vmem:[#allocation2 + $0x8d4] ss:$8 sps:$4 sm:$0xff]  }
0x2d58   : > { %8904 = vmatprep.subr.bf16.mxu1 %v13328_v21  ;;  %v13343_v21 = vld [vmem:[#allocation2 + $0x8d0] ss:$8 sps:$4 sm:$0xff]  }
0x2d5b   : > { %8905 = vmatpush1.bf16.msra.mxu1 %v13329_v56  ;;  %v13344_v56 = vld [vmem:[#allocation2 + $0x8e4] ss:$8 sps:$4 sm:$0xff]  }
0x2d5c   : > { %8906 = vmatprep.subr.bf16.mxu1 %v13330_v59  ;;  %v13345_v59 = vld [vmem:[#allocation2 + $0x8e0] ss:$8 sps:$4 sm:$0xff]  }
0x2d5f   : > { %8907 = vmatpush1.bf16.msra.mxu1 %v13331_v1  ;;  %v13346_v1 = vld [vmem:[#allocation2 + $0x8f4] ss:$8 sps:$4 sm:$0xff]  }
0x2d60   : > { %8908 = vmatprep.subr.bf16.mxu1 %v13332_v19  ;;  %v13347_v19 = vld [vmem:[#allocation2 + $0x8f0] ss:$8 sps:$4 sm:$0xff]  }
0x2d63   : > { %8909 = vmatpush1.bf16.msra.mxu1 %v13333_v41 }
0x2d64   : > { %8910 = vmatprep.subr.bf16.mxu1 %v13334_v3 }
0x2d67   : > { %8911 = vmatpush1.bf16.msra.mxu1 %v13335_v58 }
0x2d68   : > { %8912 = vmatprep.subr.bf16.mxu1 %v13336_v50 }
0x2d6b   : > { %8913 = vmatpush1.bf16.msra.mxu1 %v13337_v26 }
0x2d6c   : > { %8914 = vmatprep.subr.bf16.mxu1 %v13338_v57 }
0x2d6f   : > { %8915 = vmatpush1.bf16.msra.mxu1 %v13339_v13 }
0x2d70   : > { %8916 = vmatprep.subr.bf16.mxu1 %v13340_v37 }
0x2d73   : > { %8917 = vmatpush1.bf16.msra.mxu1 %v13341_v48 }
0x2d74   : > { %8918 = vmatprep.subr.bf16.mxu1 %v13342_v0 }
0x2d77   : > { %8919 = vmatpush1.bf16.msra.mxu1 %v13343_v21 }
0x2d78   : > { %8920 = vmatprep.subr.bf16.mxu1 %v13344_v56 }
0x2d7b   : > { %8921 = vmatpush1.bf16.msra.mxu1 %v13345_v59  ;;  %v16115_v59 = vld [vmem:[#allocation2 + $0x4] ss:$8 sps:$4 sm:$0xff]  }
0x2d7c   : > { %8922 = vmatprep.subr.bf16.mxu1 %v13346_v1  ;;  %v16126_v1 = vld [vmem:[#allocation2 + $0x10] ss:$8 sps:$4 sm:$0xff]  }
0x2d7d   : > { %17105 = vst [vmem:[#allocation144_spill] sm:$0xff] %v16126_v1 }
0x2d7f   : > { %8923 = vmatpush1.bf16.msra.mxu1 %v13347_v19  ;;  %v16129_v19 = vld [vmem:[#allocation2 + $0x24] ss:$8 sps:$4 sm:$0xff]  }
0x2d80   : > { %17106 = vst [vmem:[#allocation145_spill] sm:$0xff] %v16129_v19 }
0x2d82   : > { %8925 = vmatmul.mubr.bf16.vlgmr.msra.gmra.mrb[220].mxu1 %v15660_v52  ;;  %v8938_v52 = vld [vmem:[#allocation13 + $0x20] sm:$0xf] }
0x2d83   : > { %9070 = vmatprep.mubr.bf16.mxu1 %v16987_v6 }
0x2e15   : > { %v8883_v41 = vpop.f32.mrb[216].mxu1 }
0x2e16   : > { %v16110_v3 = vadd.f32 %v8883_v41, %v16100_v28  ;;  %v8885_v58 = vpop.f32.mrb[217].mxu1  ;;  %v16119_v28 = vld [vmem:[#allocation2] ss:$8 sps:$4 sm:$0xff]  }
0x2e17   : > { %v16113_v50 = vadd.f32 %v8885_v58, %v16103_v12  ;;  %v8887_v26 = vpop.f32.mrb[218].mxu1  ;;  %v16123_v12 = vld [vmem:[#allocation2 + $0x14] ss:$8 sps:$4 sm:$0xff]   ;;  %v16132_v41 = vld [vmem:[#allocation2 + $0x20] ss:$8 sps:$4 sm:$0xff]  }
0x2e18   : > { %v8888_v57 = vpop.f32.mrb[219].mxu1  ;;  %17107 = vst [vmem:[#allocation146_spill] sm:$0xff] %v16132_v41  ;;  %v16135_v58 = vld [vmem:[#allocation2 + $0x34] ss:$8 sps:$4 sm:$0xff]   ;;  %v16138_v26 = vld [vmem:[#allocation2 + $0x30] ss:$8 sps:$4 sm:$0xff]  }
0x2e19   : > { %17108 = vst [vmem:[#allocation147_spill] sm:$0xff] %v16135_v58  ;;  %17109 = vst [vmem:[#allocation148_spill] sm:$0xff] %v16138_v26  ;;  %v16141_v57 = vld [vmem:[#allocation2 + $0x44] ss:$8 sps:$4 sm:$0xff]  }
0x2e1a   : > { %17110 = vst [vmem:[#allocation149_spill] sm:$0xff] %v16141_v57 }
0x2e55   : > { %v8926_v13 = vpop.f32.mrb[220].mxu1 }
0x2e56   : > { %v8928_v37 = vpop.f32.mrb[221].mxu1 }
0x2e57   : > { %v8930_v48 = vpop.f32.mrb[222].mxu1 }
0x2e58   : > { %v8935_v0 = vpack.c.bf16 %v8930_v48, %v8926_v13  ;;  %v8932_v21 = vpop.f32.mrb[223].mxu1  ;;  %v16144_v13 = vld [vmem:[#allocation2 + $0x40] ss:$8 sps:$4 sm:$0xff]   ;;  %v16150_v48 = vld [vmem:[#allocation2 + $0x50] ss:$8 sps:$4 sm:$0xff]  }
0x2e59   : > { %v8936_v56 = vpack.c.bf16 %v8932_v21, %v8928_v37  ;;  %17111 = vst [vmem:[#allocation150_spill] sm:$0xff] %v16144_v13  ;;  %v16147_v37 = vld [vmem:[#allocation2 + $0x54] ss:$8 sps:$4 sm:$0xff]   ;;  %17113 = vst [vmem:[#allocation152_spill] sm:$0xff] %v16150_v48  ;;  %v16156_v21 = vld [vmem:[#allocation2 + $0x60] ss:$8 sps:$4 sm:$0xff]  }
0x2e5a   : > { %17112 = vst [vmem:[#allocation151_spill] sm:$0xff] %v16147_v37  ;;  %17115 = vst [vmem:[#allocation154_spill] sm:$0xff] %v16156_v21 }
0x2e5b   : > { %8942 = vmatprep.subr.bf16.mxu0 %v8936_v56  ;;  %v16159_v56 = vld [vmem:[#allocation2 + $0x74] ss:$8 sps:$4 sm:$0xff]  }
0x2e5c   : > { %8943 = vmatpush1.bf16.msra.mxu0 %v8935_v0  ;;  %v16153_v0 = vld [vmem:[#allocation2 + $0x64] ss:$8 sps:$4 sm:$0xff]   ;;  %17116 = vst [vmem:[#allocation155_spill] sm:$0xff] %v16159_v56 }
0x2e5d   : > { %8985 = vmatprep.subr.bf16.mxu0 %v16115_v59  ;;  %17114 = vst [vmem:[#allocation153_spill] sm:$0xff] %v16153_v0 }
0x2e5f   : > { %11367 = vmatmul.mubr.msk.bf16.vlgmr.msra.gmra.mrb[200].mxu0 %vm5143_vm7, %v8938_v52  ;;  %v16162_v52 = vld [vmem:[#allocation2 + $0x70] ss:$8 sps:$4 sm:$0xff]  }
0x2e60   : > { %8986 = vmatpush1.bf16.msra.mxu0 %v16119_v28  ;;  %9017 = vmatprep.mubr.bf16.mxu0 %v14772_v18  ;;  %17117 = vst [vmem:[#allocation156_spill] sm:$0xff] %v16162_v52 }
0x2e61   : > { %8987 = vmatprep.subr.bf16.mxu0 %v16123_v12 }
0x2e64   : > { %8988 = vmatpush1.bf16.msra.mxu0 %v16126_v1 }
0x2e65   : > { %8989 = vmatprep.subr.bf16.mxu0 %v16129_v19 }
0x2e68   : > { %8990 = vmatpush1.bf16.msra.mxu0 %v16132_v41 }
0x2e69   : > { %8991 = vmatprep.subr.bf16.mxu0 %v16135_v58 }
0x2e6c   : > { %8992 = vmatpush1.bf16.msra.mxu0 %v16138_v26 }
0x2e6d   : > { %8993 = vmatprep.subr.bf16.mxu0 %v16141_v57 }
0x2e70   : > { %8994 = vmatpush1.bf16.msra.mxu0 %v16144_v13 }
0x2e71   : > { %8995 = vmatprep.subr.bf16.mxu0 %v16147_v37  ;;  %v16165_v37 = vld [vmem:[#allocation2 + $0x84] ss:$8 sps:$4 sm:$0xff]  }
0x2e72   : > { %17118 = vst [vmem:[#allocation157_spill] sm:$0xff] %v16165_v37 }
0x2e74   : > { %8996 = vmatpush1.bf16.msra.mxu0 %v16150_v48  ;;  %v16168_v48 = vld [vmem:[#allocation2 + $0x80] ss:$8 sps:$4 sm:$0xff]  }
0x2e75   : > { %8997 = vmatprep.subr.bf16.mxu0 %v16153_v0  ;;  %17119 = vst [vmem:[#allocation158_spill] sm:$0xff] %v16168_v48  ;;  %v16171_v0 = vld [vmem:[#allocation2 + $0x94] ss:$8 sps:$4 sm:$0xff]  }
0x2e76   : > { %17120 = vst [vmem:[#allocation159_spill] sm:$0xff] %v16171_v0 }
0x2e78   : > { %8998 = vmatpush1.bf16.msra.mxu0 %v16156_v21  ;;  %v16174_v21 = vld [vmem:[#allocation2 + $0x90] ss:$8 sps:$4 sm:$0xff]  }
0x2e79   : > { %8999 = vmatprep.subr.bf16.mxu0 %v16159_v56  ;;  %17121 = vst [vmem:[#allocation160_spill] sm:$0xff] %v16174_v21  ;;  %v16177_v56 = vld [vmem:[#allocation2 + $0xa4] ss:$8 sps:$4 sm:$0xff]  }
0x2e7a   : > { %17122 = vst [vmem:[#allocation161_spill] sm:$0xff] %v16177_v56 }
0x2e7c   : > { %9000 = vmatpush1.bf16.msra.mxu0 %v16162_v52  ;;  %v16180_v52 = vld [vmem:[#allocation2 + $0xa0] ss:$8 sps:$4 sm:$0xff]  }
0x2e7d   : > { %9001 = vmatprep.subr.bf16.mxu0 %v16165_v37  ;;  %17123 = vst [vmem:[#allocation162_spill] sm:$0xff] %v16180_v52  ;;  %v16183_v37 = vld [vmem:[#allocation2 + $0xb4] ss:$8 sps:$4 sm:$0xff]  }
0x2e7e   : > { %17124 = vst [vmem:[#allocation163_spill] sm:$0xff] %v16183_v37 }
0x2e80   : > { %9002 = vmatpush1.bf16.msra.mxu0 %v16168_v48  ;;  %v16186_v48 = vld [vmem:[#allocation2 + $0xb0] ss:$8 sps:$4 sm:$0xff]  }
0x2e81   : > { %9003 = vmatprep.subr.bf16.mxu0 %v16171_v0  ;;  %17125 = vst [vmem:[#allocation164_spill] sm:$0xff] %v16186_v48  ;;  %v16189_v0 = vld [vmem:[#allocation2 + $0xc4] ss:$8 sps:$4 sm:$0xff]  }
0x2e82   : > { %17126 = vst [vmem:[#allocation165_spill] sm:$0xff] %v16189_v0 }
0x2e84   : > { %9004 = vmatpush1.bf16.msra.mxu0 %v16174_v21  ;;  %v16192_v21 = vld [vmem:[#allocation2 + $0xc0] ss:$8 sps:$4 sm:$0xff]  }
0x2e85   : > { %9005 = vmatprep.subr.bf16.mxu0 %v16177_v56  ;;  %17127 = vst [vmem:[#allocation166_spill] sm:$0xff] %v16192_v21  ;;  %v16195_v56 = vld [vmem:[#allocation2 + $0xd4] ss:$8 sps:$4 sm:$0xff]  }
0x2e86   : > { %17128 = vst [vmem:[#allocation167_spill] sm:$0xff] %v16195_v56 }
0x2e88   : > { %9006 = vmatpush1.bf16.msra.mxu0 %v16180_v52  ;;  %v16198_v52 = vld [vmem:[#allocation2 + $0xd0] ss:$8 sps:$4 sm:$0xff]  }
0x2e89   : > { %9007 = vmatprep.subr.bf16.mxu0 %v16183_v37  ;;  %17129 = vst [vmem:[#allocation168_spill] sm:$0xff] %v16198_v52  ;;  %v16201_v37 = vld [vmem:[#allocation2 + $0xe4] ss:$8 sps:$4 sm:$0xff]  }
0x2e8a   : > { %17130 = vst [vmem:[#allocation169_spill] sm:$0xff] %v16201_v37 }
0x2e8c   : > { %9008 = vmatpush1.bf16.msra.mxu0 %v16186_v48  ;;  %v16204_v48 = vld [vmem:[#allocation2 + $0xe0] ss:$8 sps:$4 sm:$0xff]  }
0x2e8d   : > { %9009 = vmatprep.subr.bf16.mxu0 %v16189_v0  ;;  %17131 = vst [vmem:[#allocation170_spill] sm:$0xff] %v16204_v48  ;;  %v16207_v0 = vld [vmem:[#allocation2 + $0xf4] ss:$8 sps:$4 sm:$0xff]  }
0x2e8e   : > { %17132 = vst [vmem:[#allocation171_spill] sm:$0xff] %v16207_v0 }
0x2e90   : > { %9010 = vmatpush1.bf16.msra.mxu0 %v16192_v21  ;;  %v16210_v21 = vld [vmem:[#allocation2 + $0xf0] ss:$8 sps:$4 sm:$0xff]  }
0x2e91   : > { %9011 = vmatprep.subr.bf16.mxu0 %v16195_v56  ;;  %17133 = vst [vmem:[#allocation172_spill] sm:$0xff] %v16210_v21 }
0x2e94   : > { %9012 = vmatpush1.bf16.msra.mxu0 %v16198_v52 }
0x2e95   : > { %9013 = vmatprep.subr.bf16.mxu0 %v16201_v37 }
0x2e98   : > { %9014 = vmatpush1.bf16.msra.mxu0 %v16204_v48 }
0x2e99   : > { %9015 = vmatprep.subr.bf16.mxu0 %v16207_v0 }
0x2e9c   : > { %9016 = vmatpush1.bf16.msra.mxu0 %v16210_v21 }
0x2e9f   : > { %9018 = vmatmul.mubr.bf16.vlgmr.msra.gmra.mrb[204].mxu0 %v14776_v2 }
0x2ea0   : > { %9167 = vmatprep.mubr.bf16.mxu0 %v16987_v6 }
0x2f32   : > { %v8976_v52 = vpop.f32.mrb[200].mxu0 }
0x2f33   : > { %v8983_v56 = vadd.f32 %v8976_v52, %v16110_v3  ;;  %v8978_v37 = vpop.f32.mrb[201].mxu0  ;;  %v9028_v3 = vld [vmem:[%s17134_s4] sm:$0xf]  ;;  %v11373_v52 = vld [vmem:[%s17134_s4 + $0x8] sm:$0xf] }
0x2f34   : > { %v8984_v13 = vadd.f32 %v8978_v37, %v16113_v50  ;;  %v8980_v57 = vpop.f32.mrb[202].mxu0 }
0x2f35   : > { %v8981_v48 = vpop.f32.mrb[203].mxu0 }
0x2f72   : > { %v9019_v26 = vpop.f32.mrb[204].mxu0 }
0x2f73   : > { %v9026_v58 = vpack.c.bf16 %v9019_v26, %v9019_v26  ;;  %v9021_v41 = vpop.f32.mrb[205].mxu0 }
0x2f74   : > { %v9027_v0 = vpack.c.bf16 %v9021_v41, %v9021_v41  ;;  %v9023_v19 = vpop.f32.mrb[206].mxu0 }
0x2f75   : > { %v9033_v1 = vsel %vm3894_vm5, %v9026_v58, 0  ;;  %v9024_v21 = vpop.f32.mrb[207].mxu0 }
0x2f76   : > { %11368 = vmatprep.subr.msk.bf16.mxu1 %vm3894_vm5, %v9027_v0 }
0x2f77   : > { %9039 = vmatpush1.bf16.msra.mxu1 %v9033_v1 }
0x2f78   : > { %9081 = vmatprep.subr.bf16.mxu1 %v15560_v62 }
0x2f7a   : > { %11369 = vmatmul.mubr.msk.bf16.vlgmr.msra.gmra.mrb[224].mxu1 %vm3890_vm6, %v9028_v3  ;;  %v17160_v3 = vld [vmem:[#allocation52_spill] sm:$0xff] }
0x2f7b   : > { %9082 = vmatpush1.bf16.msra.mxu1 %v15564_v25  ;;  %9113 = vmatprep.mubr.bf16.mxu1 %v14772_v18 }
0x2f7c   : > { %9083 = vmatprep.subr.bf16.mxu1 %v15567_v4 }
0x2f7f   : > { %9084 = vmatpush1.bf16.msra.mxu1 %v15570_v42 }
0x2f80   : > { %9085 = vmatprep.subr.bf16.mxu1 %v15573_v47 }
0x2f83   : > { %9086 = vmatpush1.bf16.msra.mxu1 %v15576_v51 }
0x2f84   : > { %9087 = vmatprep.subr.bf16.mxu1 %v15579_v14 }
0x2f87   : > { %9088 = vmatpush1.bf16.msra.mxu1 %v15582_v43 }
0x2f88   : > { %9089 = vmatprep.subr.bf16.mxu1 %v15585_v10 }
0x2f8b   : > { %9090 = vmatpush1.bf16.msra.mxu1 %v15588_v22 }
0x2f8c   : > { %9091 = vmatprep.subr.bf16.mxu1 %v15591_v8 }
0x2f8f   : > { %9092 = vmatpush1.bf16.msra.mxu1 %v15594_v49 }
0x2f90   : > { %9093 = vmatprep.subr.bf16.mxu1 %v15597_v23 }
0x2f93   : > { %9094 = vmatpush1.bf16.msra.mxu1 %v15600_v54  ;;  %v11370_v54 = vld [vmem:[%s17134_s4 + $0x4] sm:$0xf] }
0x2f94   : > { %9095 = vmatprep.subr.bf16.mxu1 %v15603_v20  ;;  %v17135_v20 = vld [vmem:[#allocation27_spill] sm:$0xff] }
0x2f97   : > { %9096 = vmatpush1.bf16.msra.mxu1 %v15606_v35  ;;  %v17136_v35 = vld [vmem:[#allocation28_spill] sm:$0xff] }
0x2f98   : > { %9097 = vmatprep.subr.bf16.mxu1 %v15609_v17  ;;  %v17137_v17 = vld [vmem:[#allocation29_spill] sm:$0xff] }
0x2f9b   : > { %9098 = vmatpush1.bf16.msra.mxu1 %v15612_v9  ;;  %v17138_v9 = vld [vmem:[#allocation30_spill] sm:$0xff] }
0x2f9c   : > { %9099 = vmatprep.subr.bf16.mxu1 %v15615_v7  ;;  %v17139_v7 = vld [vmem:[#allocation31_spill] sm:$0xff] }
0x2f9f   : > { %9100 = vmatpush1.bf16.msra.mxu1 %v15618_v27  ;;  %v17140_v27 = vld [vmem:[#allocation32_spill] sm:$0xff] }
0x2fa0   : > { %9101 = vmatprep.subr.bf16.mxu1 %v15621_v53  ;;  %v17141_v53 = vld [vmem:[#allocation33_spill] sm:$0xff] }
0x2fa3   : > { %9102 = vmatpush1.bf16.msra.mxu1 %v15624_v40  ;;  %v17142_v40 = vld [vmem:[#allocation34_spill] sm:$0xff] }
0x2fa4   : > { %9103 = vmatprep.subr.bf16.mxu1 %v15627_v24  ;;  %v17143_v24 = vld [vmem:[#allocation35_spill] sm:$0xff] }
0x2fa7   : > { %9104 = vmatpush1.bf16.msra.mxu1 %v15630_v55  ;;  %v17144_v55 = vld [vmem:[#allocation36_spill] sm:$0xff] }
0x2fa8   : > { %9105 = vmatprep.subr.bf16.mxu1 %v15633_v5  ;;  %v17145_v5 = vld [vmem:[#allocation37_spill] sm:$0xff] }
0x2fab   : > { %9106 = vmatpush1.bf16.msra.mxu1 %v15636_v15  ;;  %v17146_v15 = vld [vmem:[#allocation38_spill] sm:$0xff] }
0x2fac   : > { %9107 = vmatprep.subr.bf16.mxu1 %v15639_v38  ;;  %v17147_v38 = vld [vmem:[#allocation39_spill] sm:$0xff] }
0x2faf   : > { %9108 = vmatpush1.bf16.msra.mxu1 %v15642_v34  ;;  %v17148_v34 = vld [vmem:[#allocation40_spill] sm:$0xff] }
0x2fb0   : > { %9109 = vmatprep.subr.bf16.mxu1 %v15645_v29  ;;  %v17149_v29 = vld [vmem:[#allocation41_spill] sm:$0xff] }
0x2fb3   : > { %9110 = vmatpush1.bf16.msra.mxu1 %v15648_v60  ;;  %v17150_v60 = vld [vmem:[#allocation42_spill] sm:$0xff] }
0x2fb4   : > { %9111 = vmatprep.subr.bf16.mxu1 %v15651_v63  ;;  %v17151_v63 = vld [vmem:[#allocation43_spill] sm:$0xff] }
0x2fb7   : > { %9112 = vmatpush1.bf16.msra.mxu1 %v15654_v36  ;;  %v17152_v36 = vld [vmem:[#allocation44_spill] sm:$0xff] }
0x2fba   : > { %9114 = vmatmul.mubr.bf16.vlgmr.msra.gmra.mrb[228].mxu1 %v14776_v2 }
0x2fbb   : > { %9264 = vmatprep.mubr.bf16.mxu1 %v16987_v6 }
0x304d   : > { %v9072_v62 = vpop.f32.mrb[224].mxu1 }
0x304e   : > { %v9079_v25 = vadd.f32 %v9072_v62, %v8983_v56  ;;  %v9074_v4 = vpop.f32.mrb[225].mxu1  ;;  %v17161_v62 = vld [vmem:[#allocation53_spill] sm:$0xff] }
0x304f   : > { %v9080_v42 = vadd.f32 %v9074_v4, %v8984_v13  ;;  %v9076_v47 = vpop.f32.mrb[226].mxu1  ;;  %v17163_v4 = vld [vmem:[#allocation55_spill] sm:$0xff] }
0x3050   : > { %v9077_v51 = vpop.f32.mrb[227].mxu1  ;;  %v17165_v47 = vld [vmem:[#allocation57_spill] sm:$0xff] }
0x3051   : > { %v17166_v51 = vld [vmem:[#allocation58_spill] sm:$0xff] }
0x308d   : > { %v9115_v14 = vpop.f32.mrb[228].mxu1 }
0x308e   : > { %v9122_v43 = vpack.c.bf16 %v9115_v14, %v9115_v14  ;;  %v9117_v10 = vpop.f32.mrb[229].mxu1  ;;  %v17167_v14 = vld [vmem:[#allocation59_spill] sm:$0xff] }
0x308f   : > { %v9123_v22 = vpack.c.bf16 %v9117_v10, %v9117_v10  ;;  %v9119_v8 = vpop.f32.mrb[230].mxu1  ;;  %v17169_v10 = vld [vmem:[#allocation61_spill] sm:$0xff] }
0x3090   : > { %v9130_v49 = vsel %vm3894_vm5, %v9122_v43, 0  ;;  %v9120_v23 = vpop.f32.mrb[231].mxu1  ;;  %v17168_v43 = vld [vmem:[#allocation60_spill] sm:$0xff]  ;;  %v17171_v8 = vld [vmem:[#allocation63_spill] sm:$0xff] }
0x3091   : > { %11371 = vmatprep.subr.msk.bf16.mxu0 %vm3894_vm5, %v9123_v22  ;;  %v17170_v22 = vld [vmem:[#allocation62_spill] sm:$0xff]  ;;  %v17173_v23 = vld [vmem:[#allocation65_spill] sm:$0xff] }
0x3092   : > { %9136 = vmatpush1.bf16.msra.mxu0 %v9130_v49  ;;  %v17172_v49 = vld [vmem:[#allocation64_spill] sm:$0xff] }
0x3093   : > { %9178 = vmatprep.subr.bf16.mxu0 %v15657_v44  ;;  %v17153_v44 = vld [vmem:[#allocation45_spill] sm:$0xff] }
0x3095   : > { %11372 = vmatmul.mubr.msk.bf16.vlgmr.msra.gmra.mrb[208].mxu0 %vm3890_vm6, %v11370_v54  ;;  %v17174_v54 = vld [vmem:[#allocation66_spill] sm:$0xff] }
0x3096   : > { %9179 = vmatpush1.bf16.msra.mxu0 %v15668_v11  ;;  %9210 = vmatprep.mubr.bf16.mxu0 %v14772_v18  ;;  %v17154_v11 = vld [vmem:[#allocation46_spill] sm:$0xff] }
0x3097   : > { %9180 = vmatprep.subr.bf16.mxu0 %v15672_v61  ;;  %v17155_v61 = vld [vmem:[#allocation47_spill] sm:$0xff] }
0x309a   : > { %9181 = vmatpush1.bf16.msra.mxu0 %v15676_v33  ;;  %v17156_v33 = vld [vmem:[#allocation48_spill] sm:$0xff] }
0x309b   : > { %9182 = vmatprep.subr.bf16.mxu0 %v15679_v16  ;;  %v17157_v16 = vld [vmem:[#allocation49_spill] sm:$0xff] }
0x309e   : > { %9183 = vmatpush1.bf16.msra.mxu0 %v15682_v39  ;;  %v17158_v39 = vld [vmem:[#allocation50_spill] sm:$0xff] }
0x309f   : > { %9184 = vmatprep.subr.bf16.mxu0 %v15685_v45  ;;  %v17159_v45 = vld [vmem:[#allocation51_spill] sm:$0xff] }
0x30a2   : > { %9185 = vmatpush1.bf16.msra.mxu0 %v17135_v20  ;;  %v17175_v20 = vld [vmem:[#allocation67_spill] sm:$0xff] }
0x30a3   : > { %9186 = vmatprep.subr.bf16.mxu0 %v17136_v35  ;;  %v17176_v35 = vld [vmem:[#allocation68_spill] sm:$0xff] }
0x30a6   : > { %9187 = vmatpush1.bf16.msra.mxu0 %v17137_v17  ;;  %v17177_v17 = vld [vmem:[#allocation69_spill] sm:$0xff] }
0x30a7   : > { %9188 = vmatprep.subr.bf16.mxu0 %v17138_v9  ;;  %v17178_v9 = vld [vmem:[#allocation70_spill] sm:$0xff] }
0x30aa   : > { %9189 = vmatpush1.bf16.msra.mxu0 %v17139_v7  ;;  %v17179_v7 = vld [vmem:[#allocation71_spill] sm:$0xff] }
0x30ab   : > { %9190 = vmatprep.subr.bf16.mxu0 %v17140_v27  ;;  %v17180_v27 = vld [vmem:[#allocation72_spill] sm:$0xff] }
0x30ae   : > { %9191 = vmatpush1.bf16.msra.mxu0 %v17141_v53  ;;  %v17181_v53 = vld [vmem:[#allocation73_spill] sm:$0xff] }
0x30af   : > { %9192 = vmatprep.subr.bf16.mxu0 %v17142_v40  ;;  %v17182_v40 = vld [vmem:[#allocation74_spill] sm:$0xff] }
0x30b2   : > { %9193 = vmatpush1.bf16.msra.mxu0 %v17143_v24  ;;  %v17183_v24 = vld [vmem:[#allocation75_spill] sm:$0xff] }
0x30b3   : > { %9194 = vmatprep.subr.bf16.mxu0 %v17144_v55  ;;  %v17184_v55 = vld [vmem:[#allocation76_spill] sm:$0xff] }
0x30b6   : > { %9195 = vmatpush1.bf16.msra.mxu0 %v17145_v5  ;;  %v17185_v5 = vld [vmem:[#allocation77_spill] sm:$0xff] }
0x30b7   : > { %9196 = vmatprep.subr.bf16.mxu0 %v17146_v15  ;;  %v17186_v15 = vld [vmem:[#allocation78_spill] sm:$0xff] }
0x30ba   : > { %9197 = vmatpush1.bf16.msra.mxu0 %v17147_v38  ;;  %v17187_v38 = vld [vmem:[#allocation79_spill] sm:$0xff] }
0x30bb   : > { %9198 = vmatprep.subr.bf16.mxu0 %v17148_v34  ;;  %v17188_v34 = vld [vmem:[#allocation80_spill] sm:$0xff] }
0x30be   : > { %9199 = vmatpush1.bf16.msra.mxu0 %v17149_v29  ;;  %v17189_v29 = vld [vmem:[#allocation81_spill] sm:$0xff] }
0x30bf   : > { %9200 = vmatprep.subr.bf16.mxu0 %v17150_v60  ;;  %v17190_v60 = vld [vmem:[#allocation82_spill] sm:$0xff] }
0x30c2   : > { %9201 = vmatpush1.bf16.msra.mxu0 %v17151_v63  ;;  %v17191_v63 = vld [vmem:[#allocation83_spill] sm:$0xff] }
0x30c3   : > { %9202 = vmatprep.subr.bf16.mxu0 %v17152_v36 }
0x30c6   : > { %9203 = vmatpush1.bf16.msra.mxu0 %v17153_v44 }
0x30c7   : > { %9204 = vmatprep.subr.bf16.mxu0 %v17154_v11 }
0x30ca   : > { %9205 = vmatpush1.bf16.msra.mxu0 %v17155_v61 }
0x30cb   : > { %9206 = vmatprep.subr.bf16.mxu0 %v17156_v33 }
0x30ce   : > { %9207 = vmatpush1.bf16.msra.mxu0 %v17157_v16 }
0x30cf   : > { %9208 = vmatprep.subr.bf16.mxu0 %v17158_v39 }
0x30d2   : > { %9209 = vmatpush1.bf16.msra.mxu0 %v17159_v45 }
0x30d5   : > { %9211 = vmatmul.mubr.bf16.vlgmr.msra.gmra.mrb[212].mxu0 %v14776_v2 }
0x30d6   : > { %9361 = vmatprep.mubr.bf16.mxu0 %v16987_v6 }
0x3168   : > { %v9169_v50 = vpop.f32.mrb[208].mxu0 }
0x3169   : > { %v9176_v1 = vadd.f32 %v9169_v50, %v9079_v25  ;;  %v9171_v19 = vpop.f32.mrb[209].mxu0  ;;  %v17162_v25 = vld [vmem:[#allocation54_spill] sm:$0xff] }
0x316a   : > { %v9177_v41 = vadd.f32 %v9171_v19, %v9080_v42  ;;  %v9173_v58 = vpop.f32.mrb[210].mxu0  ;;  %v17164_v42 = vld [vmem:[#allocation56_spill] sm:$0xff] }
0x316b   : > { %v9174_v26 = vpop.f32.mrb[211].mxu0 }
0x31a8   : > { %v9212_v57 = vpop.f32.mrb[212].mxu0 }
0x31a9   : > { %v9219_v13 = vpack.c.bf16 %v9212_v57, %v9212_v57  ;;  %v9214_v37 = vpop.f32.mrb[213].mxu0 }
0x31aa   : > { %v9220_v48 = vpack.c.bf16 %v9214_v37, %v9214_v37  ;;  %v9216_v0 = vpop.f32.mrb[214].mxu0  ;;  %v17194_v37 = vld [vmem:[#allocation86_spill] sm:$0xff] }
0x31ab   : > { %v9227_v21 = vsel %vm3894_vm5, %v9219_v13, 0  ;;  %v9217_v56 = vpop.f32.mrb[215].mxu0  ;;  %v17193_v13 = vld [vmem:[#allocation85_spill] sm:$0xff]  ;;  %v17196_v0 = vld [vmem:[#allocation88_spill] sm:$0xff] }
0x31ac   : > { %11374 = vmatprep.subr.msk.bf16.mxu1 %vm3894_vm5, %v9220_v48  ;;  %v17195_v48 = vld [vmem:[#allocation87_spill] sm:$0xff]  ;;  %v17200_v56 = vld [vmem:[#allocation92_spill] sm:$0xff] }
0x31ad   : > { %9233 = vmatpush1.bf16.msra.mxu1 %v9227_v21  ;;  %v17198_v21 = vld [vmem:[#allocation90_spill] sm:$0xff] }
0x31ae   : > { %9275 = vmatprep.subr.bf16.mxu1 %v17160_v3  ;;  %v17204_v3 = vld [vmem:[#allocation96_spill] sm:$0xff] }
0x31b0   : > { %11375 = vmatmul.mubr.msk.bf16.vlgmr.msra.gmra.mrb[232].mxu1 %vm3890_vm6, %v11373_v52  ;;  %v17203_v52 = vld [vmem:[#allocation95_spill] sm:$0xff] }
0x31b1   : > { %9276 = vmatpush1.bf16.msra.mxu1 %v17161_v62  ;;  %9307 = vmatprep.mubr.bf16.mxu1 %v14772_v18  ;;  %v17205_v62 = vld [vmem:[#allocation97_spill] sm:$0xff] }
0x31b2   : > { %9277 = vmatprep.subr.bf16.mxu1 %v17162_v25  ;;  %v17206_v25 = vld [vmem:[#allocation98_spill] sm:$0xff] }
0x31b5   : > { %9278 = vmatpush1.bf16.msra.mxu1 %v17163_v4  ;;  %v17207_v4 = vld [vmem:[#allocation99_spill] sm:$0xff] }
0x31b6   : > { %9279 = vmatprep.subr.bf16.mxu1 %v17164_v42  ;;  %v17208_v42 = vld [vmem:[#allocation100_spill] sm:$0xff] }
0x31b9   : > { %9280 = vmatpush1.bf16.msra.mxu1 %v17165_v47  ;;  %v17209_v47 = vld [vmem:[#allocation101_spill] sm:$0xff] }
0x31ba   : > { %9281 = vmatprep.subr.bf16.mxu1 %v17166_v51  ;;  %v17210_v51 = vld [vmem:[#allocation102_spill] sm:$0xff] }
0x31bd   : > { %9282 = vmatpush1.bf16.msra.mxu1 %v17167_v14  ;;  %v17211_v14 = vld [vmem:[#allocation103_spill] sm:$0xff] }
0x31be   : > { %9283 = vmatprep.subr.bf16.mxu1 %v17168_v43  ;;  %v17212_v43 = vld [vmem:[#allocation104_spill] sm:$0xff] }
0x31c1   : > { %9284 = vmatpush1.bf16.msra.mxu1 %v17169_v10  ;;  %v17213_v10 = vld [vmem:[#allocation105_spill] sm:$0xff] }
0x31c2   : > { %9285 = vmatprep.subr.bf16.mxu1 %v17170_v22  ;;  %v17214_v22 = vld [vmem:[#allocation106_spill] sm:$0xff] }
0x31c5   : > { %9286 = vmatpush1.bf16.msra.mxu1 %v17171_v8  ;;  %v17215_v8 = vld [vmem:[#allocation107_spill] sm:$0xff] }
0x31c6   : > { %9287 = vmatprep.subr.bf16.mxu1 %v17172_v49  ;;  %v17216_v49 = vld [vmem:[#allocation108_spill] sm:$0xff] }
0x31c9   : > { %9288 = vmatpush1.bf16.msra.mxu1 %v17173_v23  ;;  %v17217_v23 = vld [vmem:[#allocation109_spill] sm:$0xff] }
0x31ca   : > { %9289 = vmatprep.subr.bf16.mxu1 %v17174_v54  ;;  %v17218_v54 = vld [vmem:[#allocation110_spill] sm:$0xff] }
0x31cd   : > { %9290 = vmatpush1.bf16.msra.mxu1 %v17175_v20  ;;  %v17219_v20 = vld [vmem:[#allocation111_spill] sm:$0xff] }
0x31ce   : > { %9291 = vmatprep.subr.bf16.mxu1 %v17176_v35  ;;  %v17220_v35 = vld [vmem:[#allocation112_spill] sm:$0xff] }
0x31d1   : > { %9292 = vmatpush1.bf16.msra.mxu1 %v17177_v17  ;;  %v17221_v17 = vld [vmem:[#allocation113_spill] sm:$0xff] }
0x31d2   : > { %9293 = vmatprep.subr.bf16.mxu1 %v17178_v9  ;;  %v17222_v9 = vld [vmem:[#allocation114_spill] sm:$0xff] }
0x31d5   : > { %9294 = vmatpush1.bf16.msra.mxu1 %v17179_v7  ;;  %v17223_v7 = vld [vmem:[#allocation115_spill] sm:$0xff] }
0x31d6   : > { %9295 = vmatprep.subr.bf16.mxu1 %v17180_v27  ;;  %v17224_v27 = vld [vmem:[#allocation116_spill] sm:$0xff] }
0x31d9   : > { %9296 = vmatpush1.bf16.msra.mxu1 %v17181_v53  ;;  %v17225_v53 = vld [vmem:[#allocation117_spill] sm:$0xff] }
0x31da   : > { %9297 = vmatprep.subr.bf16.mxu1 %v17182_v40  ;;  %v17226_v40 = vld [vmem:[#allocation118_spill] sm:$0xff] }
0x31dd   : > { %9298 = vmatpush1.bf16.msra.mxu1 %v17183_v24  ;;  %v17227_v24 = vld [vmem:[#allocation119_spill] sm:$0xff] }
0x31de   : > { %9299 = vmatprep.subr.bf16.mxu1 %v17184_v55  ;;  %v17228_v55 = vld [vmem:[#allocation120_spill] sm:$0xff] }
0x31e1   : > { %9300 = vmatpush1.bf16.msra.mxu1 %v17185_v5  ;;  %v17229_v5 = vld [vmem:[#allocation121_spill] sm:$0xff] }
0x31e2   : > { %9301 = vmatprep.subr.bf16.mxu1 %v17186_v15  ;;  %v17230_v15 = vld [vmem:[#allocation122_spill] sm:$0xff] }
0x31e5   : > { %9302 = vmatpush1.bf16.msra.mxu1 %v17187_v38  ;;  %v17231_v38 = vld [vmem:[#allocation123_spill] sm:$0xff] }
0x31e6   : > { %9303 = vmatprep.subr.bf16.mxu1 %v17188_v34  ;;  %v17233_v34 = vld [vmem:[#allocation125_spill] sm:$0xff] }
0x31e9   : > { %9304 = vmatpush1.bf16.msra.mxu1 %v17189_v29  ;;  %v17234_v29 = vld [vmem:[#allocation126_spill] sm:$0xff] }
0x31ea   : > { %9305 = vmatprep.subr.bf16.mxu1 %v17190_v60  ;;  %v17235_v60 = vld [vmem:[#allocation127_spill] sm:$0xff] }
0x31ed   : > { %9306 = vmatpush1.bf16.msra.mxu1 %v17191_v63  ;;  %v17236_v63 = vld [vmem:[#allocation128_spill] sm:$0xff] }
0x31f0   : > { %9308 = vmatmul.mubr.bf16.vlgmr.msra.gmra.mrb[236].mxu1 %v14776_v2 }
0x31f1   : > { %9458 = vmatprep.mubr.bf16.mxu1 %v16987_v6 }
0x3283   : > { %v9266_v36 = vpop.f32.mrb[232].mxu1 }
0x3284   : > { %v16340_v44 = vadd.f32 %v9266_v36, %v9176_v1  ;;  %v9268_v11 = vpop.f32.mrb[233].mxu1  ;;  %v11376_v1 = vld [vmem:[%s17134_s4 + $0xc] sm:$0xf]  ;;  %v17237_v36 = vld [vmem:[#allocation129_spill] sm:$0xff] }
0x3285   : > { %v16342_v61 = vadd.f32 %v9268_v11, %v9177_v41  ;;  %v9270_v33 = vpop.f32.mrb[234].mxu1  ;;  %v17192_v41 = vld [vmem:[#allocation84_spill] sm:$0xff]  ;;  %v17238_v11 = vld [vmem:[#allocation130_spill] sm:$0xff] }
0x3286   : > { %v9271_v16 = vpop.f32.mrb[235].mxu1  ;;  %v17239_v33 = vld [vmem:[#allocation131_spill] sm:$0xff] }
0x3287   : > { %v17240_v16 = vld [vmem:[#allocation132_spill] sm:$0xff] }
0x32c3   : > { %v9309_v39 = vpop.f32.mrb[236].mxu1 }
0x32c4   : > { %v9316_v45 = vpack.c.bf16 %v9309_v39, %v9309_v39  ;;  %v9311_v50 = vpop.f32.mrb[237].mxu1  ;;  %v17241_v39 = vld [vmem:[#allocation133_spill] sm:$0xff] }
0x32c5   : > { %v9317_v19 = vpack.c.bf16 %v9311_v50, %v9311_v50  ;;  %v9313_v58 = vpop.f32.mrb[238].mxu1  ;;  %v17243_v50 = vld [vmem:[#allocation135_spill] sm:$0xff] }
0x32c6   : > { %v9324_v26 = vsel %vm3894_vm5, %v9316_v45, 0  ;;  %v9314_v57 = vpop.f32.mrb[239].mxu1  ;;  %v17242_v45 = vld [vmem:[#allocation134_spill] sm:$0xff]  ;;  %v17245_v58 = vld [vmem:[#allocation137_spill] sm:$0xff] }
0x32c7   : > { %11377 = vmatprep.subr.msk.bf16.mxu0 %vm3894_vm5, %v9317_v19  ;;  %v17244_v19 = vld [vmem:[#allocation136_spill] sm:$0xff]  ;;  %v17247_v57 = vld [vmem:[#allocation139_spill] sm:$0xff] }
0x32c8   : > { %9330 = vmatpush1.bf16.msra.mxu0 %v9324_v26  ;;  %v17246_v26 = vld [vmem:[#allocation138_spill] sm:$0xff] }
0x32c9   : > { %9372 = vmatprep.subr.bf16.mxu0 %v15873_v31  ;;  %v17197_v31 = vld [vmem:[#allocation89_spill] sm:$0xff] }
0x32cb   : > { %11378 = vmatmul.mubr.msk.bf16.vlgmr.msra.gmra.mrb[216].mxu0 %vm3890_vm6, %v11376_v1  ;;  %v17248_v1 = vld [vmem:[#allocation140_spill] sm:$0xff] }
0x32cc   : > { %9373 = vmatpush1.bf16.msra.mxu0 %v15877_v32  ;;  %9404 = vmatprep.mubr.bf16.mxu0 %v14772_v18  ;;  %v17199_v32 = vld [vmem:[#allocation91_spill] sm:$0xff] }
0x32cd   : > { %9374 = vmatprep.subr.bf16.mxu0 %v15881_v30  ;;  %v17201_v30 = vld [vmem:[#allocation93_spill] sm:$0xff] }
0x32d0   : > { %9375 = vmatpush1.bf16.msra.mxu0 %v15884_v46  ;;  %v17202_v46 = vld [vmem:[#allocation94_spill] sm:$0xff] }
0x32d1   : > { %9376 = vmatprep.subr.bf16.mxu0 %v17192_v41  ;;  %v17249_v41 = vld [vmem:[#allocation141_spill] sm:$0xff] }
0x32d4   : > { %9377 = vmatpush1.bf16.msra.mxu0 %v17193_v13  ;;  %v17250_v13 = vld [vmem:[#allocation142_spill] sm:$0xff] }
0x32d5   : > { %9378 = vmatprep.subr.bf16.mxu0 %v17194_v37  ;;  %v17251_v37 = vld [vmem:[#allocation143_spill] sm:$0xff] }
0x32d8   : > { %9379 = vmatpush1.bf16.msra.mxu0 %v17195_v48  ;;  %v13380_v48 = vld [vmem:[#allocation2 + $0x104] ss:$8 sps:$4 sm:$0xff]  }
0x32d9   : > { %9380 = vmatprep.subr.bf16.mxu0 %v17196_v0  ;;  %v13381_v0 = vld [vmem:[#allocation2 + $0x100] ss:$8 sps:$4 sm:$0xff]  }
0x32dc   : > { %9381 = vmatpush1.bf16.msra.mxu0 %v17197_v31  ;;  %v13382_v31 = vld [vmem:[#allocation2 + $0x114] ss:$8 sps:$4 sm:$0xff]  }
0x32dd   : > { %9382 = vmatprep.subr.bf16.mxu0 %v17198_v21  ;;  %v13383_v21 = vld [vmem:[#allocation2 + $0x110] ss:$8 sps:$4 sm:$0xff]  }
0x32e0   : > { %9383 = vmatpush1.bf16.msra.mxu0 %v17199_v32  ;;  %v13384_v32 = vld [vmem:[#allocation2 + $0x124] ss:$8 sps:$4 sm:$0xff]  }
0x32e1   : > { %9384 = vmatprep.subr.bf16.mxu0 %v17200_v56  ;;  %v13385_v56 = vld [vmem:[#allocation2 + $0x120] ss:$8 sps:$4 sm:$0xff]  }
0x32e4   : > { %9385 = vmatpush1.bf16.msra.mxu0 %v17201_v30  ;;  %v13386_v30 = vld [vmem:[#allocation2 + $0x134] ss:$8 sps:$4 sm:$0xff]  }
0x32e5   : > { %9386 = vmatprep.subr.bf16.mxu0 %v17202_v46  ;;  %v13387_v46 = vld [vmem:[#allocation2 + $0x130] ss:$8 sps:$4 sm:$0xff]  }
0x32e8   : > { %9387 = vmatpush1.bf16.msra.mxu0 %v17203_v52  ;;  %v13388_v52 = vld [vmem:[#allocation2 + $0x144] ss:$8 sps:$4 sm:$0xff]  }
0x32e9   : > { %9388 = vmatprep.subr.bf16.mxu0 %v17204_v3  ;;  %v13389_v3 = vld [vmem:[#allocation2 + $0x140] ss:$8 sps:$4 sm:$0xff]  }
0x32ec   : > { %9389 = vmatpush1.bf16.msra.mxu0 %v17205_v62  ;;  %v13390_v62 = vld [vmem:[#allocation2 + $0x154] ss:$8 sps:$4 sm:$0xff]  }
0x32ed   : > { %9390 = vmatprep.subr.bf16.mxu0 %v17206_v25  ;;  %v13392_v25 = vld [vmem:[#allocation2 + $0x164] ss:$8 sps:$4 sm:$0xff]  }
0x32f0   : > { %9391 = vmatpush1.bf16.msra.mxu0 %v17207_v4  ;;  %v13393_v4 = vld [vmem:[#allocation2 + $0x160] ss:$8 sps:$4 sm:$0xff]  }
0x32f1   : > { %9392 = vmatprep.subr.bf16.mxu0 %v17208_v42  ;;  %v13394_v42 = vld [vmem:[#allocation2 + $0x174] ss:$8 sps:$4 sm:$0xff]  }
0x32f4   : > { %9393 = vmatpush1.bf16.msra.mxu0 %v17209_v47  ;;  %v13395_v47 = vld [vmem:[#allocation2 + $0x170] ss:$8 sps:$4 sm:$0xff]  }
0x32f5   : > { %9394 = vmatprep.subr.bf16.mxu0 %v17210_v51  ;;  %v13396_v51 = vld [vmem:[#allocation2 + $0x184] ss:$8 sps:$4 sm:$0xff]  }
0x32f8   : > { %9395 = vmatpush1.bf16.msra.mxu0 %v17211_v14  ;;  %v13397_v14 = vld [vmem:[#allocation2 + $0x180] ss:$8 sps:$4 sm:$0xff]  }
0x32f9   : > { %9396 = vmatprep.subr.bf16.mxu0 %v17212_v43  ;;  %v13398_v43 = vld [vmem:[#allocation2 + $0x194] ss:$8 sps:$4 sm:$0xff]  }
0x32fc   : > { %9397 = vmatpush1.bf16.msra.mxu0 %v17213_v10  ;;  %v13399_v10 = vld [vmem:[#allocation2 + $0x190] ss:$8 sps:$4 sm:$0xff]  }
0x32fd   : > { %9398 = vmatprep.subr.bf16.mxu0 %v17214_v22  ;;  %v13400_v22 = vld [vmem:[#allocation2 + $0x1a4] ss:$8 sps:$4 sm:$0xff]  }
0x3300   : > { %9399 = vmatpush1.bf16.msra.mxu0 %v17215_v8  ;;  %v13401_v8 = vld [vmem:[#allocation2 + $0x1a0] ss:$8 sps:$4 sm:$0xff]  }
0x3301   : > { %9400 = vmatprep.subr.bf16.mxu0 %v17216_v49  ;;  %v13402_v49 = vld [vmem:[#allocation2 + $0x1b4] ss:$8 sps:$4 sm:$0xff]  }
0x3304   : > { %9401 = vmatpush1.bf16.msra.mxu0 %v17217_v23  ;;  %v13403_v23 = vld [vmem:[#allocation2 + $0x1b0] ss:$8 sps:$4 sm:$0xff]  }
0x3305   : > { %9402 = vmatprep.subr.bf16.mxu0 %v17218_v54  ;;  %v13404_v54 = vld [vmem:[#allocation2 + $0x1c4] ss:$8 sps:$4 sm:$0xff]  }
0x3308   : > { %9403 = vmatpush1.bf16.msra.mxu0 %v17219_v20  ;;  %v13405_v20 = vld [vmem:[#allocation2 + $0x1c0] ss:$8 sps:$4 sm:$0xff]  }
0x3309   : > { %9525 = vmatprep.subr.bf16.mxu0 %v17220_v35  ;;  %v13406_v35 = vld [vmem:[#allocation2 + $0x1d4] ss:$8 sps:$4 sm:$0xff]  }
0x330b   : > { %9405 = vmatmul.mubr.bf16.vlgmr.msra.gmra.mrb[220].mxu0 %v14776_v2 }
0x330c   : > { %9526 = vmatpush1.bf16.msra.mxu0 %v17221_v17  ;;  %9557 = vmatprep.mubr.bf16.mxu0 %v14772_v18  ;;  %v17232_v18 = vld [vmem:[#allocation124_spill] sm:$0xff]  ;;  %v13407_v17 = vld [vmem:[#allocation2 + $0x1d0] ss:$8 sps:$4 sm:$0xff]  }
0x330d   : > { %9527 = vmatprep.subr.bf16.mxu0 %v17222_v9  ;;  %v13408_v9 = vld [vmem:[#allocation2 + $0x1e4] ss:$8 sps:$4 sm:$0xff]  }
0x3310   : > { %9528 = vmatpush1.bf16.msra.mxu0 %v17223_v7  ;;  %v13409_v7 = vld [vmem:[#allocation2 + $0x1e0] ss:$8 sps:$4 sm:$0xff]  }
0x3311   : > { %9529 = vmatprep.subr.bf16.mxu0 %v17224_v27  ;;  %v13410_v27 = vld [vmem:[#allocation2 + $0x1f4] ss:$8 sps:$4 sm:$0xff]  }
0x3314   : > { %9530 = vmatpush1.bf16.msra.mxu0 %v17225_v53  ;;  %v13411_v53 = vld [vmem:[#allocation2 + $0x1f0] ss:$8 sps:$4 sm:$0xff]  }
0x3315   : > { %9531 = vmatprep.subr.bf16.mxu0 %v17226_v40 }
0x3318   : > { %9532 = vmatpush1.bf16.msra.mxu0 %v17227_v24 }
0x3319   : > { %9533 = vmatprep.subr.bf16.mxu0 %v17228_v55 }
0x331c   : > { %9534 = vmatpush1.bf16.msra.mxu0 %v17229_v5 }
0x331d   : > { %9535 = vmatprep.subr.bf16.mxu0 %v17230_v15 }
0x3320   : > { %9536 = vmatpush1.bf16.msra.mxu0 %v17231_v38 }
0x3321   : > { %9537 = vmatprep.subr.bf16.mxu0 %v17232_v18 }
0x3324   : > { %9538 = vmatpush1.bf16.msra.mxu0 %v17233_v34 }
0x3325   : > { %9539 = vmatprep.subr.bf16.mxu0 %v17234_v29 }
0x3328   : > { %9540 = vmatpush1.bf16.msra.mxu0 %v17235_v60 }
0x3329   : > { %9541 = vmatprep.subr.bf16.mxu0 %v17236_v63 }
0x332c   : > { %9542 = vmatpush1.bf16.msra.mxu0 %v17237_v36 }
0x332d   : > { %9543 = vmatprep.subr.bf16.mxu0 %v17238_v11 }
0x3330   : > { %9544 = vmatpush1.bf16.msra.mxu0 %v17239_v33  ;;  %v17252_v33 = vld [vmem:[#allocation23_spill] sm:$0xff] }
0x3331   : > { %9545 = vmatprep.subr.bf16.mxu0 %v17240_v16  ;;  %v9470_v16 = vpack.c.bf16 %v17252_v33, %v17252_v33 }
0x3334   : > { %9546 = vmatpush1.bf16.msra.mxu0 %v17241_v39 }
0x3335   : > { %9547 = vmatprep.subr.bf16.mxu0 %v17242_v45 }
0x3338   : > { %9548 = vmatpush1.bf16.msra.mxu0 %v17243_v50  ;;  %v11382_v50 = vld [vmem:[%s17134_s4 + $0x14] sm:$0xf] }
0x3339   : > { %9549 = vmatprep.subr.bf16.mxu0 %v17244_v19 }
0x333c   : > { %9550 = vmatpush1.bf16.msra.mxu0 %v17245_v58 }
0x333d   : > { %9551 = vmatprep.subr.bf16.mxu0 %v17246_v26 }
0x3340   : > { %9552 = vmatpush1.bf16.msra.mxu0 %v17247_v57 }
0x3341   : > { %9553 = vmatprep.subr.bf16.mxu0 %v17248_v1 }
0x3344   : > { %9554 = vmatpush1.bf16.msra.mxu0 %v17249_v41 }
0x3345   : > { %9555 = vmatprep.subr.bf16.mxu0 %v17250_v13 }
0x3348   : > { %9556 = vmatpush1.bf16.msra.mxu0 %v17251_v37  ;;  %v17254_v37 = vld [vmem:[#allocation22_spill] sm:$0xff] }
0x3349   : > { %9790 = vmatprep.subr.bf16.mxu0 %v13380_v48  ;;  %v9622_v48 = vpack.c.bf16 %v17254_v37, %v17254_v37 }
0x334b   : > { %9558 = vmatmul.mubr.bf16.vlgmr.msra.gmra.mrb[224].mxu0 %v14776_v2  ;;  %v13391_v2 = vld [vmem:[#allocation2 + $0x150] ss:$8 sps:$4 sm:$0xff]  }
0x334c   : > { %9791 = vmatpush1.bf16.msra.mxu0 %v13381_v0  ;;  %v17255_v0 = vld [vmem:[#allocation24_spill] sm:$0xff] }
0x334d   : > { %9792 = vmatprep.subr.bf16.mxu0 %v13382_v31  ;;  %v9623_v31 = vpack.c.bf16 %v17255_v0, %v17255_v0 }
0x3350   : > { %9793 = vmatpush1.bf16.msra.mxu0 %v13383_v21  ;;  %v11385_v21 = vld [vmem:[%s17134_s4 + $0x18] sm:$0xf] }
0x3351   : > { %9794 = vmatprep.subr.bf16.mxu0 %v13384_v32  ;;  %v17256_v32 = vld [vmem:[#allocation26_spill] sm:$0xff] }
0x3354   : > { %9795 = vmatpush1.bf16.msra.mxu0 %v13385_v56  ;;  %v9679_v56 = vpack.c.bf16 %v17256_v32, %v17256_v32 }
0x3355   : > { %9796 = vmatprep.subr.bf16.mxu0 %v13386_v30  ;;  %v9630_v30 = vsel %vm3894_vm5, %v9622_v48, 0 }
0x3358   : > { %9797 = vmatpush1.bf16.msra.mxu0 %v13387_v46  ;;  %v17257_v46 = vld [vmem:[#allocation25_spill] sm:$0xff] }
0x3359   : > { %9798 = vmatprep.subr.bf16.mxu0 %v13388_v52  ;;  %v9678_v52 = vpack.c.bf16 %v17257_v46, %v17257_v46 }
0x335c   : > { %9799 = vmatpush1.bf16.msra.mxu0 %v13389_v3  ;;  %v11388_v3 = vld [vmem:[%s17134_s4 + $0x1c] sm:$0xf] }
0x335d   : > { %9800 = vmatprep.subr.bf16.mxu0 %v13390_v62  ;;  %v9686_v62 = vsel %vm3894_vm5, %v9678_v52, 0 }
0x3360   : > { %9801 = vmatpush1.bf16.msra.mxu0 %v13391_v2  ;;  %v11391_v2 = vld [vmem:[%s17134_s4 + $0x20] sm:$0xf] }
0x3361   : > { %9802 = vmatprep.subr.bf16.mxu0 %v13392_v25  ;;  %v17258_v25 = vld [vmem:[#allocation144_spill] sm:$0xff] }
0x3364   : > { %9803 = vmatpush1.bf16.msra.mxu0 %v13393_v4  ;;  %v17259_v4 = vld [vmem:[#allocation145_spill] sm:$0xff] }
0x3365   : > { %9804 = vmatprep.subr.bf16.mxu0 %v13394_v42  ;;  %v17260_v42 = vld [vmem:[#allocation146_spill] sm:$0xff] }
0x3368   : > { %9805 = vmatpush1.bf16.msra.mxu0 %v13395_v47  ;;  %v17261_v47 = vld [vmem:[#allocation147_spill] sm:$0xff] }
0x3369   : > { %9806 = vmatprep.subr.bf16.mxu0 %v13396_v51  ;;  %v17262_v51 = vld [vmem:[#allocation148_spill] sm:$0xff] }
0x336c   : > { %9807 = vmatpush1.bf16.msra.mxu0 %v13397_v14  ;;  %v17264_v14 = vld [vmem:[#allocation150_spill] sm:$0xff] }
0x336d   : > { %9808 = vmatprep.subr.bf16.mxu0 %v13398_v43  ;;  %v17265_v43 = vld [vmem:[#allocation151_spill] sm:$0xff] }
0x3370   : > { %9809 = vmatpush1.bf16.msra.mxu0 %v13399_v10  ;;  %v17266_v10 = vld [vmem:[#allocation152_spill] sm:$0xff] }
0x3371   : > { %9810 = vmatprep.subr.bf16.mxu0 %v13400_v22  ;;  %v17269_v22 = vld [vmem:[#allocation155_spill] sm:$0xff] }
0x3374   : > { %9811 = vmatpush1.bf16.msra.mxu0 %v13401_v8  ;;  %v17270_v8 = vld [vmem:[#allocation156_spill] sm:$0xff] }
0x3375   : > { %9812 = vmatprep.subr.bf16.mxu0 %v13402_v49  ;;  %v17271_v49 = vld [vmem:[#allocation157_spill] sm:$0xff] }
0x3378   : > { %9813 = vmatpush1.bf16.msra.mxu0 %v13403_v23  ;;  %v17272_v23 = vld [vmem:[#allocation158_spill] sm:$0xff] }
0x3379   : > { %9814 = vmatprep.subr.bf16.mxu0 %v13404_v54  ;;  %v17273_v54 = vld [vmem:[#allocation159_spill] sm:$0xff] }
0x337c   : > { %9815 = vmatpush1.bf16.msra.mxu0 %v13405_v20  ;;  %v17274_v20 = vld [vmem:[#allocation160_spill] sm:$0xff] }
0x337d   : > { %9816 = vmatprep.subr.bf16.mxu0 %v13406_v35  ;;  %v17275_v35 = vld [vmem:[#allocation161_spill] sm:$0xff] }
0x3380   : > { %9817 = vmatpush1.bf16.msra.mxu0 %v13407_v17  ;;  %v17276_v17 = vld [vmem:[#allocation162_spill] sm:$0xff] }
0x3381   : > { %9818 = vmatprep.subr.bf16.mxu0 %v13408_v9  ;;  %v17277_v9 = vld [vmem:[#allocation163_spill] sm:$0xff] }
0x3384   : > { %9819 = vmatpush1.bf16.msra.mxu0 %v13409_v7  ;;  %v17278_v7 = vld [vmem:[#allocation164_spill] sm:$0xff] }
0x3385   : > { %9820 = vmatprep.subr.bf16.mxu0 %v13410_v27  ;;  %v17279_v27 = vld [vmem:[#allocation165_spill] sm:$0xff] }
0x3388   : > { %9821 = vmatpush1.bf16.msra.mxu0 %v13411_v53  ;;  %v17280_v53 = vld [vmem:[#allocation166_spill] sm:$0xff] }
0x339e   : > { %v9363_v40 = vpop.f32.mrb[216].mxu0 }
0x339f   : > { %v16419_v24 = vadd.f32 %v9363_v40, %v16340_v44  ;;  %v9365_v55 = vpop.f32.mrb[217].mxu0  ;;  %v17253_v44 = vld [vmem:[#allocation21_spill] sm:$0xff]  ;;  %v17281_v40 = vld [vmem:[#allocation167_spill] sm:$0xff] }
0x33a0   : > { %v16422_v5 = vadd.f32 %v9365_v55, %v16342_v61  ;;  %v9367_v15 = vpop.f32.mrb[218].mxu0  ;;  %v9469_v39 = vpack.c.bf16 %v17253_v44, %v17253_v44  ;;  %v11379_v61 = vld [vmem:[%s17134_s4 + $0x10] sm:$0xf]  ;;  %v17282_v55 = vld [vmem:[#allocation168_spill] sm:$0xff] }
0x33a1   : > { %v9368_v38 = vpop.f32.mrb[219].mxu0  ;;  %v17283_v15 = vld [vmem:[#allocation169_spill] sm:$0xff] }
0x33a2   : > { %v9477_v45 = vsel %vm3894_vm5, %v9469_v39, 0  ;;  %v17284_v38 = vld [vmem:[#allocation170_spill] sm:$0xff] }
0x33de   : > { %v9406_v18 = vpop.f32.mrb[220].mxu0 }
0x33df   : > { %v9413_v34 = vpack.c.bf16 %v9406_v18, %v9406_v18  ;;  %v9408_v29 = vpop.f32.mrb[221].mxu0  ;;  %v17285_v18 = vld [vmem:[#allocation171_spill] sm:$0xff] }
0x33e0   : > { %v9414_v60 = vpack.c.bf16 %v9408_v29, %v9408_v29  ;;  %v9410_v63 = vpop.f32.mrb[222].mxu0 }
0x33e1   : > { %v9421_v36 = vsel %vm3894_vm5, %v9413_v34, 0  ;;  %v9411_v11 = vpop.f32.mrb[223].mxu0  ;;  %v17286_v34 = vld [vmem:[#allocation172_spill] sm:$0xff] }
0x33e2   : > { %11380 = vmatprep.subr.msk.bf16.mxu1 %vm3894_vm5, %v9414_v60 }
0x33e3   : > { %9427 = vmatpush1.bf16.msra.mxu1 %v9421_v36 }
0x33e4   : > { %11383 = vmatprep.subr.msk.bf16.mxu1 %vm3894_vm5, %v9470_v16 }
0x33e6   : > { %11381 = vmatmul.mubr.msk.bf16.vlgmr.msra.gmra.mrb[240].mxu1 %vm3890_vm6, %v11379_v61 }
0x33e7   : > { %9483 = vmatpush1.bf16.msra.mxu1 %v9477_v45  ;;  %9514 = vmatprep.mubr.bf16.mxu1 %v16987_v6 }
0x33ee   : > { %11384 = vmatmul.mubr.msk.bf16.vlgmr.msra.gmra.mrb[244].mxu1 %vm3890_vm6, %v11382_v50 }
0x33ef   : > { %9611 = vmatprep.mubr.bf16.mxu1 %v16987_v6 }
0x341e   : > { %v9559_v19 = vpop.f32.mrb[224].mxu0 }
0x341f   : > { %v9566_v58 = vpack.c.bf16 %v9559_v19, %v9559_v19  ;;  %v9561_v26 = vpop.f32.mrb[225].mxu0 }
0x3420   : > { %v9567_v57 = vpack.c.bf16 %v9561_v26, %v9561_v26  ;;  %v9563_v1 = vpop.f32.mrb[226].mxu0 }
0x3421   : > { %v9574_v41 = vsel %vm3894_vm5, %v9566_v58, 0  ;;  %v9564_v13 = vpop.f32.mrb[227].mxu0 }
0x3422   : > { %11386 = vmatprep.subr.msk.bf16.mxu1 %vm3894_vm5, %v9567_v57 }
0x3423   : > { %9580 = vmatpush1.bf16.msra.mxu1 %v9574_v41 }
0x3424   : > { %11389 = vmatprep.subr.msk.bf16.mxu1 %vm3894_vm5, %v9623_v31 }
0x3426   : > { %11387 = vmatmul.mubr.msk.bf16.vlgmr.msra.gmra.mrb[248].mxu1 %vm3890_vm6, %v11385_v21 }
0x3427   : > { %9636 = vmatpush1.bf16.msra.mxu1 %v9630_v30  ;;  %9667 = vmatprep.mubr.bf16.mxu1 %v16987_v6 }
0x3428   : > { %11392 = vmatprep.subr.msk.bf16.mxu1 %vm3894_vm5, %v9679_v56  ;;  %v9738_v56 = vpop.permute.xlu1 %9737 }
0x342e   : > { %11390 = vmatmul.mubr.msk.bf16.vlgmr.msra.gmra.mrb[252].mxu1 %vm3890_vm6, %v11388_v3 }
0x342f   : > { %9692 = vmatpush1.bf16.msra.mxu1 %v9686_v62  ;;  %9723 = vmatprep.mubr.bf16.mxu1 %v16987_v6 }
0x3430   : > { %9746 = vmatprep.subr.bf16.mxu1 %v16115_v59  ;;  %v17263_v59 = vld [vmem:[#allocation149_spill] sm:$0xff] }
0x3436   : > { %11393 = vmatmul.mubr.msk.bf16.vlgmr.msra.gmra.mrb[0].mxu1 %vm3890_vm6, %v11391_v2 }
0x3437   : > { %9747 = vmatpush1.bf16.msra.mxu1 %v16119_v28  ;;  %v17267_v28 = vld [vmem:[#allocation153_spill] sm:$0xff] }
0x3438   : > { %9748 = vmatprep.subr.bf16.mxu1 %v16123_v12  ;;  %v17268_v12 = vld [vmem:[#allocation154_spill] sm:$0xff] }
0x343b   : > { %9749 = vmatpush1.bf16.msra.mxu1 %v17258_v25 }
0x343c   : > { %9750 = vmatprep.subr.bf16.mxu1 %v17259_v4 }
0x343f   : > { %9751 = vmatpush1.bf16.msra.mxu1 %v17260_v42 }
0x3440   : > { %9752 = vmatprep.subr.bf16.mxu1 %v17261_v47 }
0x3443   : > { %9753 = vmatpush1.bf16.msra.mxu1 %v17262_v51 }
0x3444   : > { %9754 = vmatprep.subr.bf16.mxu1 %v17263_v59 }
0x3447   : > { %9755 = vmatpush1.bf16.msra.mxu1 %v17264_v14 }
0x3448   : > { %9756 = vmatprep.subr.bf16.mxu1 %v17265_v43 }
0x344b   : > { %9757 = vmatpush1.bf16.msra.mxu1 %v17266_v10 }
0x344c   : > { %9758 = vmatprep.subr.bf16.mxu1 %v17267_v28 }
0x344f   : > { %9759 = vmatpush1.bf16.msra.mxu1 %v17268_v12 }
0x3450   : > { %9760 = vmatprep.subr.bf16.mxu1 %v17269_v22 }
0x3453   : > { %9761 = vmatpush1.bf16.msra.mxu1 %v17270_v8 }
0x3454   : > { %9762 = vmatprep.subr.bf16.mxu1 %v17271_v49 }
0x3457   : > { %9763 = vmatpush1.bf16.msra.mxu1 %v17272_v23 }
0x3458   : > { %9764 = vmatprep.subr.bf16.mxu1 %v17273_v54 }
0x345b   : > { %9765 = vmatpush1.bf16.msra.mxu1 %v17274_v20  ;;  %v11394_v20 = vld [vmem:[%s17287_s28 + $0x1] sm:$0x1] }
0x345c   : > { %9766 = vmatprep.subr.bf16.mxu1 %v17275_v35 }
0x345f   : > { %9767 = vmatpush1.bf16.msra.mxu1 %v17276_v17  ;;  %v13412_v17 = vld [vmem:[#allocation2 + $0x204] ss:$8 sps:$4 sm:$0xff]  }
0x3460   : > { %9768 = vmatprep.subr.bf16.mxu1 %v17277_v9  ;;  %v9789_v9 = vld [vmem:[%s17287_s28] sm:$0x1] }
0x3463   : > { %9769 = vmatpush1.bf16.msra.mxu1 %v17278_v7  ;;  %v13413_v7 = vld [vmem:[#allocation2 + $0x200] ss:$8 sps:$4 sm:$0xff]  }
0x3464   : > { %9770 = vmatprep.subr.bf16.mxu1 %v17279_v27  ;;  %v13414_v27 = vld [vmem:[#allocation2 + $0x214] ss:$8 sps:$4 sm:$0xff]  }
0x3467   : > { %9771 = vmatpush1.bf16.msra.mxu1 %v17280_v53  ;;  %v13415_v53 = vld [vmem:[#allocation2 + $0x210] ss:$8 sps:$4 sm:$0xff]  }
0x3468   : > { %9772 = vmatprep.subr.bf16.mxu1 %v17281_v40  ;;  %v13416_v40 = vld [vmem:[#allocation2 + $0x224] ss:$8 sps:$4 sm:$0xff]  }
0x346b   : > { %9773 = vmatpush1.bf16.msra.mxu1 %v17282_v55  ;;  %v13417_v55 = vld [vmem:[#allocation2 + $0x220] ss:$8 sps:$4 sm:$0xff]  }
0x346c   : > { %9774 = vmatprep.subr.bf16.mxu1 %v17283_v15  ;;  %v13418_v15 = vld [vmem:[#allocation2 + $0x234] ss:$8 sps:$4 sm:$0xff]  }
0x346f   : > { %9775 = vmatpush1.bf16.msra.mxu1 %v17284_v38  ;;  %v13419_v38 = vld [vmem:[#allocation2 + $0x230] ss:$8 sps:$4 sm:$0xff]  }
0x3470   : > { %9776 = vmatprep.subr.bf16.mxu1 %v17285_v18  ;;  %v13420_v18 = vld [vmem:[#allocation2 + $0x244] ss:$8 sps:$4 sm:$0xff]  }
0x3473   : > { %9777 = vmatpush1.bf16.msra.mxu1 %v17286_v34  ;;  %v13421_v34 = vld [vmem:[#allocation2 + $0x240] ss:$8 sps:$4 sm:$0xff]  }
0x34b9   : > { %v9460_v29 = vpop.f32.mrb[240].mxu1 }
0x34ba   : > { %v9467_v60 = vadd.f32 %v9460_v29, %v16419_v24  ;;  %v9462_v63 = vpop.f32.mrb[241].mxu1  ;;  %v13422_v29 = vld [vmem:[#allocation2 + $0x254] ss:$8 sps:$4 sm:$0xff]  }
0x34bb   : > { %v9468_v36 = vadd.f32 %v9462_v63, %v16422_v5  ;;  %v9464_v11 = vpop.f32.mrb[242].mxu1  ;;  %v13424_v63 = vld [vmem:[#allocation2 + $0x264] ss:$8 sps:$4 sm:$0xff]  }
0x34bc   : > { %v9465_v33 = vpop.f32.mrb[243].mxu1  ;;  %v13426_v11 = vld [vmem:[#allocation2 + $0x274] ss:$8 sps:$4 sm:$0xff]  }
0x34bd   : > { %v13427_v33 = vld [vmem:[#allocation2 + $0x270] ss:$8 sps:$4 sm:$0xff]  }
0x34c1   : > { %v9516_v16 = vpop.f32.mrb[244].mxu1 }
0x34c2   : > { %v9523_v44 = vadd.f32 %v9516_v16, %v9467_v60  ;;  %v9518_v39 = vpop.f32.mrb[245].mxu1  ;;  %v13423_v60 = vld [vmem:[#allocation2 + $0x250] ss:$8 sps:$4 sm:$0xff]   ;;  %v13428_v16 = vld [vmem:[#allocation2 + $0x284] ss:$8 sps:$4 sm:$0xff]  }
0x34c3   : > { %v9524_v61 = vadd.f32 %v9518_v39, %v9468_v36  ;;  %v9520_v45 = vpop.f32.mrb[246].mxu1  ;;  %v13425_v36 = vld [vmem:[#allocation2 + $0x260] ss:$8 sps:$4 sm:$0xff]   ;;  %v13430_v39 = vld [vmem:[#allocation2 + $0x294] ss:$8 sps:$4 sm:$0xff]  }
0x34c4   : > { %v9521_v50 = vpop.f32.mrb[247].mxu1  ;;  %v13432_v45 = vld [vmem:[#allocation2 + $0x2a4] ss:$8 sps:$4 sm:$0xff]  }
0x34c5   : > { %v13433_v50 = vld [vmem:[#allocation2 + $0x2a0] ss:$8 sps:$4 sm:$0xff]  }
0x34f9   : > { %v9613_v19 = vpop.f32.mrb[248].mxu1 }
0x34fa   : > { %v9620_v58 = vadd.f32 %v9613_v19, %v9523_v44  ;;  %v9615_v26 = vpop.f32.mrb[249].mxu1  ;;  %v13429_v44 = vld [vmem:[#allocation2 + $0x280] ss:$8 sps:$4 sm:$0xff]   ;;  %v13434_v19 = vld [vmem:[#allocation2 + $0x2b4] ss:$8 sps:$4 sm:$0xff]  }
0x34fb   : > { %v9621_v57 = vadd.f32 %v9615_v26, %v9524_v61  ;;  %v9617_v1 = vpop.f32.mrb[250].mxu1  ;;  %v13431_v61 = vld [vmem:[#allocation2 + $0x290] ss:$8 sps:$4 sm:$0xff]   ;;  %v13436_v26 = vld [vmem:[#allocation2 + $0x2c4] ss:$8 sps:$4 sm:$0xff]  }
0x34fc   : > { %v9618_v41 = vpop.f32.mrb[251].mxu1  ;;  %v13438_v1 = vld [vmem:[#allocation2 + $0x2d4] ss:$8 sps:$4 sm:$0xff]  }
0x34fd   : > { %v13439_v41 = vld [vmem:[#allocation2 + $0x2d0] ss:$8 sps:$4 sm:$0xff]  }
0x3501   : > { %v9669_v13 = vpop.f32.mrb[252].mxu1 }
0x3502   : > { %v9676_v37 = vadd.f32 %v9669_v13, %v9620_v58  ;;  %v9671_v24 = vpop.f32.mrb[253].mxu1  ;;  %v13435_v58 = vld [vmem:[#allocation2 + $0x2b0] ss:$8 sps:$4 sm:$0xff]   ;;  %v13440_v13 = vld [vmem:[#allocation2 + $0x2e4] ss:$8 sps:$4 sm:$0xff]  }
0x3503   : > { %v9677_v48 = vadd.f32 %v9671_v24, %v9621_v57  ;;  %v9673_v0 = vpop.f32.mrb[254].mxu1  ;;  %v13437_v57 = vld [vmem:[#allocation2 + $0x2c0] ss:$8 sps:$4 sm:$0xff]   ;;  %v13442_v24 = vld [vmem:[#allocation2 + $0x2f4] ss:$8 sps:$4 sm:$0xff]  }
0x3504   : > { %v9674_v5 = vpop.f32.mrb[255].mxu1 }
0x3509   : > { %v9725_v31 = vpop.f32.mrb[0].mxu1 }
0x350a   : > { %v9732_v21 = vadd.f32 %v9725_v31, %v9676_v37  ;;  %v9727_v32 = vpop.f32.mrb[1].mxu1  ;;  %v13441_v37 = vld [vmem:[#allocation2 + $0x2e0] ss:$8 sps:$4 sm:$0xff]  }
0x350b   : > { %v9733_v30 = vadd.f32 %v9727_v32, %v9677_v48  ;;  %v9729_v46 = vpop.f32.mrb[2].mxu1  ;;  %v13443_v48 = vld [vmem:[#allocation2 + $0x2f0] ss:$8 sps:$4 sm:$0xff]  }
0x350c   : > { %v9740_v52 = vadd.f32 %v9738_v56, %v9732_v21  ;;  %v9730_v3 = vpop.f32.mrb[3].mxu1 }
0x350d   : > { %v9741_v62 = vadd.f32 %v9738_v56, %v9733_v30 }
0x350e   : > { %v9742_v2 = vmax.f32 %v9740_v52, 0.0 }
0x350f   : > { %v9743_v25 = vmax.f32 %v9741_v62, 0.0 }
0x3510   : > { %v16506_v42 = vpack.c.bf16 %v9742_v2, %v9742_v2 }
0x3511   : > { %v16504_v4 = vpack.c.bf16 %v9743_v25, %v9743_v25 }
0x3513   : > { %9778 = vmatprep.mubr.bf16.mxu1 %v16504_v4  ;;  %9822 = vmatprep.mubr.bf16.mxu0 %v16504_v4 }
0x3514   : > { %9779 = vmatmul.mubr.bf16.vlgmr.msra.gmra.mrb[4].mxu1 %v16506_v42  ;;  %9823 = vmatmul.mubr.bf16.vlgmr.msra.gmra.mrb[228].mxu0 %v16506_v42 }
0x3515   : > { %9876 = vmatprep.mubr.bf16.mxu1 %v16987_v6  ;;  %10021 = vmatprep.mubr.bf16.mxu0 %v16987_v6 }
0x35e7   : > { %v9780_v47 = vpop.f32.mrb[4].mxu1  ;;  %v9824_v51 = vpop.f32.mrb[228].mxu0 }
0x35e8   : > { %v9831_v59 = vpack.c.bf16 %v9824_v51, %v9824_v51  ;;  %v9782_v14 = vpop.f32.mrb[5].mxu1  ;;  %v9826_v43 = vpop.f32.mrb[229].mxu0  ;;  %v9787_v23 = vpack.c.bf16 %v9780_v47, %v9780_v47 }
0x35e9   : > { %v9832_v10 = vpack.c.bf16 %v9826_v43, %v9826_v43  ;;  %v9784_v28 = vpop.f32.mrb[6].mxu1  ;;  %v9828_v12 = vpop.f32.mrb[230].mxu0  ;;  %v9788_v54 = vpack.c.bf16 %v9782_v14, %v9782_v14  ;;  %v11399_v43 = vld [vmem:[%s17287_s28 + $0x2] sm:$0x1] }
0x35ea   : > { %v9839_v22 = vsel %vm3894_vm5, %v9831_v59, 0  ;;  %v9785_v8 = vpop.f32.mrb[7].mxu1  ;;  %v9829_v49 = vpop.f32.mrb[231].mxu0  ;;  %v9889_v35 = vsel %vm3894_vm5, %v9787_v23, 0  ;;  %v13445_v28 = vld [vmem:[#allocation2 + $0x300] ss:$8 sps:$4 sm:$0xff]  }
0x35eb   : > { %11395 = vmatprep.subr.msk.bf16.mxu1 %vm3894_vm5, %v9832_v10  ;;  %v13444_v10 = vld [vmem:[#allocation2 + $0x304] ss:$8 sps:$4 sm:$0xff]   ;;  %v13446_v12 = vld [vmem:[#allocation2 + $0x314] ss:$8 sps:$4 sm:$0xff]   ;;  %v13449_v49 = vld [vmem:[#allocation2 + $0x320] ss:$8 sps:$4 sm:$0xff]  }
0x35ec   : > { %9845 = vmatpush1.bf16.msra.mxu1 %v9839_v22  ;;  %v13447_v22 = vld [vmem:[#allocation2 + $0x310] ss:$8 sps:$4 sm:$0xff]   ;;  %v13448_v8 = vld [vmem:[#allocation2 + $0x324] ss:$8 sps:$4 sm:$0xff]   ;;  %v13450_v23 = vld [vmem:[#allocation2 + $0x334] ss:$8 sps:$4 sm:$0xff]  }
0x35ed   : > { %11397 = vmatprep.subr.msk.bf16.mxu1 %vm3894_vm5, %v9788_v54  ;;  %v13451_v54 = vld [vmem:[#allocation2 + $0x330] ss:$8 sps:$4 sm:$0xff]  }
0x35ef   : > { %11396 = vmatmul.mubr.msk.bf16.vlgmr.msra.gmra.mrb[8].mxu1 %vm3890_vm6, %v11394_v20  ;;  %v13452_v20 = vld [vmem:[#allocation2 + $0x344] ss:$8 sps:$4 sm:$0xff]  }
0x35f0   : > { %9895 = vmatpush1.bf16.msra.mxu1 %v9889_v35  ;;  %9926 = vmatprep.mubr.bf16.mxu1 %v16987_v6  ;;  %v13453_v35 = vld [vmem:[#allocation2 + $0x340] ss:$8 sps:$4 sm:$0xff]  }
0x35f1   : > { %9935 = vmatprep.subr.bf16.mxu1 %v13412_v17  ;;  %v13454_v17 = vld [vmem:[#allocation2 + $0x354] ss:$8 sps:$4 sm:$0xff]  }
0x35f7   : > { %11398 = vmatmul.mubr.msk.bf16.vlgmr.msra.gmra.mrb[12].mxu1 %vm3890_vm6, %v9789_v9  ;;  %v13455_v9 = vld [vmem:[#allocation2 + $0x350] ss:$8 sps:$4 sm:$0xff]  }
0x35f8   : > { %9936 = vmatpush1.bf16.msra.mxu1 %v13413_v7  ;;  %9967 = vmatprep.mubr.bf16.mxu1 %v16504_v4  ;;  %v13456_v7 = vld [vmem:[#allocation2 + $0x364] ss:$8 sps:$4 sm:$0xff]  }
0x35f9   : > { %9937 = vmatprep.subr.bf16.mxu1 %v13414_v27  ;;  %v13457_v27 = vld [vmem:[#allocation2 + $0x360] ss:$8 sps:$4 sm:$0xff]  }
0x35fc   : > { %9938 = vmatpush1.bf16.msra.mxu1 %v13415_v53  ;;  %v13458_v53 = vld [vmem:[#allocation2 + $0x374] ss:$8 sps:$4 sm:$0xff]  }
0x35fd   : > { %9939 = vmatprep.subr.bf16.mxu1 %v13416_v40  ;;  %v13459_v40 = vld [vmem:[#allocation2 + $0x370] ss:$8 sps:$4 sm:$0xff]  }
0x3600   : > { %9940 = vmatpush1.bf16.msra.mxu1 %v13417_v55  ;;  %v13460_v55 = vld [vmem:[#allocation2 + $0x384] ss:$8 sps:$4 sm:$0xff]  }
0x3601   : > { %9941 = vmatprep.subr.bf16.mxu1 %v13418_v15  ;;  %v13461_v15 = vld [vmem:[#allocation2 + $0x380] ss:$8 sps:$4 sm:$0xff]  }
0x3604   : > { %9942 = vmatpush1.bf16.msra.mxu1 %v13419_v38  ;;  %v13462_v38 = vld [vmem:[#allocation2 + $0x394] ss:$8 sps:$4 sm:$0xff]  }
0x3605   : > { %9943 = vmatprep.subr.bf16.mxu1 %v13420_v18  ;;  %v13463_v18 = vld [vmem:[#allocation2 + $0x390] ss:$8 sps:$4 sm:$0xff]  }
0x3608   : > { %9944 = vmatpush1.bf16.msra.mxu1 %v13421_v34  ;;  %v13464_v34 = vld [vmem:[#allocation2 + $0x3a4] ss:$8 sps:$4 sm:$0xff]  }
0x3609   : > { %9945 = vmatprep.subr.bf16.mxu1 %v13422_v29  ;;  %v13465_v29 = vld [vmem:[#allocation2 + $0x3a0] ss:$8 sps:$4 sm:$0xff]  }
0x360c   : > { %9946 = vmatpush1.bf16.msra.mxu1 %v13423_v60  ;;  %v13466_v60 = vld [vmem:[#allocation2 + $0x3b4] ss:$8 sps:$4 sm:$0xff]  }
0x360d   : > { %9947 = vmatprep.subr.bf16.mxu1 %v13424_v63  ;;  %v13467_v63 = vld [vmem:[#allocation2 + $0x3b0] ss:$8 sps:$4 sm:$0xff]  }
0x3610   : > { %9948 = vmatpush1.bf16.msra.mxu1 %v13425_v36  ;;  %v13468_v36 = vld [vmem:[#allocation2 + $0x3c4] ss:$8 sps:$4 sm:$0xff]  }
0x3611   : > { %9949 = vmatprep.subr.bf16.mxu1 %v13426_v11  ;;  %v13469_v11 = vld [vmem:[#allocation2 + $0x3c0] ss:$8 sps:$4 sm:$0xff]  }
0x3614   : > { %9950 = vmatpush1.bf16.msra.mxu1 %v13427_v33  ;;  %v13470_v33 = vld [vmem:[#allocation2 + $0x3d4] ss:$8 sps:$4 sm:$0xff]  }
0x3615   : > { %9951 = vmatprep.subr.bf16.mxu1 %v13428_v16  ;;  %v13471_v16 = vld [vmem:[#allocation2 + $0x3d0] ss:$8 sps:$4 sm:$0xff]  }
0x3618   : > { %9952 = vmatpush1.bf16.msra.mxu1 %v13429_v44  ;;  %v13472_v44 = vld [vmem:[#allocation2 + $0x3e4] ss:$8 sps:$4 sm:$0xff]  }
0x3619   : > { %9953 = vmatprep.subr.bf16.mxu1 %v13430_v39  ;;  %v13473_v39 = vld [vmem:[#allocation2 + $0x3e0] ss:$8 sps:$4 sm:$0xff]  }
0x361c   : > { %9954 = vmatpush1.bf16.msra.mxu1 %v13431_v61  ;;  %v13474_v61 = vld [vmem:[#allocation2 + $0x3f4] ss:$8 sps:$4 sm:$0xff]  }
0x361d   : > { %9955 = vmatprep.subr.bf16.mxu1 %v13432_v45  ;;  %v13475_v45 = vld [vmem:[#allocation2 + $0x3f0] ss:$8 sps:$4 sm:$0xff]  }
0x3620   : > { %9956 = vmatpush1.bf16.msra.mxu1 %v13433_v50 }
0x3621   : > { %9957 = vmatprep.subr.bf16.mxu1 %v13434_v19 }
0x3624   : > { %9958 = vmatpush1.bf16.msra.mxu1 %v13435_v58 }
0x3625   : > { %9959 = vmatprep.subr.bf16.mxu1 %v13436_v26 }
0x3628   : > { %9960 = vmatpush1.bf16.msra.mxu1 %v13437_v57 }
0x3629   : > { %9961 = vmatprep.subr.bf16.mxu1 %v13438_v1 }
0x362c   : > { %9962 = vmatpush1.bf16.msra.mxu1 %v13439_v41 }
0x362d   : > { %9963 = vmatprep.subr.bf16.mxu1 %v13440_v13 }
0x3630   : > { %9964 = vmatpush1.bf16.msra.mxu1 %v13441_v37 }
0x3631   : > { %9965 = vmatprep.subr.bf16.mxu1 %v13442_v24 }
0x3634   : > { %9966 = vmatpush1.bf16.msra.mxu1 %v13443_v48 }
0x3637   : > { %9968 = vmatmul.mubr.bf16.vlgmr.msra.gmra.mrb[16].mxu1 %v16506_v42 }
0x3638   : > { %10118 = vmatprep.mubr.bf16.mxu1 %v16987_v6 }
0x36c2   : > { %v9878_v0 = vpop.f32.mrb[8].mxu1 }
0x36c3   : > { %v9880_v5 = vpop.f32.mrb[9].mxu1 }
0x36c4   : > { %v9882_v31 = vpop.f32.mrb[10].mxu1 }
0x36c5   : > { %v9883_v21 = vpop.f32.mrb[11].mxu1  ;;  %v11402_v31 = vld [vmem:[%s17287_s28 + $0x3] sm:$0x1] }
0x36c6   : > { %v13476_v21 = vld [vmem:[#allocation2 + $0x404] ss:$8 sps:$4 sm:$0xff]  }
0x36ca   : > { %v9928_v32 = vpop.f32.mrb[12].mxu1 }
0x36cb   : > { %v16530_v56 = vadd.f32 %v9928_v32, %v9878_v0  ;;  %v9930_v30 = vpop.f32.mrb[13].mxu1  ;;  %v13477_v32 = vld [vmem:[#allocation2 + $0x400] ss:$8 sps:$4 sm:$0xff]  }
0x36cc   : > { %v16532_v46 = vadd.f32 %v9930_v30, %v9880_v5  ;;  %v9932_v52 = vpop.f32.mrb[14].mxu1  ;;  %v13479_v30 = vld [vmem:[#allocation2 + $0x410] ss:$8 sps:$4 sm:$0xff]  }
0x36cd   : > { %v9933_v3 = vpop.f32.mrb[15].mxu1  ;;  %v13481_v52 = vld [vmem:[#allocation2 + $0x420] ss:$8 sps:$4 sm:$0xff]  }
0x36ce   : > { %v13482_v3 = vld [vmem:[#allocation2 + $0x434] ss:$8 sps:$4 sm:$0xff]  }
0x370a   : > { %v9969_v62 = vpop.f32.mrb[16].mxu1 }
0x370b   : > { %v9976_v2 = vpack.c.bf16 %v9969_v62, %v9969_v62  ;;  %v9971_v25 = vpop.f32.mrb[17].mxu1  ;;  %v13483_v62 = vld [vmem:[#allocation2 + $0x430] ss:$8 sps:$4 sm:$0xff]  }
0x370c   : > { %v9977_v47 = vpack.c.bf16 %v9971_v25, %v9971_v25  ;;  %v9973_v51 = vpop.f32.mrb[18].mxu1  ;;  %v13485_v25 = vld [vmem:[#allocation2 + $0x440] ss:$8 sps:$4 sm:$0xff]  }
0x370d   : > { %v9984_v59 = vsel %vm3894_vm5, %v9976_v2, 0  ;;  %v9974_v14 = vpop.f32.mrb[19].mxu1  ;;  %v13484_v2 = vld [vmem:[#allocation2 + $0x444] ss:$8 sps:$4 sm:$0xff]   ;;  %v13487_v51 = vld [vmem:[#allocation2 + $0x450] ss:$8 sps:$4 sm:$0xff]  }
0x370e   : > { %11400 = vmatprep.subr.msk.bf16.mxu0 %vm3894_vm5, %v9977_v47  ;;  %v13486_v47 = vld [vmem:[#allocation2 + $0x454] ss:$8 sps:$4 sm:$0xff]   ;;  %v13489_v14 = vld [vmem:[#allocation2 + $0x460] ss:$8 sps:$4 sm:$0xff]  }
0x370f   : > { %9990 = vmatpush1.bf16.msra.mxu0 %v9984_v59  ;;  %v13488_v59 = vld [vmem:[#allocation2 + $0x464] ss:$8 sps:$4 sm:$0xff]  }
0x3710   : > { %10032 = vmatprep.subr.bf16.mxu0 %v13444_v10  ;;  %v13491_v10 = vld [vmem:[#allocation2 + $0x470] ss:$8 sps:$4 sm:$0xff]  }
0x3712   : > { %11401 = vmatmul.mubr.msk.bf16.vlgmr.msra.gmra.mrb[232].mxu0 %vm3890_vm6, %v11399_v43  ;;  %v13490_v43 = vld [vmem:[#allocation2 + $0x474] ss:$8 sps:$4 sm:$0xff]  }
0x3713   : > { %10033 = vmatpush1.bf16.msra.mxu0 %v13445_v28  ;;  %10064 = vmatprep.mubr.bf16.mxu0 %v16504_v4  ;;  %v13492_v28 = vld [vmem:[#allocation2 + $0x484] ss:$8 sps:$4 sm:$0xff]  }
0x3714   : > { %10034 = vmatprep.subr.bf16.mxu0 %v13446_v12  ;;  %v13493_v12 = vld [vmem:[#allocation2 + $0x480] ss:$8 sps:$4 sm:$0xff]  }
0x3717   : > { %10035 = vmatpush1.bf16.msra.mxu0 %v13447_v22  ;;  %v13494_v22 = vld [vmem:[#allocation2 + $0x494] ss:$8 sps:$4 sm:$0xff]  }
0x3718   : > { %10036 = vmatprep.subr.bf16.mxu0 %v13448_v8  ;;  %v13495_v8 = vld [vmem:[#allocation2 + $0x490] ss:$8 sps:$4 sm:$0xff]  }
0x371b   : > { %10037 = vmatpush1.bf16.msra.mxu0 %v13449_v49  ;;  %v13496_v49 = vld [vmem:[#allocation2 + $0x4a4] ss:$8 sps:$4 sm:$0xff]  }
0x371c   : > { %10038 = vmatprep.subr.bf16.mxu0 %v13450_v23  ;;  %v13497_v23 = vld [vmem:[#allocation2 + $0x4a0] ss:$8 sps:$4 sm:$0xff]  }
0x371f   : > { %10039 = vmatpush1.bf16.msra.mxu0 %v13451_v54  ;;  %v13498_v54 = vld [vmem:[#allocation2 + $0x4b4] ss:$8 sps:$4 sm:$0xff]  }
0x3720   : > { %10040 = vmatprep.subr.bf16.mxu0 %v13452_v20  ;;  %v13499_v20 = vld [vmem:[#allocation2 + $0x4b0] ss:$8 sps:$4 sm:$0xff]  }
0x3723   : > { %10041 = vmatpush1.bf16.msra.mxu0 %v13453_v35  ;;  %v13500_v35 = vld [vmem:[#allocation2 + $0x4c4] ss:$8 sps:$4 sm:$0xff]  }
0x3724   : > { %10042 = vmatprep.subr.bf16.mxu0 %v13454_v17  ;;  %v13501_v17 = vld [vmem:[#allocation2 + $0x4c0] ss:$8 sps:$4 sm:$0xff]  }
0x3727   : > { %10043 = vmatpush1.bf16.msra.mxu0 %v13455_v9  ;;  %v13502_v9 = vld [vmem:[#allocation2 + $0x4d4] ss:$8 sps:$4 sm:$0xff]  }
0x3728   : > { %10044 = vmatprep.subr.bf16.mxu0 %v13456_v7  ;;  %v13503_v7 = vld [vmem:[#allocation2 + $0x4d0] ss:$8 sps:$4 sm:$0xff]  }
0x372b   : > { %10045 = vmatpush1.bf16.msra.mxu0 %v13457_v27  ;;  %v13504_v27 = vld [vmem:[#allocation2 + $0x4e4] ss:$8 sps:$4 sm:$0xff]  }
0x372c   : > { %10046 = vmatprep.subr.bf16.mxu0 %v13458_v53  ;;  %v13505_v53 = vld [vmem:[#allocation2 + $0x4e0] ss:$8 sps:$4 sm:$0xff]  }
0x372f   : > { %10047 = vmatpush1.bf16.msra.mxu0 %v13459_v40  ;;  %v13506_v40 = vld [vmem:[#allocation2 + $0x4f4] ss:$8 sps:$4 sm:$0xff]  }
0x3730   : > { %10048 = vmatprep.subr.bf16.mxu0 %v13460_v55  ;;  %v13507_v55 = vld [vmem:[#allocation2 + $0x4f0] ss:$8 sps:$4 sm:$0xff]  }
0x3733   : > { %10049 = vmatpush1.bf16.msra.mxu0 %v13461_v15 }
0x3734   : > { %10050 = vmatprep.subr.bf16.mxu0 %v13462_v38 }
0x3737   : > { %10051 = vmatpush1.bf16.msra.mxu0 %v13463_v18 }
0x3738   : > { %10052 = vmatprep.subr.bf16.mxu0 %v13464_v34 }
0x373b   : > { %10053 = vmatpush1.bf16.msra.mxu0 %v13465_v29 }
0x373c   : > { %10054 = vmatprep.subr.bf16.mxu0 %v13466_v60 }
0x373f   : > { %10055 = vmatpush1.bf16.msra.mxu0 %v13467_v63 }
0x3740   : > { %10056 = vmatprep.subr.bf16.mxu0 %v13468_v36 }
0x3743   : > { %10057 = vmatpush1.bf16.msra.mxu0 %v13469_v11 }
0x3744   : > { %10058 = vmatprep.subr.bf16.mxu0 %v13470_v33 }
0x3747   : > { %10059 = vmatpush1.bf16.msra.mxu0 %v13471_v16 }
0x3748   : > { %10060 = vmatprep.subr.bf16.mxu0 %v13472_v44 }
0x374b   : > { %10061 = vmatpush1.bf16.msra.mxu0 %v13473_v39 }
0x374c   : > { %10062 = vmatprep.subr.bf16.mxu0 %v13474_v61  ;;  %v11405_v61 = vld [vmem:[%s17287_s28 + $0x4] sm:$0x1] }
0x374f   : > { %10063 = vmatpush1.bf16.msra.mxu0 %v13475_v45  ;;  %v13508_v45 = vld [vmem:[#allocation2 + $0x504] ss:$8 sps:$4 sm:$0xff]  }
0x3752   : > { %10065 = vmatmul.mubr.bf16.vlgmr.msra.gmra.mrb[236].mxu0 %v16506_v42 }
0x3753   : > { %10215 = vmatprep.mubr.bf16.mxu0 %v16987_v6 }
0x37e5   : > { %v10023_v50 = vpop.f32.mrb[232].mxu0 }
0x37e6   : > { %v16544_v19 = vadd.f32 %v10023_v50, %v16530_v56  ;;  %v10025_v58 = vpop.f32.mrb[233].mxu0  ;;  %v13478_v56 = vld [vmem:[#allocation2 + $0x414] ss:$8 sps:$4 sm:$0xff]   ;;  %v13509_v50 = vld [vmem:[#allocation2 + $0x500] ss:$8 sps:$4 sm:$0xff]  }
0x37e7   : > { %v16547_v26 = vadd.f32 %v10025_v58, %v16532_v46  ;;  %v10027_v57 = vpop.f32.mrb[234].mxu0  ;;  %v13480_v46 = vld [vmem:[#allocation2 + $0x424] ss:$8 sps:$4 sm:$0xff]   ;;  %v13511_v58 = vld [vmem:[#allocation2 + $0x510] ss:$8 sps:$4 sm:$0xff]  }
0x37e8   : > { %v10028_v1 = vpop.f32.mrb[235].mxu0  ;;  %v13513_v57 = vld [vmem:[#allocation2 + $0x520] ss:$8 sps:$4 sm:$0xff]  }
0x37e9   : > { %v13514_v1 = vld [vmem:[#allocation2 + $0x534] ss:$8 sps:$4 sm:$0xff]  }
0x3825   : > { %v10066_v41 = vpop.f32.mrb[236].mxu0 }
0x3826   : > { %v10073_v13 = vpack.c.bf16 %v10066_v41, %v10066_v41  ;;  %v10068_v37 = vpop.f32.mrb[237].mxu0  ;;  %v13515_v41 = vld [vmem:[#allocation2 + $0x530] ss:$8 sps:$4 sm:$0xff]  }
0x3827   : > { %v10074_v24 = vpack.c.bf16 %v10068_v37, %v10068_v37  ;;  %v10070_v48 = vpop.f32.mrb[238].mxu0  ;;  %v13517_v37 = vld [vmem:[#allocation2 + $0x540] ss:$8 sps:$4 sm:$0xff]  }
0x3828   : > { %v10081_v0 = vsel %vm3894_vm5, %v10073_v13, 0  ;;  %v10071_v5 = vpop.f32.mrb[239].mxu0  ;;  %v13516_v13 = vld [vmem:[#allocation2 + $0x544] ss:$8 sps:$4 sm:$0xff]   ;;  %v13519_v48 = vld [vmem:[#allocation2 + $0x550] ss:$8 sps:$4 sm:$0xff]  }
0x3829   : > { %11403 = vmatprep.subr.msk.bf16.mxu1 %vm3894_vm5, %v10074_v24  ;;  %v13518_v24 = vld [vmem:[#allocation2 + $0x554] ss:$8 sps:$4 sm:$0xff]   ;;  %v13521_v5 = vld [vmem:[#allocation2 + $0x560] ss:$8 sps:$4 sm:$0xff]  }
0x382a   : > { %10087 = vmatpush1.bf16.msra.mxu1 %v10081_v0  ;;  %v13520_v0 = vld [vmem:[#allocation2 + $0x564] ss:$8 sps:$4 sm:$0xff]  }
0x382b   : > { %10129 = vmatprep.subr.bf16.mxu1 %v13476_v21  ;;  %v13523_v21 = vld [vmem:[#allocation2 + $0x570] ss:$8 sps:$4 sm:$0xff]  }
0x382d   : > { %11404 = vmatmul.mubr.msk.bf16.vlgmr.msra.gmra.mrb[20].mxu1 %vm3890_vm6, %v11402_v31  ;;  %v13522_v31 = vld [vmem:[#allocation2 + $0x574] ss:$8 sps:$4 sm:$0xff]  }
0x382e   : > { %10130 = vmatpush1.bf16.msra.mxu1 %v13477_v32  ;;  %10161 = vmatprep.mubr.bf16.mxu1 %v16504_v4  ;;  %v13524_v32 = vld [vmem:[#allocation2 + $0x584] ss:$8 sps:$4 sm:$0xff]  }
0x382f   : > { %10131 = vmatprep.subr.bf16.mxu1 %v13478_v56  ;;  %v13525_v56 = vld [vmem:[#allocation2 + $0x580] ss:$8 sps:$4 sm:$0xff]  }
0x3832   : > { %10132 = vmatpush1.bf16.msra.mxu1 %v13479_v30  ;;  %v13526_v30 = vld [vmem:[#allocation2 + $0x594] ss:$8 sps:$4 sm:$0xff]  }
0x3833   : > { %10133 = vmatprep.subr.bf16.mxu1 %v13480_v46  ;;  %v13527_v46 = vld [vmem:[#allocation2 + $0x590] ss:$8 sps:$4 sm:$0xff]  }
0x3836   : > { %10134 = vmatpush1.bf16.msra.mxu1 %v13481_v52  ;;  %v13528_v52 = vld [vmem:[#allocation2 + $0x5a4] ss:$8 sps:$4 sm:$0xff]  }
0x3837   : > { %10135 = vmatprep.subr.bf16.mxu1 %v13482_v3  ;;  %v13529_v3 = vld [vmem:[#allocation2 + $0x5a0] ss:$8 sps:$4 sm:$0xff]  }
0x383a   : > { %10136 = vmatpush1.bf16.msra.mxu1 %v13483_v62  ;;  %v13530_v62 = vld [vmem:[#allocation2 + $0x5b4] ss:$8 sps:$4 sm:$0xff]  }
0x383b   : > { %10137 = vmatprep.subr.bf16.mxu1 %v13484_v2  ;;  %v13531_v2 = vld [vmem:[#allocation2 + $0x5b0] ss:$8 sps:$4 sm:$0xff]  }
0x383e   : > { %10138 = vmatpush1.bf16.msra.mxu1 %v13485_v25  ;;  %v13532_v25 = vld [vmem:[#allocation2 + $0x5c4] ss:$8 sps:$4 sm:$0xff]  }
0x383f   : > { %10139 = vmatprep.subr.bf16.mxu1 %v13486_v47  ;;  %v13533_v47 = vld [vmem:[#allocation2 + $0x5c0] ss:$8 sps:$4 sm:$0xff]  }
0x3842   : > { %10140 = vmatpush1.bf16.msra.mxu1 %v13487_v51  ;;  %v13534_v51 = vld [vmem:[#allocation2 + $0x5d4] ss:$8 sps:$4 sm:$0xff]  }
0x3843   : > { %10141 = vmatprep.subr.bf16.mxu1 %v13488_v59  ;;  %v13535_v59 = vld [vmem:[#allocation2 + $0x5d0] ss:$8 sps:$4 sm:$0xff]  }
0x3846   : > { %10142 = vmatpush1.bf16.msra.mxu1 %v13489_v14  ;;  %v13536_v14 = vld [vmem:[#allocation2 + $0x5e4] ss:$8 sps:$4 sm:$0xff]  }
0x3847   : > { %10143 = vmatprep.subr.bf16.mxu1 %v13490_v43  ;;  %v13537_v43 = vld [vmem:[#allocation2 + $0x5e0] ss:$8 sps:$4 sm:$0xff]  }
0x384a   : > { %10144 = vmatpush1.bf16.msra.mxu1 %v13491_v10  ;;  %v13538_v10 = vld [vmem:[#allocation2 + $0x5f4] ss:$8 sps:$4 sm:$0xff]  }
0x384b   : > { %10145 = vmatprep.subr.bf16.mxu1 %v13492_v28  ;;  %v13539_v28 = vld [vmem:[#allocation2 + $0x5f0] ss:$8 sps:$4 sm:$0xff]  }
0x384e   : > { %10146 = vmatpush1.bf16.msra.mxu1 %v13493_v12 }
0x384f   : > { %10147 = vmatprep.subr.bf16.mxu1 %v13494_v22 }
0x3852   : > { %10148 = vmatpush1.bf16.msra.mxu1 %v13495_v8 }
0x3853   : > { %10149 = vmatprep.subr.bf16.mxu1 %v13496_v49 }
0x3856   : > { %10150 = vmatpush1.bf16.msra.mxu1 %v13497_v23 }
0x3857   : > { %10151 = vmatprep.subr.bf16.mxu1 %v13498_v54 }
0x385a   : > { %10152 = vmatpush1.bf16.msra.mxu1 %v13499_v20 }
0x385b   : > { %10153 = vmatprep.subr.bf16.mxu1 %v13500_v35 }
0x385e   : > { %10154 = vmatpush1.bf16.msra.mxu1 %v13501_v17 }
0x385f   : > { %10155 = vmatprep.subr.bf16.mxu1 %v13502_v9 }
0x3862   : > { %10156 = vmatpush1.bf16.msra.mxu1 %v13503_v7 }
0x3863   : > { %10157 = vmatprep.subr.bf16.mxu1 %v13504_v27 }
0x3866   : > { %10158 = vmatpush1.bf16.msra.mxu1 %v13505_v53 }
0x3867   : > { %10159 = vmatprep.subr.bf16.mxu1 %v13506_v40  ;;  %v11408_v40 = vld [vmem:[%s17287_s28 + $0x5] sm:$0x1] }
0x386a   : > { %10160 = vmatpush1.bf16.msra.mxu1 %v13507_v55  ;;  %v13540_v55 = vld [vmem:[#allocation2 + $0x604] ss:$8 sps:$4 sm:$0xff]  }
0x386d   : > { %10162 = vmatmul.mubr.bf16.vlgmr.msra.gmra.mrb[24].mxu1 %v16506_v42 }
0x386e   : > { %10312 = vmatprep.mubr.bf16.mxu1 %v16987_v6 }
0x3900   : > { %v10120_v15 = vpop.f32.mrb[20].mxu1 }
0x3901   : > { %v16559_v38 = vadd.f32 %v10120_v15, %v16544_v19  ;;  %v10122_v18 = vpop.f32.mrb[21].mxu1  ;;  %v13510_v19 = vld [vmem:[#allocation2 + $0x514] ss:$8 sps:$4 sm:$0xff]   ;;  %v13541_v15 = vld [vmem:[#allocation2 + $0x600] ss:$8 sps:$4 sm:$0xff]  }
0x3902   : > { %v16562_v34 = vadd.f32 %v10122_v18, %v16547_v26  ;;  %v10124_v29 = vpop.f32.mrb[22].mxu1  ;;  %v13512_v26 = vld [vmem:[#allocation2 + $0x524] ss:$8 sps:$4 sm:$0xff]   ;;  %v13543_v18 = vld [vmem:[#allocation2 + $0x610] ss:$8 sps:$4 sm:$0xff]  }
0x3903   : > { %v10125_v60 = vpop.f32.mrb[23].mxu1  ;;  %v13545_v29 = vld [vmem:[#allocation2 + $0x620] ss:$8 sps:$4 sm:$0xff]  }
0x3904   : > { %v13546_v60 = vld [vmem:[#allocation2 + $0x634] ss:$8 sps:$4 sm:$0xff]  }
0x3940   : > { %v10163_v63 = vpop.f32.mrb[24].mxu1 }
0x3941   : > { %v10170_v36 = vpack.c.bf16 %v10163_v63, %v10163_v63  ;;  %v10165_v11 = vpop.f32.mrb[25].mxu1  ;;  %v13547_v63 = vld [vmem:[#allocation2 + $0x630] ss:$8 sps:$4 sm:$0xff]  }
0x3942   : > { %v10171_v33 = vpack.c.bf16 %v10165_v11, %v10165_v11  ;;  %v10167_v16 = vpop.f32.mrb[26].mxu1  ;;  %v13549_v11 = vld [vmem:[#allocation2 + $0x640] ss:$8 sps:$4 sm:$0xff]  }
0x3943   : > { %v10178_v44 = vsel %vm3894_vm5, %v10170_v36, 0  ;;  %v10168_v39 = vpop.f32.mrb[27].mxu1  ;;  %v13548_v36 = vld [vmem:[#allocation2 + $0x644] ss:$8 sps:$4 sm:$0xff]   ;;  %v13551_v16 = vld [vmem:[#allocation2 + $0x650] ss:$8 sps:$4 sm:$0xff]  }
0x3944   : > { %11406 = vmatprep.subr.msk.bf16.mxu0 %vm3894_vm5, %v10171_v33  ;;  %v13550_v33 = vld [vmem:[#allocation2 + $0x654] ss:$8 sps:$4 sm:$0xff]   ;;  %v13553_v39 = vld [vmem:[#allocation2 + $0x660] ss:$8 sps:$4 sm:$0xff]  }
0x3945   : > { %10184 = vmatpush1.bf16.msra.mxu0 %v10178_v44  ;;  %v13552_v44 = vld [vmem:[#allocation2 + $0x664] ss:$8 sps:$4 sm:$0xff]  }
0x3946   : > { %10226 = vmatprep.subr.bf16.mxu0 %v13508_v45  ;;  %v13555_v45 = vld [vmem:[#allocation2 + $0x670] ss:$8 sps:$4 sm:$0xff]  }
0x3948   : > { %11407 = vmatmul.mubr.msk.bf16.vlgmr.msra.gmra.mrb[240].mxu0 %vm3890_vm6, %v11405_v61  ;;  %v13554_v61 = vld [vmem:[#allocation2 + $0x674] ss:$8 sps:$4 sm:$0xff]  }
0x3949   : > { %10227 = vmatpush1.bf16.msra.mxu0 %v13509_v50  ;;  %10258 = vmatprep.mubr.bf16.mxu0 %v16504_v4  ;;  %v13556_v50 = vld [vmem:[#allocation2 + $0x684] ss:$8 sps:$4 sm:$0xff]  }
0x394a   : > { %10228 = vmatprep.subr.bf16.mxu0 %v13510_v19  ;;  %v13557_v19 = vld [vmem:[#allocation2 + $0x680] ss:$8 sps:$4 sm:$0xff]  }
0x394d   : > { %10229 = vmatpush1.bf16.msra.mxu0 %v13511_v58  ;;  %v13558_v58 = vld [vmem:[#allocation2 + $0x694] ss:$8 sps:$4 sm:$0xff]  }
0x394e   : > { %10230 = vmatprep.subr.bf16.mxu0 %v13512_v26  ;;  %v13559_v26 = vld [vmem:[#allocation2 + $0x690] ss:$8 sps:$4 sm:$0xff]  }
0x3951   : > { %10231 = vmatpush1.bf16.msra.mxu0 %v13513_v57  ;;  %v13560_v57 = vld [vmem:[#allocation2 + $0x6a4] ss:$8 sps:$4 sm:$0xff]  }
0x3952   : > { %10232 = vmatprep.subr.bf16.mxu0 %v13514_v1  ;;  %v13561_v1 = vld [vmem:[#allocation2 + $0x6a0] ss:$8 sps:$4 sm:$0xff]  }
0x3955   : > { %10233 = vmatpush1.bf16.msra.mxu0 %v13515_v41  ;;  %v13562_v41 = vld [vmem:[#allocation2 + $0x6b4] ss:$8 sps:$4 sm:$0xff]  }
0x3956   : > { %10234 = vmatprep.subr.bf16.mxu0 %v13516_v13  ;;  %v13563_v13 = vld [vmem:[#allocation2 + $0x6b0] ss:$8 sps:$4 sm:$0xff]  }
0x3959   : > { %10235 = vmatpush1.bf16.msra.mxu0 %v13517_v37  ;;  %v13564_v37 = vld [vmem:[#allocation2 + $0x6c4] ss:$8 sps:$4 sm:$0xff]  }
0x395a   : > { %10236 = vmatprep.subr.bf16.mxu0 %v13518_v24  ;;  %v13565_v24 = vld [vmem:[#allocation2 + $0x6c0] ss:$8 sps:$4 sm:$0xff]  }
0x395d   : > { %10237 = vmatpush1.bf16.msra.mxu0 %v13519_v48  ;;  %v13566_v48 = vld [vmem:[#allocation2 + $0x6d4] ss:$8 sps:$4 sm:$0xff]  }
0x395e   : > { %10238 = vmatprep.subr.bf16.mxu0 %v13520_v0  ;;  %v13567_v0 = vld [vmem:[#allocation2 + $0x6d0] ss:$8 sps:$4 sm:$0xff]  }
0x3961   : > { %10239 = vmatpush1.bf16.msra.mxu0 %v13521_v5  ;;  %v13568_v5 = vld [vmem:[#allocation2 + $0x6e4] ss:$8 sps:$4 sm:$0xff]  }
0x3962   : > { %10240 = vmatprep.subr.bf16.mxu0 %v13522_v31  ;;  %v13569_v31 = vld [vmem:[#allocation2 + $0x6e0] ss:$8 sps:$4 sm:$0xff]  }
0x3965   : > { %10241 = vmatpush1.bf16.msra.mxu0 %v13523_v21  ;;  %v13570_v21 = vld [vmem:[#allocation2 + $0x6f4] ss:$8 sps:$4 sm:$0xff]  }
0x3966   : > { %10242 = vmatprep.subr.bf16.mxu0 %v13524_v32  ;;  %v13571_v32 = vld [vmem:[#allocation2 + $0x6f0] ss:$8 sps:$4 sm:$0xff]  }
0x3969   : > { %10243 = vmatpush1.bf16.msra.mxu0 %v13525_v56 }
0x396a   : > { %10244 = vmatprep.subr.bf16.mxu0 %v13526_v30 }
0x396d   : > { %10245 = vmatpush1.bf16.msra.mxu0 %v13527_v46 }
0x396e   : > { %10246 = vmatprep.subr.bf16.mxu0 %v13528_v52 }
0x3971   : > { %10247 = vmatpush1.bf16.msra.mxu0 %v13529_v3 }
0x3972   : > { %10248 = vmatprep.subr.bf16.mxu0 %v13530_v62 }
0x3975   : > { %10249 = vmatpush1.bf16.msra.mxu0 %v13531_v2 }
0x3976   : > { %10250 = vmatprep.subr.bf16.mxu0 %v13532_v25 }
0x3979   : > { %10251 = vmatpush1.bf16.msra.mxu0 %v13533_v47 }
0x397a   : > { %10252 = vmatprep.subr.bf16.mxu0 %v13534_v51 }
0x397d   : > { %10253 = vmatpush1.bf16.msra.mxu0 %v13535_v59 }
0x397e   : > { %10254 = vmatprep.subr.bf16.mxu0 %v13536_v14 }
0x3981   : > { %10255 = vmatpush1.bf16.msra.mxu0 %v13537_v43 }
0x3982   : > { %10256 = vmatprep.subr.bf16.mxu0 %v13538_v10  ;;  %v11411_v10 = vld [vmem:[%s17287_s28 + $0x6] sm:$0x1] }
0x3985   : > { %10257 = vmatpush1.bf16.msra.mxu0 %v13539_v28  ;;  %v13572_v28 = vld [vmem:[#allocation2 + $0x704] ss:$8 sps:$4 sm:$0xff]  }
0x3988   : > { %10259 = vmatmul.mubr.bf16.vlgmr.msra.gmra.mrb[244].mxu0 %v16506_v42 }
0x3989   : > { %10409 = vmatprep.mubr.bf16.mxu0 %v16987_v6 }
0x3a1b   : > { %v10217_v12 = vpop.f32.mrb[240].mxu0 }
0x3a1c   : > { %v16574_v22 = vadd.f32 %v10217_v12, %v16559_v38  ;;  %v10219_v8 = vpop.f32.mrb[241].mxu0  ;;  %v13542_v38 = vld [vmem:[#allocation2 + $0x614] ss:$8 sps:$4 sm:$0xff]   ;;  %v13573_v12 = vld [vmem:[#allocation2 + $0x700] ss:$8 sps:$4 sm:$0xff]  }
0x3a1d   : > { %v16577_v49 = vadd.f32 %v10219_v8, %v16562_v34  ;;  %v10221_v23 = vpop.f32.mrb[242].mxu0  ;;  %v13544_v34 = vld [vmem:[#allocation2 + $0x624] ss:$8 sps:$4 sm:$0xff]   ;;  %v13575_v8 = vld [vmem:[#allocation2 + $0x710] ss:$8 sps:$4 sm:$0xff]  }
0x3a1e   : > { %v10222_v54 = vpop.f32.mrb[243].mxu0  ;;  %v13577_v23 = vld [vmem:[#allocation2 + $0x720] ss:$8 sps:$4 sm:$0xff]  }
0x3a1f   : > { %v13578_v54 = vld [vmem:[#allocation2 + $0x734] ss:$8 sps:$4 sm:$0xff]  }
0x3a5b   : > { %v10260_v20 = vpop.f32.mrb[244].mxu0 }
0x3a5c   : > { %v10267_v35 = vpack.c.bf16 %v10260_v20, %v10260_v20  ;;  %v10262_v17 = vpop.f32.mrb[245].mxu0  ;;  %v13579_v20 = vld [vmem:[#allocation2 + $0x730] ss:$8 sps:$4 sm:$0xff]  }
0x3a5d   : > { %v10268_v9 = vpack.c.bf16 %v10262_v17, %v10262_v17  ;;  %v10264_v7 = vpop.f32.mrb[246].mxu0  ;;  %v13581_v17 = vld [vmem:[#allocation2 + $0x740] ss:$8 sps:$4 sm:$0xff]  }
0x3a5e   : > { %v10275_v27 = vsel %vm3894_vm5, %v10267_v35, 0  ;;  %v10265_v53 = vpop.f32.mrb[247].mxu0  ;;  %v13580_v35 = vld [vmem:[#allocation2 + $0x744] ss:$8 sps:$4 sm:$0xff]   ;;  %v13583_v7 = vld [vmem:[#allocation2 + $0x750] ss:$8 sps:$4 sm:$0xff]  }
0x3a5f   : > { %11409 = vmatprep.subr.msk.bf16.mxu1 %vm3894_vm5, %v10268_v9  ;;  %v13582_v9 = vld [vmem:[#allocation2 + $0x754] ss:$8 sps:$4 sm:$0xff]   ;;  %v13585_v53 = vld [vmem:[#allocation2 + $0x760] ss:$8 sps:$4 sm:$0xff]  }
0x3a60   : > { %10281 = vmatpush1.bf16.msra.mxu1 %v10275_v27  ;;  %v13584_v27 = vld [vmem:[#allocation2 + $0x764] ss:$8 sps:$4 sm:$0xff]  }
0x3a61   : > { %10323 = vmatprep.subr.bf16.mxu1 %v13540_v55  ;;  %v13587_v55 = vld [vmem:[#allocation2 + $0x770] ss:$8 sps:$4 sm:$0xff]  }
0x3a63   : > { %11410 = vmatmul.mubr.msk.bf16.vlgmr.msra.gmra.mrb[28].mxu1 %vm3890_vm6, %v11408_v40  ;;  %v13586_v40 = vld [vmem:[#allocation2 + $0x774] ss:$8 sps:$4 sm:$0xff]  }
0x3a64   : > { %10324 = vmatpush1.bf16.msra.mxu1 %v13541_v15  ;;  %10355 = vmatprep.mubr.bf16.mxu1 %v16504_v4  ;;  %v13588_v15 = vld [vmem:[#allocation2 + $0x784] ss:$8 sps:$4 sm:$0xff]  }
0x3a65   : > { %10325 = vmatprep.subr.bf16.mxu1 %v13542_v38  ;;  %v13589_v38 = vld [vmem:[#allocation2 + $0x780] ss:$8 sps:$4 sm:$0xff]  }
0x3a68   : > { %10326 = vmatpush1.bf16.msra.mxu1 %v13543_v18  ;;  %v13590_v18 = vld [vmem:[#allocation2 + $0x794] ss:$8 sps:$4 sm:$0xff]  }
0x3a69   : > { %10327 = vmatprep.subr.bf16.mxu1 %v13544_v34  ;;  %v13591_v34 = vld [vmem:[#allocation2 + $0x790] ss:$8 sps:$4 sm:$0xff]  }
0x3a6c   : > { %10328 = vmatpush1.bf16.msra.mxu1 %v13545_v29  ;;  %v13592_v29 = vld [vmem:[#allocation2 + $0x7a4] ss:$8 sps:$4 sm:$0xff]  }
0x3a6d   : > { %10329 = vmatprep.subr.bf16.mxu1 %v13546_v60  ;;  %v13593_v60 = vld [vmem:[#allocation2 + $0x7a0] ss:$8 sps:$4 sm:$0xff]  }
0x3a70   : > { %10330 = vmatpush1.bf16.msra.mxu1 %v13547_v63  ;;  %v13594_v63 = vld [vmem:[#allocation2 + $0x7b4] ss:$8 sps:$4 sm:$0xff]  }
0x3a71   : > { %10331 = vmatprep.subr.bf16.mxu1 %v13548_v36  ;;  %v13595_v36 = vld [vmem:[#allocation2 + $0x7b0] ss:$8 sps:$4 sm:$0xff]  }
0x3a74   : > { %10332 = vmatpush1.bf16.msra.mxu1 %v13549_v11  ;;  %v13596_v11 = vld [vmem:[#allocation2 + $0x7c4] ss:$8 sps:$4 sm:$0xff]  }
0x3a75   : > { %10333 = vmatprep.subr.bf16.mxu1 %v13550_v33  ;;  %v13597_v33 = vld [vmem:[#allocation2 + $0x7c0] ss:$8 sps:$4 sm:$0xff]  }
0x3a78   : > { %10334 = vmatpush1.bf16.msra.mxu1 %v13551_v16  ;;  %v13598_v16 = vld [vmem:[#allocation2 + $0x7d4] ss:$8 sps:$4 sm:$0xff]  }
0x3a79   : > { %10335 = vmatprep.subr.bf16.mxu1 %v13552_v44  ;;  %v13599_v44 = vld [vmem:[#allocation2 + $0x7d0] ss:$8 sps:$4 sm:$0xff]  }
0x3a7c   : > { %10336 = vmatpush1.bf16.msra.mxu1 %v13553_v39  ;;  %v13600_v39 = vld [vmem:[#allocation2 + $0x7e4] ss:$8 sps:$4 sm:$0xff]  }
0x3a7d   : > { %10337 = vmatprep.subr.bf16.mxu1 %v13554_v61  ;;  %v13601_v61 = vld [vmem:[#allocation2 + $0x7e0] ss:$8 sps:$4 sm:$0xff]  }
0x3a80   : > { %10338 = vmatpush1.bf16.msra.mxu1 %v13555_v45  ;;  %v13602_v45 = vld [vmem:[#allocation2 + $0x7f4] ss:$8 sps:$4 sm:$0xff]  }
0x3a81   : > { %10339 = vmatprep.subr.bf16.mxu1 %v13556_v50  ;;  %v13603_v50 = vld [vmem:[#allocation2 + $0x7f0] ss:$8 sps:$4 sm:$0xff]  }
0x3a84   : > { %10340 = vmatpush1.bf16.msra.mxu1 %v13557_v19 }
0x3a85   : > { %10341 = vmatprep.subr.bf16.mxu1 %v13558_v58 }
0x3a88   : > { %10342 = vmatpush1.bf16.msra.mxu1 %v13559_v26 }
0x3a89   : > { %10343 = vmatprep.subr.bf16.mxu1 %v13560_v57 }
0x3a8c   : > { %10344 = vmatpush1.bf16.msra.mxu1 %v13561_v1 }
0x3a8d   : > { %10345 = vmatprep.subr.bf16.mxu1 %v13562_v41 }
0x3a90   : > { %10346 = vmatpush1.bf16.msra.mxu1 %v13563_v13 }
0x3a91   : > { %10347 = vmatprep.subr.bf16.mxu1 %v13564_v37 }
0x3a94   : > { %10348 = vmatpush1.bf16.msra.mxu1 %v13565_v24 }
0x3a95   : > { %10349 = vmatprep.subr.bf16.mxu1 %v13566_v48 }
0x3a98   : > { %10350 = vmatpush1.bf16.msra.mxu1 %v13567_v0 }
0x3a99   : > { %10351 = vmatprep.subr.bf16.mxu1 %v13568_v5 }
0x3a9c   : > { %10352 = vmatpush1.bf16.msra.mxu1 %v13569_v31 }
0x3a9d   : > { %10353 = vmatprep.subr.bf16.mxu1 %v13570_v21  ;;  %v13604_v21 = vld [vmem:[#allocation2 + $0x804] ss:$8 sps:$4 sm:$0xff]  }
0x3aa0   : > { %10354 = vmatpush1.bf16.msra.mxu1 %v13571_v32  ;;  %v13605_v32 = vld [vmem:[#allocation2 + $0x800] ss:$8 sps:$4 sm:$0xff]  }
0x3aa3   : > { %10356 = vmatmul.mubr.bf16.vlgmr.msra.gmra.mrb[32].mxu1 %v16506_v42 }
0x3aa4   : > { %10506 = vmatprep.mubr.bf16.mxu1 %v16987_v6 }
0x3b36   : > { %v10314_v56 = vpop.f32.mrb[28].mxu1 }
0x3b37   : > { %v16589_v30 = vadd.f32 %v10314_v56, %v16574_v22  ;;  %v10316_v46 = vpop.f32.mrb[29].mxu1  ;;  %v13574_v22 = vld [vmem:[#allocation2 + $0x714] ss:$8 sps:$4 sm:$0xff]  }
0x3b38   : > { %v16592_v52 = vadd.f32 %v10316_v46, %v16577_v49  ;;  %v10318_v3 = vpop.f32.mrb[30].mxu1  ;;  %v13576_v49 = vld [vmem:[#allocation2 + $0x724] ss:$8 sps:$4 sm:$0xff]   ;;  %v13606_v56 = vld [vmem:[#allocation2 + $0x814] ss:$8 sps:$4 sm:$0xff]  }
0x3b39   : > { %v10319_v62 = vpop.f32.mrb[31].mxu1  ;;  %v13608_v46 = vld [vmem:[#allocation2 + $0x824] ss:$8 sps:$4 sm:$0xff]   ;;  %v13610_v3 = vld [vmem:[#allocation2 + $0x834] ss:$8 sps:$4 sm:$0xff]  }
0x3b3a   : > { %v13611_v62 = vld [vmem:[#allocation2 + $0x830] ss:$8 sps:$4 sm:$0xff]  }
0x3b76   : > { %v10357_v2 = vpop.f32.mrb[32].mxu1 }
0x3b77   : > { %v10364_v25 = vpack.c.bf16 %v10357_v2, %v10357_v2  ;;  %v10359_v47 = vpop.f32.mrb[33].mxu1  ;;  %v13612_v2 = vld [vmem:[#allocation2 + $0x844] ss:$8 sps:$4 sm:$0xff]  }
0x3b78   : > { %v10365_v51 = vpack.c.bf16 %v10359_v47, %v10359_v47  ;;  %v10361_v59 = vpop.f32.mrb[34].mxu1  ;;  %v13614_v47 = vld [vmem:[#allocation2 + $0x854] ss:$8 sps:$4 sm:$0xff]  }
0x3b79   : > { %v10372_v14 = vsel %vm3894_vm5, %v10364_v25, 0  ;;  %v10362_v43 = vpop.f32.mrb[35].mxu1  ;;  %v13613_v25 = vld [vmem:[#allocation2 + $0x840] ss:$8 sps:$4 sm:$0xff]  }
0x3b7a   : > { %11412 = vmatprep.subr.msk.bf16.mxu0 %vm3894_vm5, %v10365_v51  ;;  %v13615_v51 = vld [vmem:[#allocation2 + $0x850] ss:$8 sps:$4 sm:$0xff]   ;;  %v13617_v59 = vld [vmem:[#allocation2 + $0x860] ss:$8 sps:$4 sm:$0xff]  }
0x3b7b   : > { %10378 = vmatpush1.bf16.msra.mxu0 %v10372_v14  ;;  %v13618_v14 = vld [vmem:[#allocation2 + $0x874] ss:$8 sps:$4 sm:$0xff]   ;;  %v13619_v43 = vld [vmem:[#allocation2 + $0x870] ss:$8 sps:$4 sm:$0xff]  }
0x3b7c   : > { %10420 = vmatprep.subr.bf16.mxu0 %v13572_v28  ;;  %v13621_v28 = vld [vmem:[#allocation2 + $0x880] ss:$8 sps:$4 sm:$0xff]  }
0x3b7e   : > { %11413 = vmatmul.mubr.msk.bf16.vlgmr.msra.gmra.mrb[248].mxu0 %vm3890_vm6, %v11411_v10  ;;  %v13620_v10 = vld [vmem:[#allocation2 + $0x884] ss:$8 sps:$4 sm:$0xff]  }
0x3b7f   : > { %10421 = vmatpush1.bf16.msra.mxu0 %v13573_v12  ;;  %10452 = vmatprep.mubr.bf16.mxu0 %v16504_v4  ;;  %v13622_v12 = vld [vmem:[#allocation2 + $0x894] ss:$8 sps:$4 sm:$0xff]  }
0x3b80   : > { %10422 = vmatprep.subr.bf16.mxu0 %v13574_v22  ;;  %v13623_v22 = vld [vmem:[#allocation2 + $0x890] ss:$8 sps:$4 sm:$0xff]  }
0x3b83   : > { %10423 = vmatpush1.bf16.msra.mxu0 %v13575_v8  ;;  %v13624_v8 = vld [vmem:[#allocation2 + $0x8a4] ss:$8 sps:$4 sm:$0xff]  }
0x3b84   : > { %10424 = vmatprep.subr.bf16.mxu0 %v13576_v49  ;;  %v13625_v49 = vld [vmem:[#allocation2 + $0x8a0] ss:$8 sps:$4 sm:$0xff]  }
0x3b87   : > { %10425 = vmatpush1.bf16.msra.mxu0 %v13577_v23  ;;  %v13626_v23 = vld [vmem:[#allocation2 + $0x8b4] ss:$8 sps:$4 sm:$0xff]  }
0x3b88   : > { %10426 = vmatprep.subr.bf16.mxu0 %v13578_v54  ;;  %v13627_v54 = vld [vmem:[#allocation2 + $0x8b0] ss:$8 sps:$4 sm:$0xff]  }
0x3b8b   : > { %10427 = vmatpush1.bf16.msra.mxu0 %v13579_v20  ;;  %v13628_v20 = vld [vmem:[#allocation2 + $0x8c4] ss:$8 sps:$4 sm:$0xff]  }
0x3b8c   : > { %10428 = vmatprep.subr.bf16.mxu0 %v13580_v35  ;;  %v13629_v35 = vld [vmem:[#allocation2 + $0x8c0] ss:$8 sps:$4 sm:$0xff]  }
0x3b8f   : > { %10429 = vmatpush1.bf16.msra.mxu0 %v13581_v17  ;;  %v13630_v17 = vld [vmem:[#allocation2 + $0x8d4] ss:$8 sps:$4 sm:$0xff]  }
0x3b90   : > { %10430 = vmatprep.subr.bf16.mxu0 %v13582_v9  ;;  %v13631_v9 = vld [vmem:[#allocation2 + $0x8d0] ss:$8 sps:$4 sm:$0xff]  }
0x3b93   : > { %10431 = vmatpush1.bf16.msra.mxu0 %v13583_v7  ;;  %v13632_v7 = vld [vmem:[#allocation2 + $0x8e4] ss:$8 sps:$4 sm:$0xff]  }
0x3b94   : > { %10432 = vmatprep.subr.bf16.mxu0 %v13584_v27  ;;  %v13633_v27 = vld [vmem:[#allocation2 + $0x8e0] ss:$8 sps:$4 sm:$0xff]  }
0x3b97   : > { %10433 = vmatpush1.bf16.msra.mxu0 %v13585_v53  ;;  %v13634_v53 = vld [vmem:[#allocation2 + $0x8f4] ss:$8 sps:$4 sm:$0xff]  }
0x3b98   : > { %10434 = vmatprep.subr.bf16.mxu0 %v13586_v40  ;;  %v13635_v40 = vld [vmem:[#allocation2 + $0x8f0] ss:$8 sps:$4 sm:$0xff]  }
0x3b9b   : > { %10435 = vmatpush1.bf16.msra.mxu0 %v13587_v55 }
0x3b9c   : > { %10436 = vmatprep.subr.bf16.mxu0 %v13588_v15 }
0x3b9f   : > { %10437 = vmatpush1.bf16.msra.mxu0 %v13589_v38 }
0x3ba0   : > { %10438 = vmatprep.subr.bf16.mxu0 %v13590_v18 }
0x3ba3   : > { %10439 = vmatpush1.bf16.msra.mxu0 %v13591_v34 }
0x3ba4   : > { %10440 = vmatprep.subr.bf16.mxu0 %v13592_v29 }
0x3ba7   : > { %10441 = vmatpush1.bf16.msra.mxu0 %v13593_v60 }
0x3ba8   : > { %10442 = vmatprep.subr.bf16.mxu0 %v13594_v63 }
0x3bab   : > { %10443 = vmatpush1.bf16.msra.mxu0 %v13595_v36 }
0x3bac   : > { %10444 = vmatprep.subr.bf16.mxu0 %v13596_v11 }
0x3baf   : > { %10445 = vmatpush1.bf16.msra.mxu0 %v13597_v33 }
0x3bb0   : > { %10446 = vmatprep.subr.bf16.mxu0 %v13598_v16 }
0x3bb3   : > { %10447 = vmatpush1.bf16.msra.mxu0 %v13599_v44 }
0x3bb4   : > { %10448 = vmatprep.subr.bf16.mxu0 %v13600_v39 }
0x3bb7   : > { %10449 = vmatpush1.bf16.msra.mxu0 %v13601_v61 }
0x3bb8   : > { %10450 = vmatprep.subr.bf16.mxu0 %v13602_v45 }
0x3bbb   : > { %10451 = vmatpush1.bf16.msra.mxu0 %v13603_v50  ;;  %v10618_v50 = vpop.permute.xlu0 %10617 }
0x3bbe   : > { %10453 = vmatmul.mubr.bf16.vlgmr.msra.gmra.mrb[252].mxu0 %v16506_v42 }
0x3bbf   : > { %10603 = vmatprep.mubr.bf16.mxu0 %v16987_v6  ;;  %v11414_v6 = vld [vmem:[%s17287_s28 + $0x7] sm:$0x1] }
0x3c51   : > { %v10411_v19 = vpop.f32.mrb[248].mxu0 }
0x3c52   : > { %v16604_v58 = vadd.f32 %v10411_v19, %v16589_v30  ;;  %v10413_v26 = vpop.f32.mrb[249].mxu0  ;;  %v13607_v30 = vld [vmem:[#allocation2 + $0x810] ss:$8 sps:$4 sm:$0xff]  }
0x3c53   : > { %v16607_v57 = vadd.f32 %v10413_v26, %v16592_v52  ;;  %v10415_v1 = vpop.f32.mrb[250].mxu0  ;;  %v13609_v52 = vld [vmem:[#allocation2 + $0x820] ss:$8 sps:$4 sm:$0xff]  }
0x3c54   : > { %v10416_v41 = vpop.f32.mrb[251].mxu0 }
0x3c91   : > { %v10454_v13 = vpop.f32.mrb[252].mxu0 }
0x3c92   : > { %v10461_v37 = vpack.c.bf16 %v10454_v13, %v10454_v13  ;;  %v10456_v24 = vpop.f32.mrb[253].mxu0 }
0x3c93   : > { %v10462_v48 = vpack.c.bf16 %v10456_v24, %v10456_v24  ;;  %v10458_v0 = vpop.f32.mrb[254].mxu0 }
0x3c94   : > { %v10469_v5 = vsel %vm3894_vm5, %v10461_v37, 0  ;;  %v10459_v31 = vpop.f32.mrb[255].mxu0 }
0x3c95   : > { %11415 = vmatprep.subr.msk.bf16.mxu1 %vm3894_vm5, %v10462_v48 }
0x3c96   : > { %10475 = vmatpush1.bf16.msra.mxu1 %v10469_v5 }
0x3c97   : > { %10517 = vmatprep.subr.bf16.mxu1 %v13604_v21 }
0x3c99   : > { %11416 = vmatmul.mubr.msk.bf16.vlgmr.msra.gmra.mrb[36].mxu1 %vm3890_vm6, %v11414_v6 }
0x3c9a   : > { %10518 = vmatpush1.bf16.msra.mxu1 %v13605_v32  ;;  %10549 = vmatprep.mubr.bf16.mxu1 %v16504_v4  ;;  %v13616_v4 = vld [vmem:[#allocation2 + $0x864] ss:$8 sps:$4 sm:$0xff]  }
0x3c9b   : > { %10519 = vmatprep.subr.bf16.mxu1 %v13606_v56 }
0x3c9e   : > { %10520 = vmatpush1.bf16.msra.mxu1 %v13607_v30 }
0x3c9f   : > { %10521 = vmatprep.subr.bf16.mxu1 %v13608_v46 }
0x3ca2   : > { %10522 = vmatpush1.bf16.msra.mxu1 %v13609_v52 }
0x3ca3   : > { %10523 = vmatprep.subr.bf16.mxu1 %v13610_v3 }
0x3ca6   : > { %10524 = vmatpush1.bf16.msra.mxu1 %v13611_v62 }
0x3ca7   : > { %10525 = vmatprep.subr.bf16.mxu1 %v13612_v2 }
0x3caa   : > { %10526 = vmatpush1.bf16.msra.mxu1 %v13613_v25 }
0x3cab   : > { %10527 = vmatprep.subr.bf16.mxu1 %v13614_v47 }
0x3cae   : > { %10528 = vmatpush1.bf16.msra.mxu1 %v13615_v51 }
0x3caf   : > { %10529 = vmatprep.subr.bf16.mxu1 %v13616_v4 }
0x3cb2   : > { %10530 = vmatpush1.bf16.msra.mxu1 %v13617_v59 }
0x3cb3   : > { %10531 = vmatprep.subr.bf16.mxu1 %v13618_v14 }
0x3cb6   : > { %10532 = vmatpush1.bf16.msra.mxu1 %v13619_v43 }
0x3cb7   : > { %10533 = vmatprep.subr.bf16.mxu1 %v13620_v10 }
0x3cba   : > { %10534 = vmatpush1.bf16.msra.mxu1 %v13621_v28 }
0x3cbb   : > { %10535 = vmatprep.subr.bf16.mxu1 %v13622_v12 }
0x3cbe   : > { %10536 = vmatpush1.bf16.msra.mxu1 %v13623_v22 }
0x3cbf   : > { %10537 = vmatprep.subr.bf16.mxu1 %v13624_v8 }
0x3cc2   : > { %10538 = vmatpush1.bf16.msra.mxu1 %v13625_v49 }
0x3cc3   : > { %10539 = vmatprep.subr.bf16.mxu1 %v13626_v23 }
0x3cc6   : > { %10540 = vmatpush1.bf16.msra.mxu1 %v13627_v54 }
0x3cc7   : > { %10541 = vmatprep.subr.bf16.mxu1 %v13628_v20 }
0x3cca   : > { %10542 = vmatpush1.bf16.msra.mxu1 %v13629_v35 }
0x3ccb   : > { %10543 = vmatprep.subr.bf16.mxu1 %v13630_v17 }
0x3cce   : > { %10544 = vmatpush1.bf16.msra.mxu1 %v13631_v9 }
0x3ccf   : > { %10545 = vmatprep.subr.bf16.mxu1 %v13632_v7 }
0x3cd2   : > { %10546 = vmatpush1.bf16.msra.mxu1 %v13633_v27 }
0x3cd3   : > { %10547 = vmatprep.subr.bf16.mxu1 %v13634_v53 }
0x3cd6   : > { %10548 = vmatpush1.bf16.msra.mxu1 %v13635_v40 }
0x3cd9   : > { %10550 = vmatmul.mubr.bf16.vlgmr.msra.gmra.mrb[40].mxu1 %v16506_v42  ;;  %v11417_v42 = vld [vmem:[%s17287_s28 + $0x8] sm:$0x1] }
0x3d6c   : > { %v10508_v55 = vpop.f32.mrb[36].mxu1 }
0x3d6d   : > { %v10515_v15 = vadd.f32 %v10508_v55, %v16604_v58  ;;  %v10510_v38 = vpop.f32.mrb[37].mxu1 }
0x3d6e   : > { %v10516_v18 = vadd.f32 %v10510_v38, %v16607_v57  ;;  %v10512_v34 = vpop.f32.mrb[38].mxu1 }
0x3d6f   : > { %v10513_v29 = vpop.f32.mrb[39].mxu1 }
0x3dac   : > { %v10551_v60 = vpop.f32.mrb[40].mxu1 }
0x3dad   : > { %v10558_v63 = vpack.c.bf16 %v10551_v60, %v10551_v60  ;;  %v10553_v36 = vpop.f32.mrb[41].mxu1 }
0x3dae   : > { %v10559_v11 = vpack.c.bf16 %v10553_v36, %v10553_v36  ;;  %v10555_v33 = vpop.f32.mrb[42].mxu1 }
0x3daf   : > { %v10566_v16 = vsel %vm3894_vm5, %v10558_v63, 0  ;;  %v10556_v44 = vpop.f32.mrb[43].mxu1 }
0x3db0   : > { %11418 = vmatprep.subr.msk.bf16.mxu0 %vm3894_vm5, %v10559_v11 }
0x3db1   : > { %10572 = vmatpush1.bf16.msra.mxu0 %v10566_v16 }
0x3db4   : > { %11419 = vmatmul.mubr.msk.bf16.vlgmr.msra.gmra.mrb[0].mxu0 %vm3890_vm6, %v11417_v42 }
0x3e87   : > { %v10605_v39 = vpop.f32.mrb[0].mxu0 }
0x3e88   : > { %v10612_v61 = vadd.f32 %v10605_v39, %v10515_v15  ;;  %v10607_v45 = vpop.f32.mrb[1].mxu0 }
0x3e89   : > { %v10613_v19 = vadd.f32 %v10607_v45, %v10516_v18  ;;  %v10609_v58 = vpop.f32.mrb[2].mxu0 }
0x3e8a   : > { %v10620_v26 = vadd.f32 %v10618_v50, %v10612_v61  ;;  %v10610_v57 = vpop.f32.mrb[3].mxu0 }
0x3e8b   : > { %v10621_v1 = vadd.f32 %v10618_v50, %v10613_v19 }
0x3e8d   : > { %v10624_v41 = vcombine.low %v10620_v26, %v10621_v1 }
0x3e8f   : > { %11420 = vst.sshfl [vmem:[%s800_s18] sm:$0x33 pattern:$0x76325410] %v10624_v41 }
0x3e90 PF: > { %s17289_s6 = sld [smem:[#allocation20_spill]] }
0x3e96   : > { %s37_s3 = sadd.s32 1, %s17289_s6  }
0x3e97   : > { %p34_p11 = scmp.ge.s32.totalorder %s37_s3, 4  }
0x3e99   :  { %36 = sbr.rel (!%p34_p11) target bundleno = 20 (0x14), region = 259 }
0x3ea0   :  { %10655 = vsyncpa [#allocation3], 1 }
0x3ea1   :  { %10657 = vsyncpa [#allocation3 + $0x1], 1 }
0x3ea2   :  { %10658 = vsyncpa [#allocation5], 1 }
0x3ea3   :  { %10659 = vsyncpa [#allocation8], 1 }
0x3ea4   :  { %10660 = vsyncpa [#allocation11], 1 }
0x3ea5   :  { %10661 = vsyncpa [#allocation14], 1 }

</bundles_post_ra>
